<compile_context>
chip_gen: v5e
topology: v5e:2x2
jax: 0.10.0
libtpu: 0.0.40
codegen_flags: <defaults>
</compile_context>

<pallas_src>
import math

import jax
import jax.numpy as jnp
from jax.experimental import pallas as pl
from jax.experimental.pallas import tpu as pltpu


LANE = 128
_EPS = 1e-5
_VMEM_CACHE = None


def _round_up(x, m):
    return (x + m - 1) // m * m


def _vmem_limit():
    """Generation-aware scoped-VMEM limit (bytes)."""
    global _VMEM_CACHE
    if _VMEM_CACHE is None:
        try:
            cap = int(pltpu.get_tpu_info().vmem_capacity_bytes)
        except Exception:
            cap = 64 * 1024 * 1024  # conservative fallback (v7x-sized)
        _VMEM_CACHE = max(32 * 1024 * 1024,
                          min(cap * 3 // 4, 100 * 1024 * 1024))
    return _VMEM_CACHE


def _pick_row_tile(h, w, cins, c_out_p, budget):
    """Largest row tile th (dividing H, tm=th*W multiple of 8, tm<=1024)
    whose phase-1 VMEM footprint fits the budget."""
    cands = [th for th in range(1, h + 1)
             if h % th == 0 and (th * w) % 8 == 0]
    if not cands:
        return h  # full-dim block is always legal (masked stores if W odd)
    k_tot = 9 * sum(cins)
    hp, wp = h + 2, w + 2
    fixed = sum(2 * hp * wp * c * 2 for c in cins)      # full-image blocks x2 (bf16)
    fixed += 2 * k_tot * c_out_p * 2                    # weight blocks x2 (bf16)
    best = cands[0]
    for th in cands:
        tm = th * w
        if tm > 1024:
            break
        need = (fixed
                + tm * k_tot * 2          # im2col scratch (bf16)
                + 2 * tm * c_out_p * 2    # bf16 z out block, double-buffered
                + 2 * tm * c_out_p * 4)   # f32 matmul result + headroom
        if need <= budget:
            best = th
    return best


def _pick_bn_block(hw, c_out_p, in_bytes, out_bytes, budget):
    """Big row block for the mem-bound BN+ReLU pass."""
    cands = [m for m in range(8, hw + 1, 8) if hw % m == 0]
    if not cands:
        return hw
    best = cands[0]
    per_row = c_out_p * (in_bytes + out_bytes)
    for m in cands:
        if 2 * m * per_row <= budget and m <= 8192:
            best = m
    return best


# ----------------------------------------------------------------------------
# Phase 1: 3x3 conv (padding=1) as one big-K matmul per row tile, emitting the
# bf16 conv output plus per-tile partial sum / sum-of-squares (f32).
# ----------------------------------------------------------------------------
def _make_conv_kernel(cins, th, w_out, c_out_p):
    n_in = len(cins)
    tm = th * w_out
    offs = []
    off = 0
    for c in cins:
        offs.append(off)
        off += 9 * c

    def kernel(*refs):
        x_refs = refs[:n_in]                       # (hp, wp, cin) full-image VMEM blocks
        w_ref = refs[n_in]                         # (9*sum(cin), Cp) bf16
        z_ref, ssum_ref, ssq_ref = refs[n_in + 1:n_in + 4]
        col_ref = refs[n_in + 4]                   # (tm, 9*sum(cin)) bf16 scratch

        i = pl.program_id(1)
        r0 = i * th

        # im2col: one halo'd slab load per input, 9 static shifted writes into
        # a single VMEM slab (packs both conv1 inputs -> no channel concat).
        for t in range(n_in):
            cin = cins[t]
            slab = x_refs[t][pl.ds(r0, th + 2)]    # (th+2, wp, cin)
            for dy in range(3):
                for dx in range(3):
                    patch = slab[dy:dy + th, dx:dx + w_out, :]
                    c0 = offs[t] + (dy * 3 + dx) * cin
                    col_ref[:, c0:c0 + cin] = patch.reshape(tm, cin)

        # Single accumulating MXU matmul, K = 9 * Cin_total, f32 accumulation.
        z = jnp.dot(col_ref[...], w_ref[...],
                    preferred_element_type=jnp.float32)

        z_ref[...] = z.astype(z_ref.dtype)
        ssum_ref[...] = jnp.sum(z, axis=0).reshape(1, 1, c_out_p)
        ssq_ref[...] = jnp.sum(z * z, axis=0).reshape(1, 1, c_out_p)

    return kernel


def _conv3x3_stats(x_pads, w_cat, c_out_p, th):
    n_in = len(x_pads)
    n_b, hp, wp, _ = x_pads[0].shape
    h, w = hp - 2, wp - 2
    tm = th * w
    n_tiles = h // th
    cins = [int(x.shape[-1]) for x in x_pads]
    k_tot = int(w_cat.shape[0])

    grid = (n_b, n_tiles)

    in_specs = [pl.BlockSpec((None, hp, wp, c), lambda n, i: (n, 0, 0, 0))
                for c in cins]
    in_specs.append(pl.BlockSpec((k_tot, c_out_p), lambda n, i: (0, 0)))

    out_shape = (
        jax.ShapeDtypeStruct((n_b, h * w, c_out_p), jnp.bfloat16),   # raw conv out
        jax.ShapeDtypeStruct((n_b, n_tiles, 1, c_out_p), jnp.float32),  # sum(z)
        jax.ShapeDtypeStruct((n_b, n_tiles, 1, c_out_p), jnp.float32),  # sum(z*z)
    )
    out_specs = (
        pl.BlockSpec((None, tm, c_out_p), lambda n, i: (n, i, 0)),
        pl.BlockSpec((None, 1, 1, c_out_p), lambda n, i: (n, i, 0, 0)),
        pl.BlockSpec((None, 1, 1, c_out_p), lambda n, i: (n, i, 0, 0)),
    )
    scratch_shapes = [pltpu.VMEM((tm, k_tot), jnp.bfloat16)]

    flops = 2 * n_b * h * w * k_tot * c_out_p
    bytes_accessed = (sum(int(x.size) * 2 for x in x_pads)
                      + k_tot * c_out_p * 2
                      + n_b * h * w * c_out_p * 2)

    # TODO(synk): for very large images (full padded image block no longer
    # fitting VMEM) fall back to a manually double-buffered row-slab DMA.
    return pl.pallas_call(
        _make_conv_kernel(cins, th, w, c_out_p),
        grid=grid,
        in_specs=in_specs,
        out_specs=out_specs,
        out_shape=out_shape,
        scratch_shapes=scratch_shapes,
        compiler_params=pltpu.CompilerParams(
            dimension_semantics=("parallel", "parallel"),
            vmem_limit_bytes=_vmem_limit()),
        cost_estimate=pl.CostEstimate(flops=flops, transcendentals=0,
                                      bytes_accessed=bytes_accessed),
    )(*x_pads, w_cat)


# ----------------------------------------------------------------------------
# Phase 2: folded BatchNorm affine + ReLU (pure elementwise, lane-dense,
# large row blocks since it is memory-bound).
# ----------------------------------------------------------------------------
def _bn_relu_kernel(z_ref, scale_ref, shift_ref, o_ref):
    y = z_ref[...].astype(jnp.float32) * scale_ref[...] + shift_ref[...]
    o_ref[...] = jnp.maximum(y, 0.0).astype(o_ref.dtype)


def _bn_relu_apply(z, scale, shift, bm, out_dtype):
    n_b, hw, c_out_p = z.shape
    grid = (n_b, hw // bm)
    return pl.pallas_call(
        _bn_relu_kernel,
        grid=grid,
        in_specs=[pl.BlockSpec((None, bm, c_out_p), lambda n, i: (n, i, 0)),
                  pl.BlockSpec((1, c_out_p), lambda n, i: (0, 0)),
                  pl.BlockSpec((1, c_out_p), lambda n, i: (0, 0))],
        out_specs=pl.BlockSpec((None, bm, c_out_p), lambda n, i: (n, i, 0)),
        out_shape=jax.ShapeDtypeStruct((n_b, hw, c_out_p), out_dtype),
        compiler_params=pltpu.CompilerParams(
            dimension_semantics=("parallel", "parallel"),
            vmem_limit_bytes=_vmem_limit()),
    )(z, scale, shift)


def conv3x3_bn_relu(x_pads, w_cat, gamma_p, beta_p, out_dtype):
    """3x3 conv (padding=1) + BatchNorm(batch stats, eps=1e-5) + ReLU.

    x_pads : list of spatially padded NHWC bf16 inputs (N, H+2, W+2, cin_t);
             packed into one im2col slab (replaces the channel concat).
    w_cat  : bf16 weight of shape (sum_t 9*cin_t, Cp), rows ordered per input
             as (dy, dx, cin) and concatenated in the same order as x_pads.
    """
    n_b, hp, wp, _ = x_pads[0].shape
    h, w = hp - 2, wp - 2
    c_out_p = int(w_cat.shape[-1])
    cins = [int(x.shape[-1]) for x in x_pads]
    limit = _vmem_limit()

    th = _pick_row_tile(h, w, cins, c_out_p, int(limit * 0.6))
    z, ssum, ssq = _conv3x3_stats(x_pads, w_cat, c_out_p, th)

    # Tiny per-channel epilogue (plain JAX): exact global batch statistics
    # folded into one scale/shift so phase 2 is a single FMA + ReLU.
    # NOTE: var = E[z^2]-E[z]^2 in f32; fine for BN-scale activations, switch
    # to shifted sums if |mean| >> std ever becomes an issue.
    cnt = float(n_b * h * w)
    s = jnp.sum(ssum, axis=(0, 1, 2))
    ss = jnp.sum(ssq, axis=(0, 1, 2))
    mean = s / cnt
    var = jnp.maximum(ss / cnt - mean * mean, 0.0)   # biased batch variance
    inv = jax.lax.rsqrt(var + _EPS)
    scale = (gamma_p * inv).reshape(1, c_out_p).astype(jnp.float32)
    shift = (beta_p - mean * gamma_p * inv).reshape(1, c_out_p).astype(jnp.float32)

    bm = _pick_bn_block(h * w, c_out_p, 2, jnp.dtype(out_dtype).itemsize,
                        int(limit * 0.6))
    y = _bn_relu_apply(z, scale, shift, bm, out_dtype)
    return y.reshape(n_b, h, w, c_out_p)


# ----------------------------------------------------------------------------
# Glue: bilinear 2x upsample, align_corners=True (PyTorch semantics), NHWC.
# ----------------------------------------------------------------------------
def upsample2x_bilinear_align_corners(x):
    n_b, h, w, c = x.shape
    ho, wo = 2 * h, 2 * w

    def interp_axis(lin, lout):
        if lin == 1:
            z = jnp.zeros((lout,), jnp.int32)
            return z, z, jnp.zeros((lout,), jnp.float32)
        src = jnp.arange(lout, dtype=jnp.float32) * (lin - 1) / (lout - 1)
        i0 = jnp.clip(jnp.floor(src).astype(jnp.int32), 0, lin - 2)
        frac = src - i0.astype(jnp.float32)
        return i0, i0 + 1, frac

    y0, y1, fy = interp_axis(h, ho)
    x0, x1, fx = interp_axis(w, wo)

    top, bot = x[:, y0], x[:, y1]
    rows = top * (1.0 - fy)[None, :, None, None] + bot * fy[None, :, None, None]
    left, right = rows[:, :, x0], rows[:, :, x1]
    return left * (1.0 - fx)[None, None, :, None] + right * fx[None, None, :, None]


# ----------------------------------------------------------------------------
# Up module: parameters + forward
# ----------------------------------------------------------------------------
def init_up_params(key, in_channels, out_channels):
    k1, k2, k3, k4 = jax.random.split(key, 4)
    f32 = jnp.float32
    w1 = jax.random.normal(k1, (3, 3, in_channels, out_channels), f32)
    w1 = w1 * (1.0 / math.sqrt(9 * in_channels))
    b1 = jax.random.normal(k2, (out_channels,), f32) * 0.01
    w2 = jax.random.normal(k3, (3, 3, out_channels, out_channels), f32)
    w2 = w2 * (1.0 / math.sqrt(9 * out_channels))
    b2 = jax.random.normal(k4, (out_channels,), f32) * 0.01
    g1 = jnp.ones((out_channels,), f32)
    be1 = jnp.zeros((out_channels,), f32)
    g2 = jnp.ones((out_channels,), f32)
    be2 = jnp.zeros((out_channels,), f32)
    # b1/b2 are kept for parameter parity with nn.Conv2d(bias=True) but are
    # intentionally unused: train-mode BatchNorm's mean subtraction cancels
    # a per-channel bias exactly.
    return dict(w1=w1, b1=b1, g1=g1, be1=be1, w2=w2, b2=b2, g2=g2, be2=be2)


def up_forward(params, x1_nchw, x2_nchw):
    x1 = jnp.transpose(x1_nchw, (0, 2, 3, 1)).astype(jnp.float32)
    x2 = jnp.transpose(x2_nchw, (0, 2, 3, 1)).astype(jnp.float32)

    # Upsample x1 by 2 (bilinear, align_corners=True) and pad to x2's size
    # (F.pad order [left, right, top, bottom]).
    x1 = upsample2x_bilinear_align_corners(x1)
    diff_y = x2.shape[1] - x1.shape[1]
    diff_x = x2.shape[2] - x1.shape[2]
    x1 = jnp.pad(x1, ((0, 0),
                      (diff_y // 2, diff_y - diff_y // 2),
                      (diff_x // 2, diff_x - diff_x // 2),
                      (0, 0)))

    c2 = x2.shape[-1]
    c1 = x1.shape[-1]
    c_out = params["g1"].shape[0]
    c_out_p = _round_up(c_out, LANE)
    pad_c = c_out_p - c_out

    # Spatial halo pad (for 3x3 / padding=1) + bf16 cast for the MXU.
    # NOTE: no HBM channel concat — the two inputs are packed inside the
    # kernel's im2col slab.
    x2p = jnp.pad(x2, ((0, 0), (1, 1), (1, 1), (0, 0))).astype(jnp.bfloat16)
    x1p = jnp.pad(x1, ((0, 0), (1, 1), (1, 1), (0, 0))).astype(jnp.bfloat16)

    # conv1 weight (HWIO, input-channel order = torch.cat([x2, x1], dim=1)):
    # split per input, flatten to (9*cin_t, Cout) with (dy, dx, cin) row
    # order, concat along K, pad Cout to a lane-dense multiple of 128.
    w1 = params["w1"]
    w1a = w1[:, :, :c2, :].reshape(9 * c2, c_out)
    w1b = w1[:, :, c2:, :].reshape(9 * c1, c_out)
    w1_cat = jnp.concatenate([w1a, w1b], axis=0)
    w1_cat = jnp.pad(w1_cat, ((0, 0), (0, pad_c))).astype(jnp.bfloat16)
    g1 = jnp.pad(params["g1"], (0, pad_c))
    be1 = jnp.pad(params["be1"], (0, pad_c))

    y1 = conv3x3_bn_relu([x2p, x1p], w1_cat, g1, be1, jnp.bfloat16)

    # conv2: input is the channel-padded (zero beyond c_out) bf16 y1.
    y1p = jnp.pad(y1, ((0, 0), (1, 1), (1, 1), (0, 0)))
    w2 = jnp.pad(params["w2"], ((0, 0), (0, 0), (0, pad_c), (0, pad_c)))
    w2 = w2.astype(jnp.bfloat16).reshape(9 * c_out_p, c_out_p)
    g2 = jnp.pad(params["g2"], (0, pad_c))
    be2 = jnp.pad(params["be2"], (0, pad_c))

    y2 = conv3x3_bn_relu([y1p], w2, g2, be2, jnp.float32)

    # Drop channel padding, NHWC -> NCHW.
    return jnp.transpose(y2[:, :, :, :c_out], (0, 3, 1, 2))


if __name__ == "__main__":
    key = jax.random.PRNGKey(0)
    k_p, k_x1, k_x2 = jax.random.split(key, 3)

    in_channels, out_channels = 8, 4
    # x1: low-res feature map (half the channels), x2: skip connection (NCHW).
    x1 = jax.random.normal(k_x1, (2, in_channels // 2, 8, 8), jnp.float32)
    x2 = jax.random.normal(k_x2, (2, in_channels // 2, 16, 16), jnp.float32)

    params = init_up_params(k_p, in_channels, out_channels)

    out = jax.jit(up_forward)(params, x1, x2)
    out = jax.block_until_ready(out)
    assert out.shape == (2, out_channels, 16, 16), out.shape
    print("KERNEL_OK")
</pallas_src>

<mosaic_0001>
module attributes {stable_mosaic.version = 11 : i64} {
  func.func @kernel(%arg0: i32, %arg1: i32, %arg2: memref<1x18x18x4xbf16, #tpu.memory_space<vmem>>, %arg3: memref<1x18x18x4xbf16, #tpu.memory_space<vmem>>, %arg4: memref<72x128xbf16, #tpu.memory_space<vmem>>, %arg5: memref<1x256x128xbf16, #tpu.memory_space<vmem>>, %arg6: memref<1x1x1x128xf32, #tpu.memory_space<vmem>>, %arg7: memref<1x1x1x128xf32, #tpu.memory_space<vmem>>, %arg8: memref<256x72xbf16, #tpu.memory_space<vmem>>) attributes {dimension_semantics = [#tpu.dimension_semantics<parallel>, #tpu.dimension_semantics<parallel>], iteration_bounds = array<i64: 2, 1>, scalar_prefetch = 0 : i64, scratch_operands = 1 : i64, tpu.core_type = #tpu.core_type<tc>, window_params = [{transform_indices = @transform_0, window_bounds = array<i64: 1, 18, 18, 4>}, {transform_indices = @transform_1, window_bounds = array<i64: 1, 18, 18, 4>}, {pipeline_mode = #tpu.pipeline_mode<synchronous>, transform_indices = @transform_2, window_bounds = array<i64: 72, 128>}, {transform_indices = @transform_3, window_bounds = array<i64: 1, 256, 128>}, {transform_indices = @transform_4, window_bounds = array<i64: 1, 1, 1, 128>}, {transform_indices = @transform_5, window_bounds = array<i64: 1, 1, 1, 128>}]} {
    %c16_i32 = arith.constant 16 : i32
    %0 = arith.muli %arg1, %c16_i32 : i32
    %c0 = arith.constant 0 : index
    %1 = arith.index_cast %0 : i32 to index
    %c0_0 = arith.constant 0 : index
    %c0_1 = arith.constant 0 : index
    %2 = vector.load %arg2[%c0, %1, %c0_0, %c0_1] : memref<1x18x18x4xbf16, #tpu.memory_space<vmem>>, vector<1x18x18x4xbf16>
    %3 = vector.shape_cast %2 : vector<1x18x18x4xbf16> to vector<18x18x4xbf16>
    %4 = vector.extract_strided_slice %3 {offsets = [0, 0, 0], sizes = [16, 16, 4], strides = [1, 1, 1]} : vector<18x18x4xbf16> to vector<16x16x4xbf16>
    %5 = vector.shape_cast %4 : vector<16x16x4xbf16> to vector<256x4xbf16>
    %c0_2 = arith.constant 0 : index
    %c0_3 = arith.constant 0 : index
    %6 = vector.load %arg8[%c0_2, %c0_3] : memref<256x72xbf16, #tpu.memory_space<vmem>>, vector<256x4xbf16>
    tpu.vector_store %arg8[%c0_2, %c0_3], %5 {strides = array<i32>} : memref<256x72xbf16, #tpu.memory_space<vmem>>, vector<256x4xbf16>,
    %7 = vector.extract_strided_slice %3 {offsets = [0, 1, 0], sizes = [16, 16, 4], strides = [1, 1, 1]} : vector<18x18x4xbf16> to vector<16x16x4xbf16>
    %8 = vector.shape_cast %7 : vector<16x16x4xbf16> to vector<256x4xbf16>
    %c0_4 = arith.constant 0 : index
    %c4 = arith.constant 4 : index
    %9 = vector.load %arg8[%c0_4, %c4] : memref<256x72xbf16, #tpu.memory_space<vmem>>, vector<256x4xbf16>
    tpu.vector_store %arg8[%c0_4, %c4], %8 {strides = array<i32>} : memref<256x72xbf16, #tpu.memory_space<vmem>>, vector<256x4xbf16>,
    %10 = vector.extract_strided_slice %3 {offsets = [0, 2, 0], sizes = [16, 16, 4], strides = [1, 1, 1]} : vector<18x18x4xbf16> to vector<16x16x4xbf16>
    %11 = vector.shape_cast %10 : vector<16x16x4xbf16> to vector<256x4xbf16>
    %c0_5 = arith.constant 0 : index
    %c8 = arith.constant 8 : index
    %12 = vector.load %arg8[%c0_5, %c8] : memref<256x72xbf16, #tpu.memory_space<vmem>>, vector<256x4xbf16>
    tpu.vector_store %arg8[%c0_5, %c8], %11 {strides = array<i32>} : memref<256x72xbf16, #tpu.memory_space<vmem>>, vector<256x4xbf16>,
    %13 = vector.extract_strided_slice %3 {offsets = [1, 0, 0], sizes = [16, 16, 4], strides = [1, 1, 1]} : vector<18x18x4xbf16> to vector<16x16x4xbf16>
    %14 = vector.shape_cast %13 : vector<16x16x4xbf16> to vector<256x4xbf16>
    %c0_6 = arith.constant 0 : index
    %c12 = arith.constant 12 : index
    %15 = vector.load %arg8[%c0_6, %c12] : memref<256x72xbf16, #tpu.memory_space<vmem>>, vector<256x4xbf16>
    tpu.vector_store %arg8[%c0_6, %c12], %14 {strides = array<i32>} : memref<256x72xbf16, #tpu.memory_space<vmem>>, vector<256x4xbf16>,
    %16 = vector.extract_strided_slice %3 {offsets = [1, 1, 0], sizes = [16, 16, 4], strides = [1, 1, 1]} : vector<18x18x4xbf16> to vector<16x16x4xbf16>
    %17 = vector.shape_cast %16 : vector<16x16x4xbf16> to vector<256x4xbf16>
    %c0_7 = arith.constant 0 : index
    %c16 = arith.constant 16 : index
    %18 = vector.load %arg8[%c0_7, %c16] : memref<256x72xbf16, #tpu.memory_space<vmem>>, vector<256x4xbf16>
    tpu.vector_store %arg8[%c0_7, %c16], %17 {strides = array<i32>} : memref<256x72xbf16, #tpu.memory_space<vmem>>, vector<256x4xbf16>,
    %19 = vector.extract_strided_slice %3 {offsets = [1, 2, 0], sizes = [16, 16, 4], strides = [1, 1, 1]} : vector<18x18x4xbf16> to vector<16x16x4xbf16>
    %20 = vector.shape_cast %19 : vector<16x16x4xbf16> to vector<256x4xbf16>
    %c0_8 = arith.constant 0 : index
    %c20 = arith.constant 20 : index
    %21 = vector.load %arg8[%c0_8, %c20] : memref<256x72xbf16, #tpu.memory_space<vmem>>, vector<256x4xbf16>
    tpu.vector_store %arg8[%c0_8, %c20], %20 {strides = array<i32>} : memref<256x72xbf16, #tpu.memory_space<vmem>>, vector<256x4xbf16>,
    %22 = vector.extract_strided_slice %3 {offsets = [2, 0, 0], sizes = [16, 16, 4], strides = [1, 1, 1]} : vector<18x18x4xbf16> to vector<16x16x4xbf16>
    %23 = vector.shape_cast %22 : vector<16x16x4xbf16> to vector<256x4xbf16>
    %c0_9 = arith.constant 0 : index
    %c24 = arith.constant 24 : index
    %24 = vector.load %arg8[%c0_9, %c24] : memref<256x72xbf16, #tpu.memory_space<vmem>>, vector<256x4xbf16>
    tpu.vector_store %arg8[%c0_9, %c24], %23 {strides = array<i32>} : memref<256x72xbf16, #tpu.memory_space<vmem>>, vector<256x4xbf16>,
    %25 = vector.extract_strided_slice %3 {offsets = [2, 1, 0], sizes = [16, 16, 4], strides = [1, 1, 1]} : vector<18x18x4xbf16> to vector<16x16x4xbf16>
    %26 = vector.shape_cast %25 : vector<16x16x4xbf16> to vector<256x4xbf16>
    %c0_10 = arith.constant 0 : index
    %c28 = arith.constant 28 : index
    %27 = vector.load %arg8[%c0_10, %c28] : memref<256x72xbf16, #tpu.memory_space<vmem>>, vector<256x4xbf16>
    tpu.vector_store %arg8[%c0_10, %c28], %26 {strides = array<i32>} : memref<256x72xbf16, #tpu.memory_space<vmem>>, vector<256x4xbf16>,
    %28 = vector.extract_strided_slice %3 {offsets = [2, 2, 0], sizes = [16, 16, 4], strides = [1, 1, 1]} : vector<18x18x4xbf16> to vector<16x16x4xbf16>
    %29 = vector.shape_cast %28 : vector<16x16x4xbf16> to vector<256x4xbf16>
    %c0_11 = arith.constant 0 : index
    %c32 = arith.constant 32 : index
    %30 = vector.load %arg8[%c0_11, %c32] : memref<256x72xbf16, #tpu.memory_space<vmem>>, vector<256x4xbf16>
    tpu.vector_store %arg8[%c0_11, %c32], %29 {strides = array<i32>} : memref<256x72xbf16, #tpu.memory_space<vmem>>, vector<256x4xbf16>,
    %c0_12 = arith.constant 0 : index
    %31 = arith.index_cast %0 : i32 to index
    %c0_13 = arith.constant 0 : index
    %c0_14 = arith.constant 0 : index
    %32 = vector.load %arg3[%c0_12, %31, %c0_13, %c0_14] : memref<1x18x18x4xbf16, #tpu.memory_space<vmem>>, vector<1x18x18x4xbf16>
    %33 = vector.shape_cast %32 : vector<1x18x18x4xbf16> to vector<18x18x4xbf16>
    %34 = vector.extract_strided_slice %33 {offsets = [0, 0, 0], sizes = [16, 16, 4], strides = [1, 1, 1]} : vector<18x18x4xbf16> to vector<16x16x4xbf16>
    %35 = vector.shape_cast %34 : vector<16x16x4xbf16> to vector<256x4xbf16>
    %c0_15 = arith.constant 0 : index
    %c36 = arith.constant 36 : index
    %36 = vector.load %arg8[%c0_15, %c36] : memref<256x72xbf16, #tpu.memory_space<vmem>>, vector<256x4xbf16>
    tpu.vector_store %arg8[%c0_15, %c36], %35 {strides = array<i32>} : memref<256x72xbf16, #tpu.memory_space<vmem>>, vector<256x4xbf16>,
    %37 = vector.extract_strided_slice %33 {offsets = [0, 1, 0], sizes = [16, 16, 4], strides = [1, 1, 1]} : vector<18x18x4xbf16> to vector<16x16x4xbf16>
    %38 = vector.shape_cast %37 : vector<16x16x4xbf16> to vector<256x4xbf16>
    %c0_16 = arith.constant 0 : index
    %c40 = arith.constant 40 : index
    %39 = vector.load %arg8[%c0_16, %c40] : memref<256x72xbf16, #tpu.memory_space<vmem>>, vector<256x4xbf16>
    tpu.vector_store %arg8[%c0_16, %c40], %38 {strides = array<i32>} : memref<256x72xbf16, #tpu.memory_space<vmem>>, vector<256x4xbf16>,
    %40 = vector.extract_strided_slice %33 {offsets = [0, 2, 0], sizes = [16, 16, 4], strides = [1, 1, 1]} : vector<18x18x4xbf16> to vector<16x16x4xbf16>
    %41 = vector.shape_cast %40 : vector<16x16x4xbf16> to vector<256x4xbf16>
    %c0_17 = arith.constant 0 : index
    %c44 = arith.constant 44 : index
    %42 = vector.load %arg8[%c0_17, %c44] : memref<256x72xbf16, #tpu.memory_space<vmem>>, vector<256x4xbf16>
    tpu.vector_store %arg8[%c0_17, %c44], %41 {strides = array<i32>} : memref<256x72xbf16, #tpu.memory_space<vmem>>, vector<256x4xbf16>,
    %43 = vector.extract_strided_slice %33 {offsets = [1, 0, 0], sizes = [16, 16, 4], strides = [1, 1, 1]} : vector<18x18x4xbf16> to vector<16x16x4xbf16>
    %44 = vector.shape_cast %43 : vector<16x16x4xbf16> to vector<256x4xbf16>
    %c0_18 = arith.constant 0 : index
    %c48 = arith.constant 48 : index
    %45 = vector.load %arg8[%c0_18, %c48] : memref<256x72xbf16, #tpu.memory_space<vmem>>, vector<256x4xbf16>
    tpu.vector_store %arg8[%c0_18, %c48], %44 {strides = array<i32>} : memref<256x72xbf16, #tpu.memory_space<vmem>>, vector<256x4xbf16>,
    %46 = vector.extract_strided_slice %33 {offsets = [1, 1, 0], sizes = [16, 16, 4], strides = [1, 1, 1]} : vector<18x18x4xbf16> to vector<16x16x4xbf16>
    %47 = vector.shape_cast %46 : vector<16x16x4xbf16> to vector<256x4xbf16>
    %c0_19 = arith.constant 0 : index
    %c52 = arith.constant 52 : index
    %48 = vector.load %arg8[%c0_19, %c52] : memref<256x72xbf16, #tpu.memory_space<vmem>>, vector<256x4xbf16>
    tpu.vector_store %arg8[%c0_19, %c52], %47 {strides = array<i32>} : memref<256x72xbf16, #tpu.memory_space<vmem>>, vector<256x4xbf16>,
    %49 = vector.extract_strided_slice %33 {offsets = [1, 2, 0], sizes = [16, 16, 4], strides = [1, 1, 1]} : vector<18x18x4xbf16> to vector<16x16x4xbf16>
    %50 = vector.shape_cast %49 : vector<16x16x4xbf16> to vector<256x4xbf16>
    %c0_20 = arith.constant 0 : index
    %c56 = arith.constant 56 : index
    %51 = vector.load %arg8[%c0_20, %c56] : memref<256x72xbf16, #tpu.memory_space<vmem>>, vector<256x4xbf16>
    tpu.vector_store %arg8[%c0_20, %c56], %50 {strides = array<i32>} : memref<256x72xbf16, #tpu.memory_space<vmem>>, vector<256x4xbf16>,
    %52 = vector.extract_strided_slice %33 {offsets = [2, 0, 0], sizes = [16, 16, 4], strides = [1, 1, 1]} : vector<18x18x4xbf16> to vector<16x16x4xbf16>
    %53 = vector.shape_cast %52 : vector<16x16x4xbf16> to vector<256x4xbf16>
    %c0_21 = arith.constant 0 : index
    %c60 = arith.constant 60 : index
    %54 = vector.load %arg8[%c0_21, %c60] : memref<256x72xbf16, #tpu.memory_space<vmem>>, vector<256x4xbf16>
    tpu.vector_store %arg8[%c0_21, %c60], %53 {strides = array<i32>} : memref<256x72xbf16, #tpu.memory_space<vmem>>, vector<256x4xbf16>,
    %55 = vector.extract_strided_slice %33 {offsets = [2, 1, 0], sizes = [16, 16, 4], strides = [1, 1, 1]} : vector<18x18x4xbf16> to vector<16x16x4xbf16>
    %56 = vector.shape_cast %55 : vector<16x16x4xbf16> to vector<256x4xbf16>
    %c0_22 = arith.constant 0 : index
    %c64 = arith.constant 64 : index
    %57 = vector.load %arg8[%c0_22, %c64] : memref<256x72xbf16, #tpu.memory_space<vmem>>, vector<256x4xbf16>
    tpu.vector_store %arg8[%c0_22, %c64], %56 {strides = array<i32>} : memref<256x72xbf16, #tpu.memory_space<vmem>>, vector<256x4xbf16>,
    %58 = vector.extract_strided_slice %33 {offsets = [2, 2, 0], sizes = [16, 16, 4], strides = [1, 1, 1]} : vector<18x18x4xbf16> to vector<16x16x4xbf16>
    %59 = vector.shape_cast %58 : vector<16x16x4xbf16> to vector<256x4xbf16>
    %c0_23 = arith.constant 0 : index
    %c68 = arith.constant 68 : index
    %60 = vector.load %arg8[%c0_23, %c68] : memref<256x72xbf16, #tpu.memory_space<vmem>>, vector<256x4xbf16>
    tpu.vector_store %arg8[%c0_23, %c68], %59 {strides = array<i32>} : memref<256x72xbf16, #tpu.memory_space<vmem>>, vector<256x4xbf16>,
    %c0_24 = arith.constant 0 : index
    %c0_25 = arith.constant 0 : index
    %61 = vector.load %arg8[%c0_24, %c0_25] : memref<256x72xbf16, #tpu.memory_space<vmem>>, vector<256x72xbf16>
    %c0_26 = arith.constant 0 : index
    %c0_27 = arith.constant 0 : index
    %62 = vector.load %arg4[%c0_26, %c0_27] : memref<72x128xbf16, #tpu.memory_space<vmem>>, vector<72x128xbf16>
    %cst = arith.constant dense<0.000000e+00> : vector<256x128xf32>
    %63 = tpu.matmul %61, %62, %cst {dimension_numbers = #tpu.dot_dimension_numbers<[1], [0], [0], [1], [0, 0, 1, 1], [], []>} : vector<256x72xbf16>, vector<72x128xbf16>, vector<256x128xf32> -> vector<256x128xf32>
    %64 = arith.truncf %63 : vector<256x128xf32> to vector<256x128xbf16>
    %c0_28 = arith.constant 0 : index
    %c0_29 = arith.constant 0 : index
    %c0_30 = arith.constant 0 : index
    %65 = vector.load %arg5[%c0_28, %c0_29, %c0_30] : memref<1x256x128xbf16, #tpu.memory_space<vmem>>, vector<1x256x128xbf16>
    %66 = vector.shape_cast %65 : vector<1x256x128xbf16> to vector<256x128xbf16>
    %67 = vector.shape_cast %64 : vector<256x128xbf16> to vector<1x256x128xbf16>
    tpu.vector_store %arg5[%c0_28, %c0_29, %c0_30], %67 {strides = array<i32>} : memref<1x256x128xbf16, #tpu.memory_space<vmem>>, vector<1x256x128xbf16>,
    %cst_31 = arith.constant dense<0.000000e+00> : vector<128xf32>
    %68 = vector.multi_reduction <add>, %63, %cst_31 [0] : vector<256x128xf32> to vector<128xf32>
    %69 = vector.shape_cast %68 : vector<128xf32> to vector<1x1x128xf32>
    %c0_32 = arith.constant 0 : index
    %c0_33 = arith.constant 0 : index
    %c0_34 = arith.constant 0 : index
    %c0_35 = arith.constant 0 : index
    %70 = vector.load %arg6[%c0_32, %c0_33, %c0_34, %c0_35] : memref<1x1x1x128xf32, #tpu.memory_space<vmem>>, vector<1x1x1x128xf32>
    %71 = vector.shape_cast %70 : vector<1x1x1x128xf32> to vector<1x1x128xf32>
    %72 = vector.shape_cast %69 : vector<1x1x128xf32> to vector<1x1x1x128xf32>
    tpu.vector_store %arg6[%c0_32, %c0_33, %c0_34, %c0_35], %72 {strides = array<i32>} : memref<1x1x1x128xf32, #tpu.memory_space<vmem>>, vector<1x1x1x128xf32>,
    %73 = arith.mulf %63, %63 : vector<256x128xf32>
    %cst_36 = arith.constant dense<0.000000e+00> : vector<128xf32>
    %74 = vector.multi_reduction <add>, %73, %cst_36 [0] : vector<256x128xf32> to vector<128xf32>
    %75 = vector.shape_cast %74 : vector<128xf32> to vector<1x1x128xf32>
    %c0_37 = arith.constant 0 : index
    %c0_38 = arith.constant 0 : index
    %c0_39 = arith.constant 0 : index
    %c0_40 = arith.constant 0 : index
    %76 = vector.load %arg7[%c0_37, %c0_38, %c0_39, %c0_40] : memref<1x1x1x128xf32, #tpu.memory_space<vmem>>, vector<1x1x1x128xf32>
    %77 = vector.shape_cast %76 : vector<1x1x1x128xf32> to vector<1x1x128xf32>
    %78 = vector.shape_cast %75 : vector<1x1x128xf32> to vector<1x1x1x128xf32>
    tpu.vector_store %arg7[%c0_37, %c0_38, %c0_39, %c0_40], %78 {strides = array<i32>} : memref<1x1x1x128xf32, #tpu.memory_space<vmem>>, vector<1x1x1x128xf32>,
    return
  }
  func.func @transform_0(%arg0: i32, %arg1: i32) -> (i32, i32, i32, i32) {
    %c0_i32 = arith.constant 0 : i32
    %c0_i32_0 = arith.constant 0 : i32
    %c0_i32_1 = arith.constant 0 : i32
    %c0_i32_2 = arith.constant 0 : i32
    return %arg0, %c0_i32, %c0_i32_0, %c0_i32_1 : i32, i32, i32, i32
  }
  func.func @transform_1(%arg0: i32, %arg1: i32) -> (i32, i32, i32, i32) {
    %c0_i32 = arith.constant 0 : i32
    %c0_i32_0 = arith.constant 0 : i32
    %c0_i32_1 = arith.constant 0 : i32
    %c0_i32_2 = arith.constant 0 : i32
    return %arg0, %c0_i32, %c0_i32_0, %c0_i32_1 : i32, i32, i32, i32
  }
  func.func @transform_2(%arg0: i32, %arg1: i32) -> (i32, i32) {
    %c0_i32 = arith.constant 0 : i32
    %c0_i32_0 = arith.constant 0 : i32
    %c0_i32_1 = arith.constant 0 : i32
    return %c0_i32, %c0_i32_0 : i32, i32
  }
  func.func @transform_3(%arg0: i32, %arg1: i32) -> (i32, i32, i32) {
    %c0_i32 = arith.constant 0 : i32
    %c0_i32_0 = arith.constant 0 : i32
    return %arg0, %arg1, %c0_i32 : i32, i32, i32
  }
  func.func @transform_4(%arg0: i32, %arg1: i32) -> (i32, i32, i32, i32) {
    %c0_i32 = arith.constant 0 : i32
    %c0_i32_0 = arith.constant 0 : i32
    %c0_i32_1 = arith.constant 0 : i32
    return %arg0, %arg1, %c0_i32, %c0_i32_0 : i32, i32, i32, i32
  }
  func.func @transform_5(%arg0: i32, %arg1: i32) -> (i32, i32, i32, i32) {
    %c0_i32 = arith.constant 0 : i32
    %c0_i32_0 = arith.constant 0 : i32
    %c0_i32_1 = arith.constant 0 : i32
    return %arg0, %arg1, %c0_i32, %c0_i32_0 : i32, i32, i32, i32
  }
}

module attributes {stable_mosaic.version = 11 : i64} {
  func.func @_bn_relu_kernel(%arg0: i32, %arg1: i32, %arg2: memref<1x256x128xbf16, #tpu.memory_space<vmem>>, %arg3: memref<1x128xf32, #tpu.memory_space<vmem>>, %arg4: memref<1x128xf32, #tpu.memory_space<vmem>>, %arg5: memref<1x256x128xbf16, #tpu.memory_space<vmem>>) attributes {dimension_semantics = [#tpu.dimension_semantics<parallel>, #tpu.dimension_semantics<parallel>], iteration_bounds = array<i64: 2, 1>, scalar_prefetch = 0 : i64, scratch_operands = 0 : i64, tpu.core_type = #tpu.core_type<tc>, window_params = [{transform_indices = @transform_0, window_bounds = array<i64: 1, 256, 128>}, {pipeline_mode = #tpu.pipeline_mode<synchronous>, transform_indices = @transform_1, window_bounds = array<i64: 1, 128>}, {pipeline_mode = #tpu.pipeline_mode<synchronous>, transform_indices = @transform_2, window_bounds = array<i64: 1, 128>}, {transform_indices = @transform_3, window_bounds = array<i64: 1, 256, 128>}]} {
    %c0 = arith.constant 0 : index
    %c0_0 = arith.constant 0 : index
    %c0_1 = arith.constant 0 : index
    %0 = vector.load %arg2[%c0, %c0_0, %c0_1] : memref<1x256x128xbf16, #tpu.memory_space<vmem>>, vector<1x256x128xbf16>
    %1 = vector.shape_cast %0 : vector<1x256x128xbf16> to vector<256x128xbf16>
    %2 = arith.extf %1 : vector<256x128xbf16> to vector<256x128xf32>
    %c0_2 = arith.constant 0 : index
    %c0_3 = arith.constant 0 : index
    %3 = vector.load %arg3[%c0_2, %c0_3] : memref<1x128xf32, #tpu.memory_space<vmem>>, vector<1x128xf32>
    %4 = vector.broadcast %3 : vector<1x128xf32> to vector<256x128xf32>
    %5 = arith.mulf %2, %4 : vector<256x128xf32>
    %c0_4 = arith.constant 0 : index
    %c0_5 = arith.constant 0 : index
    %6 = vector.load %arg4[%c0_4, %c0_5] : memref<1x128xf32, #tpu.memory_space<vmem>>, vector<1x128xf32>
    %7 = vector.broadcast %6 : vector<1x128xf32> to vector<256x128xf32>
    %8 = arith.addf %5, %7 : vector<256x128xf32>
    %cst = arith.constant 0.000000e+00 : f32
    %9 = vector.broadcast %cst : f32 to vector<256x128xf32>
    %10 = arith.maximumf %8, %9 : vector<256x128xf32>
    %11 = arith.truncf %10 : vector<256x128xf32> to vector<256x128xbf16>
    %c0_6 = arith.constant 0 : index
    %c0_7 = arith.constant 0 : index
    %c0_8 = arith.constant 0 : index
    %12 = vector.load %arg5[%c0_6, %c0_7, %c0_8] : memref<1x256x128xbf16, #tpu.memory_space<vmem>>, vector<1x256x128xbf16>
    %13 = vector.shape_cast %12 : vector<1x256x128xbf16> to vector<256x128xbf16>
    %14 = vector.shape_cast %11 : vector<256x128xbf16> to vector<1x256x128xbf16>
    tpu.vector_store %arg5[%c0_6, %c0_7, %c0_8], %14 {strides = array<i32>} : memref<1x256x128xbf16, #tpu.memory_space<vmem>>, vector<1x256x128xbf16>,
    return
  }
  func.func @transform_0(%arg0: i32, %arg1: i32) -> (i32, i32, i32) {
    %c0_i32 = arith.constant 0 : i32
    %c0_i32_0 = arith.constant 0 : i32
    return %arg0, %arg1, %c0_i32 : i32, i32, i32
  }
  func.func @transform_1(%arg0: i32, %arg1: i32) -> (i32, i32) {
    %c0_i32 = arith.constant 0 : i32
    %c0_i32_0 = arith.constant 0 : i32
    %c0_i32_1 = arith.constant 0 : i32
    return %c0_i32, %c0_i32_0 : i32, i32
  }
  func.func @transform_2(%arg0: i32, %arg1: i32) -> (i32, i32) {
    %c0_i32 = arith.constant 0 : i32
    %c0_i32_0 = arith.constant 0 : i32
    %c0_i32_1 = arith.constant 0 : i32
    return %c0_i32, %c0_i32_0 : i32, i32
  }
  func.func @transform_3(%arg0: i32, %arg1: i32) -> (i32, i32, i32) {
    %c0_i32 = arith.constant 0 : i32
    %c0_i32_0 = arith.constant 0 : i32
    return %arg0, %arg1, %c0_i32 : i32, i32, i32
  }
}

module attributes {stable_mosaic.version = 11 : i64} {
  func.func @kernel(%arg0: i32, %arg1: i32, %arg2: memref<1x18x18x128xbf16, #tpu.memory_space<vmem>>, %arg3: memref<1152x128xbf16, #tpu.memory_space<vmem>>, %arg4: memref<1x256x128xbf16, #tpu.memory_space<vmem>>, %arg5: memref<1x1x1x128xf32, #tpu.memory_space<vmem>>, %arg6: memref<1x1x1x128xf32, #tpu.memory_space<vmem>>, %arg7: memref<256x1152xbf16, #tpu.memory_space<vmem>>) attributes {dimension_semantics = [#tpu.dimension_semantics<parallel>, #tpu.dimension_semantics<parallel>], iteration_bounds = array<i64: 2, 1>, scalar_prefetch = 0 : i64, scratch_operands = 1 : i64, tpu.core_type = #tpu.core_type<tc>, window_params = [{transform_indices = @transform_0, window_bounds = array<i64: 1, 18, 18, 128>}, {pipeline_mode = #tpu.pipeline_mode<synchronous>, transform_indices = @transform_1, window_bounds = array<i64: 1152, 128>}, {transform_indices = @transform_2, window_bounds = array<i64: 1, 256, 128>}, {transform_indices = @transform_3, window_bounds = array<i64: 1, 1, 1, 128>}, {transform_indices = @transform_4, window_bounds = array<i64: 1, 1, 1, 128>}]} {
    %c16_i32 = arith.constant 16 : i32
    %0 = arith.muli %arg1, %c16_i32 : i32
    %c0 = arith.constant 0 : index
    %1 = arith.index_cast %0 : i32 to index
    %c0_0 = arith.constant 0 : index
    %c0_1 = arith.constant 0 : index
    %2 = vector.load %arg2[%c0, %1, %c0_0, %c0_1] : memref<1x18x18x128xbf16, #tpu.memory_space<vmem>>, vector<1x18x18x128xbf16>
    %3 = vector.shape_cast %2 : vector<1x18x18x128xbf16> to vector<18x18x128xbf16>
    %4 = vector.extract_strided_slice %3 {offsets = [0, 0, 0], sizes = [16, 16, 128], strides = [1, 1, 1]} : vector<18x18x128xbf16> to vector<16x16x128xbf16>
    %5 = vector.shape_cast %4 : vector<16x16x128xbf16> to vector<256x128xbf16>
    %c0_2 = arith.constant 0 : index
    %c0_3 = arith.constant 0 : index
    %6 = vector.load %arg7[%c0_2, %c0_3] : memref<256x1152xbf16, #tpu.memory_space<vmem>>, vector<256x128xbf16>
    tpu.vector_store %arg7[%c0_2, %c0_3], %5 {strides = array<i32>} : memref<256x1152xbf16, #tpu.memory_space<vmem>>, vector<256x128xbf16>,
    %7 = vector.extract_strided_slice %3 {offsets = [0, 1, 0], sizes = [16, 16, 128], strides = [1, 1, 1]} : vector<18x18x128xbf16> to vector<16x16x128xbf16>
    %8 = vector.shape_cast %7 : vector<16x16x128xbf16> to vector<256x128xbf16>
    %c0_4 = arith.constant 0 : index
    %c128 = arith.constant 128 : index
    %9 = vector.load %arg7[%c0_4, %c128] : memref<256x1152xbf16, #tpu.memory_space<vmem>>, vector<256x128xbf16>
    tpu.vector_store %arg7[%c0_4, %c128], %8 {strides = array<i32>} : memref<256x1152xbf16, #tpu.memory_space<vmem>>, vector<256x128xbf16>,
    %10 = vector.extract_strided_slice %3 {offsets = [0, 2, 0], sizes = [16, 16, 128], strides = [1, 1, 1]} : vector<18x18x128xbf16> to vector<16x16x128xbf16>
    %11 = vector.shape_cast %10 : vector<16x16x128xbf16> to vector<256x128xbf16>
    %c0_5 = arith.constant 0 : index
    %c256 = arith.constant 256 : index
    %12 = vector.load %arg7[%c0_5, %c256] : memref<256x1152xbf16, #tpu.memory_space<vmem>>, vector<256x128xbf16>
    tpu.vector_store %arg7[%c0_5, %c256], %11 {strides = array<i32>} : memref<256x1152xbf16, #tpu.memory_space<vmem>>, vector<256x128xbf16>,
    %13 = vector.extract_strided_slice %3 {offsets = [1, 0, 0], sizes = [16, 16, 128], strides = [1, 1, 1]} : vector<18x18x128xbf16> to vector<16x16x128xbf16>
    %14 = vector.shape_cast %13 : vector<16x16x128xbf16> to vector<256x128xbf16>
    %c0_6 = arith.constant 0 : index
    %c384 = arith.constant 384 : index
    %15 = vector.load %arg7[%c0_6, %c384] : memref<256x1152xbf16, #tpu.memory_space<vmem>>, vector<256x128xbf16>
    tpu.vector_store %arg7[%c0_6, %c384], %14 {strides = array<i32>} : memref<256x1152xbf16, #tpu.memory_space<vmem>>, vector<256x128xbf16>,
    %16 = vector.extract_strided_slice %3 {offsets = [1, 1, 0], sizes = [16, 16, 128], strides = [1, 1, 1]} : vector<18x18x128xbf16> to vector<16x16x128xbf16>
    %17 = vector.shape_cast %16 : vector<16x16x128xbf16> to vector<256x128xbf16>
    %c0_7 = arith.constant 0 : index
    %c512 = arith.constant 512 : index
    %18 = vector.load %arg7[%c0_7, %c512] : memref<256x1152xbf16, #tpu.memory_space<vmem>>, vector<256x128xbf16>
    tpu.vector_store %arg7[%c0_7, %c512], %17 {strides = array<i32>} : memref<256x1152xbf16, #tpu.memory_space<vmem>>, vector<256x128xbf16>,
    %19 = vector.extract_strided_slice %3 {offsets = [1, 2, 0], sizes = [16, 16, 128], strides = [1, 1, 1]} : vector<18x18x128xbf16> to vector<16x16x128xbf16>
    %20 = vector.shape_cast %19 : vector<16x16x128xbf16> to vector<256x128xbf16>
    %c0_8 = arith.constant 0 : index
    %c640 = arith.constant 640 : index
    %21 = vector.load %arg7[%c0_8, %c640] : memref<256x1152xbf16, #tpu.memory_space<vmem>>, vector<256x128xbf16>
    tpu.vector_store %arg7[%c0_8, %c640], %20 {strides = array<i32>} : memref<256x1152xbf16, #tpu.memory_space<vmem>>, vector<256x128xbf16>,
    %22 = vector.extract_strided_slice %3 {offsets = [2, 0, 0], sizes = [16, 16, 128], strides = [1, 1, 1]} : vector<18x18x128xbf16> to vector<16x16x128xbf16>
    %23 = vector.shape_cast %22 : vector<16x16x128xbf16> to vector<256x128xbf16>
    %c0_9 = arith.constant 0 : index
    %c768 = arith.constant 768 : index
    %24 = vector.load %arg7[%c0_9, %c768] : memref<256x1152xbf16, #tpu.memory_space<vmem>>, vector<256x128xbf16>
    tpu.vector_store %arg7[%c0_9, %c768], %23 {strides = array<i32>} : memref<256x1152xbf16, #tpu.memory_space<vmem>>, vector<256x128xbf16>,
    %25 = vector.extract_strided_slice %3 {offsets = [2, 1, 0], sizes = [16, 16, 128], strides = [1, 1, 1]} : vector<18x18x128xbf16> to vector<16x16x128xbf16>
    %26 = vector.shape_cast %25 : vector<16x16x128xbf16> to vector<256x128xbf16>
    %c0_10 = arith.constant 0 : index
    %c896 = arith.constant 896 : index
    %27 = vector.load %arg7[%c0_10, %c896] : memref<256x1152xbf16, #tpu.memory_space<vmem>>, vector<256x128xbf16>
    tpu.vector_store %arg7[%c0_10, %c896], %26 {strides = array<i32>} : memref<256x1152xbf16, #tpu.memory_space<vmem>>, vector<256x128xbf16>,
    %28 = vector.extract_strided_slice %3 {offsets = [2, 2, 0], sizes = [16, 16, 128], strides = [1, 1, 1]} : vector<18x18x128xbf16> to vector<16x16x128xbf16>
    %29 = vector.shape_cast %28 : vector<16x16x128xbf16> to vector<256x128xbf16>
    %c0_11 = arith.constant 0 : index
    %c1024 = arith.constant 1024 : index
    %30 = vector.load %arg7[%c0_11, %c1024] : memref<256x1152xbf16, #tpu.memory_space<vmem>>, vector<256x128xbf16>
    tpu.vector_store %arg7[%c0_11, %c1024], %29 {strides = array<i32>} : memref<256x1152xbf16, #tpu.memory_space<vmem>>, vector<256x128xbf16>,
    %c0_12 = arith.constant 0 : index
    %c0_13 = arith.constant 0 : index
    %31 = vector.load %arg7[%c0_12, %c0_13] : memref<256x1152xbf16, #tpu.memory_space<vmem>>, vector<256x1152xbf16>
    %c0_14 = arith.constant 0 : index
    %c0_15 = arith.constant 0 : index
    %32 = vector.load %arg3[%c0_14, %c0_15] : memref<1152x128xbf16, #tpu.memory_space<vmem>>, vector<1152x128xbf16>
    %cst = arith.constant dense<0.000000e+00> : vector<256x128xf32>
    %33 = tpu.matmul %31, %32, %cst {dimension_numbers = #tpu.dot_dimension_numbers<[1], [0], [0], [1], [0, 0, 1, 1], [], []>} : vector<256x1152xbf16>, vector<1152x128xbf16>, vector<256x128xf32> -> vector<256x128xf32>
    %34 = arith.truncf %33 : vector<256x128xf32> to vector<256x128xbf16>
    %c0_16 = arith.constant 0 : index
    %c0_17 = arith.constant 0 : index
    %c0_18 = arith.constant 0 : index
    %35 = vector.load %arg4[%c0_16, %c0_17, %c0_18] : memref<1x256x128xbf16, #tpu.memory_space<vmem>>, vector<1x256x128xbf16>
    %36 = vector.shape_cast %35 : vector<1x256x128xbf16> to vector<256x128xbf16>
    %37 = vector.shape_cast %34 : vector<256x128xbf16> to vector<1x256x128xbf16>
    tpu.vector_store %arg4[%c0_16, %c0_17, %c0_18], %37 {strides = array<i32>} : memref<1x256x128xbf16, #tpu.memory_space<vmem>>, vector<1x256x128xbf16>,
    %cst_19 = arith.constant dense<0.000000e+00> : vector<128xf32>
    %38 = vector.multi_reduction <add>, %33, %cst_19 [0] : vector<256x128xf32> to vector<128xf32>
    %39 = vector.shape_cast %38 : vector<128xf32> to vector<1x1x128xf32>
    %c0_20 = arith.constant 0 : index
    %c0_21 = arith.constant 0 : index
    %c0_22 = arith.constant 0 : index
    %c0_23 = arith.constant 0 : index
    %40 = vector.load %arg5[%c0_20, %c0_21, %c0_22, %c0_23] : memref<1x1x1x128xf32, #tpu.memory_space<vmem>>, vector<1x1x1x128xf32>
    %41 = vector.shape_cast %40 : vector<1x1x1x128xf32> to vector<1x1x128xf32>
    %42 = vector.shape_cast %39 : vector<1x1x128xf32> to vector<1x1x1x128xf32>
    tpu.vector_store %arg5[%c0_20, %c0_21, %c0_22, %c0_23], %42 {strides = array<i32>} : memref<1x1x1x128xf32, #tpu.memory_space<vmem>>, vector<1x1x1x128xf32>,
    %43 = arith.mulf %33, %33 : vector<256x128xf32>
    %cst_24 = arith.constant dense<0.000000e+00> : vector<128xf32>
    %44 = vector.multi_reduction <add>, %43, %cst_24 [0] : vector<256x128xf32> to vector<128xf32>
    %45 = vector.shape_cast %44 : vector<128xf32> to vector<1x1x128xf32>
    %c0_25 = arith.constant 0 : index
    %c0_26 = arith.constant 0 : index
    %c0_27 = arith.constant 0 : index
    %c0_28 = arith.constant 0 : index
    %46 = vector.load %arg6[%c0_25, %c0_26, %c0_27, %c0_28] : memref<1x1x1x128xf32, #tpu.memory_space<vmem>>, vector<1x1x1x128xf32>
    %47 = vector.shape_cast %46 : vector<1x1x1x128xf32> to vector<1x1x128xf32>
    %48 = vector.shape_cast %45 : vector<1x1x128xf32> to vector<1x1x1x128xf32>
    tpu.vector_store %arg6[%c0_25, %c0_26, %c0_27, %c0_28], %48 {strides = array<i32>} : memref<1x1x1x128xf32, #tpu.memory_space<vmem>>, vector<1x1x1x128xf32>,
    return
  }
  func.func @transform_0(%arg0: i32, %arg1: i32) -> (i32, i32, i32, i32) {
    %c0_i32 = arith.constant 0 : i32
    %c0_i32_0 = arith.constant 0 : i32
    %c0_i32_1 = arith.constant 0 : i32
    %c0_i32_2 = arith.constant 0 : i32
    return %arg0, %c0_i32, %c0_i32_0, %c0_i32_1 : i32, i32, i32, i32
  }
  func.func @transform_1(%arg0: i32, %arg1: i32) -> (i32, i32) {
    %c0_i32 = arith.constant 0 : i32
    %c0_i32_0 = arith.constant 0 : i32
    %c0_i32_1 = arith.constant 0 : i32
    return %c0_i32, %c0_i32_0 : i32, i32
  }
  func.func @transform_2(%arg0: i32, %arg1: i32) -> (i32, i32, i32) {
    %c0_i32 = arith.constant 0 : i32
    %c0_i32_0 = arith.constant 0 : i32
    return %arg0, %arg1, %c0_i32 : i32, i32, i32
  }
  func.func @transform_3(%arg0: i32, %arg1: i32) -> (i32, i32, i32, i32) {
    %c0_i32 = arith.constant 0 : i32
    %c0_i32_0 = arith.constant 0 : i32
    %c0_i32_1 = arith.constant 0 : i32
    return %arg0, %arg1, %c0_i32, %c0_i32_0 : i32, i32, i32, i32
  }
  func.func @transform_4(%arg0: i32, %arg1: i32) -> (i32, i32, i32, i32) {
    %c0_i32 = arith.constant 0 : i32
    %c0_i32_0 = arith.constant 0 : i32
    %c0_i32_1 = arith.constant 0 : i32
    return %arg0, %arg1, %c0_i32, %c0_i32_0 : i32, i32, i32, i32
  }
}

module attributes {stable_mosaic.version = 11 : i64} {
  func.func @_bn_relu_kernel(%arg0: i32, %arg1: i32, %arg2: memref<1x256x128xbf16, #tpu.memory_space<vmem>>, %arg3: memref<1x128xf32, #tpu.memory_space<vmem>>, %arg4: memref<1x128xf32, #tpu.memory_space<vmem>>, %arg5: memref<1x256x128xf32, #tpu.memory_space<vmem>>) attributes {dimension_semantics = [#tpu.dimension_semantics<parallel>, #tpu.dimension_semantics<parallel>], iteration_bounds = array<i64: 2, 1>, scalar_prefetch = 0 : i64, scratch_operands = 0 : i64, tpu.core_type = #tpu.core_type<tc>, window_params = [{transform_indices = @transform_0, window_bounds = array<i64: 1, 256, 128>}, {pipeline_mode = #tpu.pipeline_mode<synchronous>, transform_indices = @transform_1, window_bounds = array<i64: 1, 128>}, {pipeline_mode = #tpu.pipeline_mode<synchronous>, transform_indices = @transform_2, window_bounds = array<i64: 1, 128>}, {transform_indices = @transform_3, window_bounds = array<i64: 1, 256, 128>}]} {
    %c0 = arith.constant 0 : index
    %c0_0 = arith.constant 0 : index
    %c0_1 = arith.constant 0 : index
    %0 = vector.load %arg2[%c0, %c0_0, %c0_1] : memref<1x256x128xbf16, #tpu.memory_space<vmem>>, vector<1x256x128xbf16>
    %1 = vector.shape_cast %0 : vector<1x256x128xbf16> to vector<256x128xbf16>
    %2 = arith.extf %1 : vector<256x128xbf16> to vector<256x128xf32>
    %c0_2 = arith.constant 0 : index
    %c0_3 = arith.constant 0 : index
    %3 = vector.load %arg3[%c0_2, %c0_3] : memref<1x128xf32, #tpu.memory_space<vmem>>, vector<1x128xf32>
    %4 = vector.broadcast %3 : vector<1x128xf32> to vector<256x128xf32>
    %5 = arith.mulf %2, %4 : vector<256x128xf32>
    %c0_4 = arith.constant 0 : index
    %c0_5 = arith.constant 0 : index
    %6 = vector.load %arg4[%c0_4, %c0_5] : memref<1x128xf32, #tpu.memory_space<vmem>>, vector<1x128xf32>
    %7 = vector.broadcast %6 : vector<1x128xf32> to vector<256x128xf32>
    %8 = arith.addf %5, %7 : vector<256x128xf32>
    %cst = arith.constant 0.000000e+00 : f32
    %9 = vector.broadcast %cst : f32 to vector<256x128xf32>
    %10 = arith.maximumf %8, %9 : vector<256x128xf32>
    %c0_6 = arith.constant 0 : index
    %c0_7 = arith.constant 0 : index
    %c0_8 = arith.constant 0 : index
    %11 = vector.load %arg5[%c0_6, %c0_7, %c0_8] : memref<1x256x128xf32, #tpu.memory_space<vmem>>, vector<1x256x128xf32>
    %12 = vector.shape_cast %11 : vector<1x256x128xf32> to vector<256x128xf32>
    %13 = vector.shape_cast %10 : vector<256x128xf32> to vector<1x256x128xf32>
    tpu.vector_store %arg5[%c0_6, %c0_7, %c0_8], %13 {strides = array<i32>} : memref<1x256x128xf32, #tpu.memory_space<vmem>>, vector<1x256x128xf32>,
    return
  }
  func.func @transform_0(%arg0: i32, %arg1: i32) -> (i32, i32, i32) {
    %c0_i32 = arith.constant 0 : i32
    %c0_i32_0 = arith.constant 0 : i32
    return %arg0, %arg1, %c0_i32 : i32, i32, i32
  }
  func.func @transform_1(%arg0: i32, %arg1: i32) -> (i32, i32) {
    %c0_i32 = arith.constant 0 : i32
    %c0_i32_0 = arith.constant 0 : i32
    %c0_i32_1 = arith.constant 0 : i32
    return %c0_i32, %c0_i32_0 : i32, i32
  }
  func.func @transform_2(%arg0: i32, %arg1: i32) -> (i32, i32) {
    %c0_i32 = arith.constant 0 : i32
    %c0_i32_0 = arith.constant 0 : i32
    %c0_i32_1 = arith.constant 0 : i32
    return %c0_i32, %c0_i32_0 : i32, i32
  }
  func.func @transform_3(%arg0: i32, %arg1: i32) -> (i32, i32, i32) {
    %c0_i32 = arith.constant 0 : i32
    %c0_i32_0 = arith.constant 0 : i32
    return %arg0, %arg1, %c0_i32 : i32, i32, i32
  }
}

</mosaic_0001>

<bundles_post_ra>
// kernel: up_forward.5
= control target key start
LH: loop header
LB: loop body
LE: loop exit
PB: predicated region body
PF: predicated region fallthrough
CT: control target
= control target key end

     0   :  { %s786_s12 = smov 0   ;;  %s788_s13 = smov 0   ;;  %s936_s0 = inlined_call_operand.vmem [shape: bf16[2,256,128], index: 0, kind: input, shape index: {}]   ;;  %s937_s1 = inlined_call_operand.vmem [shape: f32[1,128], index: 1, kind: input, shape index: {}]   ;;  %s938_s2 = inlined_call_operand.vmem [shape: f32[1,128], index: 2, kind: input, shape index: {}]   ;;  %s939_s3 = inlined_call_operand.vmem [shape: bf16[2,256,128], index: 3, kind: output, shape index: {}]  }
   0x1   :  { %s790_s14 = smov 0  }
   0x2 LB: > { %s25_s15 = sadd.s32 1, %s760_s13  ;;  %p533_p0 = scmp.ge.s32.totalorder %s764_s14, 1  ;;  %s764_s14 = sphi %s790_s14, %s13_s14   ;;  %s760_s13 = sphi %s788_s13, %s941_s13   ;;  %s756_s12 = sphi %s786_s12, %s940_s12  }
   0x3   : > { %p27_p1 = scmp.ge.s32.totalorder %s25_s15, 2  ;;  %p158_p2 = scmp.lt.s32.totalorder %s764_s14, 3 }
   0x5   : > { %s943_s15 = smov (%p27_p1, %s25_s15), 0  ;;  %p159_p3 = pnand %p533_p0, %p158_p2 }
   0x6   : > { %p191_p4 = scmp.lt.s32.totalorder (!%p159_p3), %s756_s12, 1 }
   0x7   : > { %162 = sbr.rel (%p159_p3) target bundleno = 58 (0x3a), region = 32 }
   0xc   : > { %s945_s12 = smov (!%p191_p4, %s756_s12), 1  ;;  %v817_v0 = vld [vmem:[%s937_s1] ss:$0 sm:$0xff] }
   0xd   : > { %s540_s16 = sshll.u32 %s945_s12, 7  ;;  %v825_v6 = vld [vmem:[%s938_s2] ss:$0 sm:$0xff] }
   0xe   : > { %s812_s19 = scalar_lea.vmem %s936_s0, %s540_s16  ;;  %s851_s26 = scalar_lea.vmem %s939_s3, %s540_s16 }
   0xf   : > { %v543_v1 = vld [vmem:[%s812_s19] sm:$0xff]   ;;  %v686_v2 = vld [vmem:[%s812_s19 + $0x8] sm:$0xff]   ;;  %v687_v3 = vld [vmem:[%s812_s19 + $0x10] sm:$0xff]  }
  0x10   : > { %v544_v4 = vunpack.c.l.bf16 %v543_v1  ;;  %v545_v5 = vunpack.c.h.bf16 %v543_v1  ;;  %v548_v7 = vunpack.c.l.bf16 %v686_v2  ;;  %v549_v8 = vunpack.c.h.bf16 %v686_v2  ;;  %v688_v9 = vld [vmem:[%s812_s19 + $0x18] sm:$0xff]   ;;  %v689_v30 = vld [vmem:[%s812_s19 + $0x20] sm:$0xff]   ;;  %v690_v35 = vld [vmem:[%s812_s19 + $0x28] sm:$0xff]  }
  0x11   : > { %v552_v10 = vunpack.c.l.bf16 %v687_v3  ;;  %v553_v11 = vunpack.c.h.bf16 %v687_v3  ;;  %v556_v12 = vunpack.c.l.bf16 %v688_v9  ;;  %v557_v13 = vunpack.c.h.bf16 %v688_v9  ;;  %v691_v40 = vld [vmem:[%s812_s19 + $0x30] sm:$0xff]   ;;  %v692_v45 = vld [vmem:[%s812_s19 + $0x38] sm:$0xff]   ;;  %v693_v3 = vld [vmem:[%s812_s19 + $0x40] sm:$0xff]  }
  0x12   : > { %v278_v14 = vmul.f32 %v817_v0, %v544_v4  ;;  %v279_v15 = vmul.f32 %v817_v0, %v545_v5  ;;  %v280_v16 = vmul.f32 %v817_v0, %v548_v7  ;;  %v281_v17 = vmul.f32 %v817_v0, %v549_v8 }
  0x13   : > { %v282_v18 = vmul.f32 %v817_v0, %v552_v10  ;;  %v283_v19 = vmul.f32 %v817_v0, %v553_v11  ;;  %v284_v20 = vmul.f32 %v817_v0, %v556_v12  ;;  %v285_v21 = vmul.f32 %v817_v0, %v557_v13  ;;  %v694_v13 = vld [vmem:[%s812_s19 + $0x48] sm:$0xff]  }
  0x14   : > { %v314_v22 = vadd.f32 %v825_v6, %v278_v14  ;;  %v315_v23 = vadd.f32 %v825_v6, %v279_v15  ;;  %v316_v24 = vadd.f32 %v825_v6, %v280_v16  ;;  %v317_v25 = vadd.f32 %v825_v6, %v281_v17 }
  0x15   : > { %v318_v26 = vadd.f32 %v825_v6, %v282_v18  ;;  %v319_v27 = vadd.f32 %v825_v6, %v283_v19  ;;  %v320_v28 = vadd.f32 %v825_v6, %v284_v20  ;;  %v321_v29 = vadd.f32 %v825_v6, %v285_v21  ;;  %v695_v18 = vld [vmem:[%s812_s19 + $0x50] sm:$0xff]  }
  0x16   : > { %v346_v31 = vmax.f32 %v314_v22, 0.0  ;;  %v347_v32 = vmax.f32 %v315_v23, 0.0  ;;  %v348_v33 = vmax.f32 %v316_v24, 0.0  ;;  %v349_v34 = vmax.f32 %v317_v25, 0.0  ;;  %v696_v23 = vld [vmem:[%s812_s19 + $0x58] sm:$0xff]  }
  0x17   : > { %v350_v36 = vmax.f32 %v318_v26, 0.0  ;;  %v351_v37 = vmax.f32 %v319_v27, 0.0  ;;  %v352_v38 = vmax.f32 %v320_v28, 0.0  ;;  %v353_v39 = vmax.f32 %v321_v29, 0.0 }
  0x18   : > { %v609_v41 = vpack.c.bf16 %v347_v32, %v346_v31  ;;  %v614_v42 = vpack.c.bf16 %v349_v34, %v348_v33  ;;  %v560_v43 = vunpack.c.l.bf16 %v689_v30  ;;  %v561_v44 = vunpack.c.h.bf16 %v689_v30 }
  0x19   : > { %v619_v46 = vpack.c.bf16 %v351_v37, %v350_v36  ;;  %v624_v47 = vpack.c.bf16 %v353_v39, %v352_v38  ;;  %v564_v48 = vunpack.c.l.bf16 %v690_v35  ;;  %v565_v49 = vunpack.c.h.bf16 %v690_v35 }
  0x1a   : > { %610 = vst [vmem:[%s851_s26] sm:$0xff] %v609_v41   ;;  %v286_v50 = vmul.f32 %v817_v0, %v560_v43  ;;  %v287_v51 = vmul.f32 %v817_v0, %v561_v44  ;;  %v568_v52 = vunpack.c.l.bf16 %v691_v40  ;;  %v569_v53 = vunpack.c.h.bf16 %v691_v40  ;;  %v697_v40 = vld [vmem:[%s812_s19 + $0x60] sm:$0xff]  }
  0x1b   : > { %701 = vst [vmem:[%s851_s26 + $0x8] sm:$0xff] %v614_v42   ;;  %v288_v54 = vmul.f32 %v817_v0, %v564_v48  ;;  %v289_v55 = vmul.f32 %v817_v0, %v565_v49  ;;  %v572_v56 = vunpack.c.l.bf16 %v692_v45  ;;  %v573_v57 = vunpack.c.h.bf16 %v692_v45 }
  0x1c   : > { %702 = vst [vmem:[%s851_s26 + $0x10] sm:$0xff] %v619_v46   ;;  %v322_v58 = vadd.f32 %v825_v6, %v286_v50  ;;  %v323_v59 = vadd.f32 %v825_v6, %v287_v51  ;;  %v290_v60 = vmul.f32 %v817_v0, %v568_v52  ;;  %v291_v61 = vmul.f32 %v817_v0, %v569_v53  ;;  %v698_v53 = vld [vmem:[%s812_s19 + $0x68] sm:$0xff]  }
  0x1d   : > { %703 = vst [vmem:[%s851_s26 + $0x18] sm:$0xff] %v624_v47   ;;  %v324_v62 = vadd.f32 %v825_v6, %v288_v54  ;;  %v325_v63 = vadd.f32 %v825_v6, %v289_v55  ;;  %v292_v1 = vmul.f32 %v817_v0, %v572_v56  ;;  %v293_v2 = vmul.f32 %v817_v0, %v573_v57 }
  0x1e   : > { %v354_v4 = vmax.f32 %v322_v58, 0.0  ;;  %v355_v5 = vmax.f32 %v323_v59, 0.0  ;;  %v326_v7 = vadd.f32 %v825_v6, %v290_v60  ;;  %v327_v8 = vadd.f32 %v825_v6, %v291_v61  ;;  %v699_v58 = vld [vmem:[%s812_s19 + $0x70] sm:$0xff]  }
  0x1f   : > { %v356_v9 = vmax.f32 %v324_v62, 0.0  ;;  %v357_v10 = vmax.f32 %v325_v63, 0.0  ;;  %v328_v11 = vadd.f32 %v825_v6, %v292_v1  ;;  %v329_v12 = vadd.f32 %v825_v6, %v293_v2  ;;  %v700_v63 = vld [vmem:[%s812_s19 + $0x78] sm:$0xff]  }
  0x20   : > { %v629_v14 = vpack.c.bf16 %v355_v5, %v354_v4  ;;  %v358_v15 = vmax.f32 %v326_v7, 0.0  ;;  %v359_v16 = vmax.f32 %v327_v8, 0.0  ;;  %v576_v17 = vunpack.c.l.bf16 %v693_v3 }
  0x21   : > { %v634_v19 = vpack.c.bf16 %v357_v10, %v356_v9  ;;  %v360_v20 = vmax.f32 %v328_v11, 0.0  ;;  %v361_v21 = vmax.f32 %v329_v12, 0.0  ;;  %v577_v22 = vunpack.c.h.bf16 %v693_v3 }
  0x22   : > { %704 = vst [vmem:[%s851_s26 + $0x20] sm:$0xff] %v629_v14   ;;  %v639_v24 = vpack.c.bf16 %v359_v16, %v358_v15  ;;  %v294_v25 = vmul.f32 %v817_v0, %v576_v17  ;;  %v580_v26 = vunpack.c.l.bf16 %v694_v13  ;;  %v581_v27 = vunpack.c.h.bf16 %v694_v13 }
  0x23   : > { %705 = vst [vmem:[%s851_s26 + $0x28] sm:$0xff] %v634_v19   ;;  %v644_v28 = vpack.c.bf16 %v361_v21, %v360_v20  ;;  %v295_v29 = vmul.f32 %v817_v0, %v577_v22  ;;  %v584_v30 = vunpack.c.l.bf16 %v695_v18  ;;  %v585_v31 = vunpack.c.h.bf16 %v695_v18 }
  0x24   : > { %706 = vst [vmem:[%s851_s26 + $0x30] sm:$0xff] %v639_v24   ;;  %v330_v32 = vadd.f32 %v825_v6, %v294_v25  ;;  %v296_v33 = vmul.f32 %v817_v0, %v580_v26  ;;  %v297_v34 = vmul.f32 %v817_v0, %v581_v27  ;;  %v588_v35 = vunpack.c.l.bf16 %v696_v23 }
  0x25   : > { %707 = vst [vmem:[%s851_s26 + $0x38] sm:$0xff] %v644_v28   ;;  %v331_v36 = vadd.f32 %v825_v6, %v295_v29  ;;  %v298_v37 = vmul.f32 %v817_v0, %v584_v30  ;;  %v299_v38 = vmul.f32 %v817_v0, %v585_v31  ;;  %v589_v39 = vunpack.c.h.bf16 %v696_v23 }
  0x26   : > { %v362_v41 = vmax.f32 %v330_v32, 0.0  ;;  %v332_v42 = vadd.f32 %v825_v6, %v296_v33  ;;  %v333_v43 = vadd.f32 %v825_v6, %v297_v34  ;;  %v300_v44 = vmul.f32 %v817_v0, %v588_v35 }
  0x27   : > { %v363_v45 = vmax.f32 %v331_v36, 0.0  ;;  %v334_v46 = vadd.f32 %v825_v6, %v298_v37  ;;  %v335_v47 = vadd.f32 %v825_v6, %v299_v38  ;;  %v301_v48 = vmul.f32 %v817_v0, %v589_v39 }
  0x28   : > { %v364_v49 = vmax.f32 %v332_v42, 0.0  ;;  %v365_v50 = vmax.f32 %v333_v43, 0.0  ;;  %v336_v51 = vadd.f32 %v825_v6, %v300_v44  ;;  %v592_v52 = vunpack.c.l.bf16 %v697_v40 }
  0x29   : > { %v649_v54 = vpack.c.bf16 %v363_v45, %v362_v41  ;;  %v366_v55 = vmax.f32 %v334_v46, 0.0  ;;  %v367_v56 = vmax.f32 %v335_v47, 0.0  ;;  %v337_v57 = vadd.f32 %v825_v6, %v301_v48 }
  0x2a   : > { %v654_v59 = vpack.c.bf16 %v365_v50, %v364_v49  ;;  %v368_v60 = vmax.f32 %v336_v51, 0.0  ;;  %v593_v61 = vunpack.c.h.bf16 %v697_v40  ;;  %v302_v62 = vmul.f32 %v817_v0, %v592_v52 }
  0x2b   : > { %708 = vst [vmem:[%s851_s26 + $0x40] sm:$0xff] %v649_v54   ;;  %v659_v1 = vpack.c.bf16 %v367_v56, %v366_v55  ;;  %v369_v2 = vmax.f32 %v337_v57, 0.0  ;;  %v596_v3 = vunpack.c.l.bf16 %v698_v53  ;;  %v597_v4 = vunpack.c.h.bf16 %v698_v53 }
  0x2c   : > { %709 = vst [vmem:[%s851_s26 + $0x48] sm:$0xff] %v654_v59   ;;  %v303_v5 = vmul.f32 %v817_v0, %v593_v61  ;;  %v338_v7 = vadd.f32 %v825_v6, %v302_v62  ;;  %v600_v8 = vunpack.c.l.bf16 %v699_v58  ;;  %v601_v9 = vunpack.c.h.bf16 %v699_v58 }
  0x2d   : > { %710 = vst [vmem:[%s851_s26 + $0x50] sm:$0xff] %v659_v1   ;;  %v664_v10 = vpack.c.bf16 %v369_v2, %v368_v60  ;;  %v304_v11 = vmul.f32 %v817_v0, %v596_v3  ;;  %v305_v12 = vmul.f32 %v817_v0, %v597_v4  ;;  %v604_v13 = vunpack.c.l.bf16 %v700_v63 }
  0x2e   : > { %v339_v14 = vadd.f32 %v825_v6, %v303_v5  ;;  %v370_v15 = vmax.f32 %v338_v7, 0.0  ;;  %v306_v16 = vmul.f32 %v817_v0, %v600_v8  ;;  %v307_v17 = vmul.f32 %v817_v0, %v601_v9 }
  0x2f   : > { %711 = vst [vmem:[%s851_s26 + $0x58] sm:$0xff] %v664_v10   ;;  %v340_v18 = vadd.f32 %v825_v6, %v304_v11  ;;  %v341_v19 = vadd.f32 %v825_v6, %v305_v12  ;;  %v605_v20 = vunpack.c.h.bf16 %v700_v63  ;;  %v308_v21 = vmul.f32 %v817_v0, %v604_v13 }
  0x30   : > { %v371_v22 = vmax.f32 %v339_v14, 0.0  ;;  %v342_v23 = vadd.f32 %v825_v6, %v306_v16  ;;  %v343_v24 = vadd.f32 %v825_v6, %v307_v17 }
  0x31   : > { %v372_v25 = vmax.f32 %v340_v18, 0.0  ;;  %v373_v26 = vmax.f32 %v341_v19, 0.0  ;;  %v309_v27 = vmul.f32 %v817_v0, %v605_v20  ;;  %v344_v28 = vadd.f32 %v825_v6, %v308_v21 }
  0x32   : > { %v669_v29 = vpack.c.bf16 %v371_v22, %v370_v15  ;;  %v374_v30 = vmax.f32 %v342_v23, 0.0  ;;  %v375_v31 = vmax.f32 %v343_v24, 0.0 }
  0x33   : > { %v674_v32 = vpack.c.bf16 %v373_v26, %v372_v25  ;;  %v345_v33 = vadd.f32 %v825_v6, %v309_v27  ;;  %v376_v34 = vmax.f32 %v344_v28, 0.0 }
  0x34   : > { %712 = vst [vmem:[%s851_s26 + $0x60] sm:$0xff] %v669_v29   ;;  %v679_v35 = vpack.c.bf16 %v375_v31, %v374_v30 }
  0x35   : > { %713 = vst [vmem:[%s851_s26 + $0x68] sm:$0xff] %v674_v32   ;;  %v377_v36 = vmax.f32 %v345_v33, 0.0 }
  0x36   : > { %714 = vst [vmem:[%s851_s26 + $0x70] sm:$0xff] %v679_v35  }
  0x37   : > { %v684_v37 = vpack.c.bf16 %v377_v36, %v376_v34 }
  0x39   : > { %715 = vst [vmem:[%s851_s26 + $0x78] sm:$0xff] %v684_v37  }
  0x3a PF: > { %s13_s14 = sadd.s32 1, %s764_s14   ;;  %s940_s12 = smov %s760_s13 }
  0x3b   : > { %p10_p5 = scmp.ge.s32.totalorder %s13_s14, 4   ;;  %s941_s13 = smov %s943_s15 }
  0x3d   :  { %12 = sbr.rel (!%p10_p5) target bundleno = 2 (0x2), region = 62 }

// kernel: up_forward.7
= control target key start
LH: loop header
LB: loop body
LE: loop exit
PB: predicated region body
PF: predicated region fallthrough
CT: control target
= control target key end

     0   :  { %s659_s12 = smov 0   ;;  %s661_s13 = smov 0   ;;  %s822_s0 = inlined_call_operand.vmem [shape: bf16[2,256,128], index: 0, kind: input, shape index: {}]   ;;  %s823_s1 = inlined_call_operand.vmem [shape: f32[1,128], index: 1, kind: input, shape index: {}]   ;;  %s824_s2 = inlined_call_operand.vmem [shape: f32[1,128], index: 2, kind: input, shape index: {}]   ;;  %s825_s3 = inlined_call_operand.vmem [shape: f32[2,256,128], index: 3, kind: output, shape index: {}]  }
   0x1   :  { %s663_s14 = smov 0  }
   0x2 LB: > { %s25_s15 = sadd.s32 1, %s633_s13  ;;  %p501_p0 = scmp.ge.s32.totalorder %s637_s14, 1  ;;  %s637_s14 = sphi %s663_s14, %s13_s14   ;;  %s633_s13 = sphi %s661_s13, %s827_s13   ;;  %s629_s12 = sphi %s659_s12, %s826_s12  }
   0x3   : > { %p27_p1 = scmp.ge.s32.totalorder %s25_s15, 2  ;;  %p158_p2 = scmp.lt.s32.totalorder %s637_s14, 3 }
   0x5   : > { %s829_s15 = smov (%p27_p1, %s25_s15), 0  ;;  %p159_p3 = pnand %p501_p0, %p158_p2 }
   0x6   : > { %p191_p4 = scmp.lt.s32.totalorder (!%p159_p3), %s629_s12, 1 }
   0x7   : > { %162 = sbr.rel (%p159_p3) target bundleno = 56 (0x38), region = 32 }
   0xc   : > { %s831_s12 = smov (!%p191_p4, %s629_s12), 1  ;;  %v688_v0 = vld [vmem:[%s823_s1] ss:$0 sm:$0xff] }
   0xd   : > { %s508_s16 = sshll.u32 %s831_s12, 7  ;;  %v696_v5 = vld [vmem:[%s824_s2] ss:$0 sm:$0xff]  ;;  %s509_s24 = sshll.u32 %s831_s12, 8 }
   0xe   : > { %s683_s19 = scalar_lea.vmem %s822_s0, %s508_s16  ;;  %s715_s27 = scalar_lea.vmem %s825_s3, %s509_s24 }
   0xf   : > { %v511_v1 = vld [vmem:[%s683_s19] sm:$0xff]   ;;  %v574_v2 = vld [vmem:[%s683_s19 + $0x8] sm:$0xff]   ;;  %v575_v3 = vld [vmem:[%s683_s19 + $0x10] sm:$0xff]  }
  0x10   : > { %v512_v4 = vunpack.c.l.bf16 %v511_v1  ;;  %v513_v6 = vunpack.c.h.bf16 %v511_v1  ;;  %v516_v7 = vunpack.c.l.bf16 %v574_v2  ;;  %v517_v8 = vunpack.c.h.bf16 %v574_v2  ;;  %v576_v9 = vld [vmem:[%s683_s19 + $0x18] sm:$0xff]   ;;  %v577_v30 = vld [vmem:[%s683_s19 + $0x20] sm:$0xff]   ;;  %v578_v31 = vld [vmem:[%s683_s19 + $0x28] sm:$0xff]  }
  0x11   : > { %v520_v10 = vunpack.c.l.bf16 %v575_v3  ;;  %v521_v11 = vunpack.c.h.bf16 %v575_v3  ;;  %v524_v12 = vunpack.c.l.bf16 %v576_v9  ;;  %v525_v13 = vunpack.c.h.bf16 %v576_v9  ;;  %v579_v36 = vld [vmem:[%s683_s19 + $0x30] sm:$0xff]   ;;  %v580_v37 = vld [vmem:[%s683_s19 + $0x38] sm:$0xff]   ;;  %v581_v3 = vld [vmem:[%s683_s19 + $0x40] sm:$0xff]  }
  0x12   : > { %v278_v14 = vmul.f32 %v688_v0, %v512_v4  ;;  %v279_v15 = vmul.f32 %v688_v0, %v513_v6  ;;  %v280_v16 = vmul.f32 %v688_v0, %v516_v7  ;;  %v281_v17 = vmul.f32 %v688_v0, %v517_v8  ;;  %v582_v4 = vld [vmem:[%s683_s19 + $0x48] sm:$0xff]   ;;  %v583_v6 = vld [vmem:[%s683_s19 + $0x50] sm:$0xff]  }
  0x13   : > { %v282_v18 = vmul.f32 %v688_v0, %v520_v10  ;;  %v283_v19 = vmul.f32 %v688_v0, %v521_v11  ;;  %v284_v20 = vmul.f32 %v688_v0, %v524_v12  ;;  %v285_v21 = vmul.f32 %v688_v0, %v525_v13  ;;  %v584_v11 = vld [vmem:[%s683_s19 + $0x58] sm:$0xff]  }
  0x14   : > { %v314_v22 = vadd.f32 %v696_v5, %v278_v14  ;;  %v315_v23 = vadd.f32 %v696_v5, %v279_v15  ;;  %v316_v24 = vadd.f32 %v696_v5, %v280_v16  ;;  %v317_v25 = vadd.f32 %v696_v5, %v281_v17 }
  0x15   : > { %v318_v26 = vadd.f32 %v696_v5, %v282_v18  ;;  %v319_v27 = vadd.f32 %v696_v5, %v283_v19  ;;  %v320_v28 = vadd.f32 %v696_v5, %v284_v20  ;;  %v321_v29 = vadd.f32 %v696_v5, %v285_v21 }
  0x16   : > { %v346_v32 = vmax.f32 %v314_v22, 0.0  ;;  %v347_v33 = vmax.f32 %v315_v23, 0.0  ;;  %v348_v34 = vmax.f32 %v316_v24, 0.0  ;;  %v349_v35 = vmax.f32 %v317_v25, 0.0 }
  0x17   : > { %v350_v38 = vmax.f32 %v318_v26, 0.0  ;;  %v351_v39 = vmax.f32 %v319_v27, 0.0  ;;  %v352_v40 = vmax.f32 %v320_v28, 0.0  ;;  %v353_v41 = vmax.f32 %v321_v29, 0.0 }
  0x18   : > { %378 = vst [vmem:[%s715_s27] sm:$0xff] %v346_v32  ;;  %v528_v42 = vunpack.c.l.bf16 %v577_v30  ;;  %v529_v43 = vunpack.c.h.bf16 %v577_v30  ;;  %v532_v44 = vunpack.c.l.bf16 %v578_v31  ;;  %v533_v45 = vunpack.c.h.bf16 %v578_v31 }
  0x19   : > { %379 = vst [vmem:[%s715_s27 + $0x8] sm:$0xff] %v347_v33  ;;  %v536_v46 = vunpack.c.l.bf16 %v579_v36  ;;  %v537_v47 = vunpack.c.h.bf16 %v579_v36  ;;  %v540_v48 = vunpack.c.l.bf16 %v580_v37  ;;  %v541_v49 = vunpack.c.h.bf16 %v580_v37 }
  0x1a   : > { %380 = vst [vmem:[%s715_s27 + $0x10] sm:$0xff] %v348_v34  ;;  %v286_v50 = vmul.f32 %v688_v0, %v528_v42  ;;  %v287_v51 = vmul.f32 %v688_v0, %v529_v43  ;;  %v288_v52 = vmul.f32 %v688_v0, %v532_v44  ;;  %v289_v53 = vmul.f32 %v688_v0, %v533_v45  ;;  %v587_v42 = vld [vmem:[%s683_s19 + $0x70] sm:$0xff]  }
  0x1b   : > { %381 = vst [vmem:[%s715_s27 + $0x18] sm:$0xff] %v349_v35  ;;  %v290_v54 = vmul.f32 %v688_v0, %v536_v46  ;;  %v291_v55 = vmul.f32 %v688_v0, %v537_v47  ;;  %v292_v56 = vmul.f32 %v688_v0, %v540_v48  ;;  %v293_v57 = vmul.f32 %v688_v0, %v541_v49  ;;  %v588_v47 = vld [vmem:[%s683_s19 + $0x78] sm:$0xff]  }
  0x1c   : > { %382 = vst [vmem:[%s715_s27 + $0x20] sm:$0xff] %v350_v38  ;;  %v322_v58 = vadd.f32 %v696_v5, %v286_v50  ;;  %v323_v59 = vadd.f32 %v696_v5, %v287_v51  ;;  %v324_v60 = vadd.f32 %v696_v5, %v288_v52  ;;  %v325_v61 = vadd.f32 %v696_v5, %v289_v53 }
  0x1d   : > { %383 = vst [vmem:[%s715_s27 + $0x28] sm:$0xff] %v351_v39  ;;  %v326_v62 = vadd.f32 %v696_v5, %v290_v54  ;;  %v327_v63 = vadd.f32 %v696_v5, %v291_v55  ;;  %v328_v1 = vadd.f32 %v696_v5, %v292_v56  ;;  %v329_v2 = vadd.f32 %v696_v5, %v293_v57 }
  0x1e   : > { %384 = vst [vmem:[%s715_s27 + $0x30] sm:$0xff] %v352_v40  ;;  %v354_v7 = vmax.f32 %v322_v58, 0.0  ;;  %v355_v8 = vmax.f32 %v323_v59, 0.0  ;;  %v356_v9 = vmax.f32 %v324_v60, 0.0  ;;  %v357_v10 = vmax.f32 %v325_v61, 0.0  ;;  %v585_v40 = vld [vmem:[%s683_s19 + $0x60] sm:$0xff]  }
  0x1f   : > { %385 = vst [vmem:[%s715_s27 + $0x38] sm:$0xff] %v353_v41  ;;  %v358_v12 = vmax.f32 %v326_v62, 0.0  ;;  %v359_v13 = vmax.f32 %v327_v63, 0.0  ;;  %v360_v14 = vmax.f32 %v328_v1, 0.0  ;;  %v361_v15 = vmax.f32 %v329_v2, 0.0  ;;  %v586_v41 = vld [vmem:[%s683_s19 + $0x68] sm:$0xff]  }
  0x20   : > { %386 = vst [vmem:[%s715_s27 + $0x40] sm:$0xff] %v354_v7  ;;  %v544_v16 = vunpack.c.l.bf16 %v581_v3  ;;  %v545_v17 = vunpack.c.h.bf16 %v581_v3  ;;  %v548_v18 = vunpack.c.l.bf16 %v582_v4  ;;  %v549_v19 = vunpack.c.h.bf16 %v582_v4 }
  0x21   : > { %387 = vst [vmem:[%s715_s27 + $0x48] sm:$0xff] %v355_v8  ;;  %v552_v20 = vunpack.c.l.bf16 %v583_v6  ;;  %v553_v21 = vunpack.c.h.bf16 %v583_v6  ;;  %v556_v22 = vunpack.c.l.bf16 %v584_v11  ;;  %v557_v23 = vunpack.c.h.bf16 %v584_v11 }
  0x22   : > { %388 = vst [vmem:[%s715_s27 + $0x50] sm:$0xff] %v356_v9  ;;  %v294_v24 = vmul.f32 %v688_v0, %v544_v16  ;;  %v295_v25 = vmul.f32 %v688_v0, %v545_v17  ;;  %v296_v26 = vmul.f32 %v688_v0, %v548_v18  ;;  %v297_v27 = vmul.f32 %v688_v0, %v549_v19 }
  0x23   : > { %389 = vst [vmem:[%s715_s27 + $0x58] sm:$0xff] %v357_v10  ;;  %v298_v28 = vmul.f32 %v688_v0, %v552_v20  ;;  %v299_v29 = vmul.f32 %v688_v0, %v553_v21  ;;  %v300_v30 = vmul.f32 %v688_v0, %v556_v22  ;;  %v301_v31 = vmul.f32 %v688_v0, %v557_v23 }
  0x24   : > { %390 = vst [vmem:[%s715_s27 + $0x60] sm:$0xff] %v358_v12  ;;  %v330_v32 = vadd.f32 %v696_v5, %v294_v24  ;;  %v331_v33 = vadd.f32 %v696_v5, %v295_v25  ;;  %v332_v34 = vadd.f32 %v696_v5, %v296_v26  ;;  %v333_v35 = vadd.f32 %v696_v5, %v297_v27 }
  0x25   : > { %391 = vst [vmem:[%s715_s27 + $0x68] sm:$0xff] %v359_v13  ;;  %v334_v36 = vadd.f32 %v696_v5, %v298_v28  ;;  %v335_v37 = vadd.f32 %v696_v5, %v299_v29  ;;  %v336_v38 = vadd.f32 %v696_v5, %v300_v30  ;;  %v337_v39 = vadd.f32 %v696_v5, %v301_v31 }
  0x26   : > { %392 = vst [vmem:[%s715_s27 + $0x70] sm:$0xff] %v360_v14  ;;  %v362_v43 = vmax.f32 %v330_v32, 0.0  ;;  %v363_v44 = vmax.f32 %v331_v33, 0.0  ;;  %v364_v45 = vmax.f32 %v332_v34, 0.0  ;;  %v365_v46 = vmax.f32 %v333_v35, 0.0 }
  0x27   : > { %393 = vst [vmem:[%s715_s27 + $0x78] sm:$0xff] %v361_v15  ;;  %v366_v48 = vmax.f32 %v334_v36, 0.0  ;;  %v367_v49 = vmax.f32 %v335_v37, 0.0  ;;  %v368_v50 = vmax.f32 %v336_v38, 0.0  ;;  %v369_v51 = vmax.f32 %v337_v39, 0.0 }
  0x28   : > { %394 = vst [vmem:[%s715_s27 + $0x80] sm:$0xff] %v362_v43  ;;  %v560_v52 = vunpack.c.l.bf16 %v585_v40  ;;  %v561_v53 = vunpack.c.h.bf16 %v585_v40  ;;  %v564_v54 = vunpack.c.l.bf16 %v586_v41  ;;  %v565_v55 = vunpack.c.h.bf16 %v586_v41 }
  0x29   : > { %395 = vst [vmem:[%s715_s27 + $0x88] sm:$0xff] %v363_v44  ;;  %v568_v56 = vunpack.c.l.bf16 %v587_v42  ;;  %v569_v57 = vunpack.c.h.bf16 %v587_v42  ;;  %v572_v58 = vunpack.c.l.bf16 %v588_v47  ;;  %v573_v59 = vunpack.c.h.bf16 %v588_v47 }
  0x2a   : > { %396 = vst [vmem:[%s715_s27 + $0x90] sm:$0xff] %v364_v45  ;;  %v302_v60 = vmul.f32 %v688_v0, %v560_v52  ;;  %v303_v61 = vmul.f32 %v688_v0, %v561_v53  ;;  %v304_v62 = vmul.f32 %v688_v0, %v564_v54  ;;  %v305_v63 = vmul.f32 %v688_v0, %v565_v55 }
  0x2b   : > { %397 = vst [vmem:[%s715_s27 + $0x98] sm:$0xff] %v365_v46  ;;  %v306_v1 = vmul.f32 %v688_v0, %v568_v56  ;;  %v307_v2 = vmul.f32 %v688_v0, %v569_v57  ;;  %v308_v3 = vmul.f32 %v688_v0, %v572_v58  ;;  %v309_v4 = vmul.f32 %v688_v0, %v573_v59 }
  0x2c   : > { %398 = vst [vmem:[%s715_s27 + $0xa0] sm:$0xff] %v366_v48  ;;  %v338_v6 = vadd.f32 %v696_v5, %v302_v60  ;;  %v339_v7 = vadd.f32 %v696_v5, %v303_v61  ;;  %v340_v8 = vadd.f32 %v696_v5, %v304_v62  ;;  %v341_v9 = vadd.f32 %v696_v5, %v305_v63 }
  0x2d   : > { %399 = vst [vmem:[%s715_s27 + $0xa8] sm:$0xff] %v367_v49  ;;  %v342_v10 = vadd.f32 %v696_v5, %v306_v1  ;;  %v343_v11 = vadd.f32 %v696_v5, %v307_v2  ;;  %v344_v14 = vadd.f32 %v696_v5, %v308_v3  ;;  %v345_v16 = vadd.f32 %v696_v5, %v309_v4 }
  0x2e   : > { %400 = vst [vmem:[%s715_s27 + $0xb0] sm:$0xff] %v368_v50  ;;  %v370_v0 = vmax.f32 %v338_v6, 0.0  ;;  %v371_v12 = vmax.f32 %v339_v7, 0.0  ;;  %v372_v13 = vmax.f32 %v340_v8, 0.0  ;;  %v373_v15 = vmax.f32 %v341_v9, 0.0 }
  0x2f   : > { %401 = vst [vmem:[%s715_s27 + $0xb8] sm:$0xff] %v369_v51  ;;  %v374_v17 = vmax.f32 %v342_v10, 0.0  ;;  %v375_v18 = vmax.f32 %v343_v11, 0.0  ;;  %v376_v19 = vmax.f32 %v344_v14, 0.0  ;;  %v377_v20 = vmax.f32 %v345_v16, 0.0 }
  0x30   : > { %402 = vst [vmem:[%s715_s27 + $0xc0] sm:$0xff] %v370_v0 }
  0x31   : > { %403 = vst [vmem:[%s715_s27 + $0xc8] sm:$0xff] %v371_v12 }
  0x32   : > { %404 = vst [vmem:[%s715_s27 + $0xd0] sm:$0xff] %v372_v13 }
  0x33   : > { %405 = vst [vmem:[%s715_s27 + $0xd8] sm:$0xff] %v373_v15 }
  0x34   : > { %406 = vst [vmem:[%s715_s27 + $0xe0] sm:$0xff] %v374_v17 }
  0x35   : > { %407 = vst [vmem:[%s715_s27 + $0xe8] sm:$0xff] %v375_v18 }
  0x36   : > { %408 = vst [vmem:[%s715_s27 + $0xf0] sm:$0xff] %v376_v19 }
  0x37   : > { %409 = vst [vmem:[%s715_s27 + $0xf8] sm:$0xff] %v377_v20 }
  0x38 PF: > { %s13_s14 = sadd.s32 1, %s637_s14   ;;  %s826_s12 = smov %s633_s13 }
  0x39   : > { %p10_p5 = scmp.ge.s32.totalorder %s13_s14, 4   ;;  %s827_s13 = smov %s829_s15 }
  0x3b   :  { %12 = sbr.rel (!%p10_p5) target bundleno = 2 (0x2), region = 62 }

// kernel: up_forward.6
= control target key start
LH: loop header
LB: loop body
LE: loop exit
PB: predicated region body
PF: predicated region fallthrough
CT: control target
= control target key end

     0   :  { %s5191_s15 = smov 0   ;;  %s5193_s16 = smov 0   ;;  %s6211_s0 = inlined_call_operand.vmem [shape: bf16[2,18,18,128], index: 0, kind: input, shape index: {}]   ;;  %s6212_s1 = inlined_call_operand.vmem [shape: bf16[1152,128], index: 1, kind: input, shape index: {}]   ;;  %s6213_s2 = inlined_call_operand.vmem [shape: bf16[2,256,128], index: 2, kind: output, shape index: {0}]   ;;  %s6214_s3 = inlined_call_operand.vmem [shape: f32[2,1,1,128], index: 3, kind: output, shape index: {1}]   ;;  %s6215_s4 = inlined_call_operand.vmem [shape: f32[2,1,1,128], index: 4, kind: output, shape index: {2}]  }
   0x1   :  { %s5195_s17 = smov 0  }
   0x2 LB: > { %s27_s18 = sadd.s32 1, %s5160_s16  ;;  %p3892_p0 = scmp.ge.s32.totalorder %s5164_s17, 1  ;;  %s5164_s17 = sphi %s5195_s17, %s15_s17   ;;  %s5160_s16 = sphi %s5193_s16, %s6233_s16   ;;  %s5156_s15 = sphi %s5191_s15, %s6232_s15  }
   0x3   : > { %p29_p1 = scmp.ge.s32.totalorder %s27_s18, 2  ;;  %p185_p2 = scmp.lt.s32.totalorder %s5164_s17, 3 }
   0x5   : > { %s6235_s18 = smov (%p29_p1, %s27_s18), 0  ;;  %p186_p3 = pnand %p3892_p0, %p185_p2 }
   0x7   : > { %189 = sbr.rel (%p186_p3) target bundleno = 781 (0x30d), region = 28 }
   0xc   : > { %v4932_v0 = vld [vmem:[%s6212_s1 + $0x38] sm:$0xff]  ;;  %p227_p4 = scmp.lt.s32.totalorder %s5156_s15, 1  ;;  %v4931_v1 = vld [vmem:[%s6212_s1 + $0x30] sm:$0xff]  ;;  %v4930_v2 = vld [vmem:[%s6212_s1 + $0x28] sm:$0xff]  ;;  %vm344_vm0 = vsmask.f32 3328 }
   0xd   : > { %5092 = vmatpush.bf16.msra.mxu1 %v4932_v0  ;;  %5093 = vmatpush.bf16.msra.mxu2 %v4932_v0  ;;  %v4929_v5 = vld [vmem:[%s6212_s1 + $0x20] sm:$0xff]  ;;  %v4928_v8 = vld [vmem:[%s6212_s1 + $0x18] sm:$0xff]  ;;  %v4927_v10 = vld [vmem:[%s6212_s1 + $0x10] sm:$0xff]  ;;  %vm345_vm1 = vsmask.f32 7440  ;;  %vm843_vm3 = vcmask 1042432  }
   0xe   : > { %s6237_s15 = smov (!%p227_p4, %s5156_s15), 1  ;;  %5094 = vmatpush.bf16.msra.mxu3 %v4932_v0  ;;  %2762 = vmatpush.bf16.msra.mxu0 %v4932_v0  ;;  %v4926_v12 = vld [vmem:[%s6212_s1 + $0x8] sm:$0xff]  ;;  %v4925_v15 = vld [vmem:[%s6212_s1] sm:$0xff]  ;;  %v4948_v24 = vld [vmem:[%s6212_s1 + $0xb8] sm:$0xff]  ;;  %vm844_vm4 = vcmask 1046532  }
   0xf   : > { %s5116_s23 = smul.u32 216, %s6237_s15  ;;  %v4956_v25 = vld [vmem:[%s6212_s1 + $0xf8] sm:$0xff]  ;;  %v4947_v32 = vld [vmem:[%s6212_s1 + $0xb0] sm:$0xff]  ;;  %v4946_v40 = vld [vmem:[%s6212_s1 + $0xa8] sm:$0xff]  ;;  %s4780_s19 = sshll.u32 %s6237_s15, 7 }
  0x10   : > { %v4940_v29 = vld [vmem:[%s6212_s1 + $0x78] sm:$0xff]  ;;  %v4955_v33 = vld [vmem:[%s6212_s1 + $0xf0] sm:$0xff]  ;;  %v4954_v41 = vld [vmem:[%s6212_s1 + $0xe8] sm:$0xff]  ;;  %s6128_s22 = scalar_lea.vmem %s6213_s2, %s4780_s19  ;;  %s247_s24 = scalar_lea.vmem %s6214_s3, %s6237_s15 }
  0x11   : > { %5095 = vmatpush.bf16.msra.mxu1 %v4931_v1  ;;  %5096 = vmatpush.bf16.msra.mxu2 %v4931_v1  ;;  %s5224_s28 = scalar_lea.vmem %s6211_s0, %s5116_s23  ;;  %v4964_v30 = vld [vmem:[%s6212_s1 + $0x138] sm:$0xff]  ;;  %v4939_v37 = vld [vmem:[%s6212_s1 + $0x70] sm:$0xff]  ;;  %v4938_v44 = vld [vmem:[%s6212_s1 + $0x68] sm:$0xff]  ;;  %s253_s27 = scalar_lea.vmem %s6215_s4, %s6237_s15 }
  0x12   : > { %5097 = vmatpush.bf16.msra.mxu3 %v4931_v1  ;;  %2763 = vmatpush.bf16.msra.mxu0 %v4931_v1  ;;  %v5227_v3 = vld [vmem:[%s5224_s28 + $0x30] sm:$0xf]  ;;  %v5230_v4 = vld [vmem:[%s5224_s28 + $0x34] sm:$0xf]  ;;  %v5240_v6 = vld [vmem:[%s5224_s28 + $0x60] sm:$0xf] }
  0x13   : > { %320 = vst [vmem:[#allocation2 + $0x120] sm:$0xf] %v5227_v3  ;;  %v5244_v7 = vld [vmem:[%s5224_s28 + $0x64] sm:$0xf]  ;;  %v5255_v9 = vld [vmem:[%s5224_s28 + $0x90] sm:$0xf]  ;;  %vm5552_vm2 = vmor %vm344_vm0, %vm345_vm1 }
  0x14   : > { %321 = vst [vmem:[#allocation2 + $0x144] sm:$0xf] %v5230_v4  ;;  %v5262_v11 = vld [vmem:[%s5224_s28 + $0x94] sm:$0xf]  ;;  %v5273_v13 = vld [vmem:[%s5224_s28] sm:$0xf]  ;;  %vm5573_vm5 = vmor %vm843_vm3, %vm844_vm4 }
  0x15   : > { %5098 = vmatpush.bf16.msra.mxu1 %v4930_v2  ;;  %5099 = vmatpush.bf16.msra.mxu2 %v4930_v2  ;;  %1028 = vst [vmem:[#allocation2 + $0xe4] sm:$0xf] %v5227_v3  ;;  %v5276_v14 = vld [vmem:[%s5224_s28 + $0x4] sm:$0xf]  ;;  %v5283_v16 = vld [vmem:[%s5224_s28 + $0x3c] sm:$0xf] }
  0x16   : > { %5100 = vmatpush.bf16.msra.mxu3 %v4930_v2  ;;  %2764 = vmatpush.bf16.msra.mxu0 %v4930_v2  ;;  %1029 = vst [vmem:[#allocation2 + $0x108] sm:$0xf] %v5230_v4  ;;  %v5286_v17 = vld [vmem:[%s5224_s28 + $0x40] sm:$0xf]  ;;  %v5308_v31 = vld [vmem:[%s5224_s28 + $0x6c] sm:$0xf] }
  0x17   : > { %1160 = vst [vmem:[#allocation2 + $0xa8] sm:$0xf] %v5227_v3  ;;  %v5318_v34 = vld [vmem:[%s5224_s28 + $0x70] sm:$0xf]  ;;  %v5338_v42 = vld [vmem:[%s5224_s28 + $0x9c] sm:$0xf] }
  0x18   : > { %1161 = vst [vmem:[#allocation2 + $0xcc] sm:$0xf] %v5230_v4  ;;  %v4963_v39 = vld [vmem:[%s6212_s1 + $0x130] sm:$0xff]  ;;  %v5342_v43 = vld [vmem:[%s5224_s28 + $0xa0] sm:$0xf]  ;;  %v4962_v45 = vld [vmem:[%s6212_s1 + $0x128] sm:$0xff] }
  0x19   : > { %5101 = vmatpush.bf16.msra.mxu1 %v4929_v5  ;;  %5102 = vmatpush.bf16.msra.mxu2 %v4929_v5  ;;  %328 = vst [vmem:[#allocation2 + $0x240] sm:$0xf] %v5240_v6  ;;  %v4945_v46 = vld [vmem:[%s6212_s1 + $0xa0] sm:$0xff]  ;;  %v5365_v53 = vld [vmem:[%s5224_s28 + $0xc] sm:$0xf]  ;;  %v4944_v55 = vld [vmem:[%s6212_s1 + $0x98] sm:$0xff] }
  0x1a   : > { %5103 = vmatpush.bf16.msra.mxu3 %v4929_v5  ;;  %2765 = vmatpush.bf16.msra.mxu0 %v4929_v5  ;;  %329 = vst [vmem:[#allocation2 + $0x264] sm:$0xf] %v5244_v7  ;;  %v4060_v18 = vld [vmem:[#allocation2 + $0x120] sm:$0xf]  ;;  %v5369_v54 = vld [vmem:[%s5224_s28 + $0x10] sm:$0xf] }
  0x1b   : > { %1036 = vst [vmem:[#allocation2 + $0x204] sm:$0xf] %v5240_v6  ;;  %v4821_v19 = vld [vmem:[#allocation2 + $0x140] sm:$0xf0]  ;;  %v5377_v58 = vld [vmem:[%s5224_s28 + $0x48] sm:$0xf] }
  0x1c   : > { %1037 = vst [vmem:[#allocation2 + $0x228] sm:$0xf] %v5244_v7  ;;  %v4061_v26 = vor.u32 %v4821_v19, %v4060_v18  ;;  %v4953_v47 = vld [vmem:[%s6212_s1 + $0xe0] sm:$0xff]  ;;  %v5380_v59 = vld [vmem:[%s5224_s28 + $0x4c] sm:$0xf]  ;;  %v4952_v61 = vld [vmem:[%s6212_s1 + $0xd8] sm:$0xff] }
  0x1d   : > { %5104 = vmatpush.bf16.msra.mxu1 %v4928_v8  ;;  %5105 = vmatpush.bf16.msra.mxu2 %v4928_v8  ;;  %1168 = vst [vmem:[#allocation2 + $0x1c8] sm:$0xf] %v5240_v6  ;;  %v4937_v48 = vld [vmem:[%s6212_s1 + $0x60] sm:$0xff]  ;;  %v4936_v0 = vld [vmem:[%s6212_s1 + $0x58] sm:$0xff]  ;;  %v4943_v1 = vld [vmem:[%s6212_s1 + $0x90] sm:$0xff] }
  0x1e   : > { %5106 = vmatpush.bf16.msra.mxu3 %v4928_v8  ;;  %2766 = vmatpush.bf16.msra.mxu0 %v4928_v8  ;;  %1169 = vst [vmem:[#allocation2 + $0x1ec] sm:$0xf] %v5244_v7  ;;  %v4961_v62 = vld [vmem:[%s6212_s1 + $0x120] sm:$0xff]  ;;  %v4951_v5 = vld [vmem:[%s6212_s1 + $0xd0] sm:$0xff]  ;;  %v4960_v8 = vld [vmem:[%s6212_s1 + $0x118] sm:$0xff] }
  0x1f   : > { %336 = vst [vmem:[#allocation2 + $0x360] sm:$0xf] %v5255_v9  ;;  %v5415_v19 = vld [vmem:[%s5224_s28 + $0x7c] sm:$0xf] }
  0x20   : > { %337 = vst [vmem:[#allocation2 + $0x384] sm:$0xf] %v5262_v11  ;;  %v4204_v20 = vld [vmem:[#allocation2 + $0x240] sm:$0xf] }
  0x21   : > { %5107 = vmatpush.bf16.msra.mxu1 %v4927_v10  ;;  %5108 = vmatpush.bf16.msra.mxu2 %v4927_v10  ;;  %1044 = vst [vmem:[#allocation2 + $0x324] sm:$0xf] %v5255_v9  ;;  %v4857_v21 = vld [vmem:[#allocation2 + $0x260] sm:$0xf0] }
  0x22   : > { %5109 = vmatpush.bf16.msra.mxu3 %v4927_v10  ;;  %2767 = vmatpush.bf16.msra.mxu0 %v4927_v10  ;;  %1045 = vst [vmem:[#allocation2 + $0x348] sm:$0xf] %v5262_v11  ;;  %v4205_v27 = vor.u32 %v4857_v21, %v4204_v20  ;;  %v4935_v10 = vld [vmem:[%s6212_s1 + $0x50] sm:$0xff] }
  0x23   : > { %1176 = vst [vmem:[#allocation2 + $0x2e8] sm:$0xf] %v5255_v9 }
  0x24   : > { %1177 = vst [vmem:[#allocation2 + $0x30c] sm:$0xf] %v5262_v11 }
  0x25   : > { %5110 = vmatpush.bf16.msra.mxu1 %v4926_v12  ;;  %5111 = vmatpush.bf16.msra.mxu2 %v4926_v12  ;;  %312 = vst [vmem:[#allocation2] sm:$0xf] %v5273_v13 }
  0x26   : > { %5112 = vmatpush.bf16.msra.mxu3 %v4926_v12  ;;  %2768 = vmatpush.bf16.msra.mxu0 %v4926_v12  ;;  %v4348_v22 = vld [vmem:[#allocation2 + $0x360] sm:$0xf]  ;;  %313 = vst [vmem:[#allocation2 + $0x24] sm:$0xf] %v5276_v14 }
  0x27   : > { %v4893_v23 = vld [vmem:[#allocation2 + $0x380] sm:$0xf0]  ;;  %322 = vst [vmem:[#allocation2 + $0x168] sm:$0xf] %v5283_v16 }
  0x28   : > { %323 = vst [vmem:[#allocation2 + $0x18c] sm:$0xf] %v5286_v17  ;;  %v4349_v28 = vor.u32 %v4893_v23, %v4348_v22  ;;  %v5423_v23 = vld [vmem:[%s5224_s28 + $0xa8] sm:$0xf] }
  0x29   : > { %5113 = vmatpush.bf16.msra.mxu1 %v4925_v15  ;;  %5114 = vmatpush.bf16.msra.mxu2 %v4925_v15  ;;  %1030 = vst [vmem:[#allocation2 + $0x12c] sm:$0xf] %v5283_v16 }
  0x2a   : > { %5115 = vmatpush.bf16.msra.mxu3 %v4925_v15  ;;  %2769 = vmatpush.bf16.msra.mxu0 %v4925_v15  ;;  %1031 = vst [vmem:[#allocation2 + $0x150] sm:$0xf] %v5286_v17  ;;  %v5411_v15 = vld [vmem:[%s5224_s28 + $0x78] sm:$0xf] }
  0x2b   : > { %1162 = vst [vmem:[#allocation2 + $0xf0] sm:$0xf] %v5283_v16 }
  0x2c   : > { %2790 = vmatmul.bf16.vlgmr.msra.gmra.mxu1 %v4061_v26  ;;  %2810 = vmatmul.bf16.vlgmr.msra.gmra.mxu2 %v4205_v27  ;;  %v3916_v35 = vld [vmem:[#allocation2] sm:$0xf]  ;;  %1163 = vst [vmem:[#allocation2 + $0x114] sm:$0xf] %v5286_v17 }
  0x2d   : > { %2940 = vmatpush.bf16.msrb.mxu2 %v4948_v24  ;;  %2830 = vmatmul.bf16.vlgmr.msra.gmra.mxu3 %v4349_v28  ;;  %v4785_v36 = vld [vmem:[#allocation2 + $0x20] sm:$0xf0]  ;;  %330 = vst [vmem:[#allocation2 + $0x288] sm:$0xf] %v5308_v31  ;;  %v5427_v24 = vld [vmem:[%s5224_s28 + $0xac] sm:$0xf] }
  0x2e   : > { %3029 = vmatpush.bf16.msrb.mxu3 %v4956_v25  ;;  %2851 = vmatpush.bf16.msrb.mxu1 %v4940_v29  ;;  %v3917_v38 = vor.u32 %v4785_v36, %v3916_v35  ;;  %331 = vst [vmem:[#allocation2 + $0x2ac] sm:$0xf] %v5318_v34  ;;  %v4096_v49 = vld [vmem:[#allocation2 + $0x168] sm:$0xf]  ;;  %v5435_v29 = vld [vmem:[%s5224_s28 + $0x18] sm:$0xf] }
  0x2f   : > { %3118 = vmatpush.bf16.msrb.mxu0 %v4964_v30  ;;  %1038 = vst [vmem:[#allocation2 + $0x24c] sm:$0xf] %v5308_v31  ;;  %v4830_v50 = vld [vmem:[#allocation2 + $0x188] sm:$0xf0]  ;;  %v5449_v36 = vld [vmem:[%s5224_s28 + $0x54] sm:$0xf] }
  0x30   : > { %2770 = vmatmul.bf16.vlgmr.msra.gmra.mxu0 %v3917_v38  ;;  %1039 = vst [vmem:[#allocation2 + $0x270] sm:$0xf] %v5318_v34  ;;  %v4097_v56 = vor.u32 %v4830_v50, %v4096_v49  ;;  %v4942_v30 = vld [vmem:[%s6212_s1 + $0x88] sm:$0xff]  ;;  %v351_v49 = vshll.u32 %v5273_v13, 16 }
  0x31   : > { %2941 = vmatpush.bf16.msrb.mxu2 %v4947_v32  ;;  %1170 = vst [vmem:[#allocation2 + $0x210] sm:$0xf] %v5308_v31  ;;  %v5442_v32 = vld [vmem:[%s5224_s28 + $0x1c] sm:$0xf]  ;;  %v4950_v38 = vld [vmem:[%s6212_s1 + $0xc8] sm:$0xff] }
  0x32   : > { %3030 = vmatpush.bf16.msrb.mxu3 %v4955_v33  ;;  %2852 = vmatpush.bf16.msrb.mxu1 %v4939_v37  ;;  %1171 = vst [vmem:[#allocation2 + $0x234] sm:$0xf] %v5318_v34 }
  0x33   : > { %3119 = vmatpush.bf16.msrb.mxu0 %v4963_v39  ;;  %338 = vst [vmem:[#allocation2 + $0x3a8] sm:$0xf] %v5338_v42  ;;  %v4959_v39 = vld [vmem:[%s6212_s1 + $0x110] sm:$0xff] }
  0x34   : > { %339 = vst [vmem:[#allocation2 + $0x3cc] sm:$0xf] %v5342_v43  ;;  %v4240_v51 = vld [vmem:[#allocation2 + $0x288] sm:$0xf] }
  0x35   : > { %2942 = vmatpush.bf16.msrb.mxu2 %v4946_v40  ;;  %v4866_v52 = vld [vmem:[#allocation2 + $0x2a8] sm:$0xf0]  ;;  %1046 = vst [vmem:[#allocation2 + $0x36c] sm:$0xf] %v5338_v42 }
  0x36   : > { %3031 = vmatpush.bf16.msrb.mxu3 %v4954_v41  ;;  %2853 = vmatpush.bf16.msrb.mxu1 %v4938_v44  ;;  %1047 = vst [vmem:[#allocation2 + $0x390] sm:$0xf] %v5342_v43  ;;  %v4241_v57 = vor.u32 %v4866_v52, %v4240_v51  ;;  %v4934_v40 = vld [vmem:[%s6212_s1 + $0x48] sm:$0xff]  ;;  %v5463_v41 = vld [vmem:[%s5224_s28 + $0x58] sm:$0xf]  ;;  %v4941_v44 = vld [vmem:[%s6212_s1 + $0x80] sm:$0xff] }
  0x37   : > { %3120 = vmatpush.bf16.msrb.mxu0 %v4962_v45  ;;  %1178 = vst [vmem:[#allocation2 + $0x330] sm:$0xf] %v5338_v42  ;;  %v4958_v45 = vld [vmem:[%s6212_s1 + $0x108] sm:$0xff]  ;;  %v361_v51 = vshrl.u32 %v5276_v14, 16 }
  0x38   : > { %1179 = vst [vmem:[#allocation2 + $0x354] sm:$0xf] %v5342_v43 }
  0x39   : > { %2943 = vmatpush.bf16.msrb.mxu2 %v4945_v46  ;;  %314 = vst [vmem:[#allocation2 + $0x48] sm:$0xf] %v5365_v53  ;;  %v4949_v46 = vld [vmem:[%s6212_s1 + $0xc0] sm:$0xff] }
  0x3a   : > { %3032 = vmatpush.bf16.msrb.mxu3 %v4953_v47  ;;  %2854 = vmatpush.bf16.msrb.mxu1 %v4937_v48  ;;  %v4384_v60 = vld [vmem:[#allocation2 + $0x3a8] sm:$0xf]  ;;  %315 = vst [vmem:[#allocation2 + $0x6c] sm:$0xf] %v5369_v54  ;;  %v4933_v47 = vld [vmem:[%s6212_s1 + $0x40] sm:$0xff]  ;;  %v348_v48 = vshrl.u32 %v5273_v13, 16 }
  0x3b   : > { %v4902_v63 = vld [vmem:[#allocation2 + $0x3c8] sm:$0xf0]  ;;  %1022 = vst [vmem:[#allocation2 + $0xc] sm:$0xf] %v5365_v53  ;;  %3121 = vmatpush.bf16.msrb.mxu0 %v4961_v62 }
  0x3c   : > { %2795 = vmatmul.bf16.gmra.mxu1 %v4097_v56  ;;  %2815 = vmatmul.bf16.gmra.mxu2 %v4241_v57  ;;  %v4385_v2 = vor.u32 %v4902_v63, %v4384_v60  ;;  %1023 = vst [vmem:[#allocation2 + $0x30] sm:$0xf] %v5369_v54  ;;  %v5487_v57 = vld [vmem:[%s5224_s28 + $0x84] sm:$0xf]  ;;  %v350_v62 = vrot.slane %v348_v48, 4  ;;  %v353_v63 = vrot.slane %v351_v49, 5 }
  0x3d   : > { %2944 = vmatpush.bf16.msrb.mxu2 %v4944_v55  ;;  %324 = vst [vmem:[#allocation2 + $0x1b0] sm:$0xf] %v5377_v58  ;;  %v357_v55 = vshll.u32 %v5276_v14, 16  ;;  %v4957_v60 = vld [vmem:[%s6212_s1 + $0x100] sm:$0xff]  ;;  %v4996_v48 = vld [vmem:[%s6212_s1 + $0x238] sm:$0xff] }
  0x3e   : > { %3033 = vmatpush.bf16.msrb.mxu3 %v4952_v61  ;;  %325 = vst [vmem:[#allocation2 + $0x1d4] sm:$0xf] %v5380_v59  ;;  %2855 = vmatpush.bf16.msrb.mxu1 %v4936_v0  ;;  %v5494_v61 = vld [vmem:[%s5224_s28 + $0x88] sm:$0xf]  ;;  %v363_v0 = vrot.slane %v361_v51, 4 }
  0x3f   : > { %2835 = vmatmul.bf16.gmra.mxu3 %v4385_v2  ;;  %1032 = vst [vmem:[#allocation2 + $0x174] sm:$0xf] %v5377_v58  ;;  %3122 = vmatpush.bf16.msrb.mxu0 %v4960_v8  ;;  %v372_v2 = vshrl.u32 %v5365_v53, 16  ;;  %v5546_v51 = vld [vmem:[%s5224_s28 + $0x14] sm:$0x1] }
  0x40   : > { %v3952_v12 = vld [vmem:[#allocation2 + $0x48] sm:$0xf]  ;;  %1033 = vst [vmem:[#allocation2 + $0x198] sm:$0xf] %v5380_v59 }
  0x41   : > { %2945 = vmatpush.bf16.msrb.mxu2 %v4943_v1  ;;  %v4794_v18 = vld [vmem:[#allocation2 + $0x68] sm:$0xf0]  ;;  %1164 = vst [vmem:[#allocation2 + $0x138] sm:$0xf] %v5377_v58  ;;  %v5498_v1 = vrot.slane %v357_v55, 5 }
  0x42   : > { %3034 = vmatpush.bf16.msrb.mxu3 %v4951_v5  ;;  %v3953_v20 = vor.u32 %v4794_v18, %v3952_v12  ;;  %1165 = vst [vmem:[#allocation2 + $0x15c] sm:$0xf] %v5380_v59  ;;  %2856 = vmatpush.bf16.msrb.mxu1 %v4935_v10  ;;  %v375_v5 = vshll.u32 %v5365_v53, 16  ;;  %v4980_v10 = vld [vmem:[%s6212_s1 + $0x1b8] sm:$0xff]  ;;  %v381_v12 = vshll.u32 %v5369_v54, 16 }
  0x43   : > { %332 = vst [vmem:[#allocation2 + $0x2d0] sm:$0xf] %v5411_v15  ;;  %3123 = vmatpush.bf16.msrb.mxu0 %v4959_v39  ;;  %v5528_v39 = vld [vmem:[%s5224_s28 + $0x24] sm:$0xf] }
  0x44   : > { %2775 = vmatmul.bf16.gmra.mxu0 %v3953_v20  ;;  %333 = vst [vmem:[#allocation2 + $0x2f4] sm:$0xf] %v5415_v19  ;;  %v4132_v21 = vld [vmem:[#allocation2 + $0x1b0] sm:$0xf]  ;;  %v5509_v20 = vld [vmem:[%s5224_s28 + $0x8] sm:$0x1] }
  0x45   : > { %v4839_v22 = vld [vmem:[#allocation2 + $0x1d0] sm:$0xf0]  ;;  %1040 = vst [vmem:[#allocation2 + $0x294] sm:$0xf] %v5411_v15  ;;  %2946 = vmatpush.bf16.msrb.mxu2 %v4942_v30  ;;  %v374_v30 = vrot.slane %v372_v2, 4  ;;  %v391_v2 = vshll.u32 %v5546_v51, 16 }
  0x46   : > { %1041 = vst [vmem:[#allocation2 + $0x2b8] sm:$0xf] %v5415_v19  ;;  %v4133_v25 = vor.u32 %v4839_v22, %v4132_v21  ;;  %3035 = vmatpush.bf16.msrb.mxu3 %v4950_v38  ;;  %2857 = vmatpush.bf16.msrb.mxu1 %v4934_v40  ;;  %v5513_v22 = vld [vmem:[%s5224_s28 + $0xb4] sm:$0xf]  ;;  %v4988_v40 = vld [vmem:[%s6212_s1 + $0x1f8] sm:$0xff] }
  0x47   : > { %1172 = vst [vmem:[#allocation2 + $0x258] sm:$0xf] %v5411_v15  ;;  %3124 = vmatpush.bf16.msrb.mxu0 %v4958_v45 }
  0x48   : > { %1173 = vst [vmem:[#allocation2 + $0x27c] sm:$0xf] %v5415_v19 }
  0x49   : > { %340 = vst [vmem:[#allocation2 + $0x3f0] sm:$0xf] %v5423_v23  ;;  %2947 = vmatpush.bf16.msrb.mxu2 %v4941_v44  ;;  %v4972_v44 = vld [vmem:[%s6212_s1 + $0x178] sm:$0xff] }
  0x4a   : > { %v4276_v26 = vld [vmem:[#allocation2 + $0x2d0] sm:$0xf]  ;;  %341 = vst [vmem:[#allocation2 + $0x414] sm:$0xf] %v5427_v24  ;;  %3036 = vmatpush.bf16.msrb.mxu3 %v4949_v46  ;;  %2858 = vmatpush.bf16.msrb.mxu1 %v4933_v47  ;;  %v5538_v46 = vld [vmem:[%s5224_s28 + $0x28] sm:$0xf] }
  0x4b   : > { %v4875_v27 = vld [vmem:[#allocation2 + $0x2f0] sm:$0xf0]  ;;  %1048 = vst [vmem:[#allocation2 + $0x3b4] sm:$0xf] %v5423_v23  ;;  %3125 = vmatpush.bf16.msrb.mxu0 %v4957_v60 }
  0x4c   : > { %2800 = vmatmul.bf16.gmra.mxu1 %v4133_v25  ;;  %v4277_v28 = vor.u32 %v4875_v27, %v4276_v26  ;;  %1049 = vst [vmem:[#allocation2 + $0x3d8] sm:$0xf] %v5427_v24  ;;  %v5517_v25 = vld [vmem:[%s5224_s28 + $0xb8] sm:$0xf]  ;;  %v385_v26 = vshrl.u32 %v5369_v54, 16  ;;  %v354_v27 = vor.u32 %v353_v63, %v350_v62  ;;  %v399_v63 = vshll.u32 %v5435_v29, 16 }
  0x4d   : > { %1180 = vst [vmem:[#allocation2 + $0x378] sm:$0xf] %v5423_v23  ;;  %3296 = vmatpush.bf16.msra.mxu2 %v4980_v10 }
  0x4e   : > { %2820 = vmatmul.bf16.gmra.mxu2 %v4277_v28  ;;  %1181 = vst [vmem:[#allocation2 + $0x39c] sm:$0xf] %v5427_v24  ;;  %v367_v28 = vshll.u32 %v5509_v20, 16  ;;  %v387_v47 = vrot.slane %v385_v26, 4  ;;  %3385 = vmatpush.bf16.msra.mxu3 %v4988_v40 }
  0x4f   : > { %316 = vst [vmem:[#allocation2 + $0x90] sm:$0xf] %v5435_v29  ;;  %3207 = vmatpush.bf16.msra.mxu1 %v4972_v44  ;;  %3474 = vmatpush.bf16.msra.mxu0 %v4996_v48  ;;  %v393_v44 = vrot.slane %v391_v2, 5  ;;  %v5585_v48 = vld [vmem:[%s5224_s28 + $0x20] sm:$0x1] }
  0x50   : > { %v4420_v33 = vld [vmem:[#allocation2 + $0x3f0] sm:$0xf]  ;;  %317 = vst [vmem:[#allocation2 + $0xb4] sm:$0xf] %v5442_v32  ;;  %v415_v2 = vshll.u32 %v5585_v48, 16 }
  0x51   : > { %v4911_v35 = vld [vmem:[#allocation2 + $0x410] sm:$0xf0]  ;;  %1024 = vst [vmem:[#allocation2 + $0x54] sm:$0xf] %v5435_v29 }
  0x52   : > { %v4421_v37 = vor.u32 %v4911_v35, %v4420_v33  ;;  %1025 = vst [vmem:[#allocation2 + $0x78] sm:$0xf] %v5442_v32  ;;  %v364_v33 = vor.u32 %v363_v0, %v5498_v1  ;;  %v377_v35 = vrot.slane %v375_v5, 5  ;;  %v405_v5 = vshll.u32 %v5442_v32, 16 }
  0x53   : > { %1156 = vst [vmem:[#allocation2 + $0x18] sm:$0xf] %v5435_v29 }
  0x54   : > { %2840 = vmatmul.bf16.gmra.mxu3 %v4421_v37  ;;  %1157 = vst [vmem:[#allocation2 + $0x3c] sm:$0xf] %v5442_v32  ;;  %v5524_v37 = vrot.slane %v381_v12, 5  ;;  %v365_v55 = vrot.slane %v364_v33, 4  ;;  %v378_v60 = vor.u32 %v377_v35, %v374_v30  ;;  %v3896_v12 = vrot.slane %v5273_v13, 9 }
  0x55   : > { %326 = vst [vmem:[#allocation2 + $0x1f8] sm:$0xf] %v5449_v36  ;;  %v851_v13 = vrot.slane %v5509_v20, 5  ;;  %v855_v35 = vrot.slane %v5369_v54, 5 }
  0x56   : > { %v3988_v50 = vld [vmem:[#allocation2 + $0x90] sm:$0xf]  ;;  %327 = vst [vmem:[#allocation2 + $0x21c] sm:$0xf] %v5463_v41  ;;  %v388_v0 = vor.u32 %v387_v47, %v5524_v37  ;;  %v379_v30 = vrot.slane %v378_v60, 4 }
  0x57   : > { %v4803_v52 = vld [vmem:[#allocation2 + $0xb0] sm:$0xf0]  ;;  %1034 = vst [vmem:[#allocation2 + $0x1bc] sm:$0xf] %v5449_v36 }
  0x58   : > { %v3989_v56 = vor.u32 %v4803_v52, %v3988_v50  ;;  %1035 = vst [vmem:[#allocation2 + $0x1e0] sm:$0xf] %v5463_v41  ;;  %v848_v50 = vrot.slane %v5276_v14, 5  ;;  %v355_v52 = vrot.slane %v354_v27, 4  ;;  %v396_v14 = vshrl.u32 %v5435_v29, 16 }
  0x59   : > { %1166 = vst [vmem:[#allocation2 + $0x180] sm:$0xf] %v5449_v36  ;;  %v389_v40 = vrot.slane %v388_v0, 4 }
  0x5a   : > { %2780 = vmatmul.bf16.gmra.mxu0 %v3989_v56  ;;  %1167 = vst [vmem:[#allocation2 + $0x1a4] sm:$0xf] %v5463_v41  ;;  %v369_v56 = vrot.slane %v367_v28, 5  ;;  %v360_v26 = vsel %vm5552_vm2, %v355_v52, %v5498_v1  ;;  %v401_v1 = vrot.slane %v399_v63, 5  ;;  %v849_v20 = vsel %vm5573_vm5, %v3896_v12, %v848_v50 }
  0x5b   : > { %334 = vst [vmem:[#allocation2 + $0x318] sm:$0xf] %v5487_v57  ;;  %v384_v52 = vsel %vm5552_vm2, %v379_v30, %v5524_v37  ;;  %v858_v63 = vrot.slane %v5546_v51, 5  ;;  %v423_v37 = vshll.u32 %v5528_v39, 16  ;;  %v429_v12 = vshll.u32 %v5538_v46, 16 }
  0x5c   : > { %v4168_v8 = vld [vmem:[#allocation2 + $0x1f8] sm:$0xf]  ;;  %335 = vst [vmem:[#allocation2 + $0x33c] sm:$0xf] %v5494_v61  ;;  %v370_v27 = vsel %vm5552_vm2, %v365_v55, %v369_v56  ;;  %v3897_v55 = vrot.slane %v5365_v53, 9  ;;  %v857_v56 = vrot.slane %v855_v35, 4 }
  0x5d   : > { %v4848_v18 = vld [vmem:[#allocation2 + $0x218] sm:$0xf0]  ;;  %1042 = vst [vmem:[#allocation2 + $0x2dc] sm:$0xf] %v5487_v57  ;;  %v433_v51 = vshrl.u32 %v5538_v46, 16 }
  0x5e   : > { %v4169_v21 = vor.u32 %v4848_v18, %v4168_v8  ;;  %1043 = vst [vmem:[#allocation2 + $0x300] sm:$0xf] %v5494_v61  ;;  %v409_v8 = vshrl.u32 %v5442_v32, 16  ;;  %v850_v18 = vrot.slane %v848_v50, 4  ;;  %v394_v50 = vsel %vm5552_vm2, %v389_v40, %v393_v44 }
  0x5f   : > { %1174 = vst [vmem:[#allocation2 + $0x2a0] sm:$0xf] %v5487_v57  ;;  %v856_v53 = vsel %vm5573_vm5, %v3897_v55, %v855_v35  ;;  %v5611_v55 = vld [vmem:[%s5224_s28 + $0x2c] sm:$0x1] }
  0x60   : > { %2805 = vmatmul.bf16.gmra.mxu1 %v4169_v21  ;;  %1175 = vst [vmem:[#allocation2 + $0x2c4] sm:$0xf] %v5494_v61  ;;  %v411_v47 = vrot.slane %v409_v8, 4  ;;  %v852_v54 = vsel %vm5573_vm5, %v850_v18, %v851_v13  ;;  %v420_v8 = vshrl.u32 %v5528_v39, 16  ;;  %v4782_v18 = vld [vmem:[#allocation2 + $0xc] sm:$0xf] }
  0x61   : > { %342 = vst [vmem:[#allocation2 + $0x438] sm:$0xf] %v5513_v22  ;;  %v417_v13 = vrot.slane %v415_v2, 5 }
  0x62   : > { %v4312_v38 = vld [vmem:[#allocation2 + $0x318] sm:$0xf]  ;;  %343 = vst [vmem:[#allocation2 + $0x45c] sm:$0xf] %v5517_v25  ;;  %v422_v35 = vrot.slane %v420_v8, 4 }
  0x63   : > { %v4884_v45 = vld [vmem:[#allocation2 + $0x338] sm:$0xf0]  ;;  %1050 = vst [vmem:[#allocation2 + $0x3fc] sm:$0xf] %v5513_v22 }
  0x64   : > { %v4313_v49 = vor.u32 %v4884_v45, %v4312_v38  ;;  %1051 = vst [vmem:[#allocation2 + $0x420] sm:$0xf] %v5517_v25  ;;  %v398_v38 = vrot.slane %v396_v14, 4  ;;  %v407_v45 = vrot.slane %v405_v5, 5 }
  0x65   : > { %1182 = vst [vmem:[#allocation2 + $0x3c0] sm:$0xf] %v5513_v22 }
  0x66   : > { %2825 = vmatmul.bf16.gmra.mxu2 %v4313_v49  ;;  %1183 = vst [vmem:[#allocation2 + $0x3e4] sm:$0xf] %v5517_v25  ;;  %v402_v60 = vor.u32 %v401_v1, %v398_v38  ;;  %v412_v0 = vor.u32 %v411_v47, %v407_v45  ;;  %v425_v1 = vrot.slane %v423_v37, 5 }
  0x67   : > { %318 = vst [vmem:[#allocation2 + $0xd8] sm:$0xf] %v5528_v39 }
  0x68   : > { %v4456_v10 = vld [vmem:[#allocation2 + $0x438] sm:$0xf]  ;;  %319 = vst [vmem:[#allocation2 + $0xfc] sm:$0xf] %v5538_v46 }
  0x69   : > { %v4920_v21 = vld [vmem:[#allocation2 + $0x458] sm:$0xf0]  ;;  %1026 = vst [vmem:[#allocation2 + $0x9c] sm:$0xf] %v5528_v39 }
  0x6a   : > { %v4457_v33 = vor.u32 %v4920_v21, %v4456_v10  ;;  %1027 = vst [vmem:[#allocation2 + $0xc0] sm:$0xf] %v5538_v46  ;;  %v403_v10 = vrot.slane %v402_v60, 4  ;;  %v3926_v21 = vld [vmem:[#allocation2 + $0x2c] sm:$0xf0]  ;;  %v3898_v60 = vrot.slane %v5435_v29, 9 }
  0x6b   : > { %1158 = vst [vmem:[#allocation2 + $0x60] sm:$0xf] %v5528_v39  ;;  %v4979_v29 = vld [vmem:[%s6212_s1 + $0x1b0] sm:$0xff] }
  0x6c   : > { %2845 = vmatmul.bf16.gmra.mxu3 %v4457_v33  ;;  %1159 = vst [vmem:[#allocation2 + $0x84] sm:$0xf] %v5538_v46  ;;  %v862_v33 = vrot.slane %v5442_v32, 5  ;;  %v408_v47 = vsel %vm5552_vm2, %v403_v10, %v407_v45  ;;  %v426_v45 = vor.u32 %v425_v1, %v422_v35  ;;  %3297 = vmatpush.bf16.msra.mxu2 %v4979_v29  ;;  %v4987_v1 = vld [vmem:[%s6212_s1 + $0x1f0] sm:$0xff] }
  0x6d   : > { %763 = vst [vmem:[#allocation2 + $0x4] sm:$0xf] %v360_v26  ;;  %v859_v26 = vsel %vm5573_vm5, %v857_v56, %v858_v63  ;;  %v3929_v56 = vor.u32 %v4782_v18, %v3926_v21  ;;  %v447_v18 = vshll.u32 %v5227_v3, 16  ;;  %v453_v21 = vshll.u32 %v5230_v4, 16  ;;  %3386 = vmatpush.bf16.msra.mxu3 %v4987_v1 }
  0x6e   : > { %v4024_v49 = vld [vmem:[#allocation2 + $0xd8] sm:$0xf]  ;;  %764 = vst [vmem:[#allocation2 + $0x28] sm:$0xf] %v370_v27  ;;  %v413_v27 = vrot.slane %v412_v0, 4  ;;  %v439_v0 = vshll.u32 %v5611_v55, 16  ;;  %v863_v8 = vsel %vm5573_vm5, %v3898_v60, %v862_v33 }
  0x6f   : > { %v4812_v14 = vld [vmem:[#allocation2 + $0xf8] sm:$0xf0]  ;;  %990 = vst [vmem:[#allocation2 + $0x8] sm:$0xf] %v849_v20  ;;  %v431_v20 = vrot.slane %v429_v12, 5 }
  0x70   : > { %v4025_v5 = vor.u32 %v4812_v14, %v4024_v49  ;;  %991 = vst [vmem:[#allocation2 + $0x2c] sm:$0xf] %v852_v54  ;;  %v435_v54 = vrot.slane %v433_v51, 4  ;;  %v864_v14 = vrot.slane %v862_v33, 4  ;;  %v441_v12 = vrot.slane %v439_v0, 5 }
  0x71   : > { %1080 = vst [vmem:[#allocation2 + $0x10] sm:$0xf] %v384_v52  ;;  %v444_v51 = vshrl.u32 %v5227_v3, 16  ;;  %v5643_v60 = vld [vmem:[%s5224_s28 + $0x38] sm:$0x1] }
  0x72   : > { %2785 = vmatmul.bf16.gmra.mxu0 %v4025_v5  ;;  %1081 = vst [vmem:[#allocation2 + $0x34] sm:$0xf] %v394_v50  ;;  %v436_v63 = vor.u32 %v435_v54, %v431_v20  ;;  %v4791_v54 = vld [vmem:[#allocation2 + $0x54] sm:$0xf] }
  0x73   : > { %765 = vst [vmem:[#allocation2 + $0x4c] sm:$0xf] %v384_v52  ;;  %v418_v52 = vsel %vm5552_vm2, %v413_v27, %v417_v13  ;;  %v446_v33 = vrot.slane %v444_v51, 4 }
  0x74   : > { %v4781_v30 = vld [vmem:[#allocation2 + $0x4] sm:$0xf]  ;;  %766 = vst [vmem:[#allocation2 + $0x70] sm:$0xf] %v394_v50  ;;  %v865_v50 = vrot.slane %v5585_v48, 5  ;;  %v437_v10 = vrot.slane %v436_v63, 4 }
  0x75   : > { %v3918_v38 = vld [vmem:[#allocation2 + $0x24] sm:$0xf0]  ;;  %992 = vst [vmem:[#allocation2 + $0x50] sm:$0xf] %v856_v53 }
  0x76   : > { %v3921_v40 = vor.u32 %v4781_v30, %v3918_v38  ;;  %v3924_v44 = vld [vmem:[#allocation2 + $0x8] sm:$0xf]  ;;  %993 = vst [vmem:[#allocation2 + $0x74] sm:$0xf] %v859_v26  ;;  %v866_v48 = vsel %vm5573_vm5, %v864_v14, %v865_v50  ;;  %v869_v30 = vrot.slane %v5538_v46, 5  ;;  %v457_v38 = vshrl.u32 %v5230_v4, 16 }
  0x77   : > { %v4786_v49 = vld [vmem:[#allocation2 + $0x28] sm:$0xf0]  ;;  %1124 = vst [vmem:[#allocation2 + $0x14] sm:$0xf] %v856_v53  ;;  %v427_v53 = vrot.slane %v426_v45, 4  ;;  %v4995_v46 = vld [vmem:[%s6212_s1 + $0x230] sm:$0xff] }
  0x78   : > { %2859 = vmatmul.bf16.vlgmr.msrb.gmra.mxu1 %v3921_v40  ;;  %v3925_v32 = vor.u32 %v4786_v49, %v3924_v44  ;;  %1125 = vst [vmem:[#allocation2 + $0x38] sm:$0xf] %v859_v26  ;;  %v3932_v2 = vld [vmem:[#allocation2 + $0x10] sm:$0xf]  ;;  %v449_v44 = vrot.slane %v447_v18, 5  ;;  %3475 = vmatpush.bf16.msra.mxu0 %v4995_v46  ;;  %v871_v14 = vrot.slane %v869_v30, 4 }
  0x79   : > { %1082 = vst [vmem:[#allocation2 + $0x58] sm:$0xf] %v408_v47  ;;  %v4787_v5 = vld [vmem:[#allocation2 + $0x30] sm:$0xf0]  ;;  %v432_v35 = vsel %vm5552_vm2, %v427_v53, %v431_v20  ;;  %v3962_v49 = vld [vmem:[#allocation2 + $0x74] sm:$0xf0]  ;;  %v442_v20 = vsel %vm5552_vm2, %v437_v10, %v441_v12 }
  0x7a   : > { %2948 = vmatmul.bf16.vlgmr.msrb.gmra.mxu2 %v3925_v32  ;;  %1083 = vst [vmem:[#allocation2 + $0x7c] sm:$0xf] %v418_v52  ;;  %v3933_v37 = vor.u32 %v4787_v5, %v3932_v2  ;;  %v4790_v26 = vld [vmem:[#allocation2 + $0x4c] sm:$0xf]  ;;  %v4971_v40 = vld [vmem:[%s6212_s1 + $0x170] sm:$0xff]  ;;  %v872_v50 = vrot.slane %v5611_v55, 5  ;;  %v450_v0 = vor.u32 %v449_v44, %v446_v33 }
  0x7b   : > { %1214 = vst [vmem:[#allocation2 + $0x1c] sm:$0xf] %v408_v47  ;;  %v3954_v27 = vld [vmem:[#allocation2 + $0x6c] sm:$0xf0]  ;;  %3208 = vmatpush.bf16.msra.mxu1 %v4971_v40  ;;  %v459_v45 = vrot.slane %v457_v38, 4  ;;  %v463_v5 = vshll.u32 %v5643_v60, 16 }
  0x7c   : > { %3037 = vmatmul.bf16.vlgmr.msrb.gmra.mxu3 %v3929_v56  ;;  %1215 = vst [vmem:[#allocation2 + $0x40] sm:$0xf] %v418_v52  ;;  %v3960_v13 = vld [vmem:[#allocation2 + $0x50] sm:$0xf]  ;;  %v3957_v32 = vor.u32 %v4790_v26, %v3954_v27  ;;  %v3899_v56 = vrot.slane %v5528_v39, 9  ;;  %v873_v29 = vsel %vm5573_vm5, %v871_v14, %v872_v50  ;;  %v468_v26 = vshrl.u32 %v5283_v16, 16 }
  0x7d   : > { %767 = vst [vmem:[#allocation2 + $0x94] sm:$0xf] %v408_v47  ;;  %v4795_v47 = vld [vmem:[#allocation2 + $0x70] sm:$0xf0]  ;;  %v465_v10 = vrot.slane %v463_v5, 5  ;;  %v471_v27 = vshll.u32 %v5283_v16, 16 }
  0x7e   : > { %768 = vst [vmem:[#allocation2 + $0xb8] sm:$0xf] %v418_v52  ;;  %v455_v52 = vrot.slane %v453_v21, 5  ;;  %v3961_v63 = vor.u32 %v4795_v47, %v3960_v13  ;;  %v870_v39 = vsel %vm5573_vm5, %v3899_v56, %v869_v30  ;;  %v477_v30 = vshll.u32 %v5286_v17, 16  ;;  %v5661_v46 = vld [vmem:[%s5224_s28 + $0x44] sm:$0x1] }
  0x7f   : > { %994 = vst [vmem:[#allocation2 + $0x98] sm:$0xf] %v863_v8  ;;  %v481_v33 = vshrl.u32 %v5286_v17, 16  ;;  %v876_v38 = vrot.slane %v5230_v4, 5  ;;  %v473_v1 = vrot.slane %v471_v27, 5 }
  0x80   : > { %995 = vst [vmem:[#allocation2 + $0xbc] sm:$0xf] %v866_v48  ;;  %v460_v2 = vor.u32 %v459_v45, %v455_v52  ;;  %v3968_v55 = vld [vmem:[#allocation2 + $0x58] sm:$0xf]  ;;  %v4800_v47 = vld [vmem:[#allocation2 + $0x9c] sm:$0xf] }
  0x81   : > { %1258 = vst [vmem:[#allocation2 + $0x20] sm:$0xf] %v863_v8  ;;  %v479_v56 = vrot.slane %v477_v30, 5  ;;  %v483_v4 = vrot.slane %v481_v33, 4  ;;  %v3998_v14 = vld [vmem:[#allocation2 + $0xbc] sm:$0xf0] }
  0x82   : > { %3126 = vmatmul.bf16.vlgmr.msrb.gmra.mxu0 %v3933_v37  ;;  %1259 = vst [vmem:[#allocation2 + $0x44] sm:$0xf] %v866_v48  ;;  %v4796_v37 = vld [vmem:[#allocation2 + $0x78] sm:$0xf0]  ;;  %v461_v53 = vrot.slane %v460_v2, 4  ;;  %v487_v45 = vshll.u32 %v5661_v46, 16 }
  0x83   : > { %1126 = vst [vmem:[#allocation2 + $0x5c] sm:$0xf] %v863_v8  ;;  %v3965_v8 = vor.u32 %v4791_v54, %v3962_v49  ;;  %v3969_v12 = vor.u32 %v4796_v37, %v3968_v55  ;;  %v3900_v54 = vrot.slane %v5227_v3, 9  ;;  %v878_v49 = vrot.slane %v876_v38, 4  ;;  %v4978_v37 = vld [vmem:[%s6212_s1 + $0x1a8] sm:$0xff] }
  0x84   : > { %1127 = vst [vmem:[#allocation2 + $0x80] sm:$0xf] %v866_v48  ;;  %v451_v48 = vrot.slane %v450_v0, 4  ;;  %v4799_v18 = vld [vmem:[#allocation2 + $0x94] sm:$0xf]  ;;  %v466_v21 = vsel %vm5552_vm2, %v461_v53, %v465_v10  ;;  %v484_v2 = vor.u32 %v483_v4, %v479_v56  ;;  %v489_v5 = vrot.slane %v487_v45, 5  ;;  %3298 = vmatpush.bf16.msra.mxu2 %v4978_v37 }
  0x85   : > { %1084 = vst [vmem:[#allocation2 + $0xa0] sm:$0xf] %v432_v35  ;;  %v3990_v13 = vld [vmem:[#allocation2 + $0xb4] sm:$0xf0]  ;;  %v877_v50 = vsel %vm5573_vm5, %v3900_v54, %v876_v38  ;;  %v883_v30 = vrot.slane %v5286_v17, 5  ;;  %v886_v54 = vrot.slane %v5661_v46, 5 }
  0x86   : > { %1085 = vst [vmem:[#allocation2 + $0xc4] sm:$0xf] %v442_v20  ;;  %v456_v51 = vsel %vm5552_vm2, %v451_v48, %v455_v52  ;;  %v3996_v40 = vld [vmem:[#allocation2 + $0x98] sm:$0xf]  ;;  %v3993_v52 = vor.u32 %v4799_v18, %v3990_v13  ;;  %v4809_v4 = vld [vmem:[#allocation2 + $0xe4] sm:$0xf] }
  0x87   : > { %769 = vst [vmem:[#allocation2 + $0xdc] sm:$0xf] %v432_v35  ;;  %v4804_v44 = vld [vmem:[#allocation2 + $0xb8] sm:$0xf0]  ;;  %v885_v17 = vrot.slane %v883_v30, 4 }
  0x88   : > { %2864 = vmatmul.bf16.gmra.mxu1 %v3957_v32  ;;  %770 = vst [vmem:[#allocation2 + $0x100] sm:$0xf] %v442_v20  ;;  %v879_v32 = vrot.slane %v5643_v60, 5  ;;  %v4001_v60 = vor.u32 %v4800_v47, %v3998_v14  ;;  %v3901_v47 = vrot.slane %v5283_v16, 9  ;;  %v4034_v14 = vld [vmem:[#allocation2 + $0x104] sm:$0xf0] }
  0x89   : > { %1216 = vst [vmem:[#allocation2 + $0x64] sm:$0xf] %v432_v35  ;;  %v470_v35 = vrot.slane %v468_v26, 4  ;;  %v505_v26 = vshrl.u32 %v5380_v59, 16  ;;  %v887_v16 = vsel %vm5573_vm5, %v885_v17, %v886_v54 }
  0x8a   : > { %2953 = vmatmul.bf16.gmra.mxu2 %v3961_v63  ;;  %1217 = vst [vmem:[#allocation2 + $0x88] sm:$0xf] %v442_v20  ;;  %v3997_v63 = vor.u32 %v4804_v44, %v3996_v40  ;;  %v880_v3 = vsel %vm5573_vm5, %v878_v49, %v879_v32  ;;  %v4994_v40 = vld [vmem:[%s6212_s1 + $0x228] sm:$0xff]  ;;  %v5694_v49 = vld [vmem:[%s5224_s28 + $0x50] sm:$0x1] }
  0x8b   : > { %996 = vst [vmem:[#allocation2 + $0xe0] sm:$0xf] %v870_v39  ;;  %v474_v20 = vor.u32 %v473_v1, %v470_v35  ;;  %v4986_v35 = vld [vmem:[%s6212_s1 + $0x1e8] sm:$0xff]  ;;  %v507_v32 = vrot.slane %v505_v26, 4  ;;  %3476 = vmatpush.bf16.msra.mxu0 %v4994_v40  ;;  %v890_v26 = vrot.slane %v5380_v59, 5  ;;  %v893_v54 = vrot.slane %v5694_v49, 5 }
  0x8c   : > { %3042 = vmatmul.bf16.gmra.mxu3 %v3965_v8  ;;  %997 = vst [vmem:[#allocation2 + $0x104] sm:$0xf] %v873_v29  ;;  %v485_v8 = vrot.slane %v484_v2, 4  ;;  %v4970_v1 = vld [vmem:[%s6212_s1 + $0x168] sm:$0xff] }
  0x8d   : > { %1128 = vst [vmem:[#allocation2 + $0xa4] sm:$0xf] %v870_v39  ;;  %v475_v0 = vrot.slane %v474_v20, 4  ;;  %v4805_v55 = vld [vmem:[#allocation2 + $0xc0] sm:$0xf0]  ;;  %3387 = vmatpush.bf16.msra.mxu3 %v4986_v35  ;;  %3209 = vmatpush.bf16.msra.mxu1 %v4970_v1  ;;  %v892_v17 = vrot.slane %v890_v26, 4 }
  0x8e   : > { %1129 = vst [vmem:[#allocation2 + $0xc8] sm:$0xf] %v873_v29  ;;  %v490_v48 = vsel %vm5552_vm2, %v485_v8, %v489_v5  ;;  %v4808_v10 = vld [vmem:[#allocation2 + $0xdc] sm:$0xf] }
  0x8f   : > { %1260 = vst [vmem:[#allocation2 + $0x68] sm:$0xf] %v870_v39  ;;  %v480_v39 = vsel %vm5552_vm2, %v475_v0, %v479_v56  ;;  %v4026_v18 = vld [vmem:[#allocation2 + $0xfc] sm:$0xf0]  ;;  %v511_v56 = vshll.u32 %v5694_v49, 16  ;;  %v4037_v0 = vor.u32 %v4809_v4, %v4034_v14 }
  0x90   : > { %1261 = vst [vmem:[#allocation2 + $0x8c] sm:$0xf] %v873_v29  ;;  %v4004_v29 = vld [vmem:[#allocation2 + $0xa0] sm:$0xf]  ;;  %v4070_v4 = vld [vmem:[#allocation2 + $0x14c] sm:$0xf0] }
  0x91   : > { %1086 = vst [vmem:[#allocation2 + $0xe8] sm:$0xf] %v456_v51  ;;  %v4005_v53 = vor.u32 %v4805_v55, %v4004_v29 }
  0x92   : > { %3131 = vmatmul.bf16.gmra.mxu0 %v3969_v12  ;;  %1087 = vst [vmem:[#allocation2 + $0x10c] sm:$0xf] %v466_v21  ;;  %v492_v12 = vshrl.u32 %v5377_v58, 16  ;;  %v4032_v27 = vld [vmem:[#allocation2 + $0xe0] sm:$0xf] }
  0x93   : > { %771 = vst [vmem:[#allocation2 + $0x124] sm:$0xf] %v456_v51  ;;  %v4813_v13 = vld [vmem:[#allocation2 + $0x100] sm:$0xf0] }
  0x94   : > { %772 = vst [vmem:[#allocation2 + $0x148] sm:$0xf] %v466_v21  ;;  %v494_v33 = vrot.slane %v492_v12, 4  ;;  %v4033_v46 = vor.u32 %v4813_v13, %v4032_v27  ;;  %v525_v12 = vshll.u32 %v5463_v41, 16 }
  0x95   : > { %1218 = vst [vmem:[#allocation2 + $0xac] sm:$0xf] %v456_v51  ;;  %v495_v51 = vshll.u32 %v5377_v58, 16 }
  0x96   : > { %1219 = vst [vmem:[#allocation2 + $0xd0] sm:$0xf] %v466_v21  ;;  %v501_v21 = vshll.u32 %v5380_v59, 16 }
  0x97   : > { %998 = vst [vmem:[#allocation2 + $0x128] sm:$0xf] %v877_v50  ;;  %v497_v38 = vrot.slane %v495_v51, 5 }
  0x98   : > { %2869 = vmatmul.bf16.gmra.mxu1 %v3993_v52  ;;  %999 = vst [vmem:[#allocation2 + $0x14c] sm:$0xf] %v880_v3  ;;  %v503_v44 = vrot.slane %v501_v21, 5  ;;  %v4029_v52 = vor.u32 %v4808_v10, %v4026_v18  ;;  %v519_v10 = vshll.u32 %v5449_v36, 16  ;;  %v529_v18 = vshrl.u32 %v5463_v41, 16 }
  0x99   : > { %1130 = vst [vmem:[#allocation2 + $0xec] sm:$0xf] %v877_v50  ;;  %v498_v20 = vor.u32 %v497_v38, %v494_v33  ;;  %v4814_v29 = vld [vmem:[#allocation2 + $0x108] sm:$0xf0]  ;;  %v5717_v38 = vld [vmem:[%s5224_s28 + $0x5c] sm:$0x1] }
  0x9a   : > { %2958 = vmatmul.bf16.gmra.mxu2 %v3997_v63  ;;  %1131 = vst [vmem:[#allocation2 + $0x110] sm:$0xf] %v880_v3  ;;  %v508_v63 = vor.u32 %v507_v32, %v503_v44  ;;  %v521_v13 = vrot.slane %v519_v10, 5  ;;  %v531_v35 = vrot.slane %v529_v18, 4  ;;  %v535_v32 = vshll.u32 %v5717_v38, 16 }
  0x9b   : > { %1262 = vst [vmem:[#allocation2 + $0xb0] sm:$0xf] %v877_v50  ;;  %v884_v50 = vsel %vm5573_vm5, %v3901_v47, %v883_v30  ;;  %v499_v45 = vrot.slane %v498_v20, 4  ;;  %v4062_v51 = vld [vmem:[#allocation2 + $0x144] sm:$0xf0]  ;;  %v527_v30 = vrot.slane %v525_v12, 5 }
  0x9c   : > { %3047 = vmatmul.bf16.gmra.mxu3 %v4001_v60  ;;  %1263 = vst [vmem:[#allocation2 + $0xd4] sm:$0xf] %v880_v3  ;;  %v513_v3 = vrot.slane %v511_v56, 5  ;;  %v509_v2 = vrot.slane %v508_v63, 4  ;;  %v3902_v47 = vrot.slane %v5377_v58, 9  ;;  %v540_v10 = vshrl.u32 %v5240_v6, 16 }
  0x9d   : > { %1088 = vst [vmem:[#allocation2 + $0x130] sm:$0xf] %v480_v39  ;;  %v504_v60 = vsel %vm5552_vm2, %v499_v45, %v503_v44  ;;  %v4818_v56 = vld [vmem:[#allocation2 + $0x12c] sm:$0xf]  ;;  %v543_v12 = vshll.u32 %v5240_v6, 16 }
  0x9e   : > { %1089 = vst [vmem:[#allocation2 + $0x154] sm:$0xf] %v490_v48  ;;  %v514_v8 = vsel %vm5552_vm2, %v509_v2, %v513_v3  ;;  %v4068_v33 = vld [vmem:[#allocation2 + $0x128] sm:$0xf]  ;;  %v891_v14 = vsel %vm5573_vm5, %v3902_v47, %v890_v26  ;;  %v4073_v49 = vor.u32 %v4818_v56, %v4070_v4  ;;  %v553_v26 = vshrl.u32 %v5244_v7, 16  ;;  %v4985_v47 = vld [vmem:[%s6212_s1 + $0x1e0] sm:$0xff] }
  0x9f   : > { %773 = vst [vmem:[#allocation2 + $0x16c] sm:$0xf] %v480_v39  ;;  %v4822_v40 = vld [vmem:[#allocation2 + $0x148] sm:$0xf0]  ;;  %v900_v56 = vrot.slane %v5717_v38, 5  ;;  %3388 = vmatpush.bf16.msra.mxu3 %v4985_v47  ;;  %v573_v47 = vshll.u32 %v5318_v34, 16 }
  0xa0   : > { %774 = vst [vmem:[#allocation2 + $0x190] sm:$0xf] %v490_v48  ;;  %v4069_v45 = vor.u32 %v4822_v40, %v4068_v33  ;;  %v542_v33 = vrot.slane %v540_v10, 4 }
  0xa1   : > { %1220 = vst [vmem:[#allocation2 + $0xf4] sm:$0xf] %v480_v39  ;;  %v4040_v39 = vld [vmem:[#allocation2 + $0xe8] sm:$0xf] }
  0xa2   : > { %3136 = vmatmul.bf16.gmra.mxu0 %v4005_v53  ;;  %1221 = vst [vmem:[#allocation2 + $0x118] sm:$0xf] %v490_v48  ;;  %v4041_v55 = vor.u32 %v4814_v29, %v4040_v39  ;;  %v4817_v48 = vld [vmem:[#allocation2 + $0x124] sm:$0xf]  ;;  %v516_v53 = vshrl.u32 %v5449_v36, 16 }
  0xa3   : > { %1000 = vst [vmem:[#allocation2 + $0x170] sm:$0xf] %v884_v50  ;;  %v4065_v59 = vor.u32 %v4817_v48, %v4062_v51  ;;  %v4977_v39 = vld [vmem:[%s6212_s1 + $0x1a0] sm:$0xff]  ;;  %v549_v51 = vshll.u32 %v5244_v7, 16 }
  0xa4   : > { %1001 = vst [vmem:[#allocation2 + $0x194] sm:$0xf] %v887_v16  ;;  %v518_v27 = vrot.slane %v516_v53, 4  ;;  %3299 = vmatpush.bf16.msra.mxu2 %v4977_v39 }
  0xa5   : > { %1132 = vst [vmem:[#allocation2 + $0x134] sm:$0xf] %v884_v50  ;;  %v551_v40 = vrot.slane %v549_v51, 5 }
  0xa6   : > { %1133 = vst [vmem:[#allocation2 + $0x158] sm:$0xf] %v887_v16  ;;  %v522_v20 = vor.u32 %v521_v13, %v518_v27  ;;  %v4826_v53 = vld [vmem:[#allocation2 + $0x16c] sm:$0xf] }
  0xa7   : > { %1264 = vst [vmem:[#allocation2 + $0xf8] sm:$0xf] %v884_v50  ;;  %v894_v50 = vsel %vm5573_vm5, %v892_v17, %v893_v54  ;;  %v4098_v18 = vld [vmem:[#allocation2 + $0x18c] sm:$0xf0]  ;;  %v4969_v17 = vld [vmem:[%s6212_s1 + $0x160] sm:$0xff] }
  0xa8   : > { %2874 = vmatmul.bf16.gmra.mxu1 %v4029_v52  ;;  %1265 = vst [vmem:[#allocation2 + $0x11c] sm:$0xf] %v887_v16  ;;  %v532_v52 = vor.u32 %v531_v35, %v527_v30  ;;  %v523_v16 = vrot.slane %v522_v20, 4  ;;  %v545_v35 = vrot.slane %v543_v12, 5  ;;  %v4993_v54 = vld [vmem:[%s6212_s1 + $0x220] sm:$0xff]  ;;  %v555_v20 = vrot.slane %v553_v26, 4 }
  0xa9   : > { %v5701_v5 = vpop.f32.mrf.mxu1  ;;  %1090 = vst [vmem:[#allocation2 + $0x178] sm:$0xf] %v504_v60  ;;  %3210 = vmatpush.bf16.msra.mxu1 %v4969_v17  ;;  %3477 = vmatpush.bf16.msra.mxu0 %v4993_v54  ;;  %v577_v17 = vshrl.u32 %v5318_v34, 16 }
  0xaa   : > { %2963 = vmatmul.bf16.gmra.mxu2 %v4033_v46  ;;  %1091 = vst [vmem:[#allocation2 + $0x19c] sm:$0xf] %v514_v8  ;;  %v533_v58 = vrot.slane %v532_v52, 4  ;;  %v537_v46 = vrot.slane %v535_v32, 5  ;;  %v4104_v27 = vld [vmem:[#allocation2 + $0x170] sm:$0xf]  ;;  %v546_v4 = vor.u32 %v545_v35, %v542_v33 }
  0xab   : > { %775 = vst [vmem:[#allocation2 + $0x1b4] sm:$0xf] %v504_v60  ;;  %v3903_v52 = vrot.slane %v5449_v36, 9  ;;  %v564_v33 = vshrl.u32 %v5308_v31, 16  ;;  %v567_v35 = vshll.u32 %v5308_v31, 16 }
  0xac   : > { %3052 = vmatmul.bf16.gmra.mxu3 %v4037_v0  ;;  %776 = vst [vmem:[#allocation2 + $0x1d8] sm:$0xf] %v514_v8  ;;  %v528_v0 = vsel %vm5552_vm2, %v523_v16, %v527_v30  ;;  %v538_v2 = vsel %vm5552_vm2, %v533_v58, %v537_v46  ;;  %v897_v30 = vrot.slane %v5463_v41, 5  ;;  %v556_v16 = vor.u32 %v555_v20, %v551_v40  ;;  %v4106_v58 = vld [vmem:[#allocation2 + $0x194] sm:$0xf0] }
  0xad   : > { %1222 = vst [vmem:[#allocation2 + $0x13c] sm:$0xf] %v504_v60  ;;  %v5719_v1 = vpop.f32.mrf.mxu0  ;;  %v4076_v60 = vld [vmem:[#allocation2 + $0x130] sm:$0xf]  ;;  %v547_v36 = vrot.slane %v546_v4, 4 }
  0xae   : > { %1223 = vst [vmem:[#allocation2 + $0x160] sm:$0xf] %v514_v8  ;;  %v4823_v8 = vld [vmem:[#allocation2 + $0x150] sm:$0xf0]  ;;  %v899_v32 = vrot.slane %v897_v30, 4  ;;  %v898_v46 = vsel %vm5573_vm5, %v3903_v52, %v897_v30  ;;  %v557_v39 = vrot.slane %v556_v16, 4 }
  0xaf   : > { %v5707_v37 = vpop.f32.mrf.mxu2  ;;  %1002 = vst [vmem:[#allocation2 + $0x1b8] sm:$0xf] %v891_v14  ;;  %v4077_v48 = vor.u32 %v4823_v8, %v4076_v60  ;;  %v904_v52 = vrot.slane %v5244_v7, 5  ;;  %v5795_v4 = vld [vmem:[%s5224_s28 + $0x74] sm:$0x1]  ;;  %v579_v16 = vrot.slane %v577_v17, 4 }
  0xb0   : > { %v5721_v44 = vpop.f32.mrf.mxu3  ;;  %1003 = vst [vmem:[#allocation2 + $0x1dc] sm:$0xf] %v894_v50  ;;  %v4112_v10 = vld [vmem:[#allocation2 + $0x178] sm:$0xf]  ;;  %v583_v7 = vshll.u32 %v5795_v4, 16 }
  0xb1   : > { %v5713_v21 = vpop.f32.mrf.mxu1  ;;  %1134 = vst [vmem:[#allocation2 + $0x17c] sm:$0xf] %v891_v14  ;;  %v4832_v12 = vld [vmem:[#allocation2 + $0x198] sm:$0xf0] }
  0xb2   : > { %3141 = vmatmul.bf16.gmra.mxu0 %v4041_v55  ;;  %1135 = vst [vmem:[#allocation2 + $0x1a0] sm:$0xf] %v894_v50  ;;  %v4835_v30 = vld [vmem:[#allocation2 + $0x1b4] sm:$0xf] }
  0xb3   : > { %1266 = vst [vmem:[#allocation2 + $0x140] sm:$0xf] %v891_v14  ;;  %v4101_v14 = vor.u32 %v4826_v53, %v4098_v18  ;;  %v552_v53 = vsel %vm5552_vm2, %v547_v36, %v551_v40  ;;  %v4134_v40 = vld [vmem:[#allocation2 + $0x1d4] sm:$0xf0] }
  0xb4   : > { %1267 = vst [vmem:[#allocation2 + $0x164] sm:$0xf] %v894_v50  ;;  %v5766_v50 = vld [vmem:[%s5224_s28 + $0x68] sm:$0x1]  ;;  %v4137_v36 = vor.u32 %v4835_v30, %v4134_v40  ;;  %v585_v30 = vrot.slane %v583_v7, 5 }
  0xb5   : > { %1092 = vst [vmem:[#allocation2 + $0x1c0] sm:$0xf] %v528_v0  ;;  %v5741_v29 = vpop.f32.mrf.mxu0  ;;  %v559_v38 = vshll.u32 %v5766_v50, 16 }
  0xb6   : > { %1093 = vst [vmem:[#allocation2 + $0x1e4] sm:$0xf] %v538_v2 }
  0xb7   : > { %v5730_v63 = vpop.f32.mrf.mxu2  ;;  %777 = vst [vmem:[#allocation2 + $0x1fc] sm:$0xf] %v528_v0 }
  0xb8   : > { %2879 = vmatmul.bf16.gmra.mxu1 %v4065_v59  ;;  %v5743_v55 = vpop.f32.mrf.mxu3  ;;  %778 = vst [vmem:[#allocation2 + $0x220] sm:$0xf] %v538_v2  ;;  %v4831_v59 = vld [vmem:[#allocation2 + $0x190] sm:$0xf0] }
  0xb9   : > { %v5732_v3 = vpop.f32.mrf.mxu1  ;;  %1224 = vst [vmem:[#allocation2 + $0x184] sm:$0xf] %v528_v0  ;;  %v4105_v0 = vor.u32 %v4831_v59, %v4104_v27  ;;  %v4113_v27 = vor.u32 %v4832_v12, %v4112_v10  ;;  %v4140_v59 = vld [vmem:[#allocation2 + $0x1b8] sm:$0xf] }
  0xba   : > { %2968 = vmatmul.bf16.gmra.mxu2 %v4069_v45  ;;  %1225 = vst [vmem:[#allocation2 + $0x1a8] sm:$0xf] %v538_v2  ;;  %v4827_v45 = vld [vmem:[#allocation2 + $0x174] sm:$0xf] }
  0xbb   : > { %1004 = vst [vmem:[#allocation2 + $0x200] sm:$0xf] %v898_v46  ;;  %v4109_v8 = vor.u32 %v4827_v45, %v4106_v58  ;;  %v4840_v45 = vld [vmem:[#allocation2 + $0x1d8] sm:$0xf0]  ;;  %v3904_v58 = vrot.slane %v5240_v6, 9 }
  0xbc   : > { %3057 = vmatmul.bf16.gmra.mxu3 %v4073_v49  ;;  %v901_v49 = vsel %vm5573_vm5, %v899_v32, %v900_v56  ;;  %1136 = vst [vmem:[#allocation2 + $0x1c4] sm:$0xf] %v898_v46  ;;  %v566_v32 = vrot.slane %v564_v33, 4  ;;  %v569_v56 = vrot.slane %v567_v35, 5  ;;  %v4141_v12 = vor.u32 %v4840_v45, %v4140_v59  ;;  %v4148_v40 = vld [vmem:[#allocation2 + $0x1c0] sm:$0xf] }
  0xbd   : > { %1005 = vst [vmem:[#allocation2 + $0x224] sm:$0xf] %v901_v49  ;;  %v591_v45 = vshll.u32 %v5411_v15, 16 }
  0xbe   : > { %1137 = vst [vmem:[#allocation2 + $0x1e8] sm:$0xf] %v901_v49 }
  0xbf   : > { %v5749_v13 = vpop.f32.mrf.mxu2  ;;  %1268 = vst [vmem:[#allocation2 + $0x188] sm:$0xf] %v898_v46  ;;  %v906_v46 = vrot.slane %v904_v52, 4 }
  0xc0   : > { %1269 = vst [vmem:[#allocation2 + $0x1ac] sm:$0xf] %v901_v49  ;;  %v570_v49 = vor.u32 %v569_v56, %v566_v32  ;;  %v4844_v32 = vld [vmem:[#allocation2 + $0x1fc] sm:$0xf] }
  0xc1   : > { %v5761_v41 = vpop.f32.mrf.mxu1  ;;  %v5773_v2 = vpop.f32.mrf.mxu0  ;;  %1094 = vst [vmem:[#allocation2 + $0x208] sm:$0xf] %v552_v53 }
  0xc2   : > { %3146 = vmatmul.bf16.gmra.mxu0 %v4077_v48  ;;  %v5775_v60 = vpop.f32.mrf.mxu3  ;;  %v561_v48 = vrot.slane %v559_v38, 5  ;;  %779 = vst [vmem:[#allocation2 + $0x244] sm:$0xf] %v552_v53  ;;  %v571_v10 = vrot.slane %v570_v49, 4  ;;  %v601_v49 = vshrl.u32 %v5415_v19, 16 }
  0xc3   : > { %6220 = vst [vmem:[#allocation3_spill] sm:$0xff] %v5775_v60 }
  0xc4   : > { %v562_v18 = vsel %vm5552_vm2, %v557_v39, %v561_v48  ;;  %1226 = vst [vmem:[#allocation2 + $0x1cc] sm:$0xf] %v552_v53  ;;  %v4142_v39 = vld [vmem:[#allocation2 + $0x1dc] sm:$0xf0]  ;;  %v905_v53 = vsel %vm5573_vm5, %v3904_v58, %v904_v52 }
  0xc5   : > { %1095 = vst [vmem:[#allocation2 + $0x22c] sm:$0xf] %v562_v18  ;;  %v4170_v58 = vld [vmem:[#allocation2 + $0x21c] sm:$0xf0] }
  0xc6   : > { %780 = vst [vmem:[#allocation2 + $0x268] sm:$0xf] %v562_v18 }
  0xc7   : > { %v5779_v51 = vpop.f32.mrf.mxu2  ;;  %1227 = vst [vmem:[#allocation2 + $0x1f0] sm:$0xf] %v562_v18 }
  0xc8   : > { %2884 = vmatmul.bf16.gmra.mxu1 %v4101_v14  ;;  %v575_v14 = vrot.slane %v573_v47, 5  ;;  %1006 = vst [vmem:[#allocation2 + $0x248] sm:$0xf] %v905_v53  ;;  %v4841_v47 = vld [vmem:[#allocation2 + $0x1e0] sm:$0xf0] }
  0xc9   : > { %v5783_v26 = vpop.f32.mrf.mxu1  ;;  %v5789_v54 = vpop.f32.mrf.mxu0  ;;  %1138 = vst [vmem:[#allocation2 + $0x20c] sm:$0xf] %v905_v53  ;;  %v4149_v52 = vor.u32 %v4841_v47, %v4148_v40  ;;  %v603_v40 = vrot.slane %v601_v49, 4 }
  0xca   : > { %2973 = vmatmul.bf16.gmra.mxu2 %v4105_v0  ;;  %v5791_v20 = vpop.f32.mrf.mxu3  ;;  %v907_v0 = vrot.slane %v5766_v50, 5  ;;  %v580_v38 = vor.u32 %v579_v16, %v575_v14  ;;  %v576_v33 = vsel %vm5552_vm2, %v571_v10, %v575_v14  ;;  %1270 = vst [vmem:[#allocation2 + $0x1d0] sm:$0xf] %v905_v53  ;;  %v4976_v14 = vld [vmem:[%s6212_s1 + $0x198] sm:$0xff]  ;;  %v588_v16 = vshrl.u32 %v5411_v15, 16 }
  0xcb   : > { %6221 = vst [vmem:[#allocation4_spill] sm:$0xff] %v5791_v20  ;;  %3300 = vmatpush.bf16.msra.mxu2 %v4976_v14  ;;  %v4968_v53 = vld [vmem:[%s6212_s1 + $0x158] sm:$0xff]  ;;  %v5835_v10 = vld [vmem:[%s5224_s28 + $0x80] sm:$0x1] }
  0xcc   : > { %3062 = vmatmul.bf16.gmra.mxu3 %v4109_v8  ;;  %v4836_v8 = vld [vmem:[#allocation2 + $0x1bc] sm:$0xf]  ;;  %v908_v6 = vsel %vm5573_vm5, %v906_v46, %v907_v0  ;;  %1096 = vst [vmem:[#allocation2 + $0x250] sm:$0xf] %v576_v33  ;;  %v597_v46 = vshll.u32 %v5415_v19, 16  ;;  %v590_v7 = vrot.slane %v588_v16, 4  ;;  %3211 = vmatpush.bf16.msra.mxu1 %v4968_v53 }
  0xcd   : > { %1007 = vst [vmem:[#allocation2 + $0x26c] sm:$0xf] %v908_v6  ;;  %v4145_v50 = vor.u32 %v4836_v8, %v4142_v39  ;;  %v4176_v0 = vld [vmem:[#allocation2 + $0x200] sm:$0xf]  ;;  %v593_v8 = vrot.slane %v591_v45, 5  ;;  %v4984_v39 = vld [vmem:[%s6212_s1 + $0x1d8] sm:$0xff] }
  0xce   : > { %1139 = vst [vmem:[#allocation2 + $0x230] sm:$0xf] %v908_v6  ;;  %3389 = vmatpush.bf16.msra.mxu3 %v4984_v39  ;;  %v607_v47 = vshll.u32 %v5835_v10, 16  ;;  %v4845_v16 = vld [vmem:[#allocation2 + $0x204] sm:$0xf] }
  0xcf   : > { %1271 = vst [vmem:[#allocation2 + $0x1f4] sm:$0xf] %v908_v6  ;;  %v4849_v6 = vld [vmem:[#allocation2 + $0x220] sm:$0xf0]  ;;  %v4850_v53 = vld [vmem:[#allocation2 + $0x228] sm:$0xf0] }
  0xd0   : > { %781 = vst [vmem:[#allocation2 + $0x28c] sm:$0xf] %v576_v33  ;;  %v4177_v45 = vor.u32 %v4849_v6, %v4176_v0 }
  0xd1   : > { %v5800_v48 = vpop.f32.mrf.mxu2  ;;  %v5806_v18 = vpop.f32.mrf.mxu1  ;;  %1228 = vst [vmem:[#allocation2 + $0x214] sm:$0xf] %v576_v33  ;;  %v599_v33 = vrot.slane %v597_v46, 5  ;;  %v4992_v46 = vld [vmem:[%s6212_s1 + $0x218] sm:$0xff] }
  0xd2   : > { %3151 = vmatmul.bf16.gmra.mxu0 %v4113_v27  ;;  %v581_v27 = vrot.slane %v580_v38, 4  ;;  %v911_v38 = vrot.slane %v5318_v34, 5 }
  0xd3   : > { %3478 = vmatpush.bf16.msra.mxu0 %v4992_v46 }
  0xd4   : > { %v586_v59 = vsel %vm5552_vm2, %v581_v27, %v585_v30  ;;  %v913_v34 = vrot.slane %v911_v38, 4  ;;  %v594_v27 = vor.u32 %v593_v8, %v590_v7  ;;  %v914_v30 = vrot.slane %v5795_v4, 5 }
  0xd5   : > { %1097 = vst [vmem:[#allocation2 + $0x274] sm:$0xf] %v586_v59  ;;  %v604_v4 = vor.u32 %v603_v40, %v599_v33  ;;  %v609_v8 = vrot.slane %v607_v47, 5  ;;  %v615_v40 = vshll.u32 %v5487_v57, 16  ;;  %v4206_v47 = vld [vmem:[#allocation2 + $0x264] sm:$0xf0] }
  0xd6   : > { %782 = vst [vmem:[#allocation2 + $0x2b0] sm:$0xf] %v586_v59 }
  0xd7   : > { %v5810_v35 = vpop.f32.mrf.mxu0  ;;  %v5812_v17 = vpop.f32.mrf.mxu3  ;;  %1229 = vst [vmem:[#allocation2 + $0x238] sm:$0xf] %v586_v59  ;;  %v605_v7 = vrot.slane %v604_v4, 4  ;;  %v5869_v4 = vld [vmem:[%s5224_s28 + $0x8c] sm:$0x1] }
  0xd8   : > { %2889 = vmatmul.bf16.gmra.mxu1 %v4137_v36  ;;  %6222 = vst [vmem:[#allocation5_spill] sm:$0xff] %v5812_v17  ;;  %v921_v17 = vrot.slane %v5835_v10, 5 }
  0xd9   : > { %v5816_v56 = vpop.f32.mrf.mxu2 }
  0xda   : > { %2978 = vmatmul.bf16.gmra.mxu2 %v4141_v12  ;;  %v4173_v12 = vor.u32 %v4844_v32, %v4170_v58  ;;  %v4178_v32 = vld [vmem:[#allocation2 + $0x224] sm:$0xf0]  ;;  %v915_v58 = vsel %vm5573_vm5, %v913_v34, %v914_v30  ;;  %v4853_v30 = vld [vmem:[#allocation2 + $0x244] sm:$0xf] }
  0xdb   : > { %1009 = vst [vmem:[#allocation2 + $0x2b4] sm:$0xf] %v915_v58  ;;  %v4181_v49 = vor.u32 %v4845_v16, %v4178_v32  ;;  %v621_v16 = vshll.u32 %v5494_v61, 16  ;;  %v625_v32 = vshrl.u32 %v5494_v61, 16 }
  0xdc   : > { %3067 = vmatmul.bf16.gmra.mxu3 %v4145_v50  ;;  %v3905_v50 = vrot.slane %v5308_v31, 9  ;;  %v595_v31 = vrot.slane %v594_v27, 4  ;;  %1141 = vst [vmem:[#allocation2 + $0x278] sm:$0xf] %v915_v58 }
  0xdd   : > { %v5825_v36 = vpop.f32.mrf.mxu1  ;;  %1273 = vst [vmem:[#allocation2 + $0x23c] sm:$0xf] %v915_v58  ;;  %v617_v58 = vrot.slane %v615_v40, 5  ;;  %v623_v46 = vrot.slane %v621_v16, 5  ;;  %v4214_v40 = vld [vmem:[#allocation2 + $0x26c] sm:$0xf0] }
  0xde   : > { %v912_v59 = vsel %vm5573_vm5, %v3905_v50, %v911_v38  ;;  %v600_v0 = vsel %vm5552_vm2, %v595_v31, %v599_v33  ;;  %v4184_v38 = vld [vmem:[#allocation2 + $0x208] sm:$0xf]  ;;  %v612_v33 = vshrl.u32 %v5487_v57, 16  ;;  %v918_v31 = vrot.slane %v5415_v19, 5 }
  0xdf   : > { %v5842_v14 = vpop.f32.mrf.mxu3  ;;  %1008 = vst [vmem:[#allocation2 + $0x290] sm:$0xf] %v912_v59  ;;  %v4185_v50 = vor.u32 %v4850_v53, %v4184_v38  ;;  %v3906_v38 = vrot.slane %v5411_v15, 9 }
  0xe0   : > { %6223 = vst [vmem:[#allocation6_spill] sm:$0xff] %v5842_v14  ;;  %v920_v53 = vrot.slane %v918_v31, 4  ;;  %v4209_v14 = vor.u32 %v4853_v30, %v4206_v47 }
  0xe1   : > { %1140 = vst [vmem:[#allocation2 + $0x254] sm:$0xf] %v912_v59  ;;  %v919_v16 = vsel %vm5573_vm5, %v3906_v38, %v918_v31 }
  0xe2   : > { %3156 = vmatmul.bf16.gmra.mxu0 %v4149_v52  ;;  %v5840_v52 = vpop.f32.mrf.mxu0  ;;  %1272 = vst [vmem:[#allocation2 + $0x218] sm:$0xf] %v912_v59  ;;  %v4212_v59 = vld [vmem:[#allocation2 + $0x248] sm:$0xf] }
  0xe3   : > { %1098 = vst [vmem:[#allocation2 + $0x298] sm:$0xf] %v600_v0 }
  0xe4   : > { %783 = vst [vmem:[#allocation2 + $0x2d4] sm:$0xf] %v600_v0 }
  0xe5   : > { %v5855_v6 = vpop.f32.mrf.mxu1  ;;  %1230 = vst [vmem:[#allocation2 + $0x25c] sm:$0xf] %v600_v0  ;;  %v4854_v0 = vld [vmem:[#allocation2 + $0x24c] sm:$0xf] }
  0xe6   : > { %1010 = vst [vmem:[#allocation2 + $0x2d8] sm:$0xf] %v919_v16  ;;  %v4217_v10 = vor.u32 %v4854_v0, %v4214_v40  ;;  %v4248_v40 = vld [vmem:[#allocation2 + $0x290] sm:$0xf] }
  0xe7   : > { %1142 = vst [vmem:[#allocation2 + $0x29c] sm:$0xf] %v919_v16 }
  0xe8   : > { %2894 = vmatmul.bf16.gmra.mxu1 %v4173_v12  ;;  %v610_v12 = vsel %vm5552_vm2, %v605_v7, %v609_v8  ;;  %v4858_v8 = vld [vmem:[#allocation2 + $0x268] sm:$0xf0]  ;;  %1274 = vst [vmem:[#allocation2 + $0x260] sm:$0xf] %v919_v16  ;;  %v4867_v16 = vld [vmem:[#allocation2 + $0x2b0] sm:$0xf0] }
  0xe9   : > { %v5851_v39 = vpop.f32.mrf.mxu2  ;;  %1099 = vst [vmem:[#allocation2 + $0x2bc] sm:$0xf] %v610_v12  ;;  %v4213_v20 = vor.u32 %v4858_v8, %v4212_v59  ;;  %v4859_v59 = vld [vmem:[#allocation2 + $0x270] sm:$0xf0]  ;;  %v4249_v60 = vor.u32 %v4867_v16, %v4248_v40 }
  0xea   : > { %2983 = vmatmul.bf16.gmra.mxu2 %v4177_v45  ;;  %784 = vst [vmem:[#allocation2 + $0x2f8] sm:$0xf] %v610_v12  ;;  %v614_v45 = vrot.slane %v612_v33, 4  ;;  %v631_v33 = vshll.u32 %v5869_v4, 16  ;;  %v4991_v40 = vld [vmem:[%s6212_s1 + $0x210] sm:$0xff] }
  0xeb   : > { %1231 = vst [vmem:[#allocation2 + $0x280] sm:$0xf] %v610_v12  ;;  %v922_v12 = vsel %vm5573_vm5, %v920_v53, %v921_v17  ;;  %v4862_v53 = vld [vmem:[#allocation2 + $0x28c] sm:$0xf]  ;;  %3479 = vmatpush.bf16.msra.mxu0 %v4991_v40 }
  0xec   : > { %3072 = vmatmul.bf16.gmra.mxu3 %v4181_v49  ;;  %v627_v49 = vrot.slane %v625_v32, 4  ;;  %1011 = vst [vmem:[#allocation2 + $0x2fc] sm:$0xf] %v922_v12 }
  0xed   : > { %1143 = vst [vmem:[#allocation2 + $0x2c0] sm:$0xf] %v922_v12 }
  0xee   : > { %v628_v19 = vor.u32 %v627_v49, %v623_v46  ;;  %1275 = vst [vmem:[#allocation2 + $0x284] sm:$0xf] %v922_v12  ;;  %v649_v12 = vshrl.u32 %v5262_v11, 16 }
  0xef   : > { %v5859_v34 = vpop.f32.mrf.mxu0  ;;  %v5861_v27 = vpop.f32.mrf.mxu3 }
  0xf0   : > { %6224 = vst [vmem:[#allocation7_spill] sm:$0xff] %v5861_v27  ;;  %v618_v27 = vor.u32 %v617_v58, %v614_v45  ;;  %v629_v47 = vrot.slane %v628_v19, 4  ;;  %v633_v45 = vrot.slane %v631_v33, 5  ;;  %v4242_v19 = vld [vmem:[#allocation2 + $0x2ac] sm:$0xf0] }
  0xf1   : > { %v5871_v7 = vpop.f32.mrf.mxu2 }
  0xf2   : > { %3161 = vmatmul.bf16.gmra.mxu0 %v4185_v50  ;;  %v619_v32 = vrot.slane %v618_v27, 4  ;;  %v4220_v27 = vld [vmem:[#allocation2 + $0x250] sm:$0xf]  ;;  %v634_v58 = vsel %vm5552_vm2, %v629_v47, %v633_v45 }
  0xf3   : > { %v4221_v8 = vor.u32 %v4859_v59, %v4220_v27  ;;  %1101 = vst [vmem:[#allocation2 + $0x304] sm:$0xf] %v634_v58  ;;  %v4245_v27 = vor.u32 %v4862_v53, %v4242_v19  ;;  %v4983_v59 = vld [vmem:[%s6212_s1 + $0x1d0] sm:$0xff] }
  0xf4   : > { %v624_v31 = vsel %vm5552_vm2, %v619_v32, %v623_v46  ;;  %v645_v32 = vshll.u32 %v5262_v11, 16  ;;  %786 = vst [vmem:[#allocation2 + $0x340] sm:$0xf] %v634_v58  ;;  %3390 = vmatpush.bf16.msra.mxu3 %v4983_v59 }
  0xf5   : > { %v2860_v50 = vpop.f32.mrf.mxu1  ;;  %1100 = vst [vmem:[#allocation2 + $0x2e0] sm:$0xf] %v624_v31 }
  0xf6   : > { %v2861_v17 = vadd.f32 %v2860_v50, %v5719_v1  ;;  %v636_v1 = vshrl.u32 %v5255_v9, 16  ;;  %v639_v50 = vshll.u32 %v5255_v9, 16  ;;  %785 = vst [vmem:[#allocation2 + $0x31c] sm:$0xf] %v624_v31  ;;  %v647_v19 = vrot.slane %v645_v32, 5 }
  0xf7   : > { %v5880_v15 = vpop.f32.mrf.mxu0  ;;  %v5882_v30 = vpop.f32.mrf.mxu3  ;;  %1232 = vst [vmem:[#allocation2 + $0x2a4] sm:$0xf] %v624_v31  ;;  %v928_v31 = vrot.slane %v5869_v4, 5 }
  0xf8   : > { %6225 = vst [vmem:[#allocation8_spill] sm:$0xff] %v5882_v30  ;;  %2899 = vmatmul.bf16.gmra.mxu1 %v4209_v14  ;;  %v638_v47 = vrot.slane %v636_v1, 4  ;;  %v641_v45 = vrot.slane %v639_v50, 5 }
  0xf9   : > { %1233 = vst [vmem:[#allocation2 + $0x2c8] sm:$0xf] %v634_v58 }
  0xfa   : > { %2988 = vmatmul.bf16.gmra.mxu2 %v4213_v20  ;;  %v4975_v20 = vld [vmem:[%s6212_s1 + $0x190] sm:$0xff]  ;;  %v642_v53 = vor.u32 %v641_v45, %v638_v47 }
  0xfb   : > { %3301 = vmatpush.bf16.msra.mxu2 %v4975_v20  ;;  %v651_v20 = vrot.slane %v649_v12, 4 }
  0xfc   : > { %3077 = vmatmul.bf16.gmra.mxu3 %v4217_v10  ;;  %v925_v10 = vrot.slane %v5494_v61, 5  ;;  %v3907_v61 = vrot.slane %v5487_v57, 9  ;;  %v643_v58 = vrot.slane %v642_v53, 4 }
  0xfd   : > { %v2949_v14 = vpop.f32.mrf.mxu2  ;;  %v2862_v49 = vpop.f32.mrf.mxu1  ;;  %v652_v4 = vor.u32 %v651_v20, %v647_v19 }
  0xfe   : > { %v2950_v38 = vadd.f32 %v2949_v14, %v2861_v17  ;;  %v4967_v17 = vld [vmem:[%s6212_s1 + $0x150] sm:$0xff]  ;;  %v5904_v14 = vld [vmem:[%s5224_s28 + $0x98] sm:$0x1] }
  0xff   : > { %v3127_v33 = vpop.f32.mrf.mxu0  ;;  %v3038_v46 = vpop.f32.mrf.mxu3  ;;  %3212 = vmatpush.bf16.msra.mxu1 %v4967_v17  ;;  %v655_v1 = vshll.u32 %v5904_v14, 16  ;;  %v4256_v17 = vld [vmem:[#allocation2 + $0x298] sm:$0xf] }
 0x100   : > { %v3039_v0 = vadd.f32 %v3038_v46, %v2950_v38  ;;  %v2863_v46 = vadd.f32 %v2862_v49, %v5741_v29  ;;  %v926_v29 = vsel %vm5573_vm5, %v3907_v61, %v925_v10 }
 0x101   : > { %1012 = vst [vmem:[#allocation2 + $0x320] sm:$0xf] %v926_v29  ;;  %v657_v59 = vrot.slane %v655_v1, 5 }
 0x102   : > { %3166 = vmatmul.bf16.gmra.mxu0 %v4221_v8  ;;  %v5906_v38 = vadd.f32 %v3127_v33, %v3039_v0  ;;  %v927_v8 = vrot.slane %v925_v10, 4  ;;  %v4863_v33 = vld [vmem:[#allocation2 + $0x294] sm:$0xf]  ;;  %v4250_v0 = vld [vmem:[#allocation2 + $0x2b4] sm:$0xf0]  ;;  %v653_v10 = vrot.slane %v652_v4, 4 }
 0x103   : > { %v4253_v45 = vor.u32 %v4863_v33, %v4250_v0  ;;  %1144 = vst [vmem:[#allocation2 + $0x2e4] sm:$0xf] %v926_v29  ;;  %v663_v33 = vshll.u32 %v5338_v42, 16 }
 0x104   : > { %v929_v47 = vsel %vm5573_vm5, %v927_v8, %v928_v31  ;;  %1276 = vst [vmem:[#allocation2 + $0x2a8] sm:$0xf] %v926_v29  ;;  %v4278_v29 = vld [vmem:[#allocation2 + $0x2f4] sm:$0xf0] }
 0x105   : > { %v2951_v50 = vpop.f32.mrf.mxu2  ;;  %v2865_v30 = vpop.f32.mrf.mxu1  ;;  %1013 = vst [vmem:[#allocation2 + $0x344] sm:$0xf] %v929_v47  ;;  %v665_v4 = vrot.slane %v663_v33, 5 }
 0x106   : > { %v2952_v57 = vadd.f32 %v2951_v50, %v2863_v46  ;;  %v2866_v49 = vadd.f32 %v2865_v30, %v5773_v2  ;;  %1145 = vst [vmem:[#allocation2 + $0x308] sm:$0xf] %v929_v47  ;;  %v648_v2 = vsel %vm5552_vm2, %v643_v58, %v647_v19  ;;  %v4868_v46 = vld [vmem:[#allocation2 + $0x2b8] sm:$0xf0]  ;;  %v660_v50 = vshrl.u32 %v5338_v42, 16 }
 0x107   : > { %v3129_v32 = vpop.f32.mrf.mxu0  ;;  %v3040_v12 = vpop.f32.mrf.mxu3  ;;  %1277 = vst [vmem:[#allocation2 + $0x2cc] sm:$0xf] %v929_v47  ;;  %v4257_v53 = vor.u32 %v4868_v46, %v4256_v17  ;;  %v669_v58 = vshll.u32 %v5342_v43, 16  ;;  %v4284_v47 = vld [vmem:[#allocation2 + $0x2d8] sm:$0xf] }
 0x108   : > { %v3041_v16 = vadd.f32 %v3040_v12, %v2952_v57  ;;  %2904 = vmatmul.bf16.gmra.mxu1 %v4245_v27  ;;  %v658_v27 = vsel %vm5552_vm2, %v653_v10, %v657_v59  ;;  %1102 = vst [vmem:[#allocation2 + $0x328] sm:$0xf] %v648_v2  ;;  %v673_v57 = vshrl.u32 %v5342_v43, 16  ;;  %v3908_v10 = vrot.slane %v5255_v9, 9 }
 0x109   : > { %1103 = vst [vmem:[#allocation2 + $0x34c] sm:$0xf] %v658_v27  ;;  %v671_v12 = vrot.slane %v669_v58, 5 }
 0x10a   : > { %2993 = vmatmul.bf16.gmra.mxu2 %v4249_v60  ;;  %v5922_v30 = vadd.f32 %v3129_v32, %v3041_v16  ;;  %v4871_v60 = vld [vmem:[#allocation2 + $0x2d4] sm:$0xf]  ;;  %787 = vst [vmem:[#allocation2 + $0x364] sm:$0xf] %v648_v2  ;;  %v5933_v32 = vld [vmem:[%s5224_s28 + $0xa4] sm:$0x1] }
 0x10b   : > { %788 = vst [vmem:[#allocation2 + $0x388] sm:$0xf] %v658_v27  ;;  %v675_v40 = vrot.slane %v673_v57, 4  ;;  %v4281_v46 = vor.u32 %v4871_v60, %v4278_v29 }
 0x10c   : > { %3082 = vmatmul.bf16.gmra.mxu3 %v4253_v45  ;;  %1234 = vst [vmem:[#allocation2 + $0x2ec] sm:$0xf] %v648_v2  ;;  %v4876_v45 = vld [vmem:[#allocation2 + $0x2f8] sm:$0xf0] }
 0x10d   : > { %v2954_v61 = vpop.f32.mrf.mxu2  ;;  %v2867_v8 = vpop.f32.mrf.mxu1  ;;  %1235 = vst [vmem:[#allocation2 + $0x310] sm:$0xf] %v658_v27  ;;  %v4285_v9 = vor.u32 %v4876_v45, %v4284_v47  ;;  %v4292_v47 = vld [vmem:[#allocation2 + $0x2e0] sm:$0xf] }
 0x10e   : > { %v2955_v31 = vadd.f32 %v2954_v61, %v2866_v49  ;;  %v2868_v20 = vadd.f32 %v2867_v8, %v5789_v54  ;;  %v932_v54 = vrot.slane %v5262_v11, 5  ;;  %v662_v49 = vrot.slane %v660_v50, 4 }
 0x10f   : > { %v3132_v1 = vpop.f32.mrf.mxu0  ;;  %v3043_v19 = vpop.f32.mrf.mxu3  ;;  %v935_v61 = vrot.slane %v5904_v14, 5  ;;  %v676_v11 = vor.u32 %v675_v40, %v671_v12  ;;  %v679_v8 = vshll.u32 %v5933_v32, 16 }
 0x110   : > { %v3044_v0 = vadd.f32 %v3043_v19, %v2955_v31  ;;  %v934_v59 = vrot.slane %v932_v54, 4  ;;  %v666_v17 = vor.u32 %v665_v4, %v662_v49  ;;  %v4872_v31 = vld [vmem:[#allocation2 + $0x2dc] sm:$0xf]  ;;  %v4286_v19 = vld [vmem:[#allocation2 + $0x2fc] sm:$0xf0] }
 0x111   : > { %v4289_v58 = vor.u32 %v4872_v31, %v4286_v19  ;;  %v677_v57 = vrot.slane %v676_v11, 4  ;;  %v681_v49 = vrot.slane %v679_v8, 5  ;;  %v4974_v8 = vld [vmem:[%s6212_s1 + $0x188] sm:$0xff]  ;;  %v4320_v19 = vld [vmem:[#allocation2 + $0x320] sm:$0xf] }
 0x112   : > { %3171 = vmatmul.bf16.gmra.mxu0 %v4257_v53  ;;  %v5935_v16 = vadd.f32 %v3132_v1, %v3044_v0  ;;  %v933_v1 = vsel %vm5573_vm5, %v3908_v10, %v932_v54  ;;  %v667_v50 = vrot.slane %v666_v17, 4  ;;  %v936_v60 = vsel %vm5573_vm5, %v934_v59, %v935_v61  ;;  %v4877_v54 = vld [vmem:[#allocation2 + $0x300] sm:$0xf0]  ;;  %3302 = vmatpush.bf16.msra.mxu2 %v4974_v8 }
 0x113   : > { %1014 = vst [vmem:[#allocation2 + $0x368] sm:$0xf] %v933_v1  ;;  %v682_v4 = vsel %vm5552_vm2, %v677_v57, %v681_v49  ;;  %v4293_v10 = vor.u32 %v4877_v54, %v4292_v47 }
 0x114   : > { %1015 = vst [vmem:[#allocation2 + $0x38c] sm:$0xf] %v936_v60 }
 0x115   : > { %v2956_v53 = vpop.f32.mrf.mxu2  ;;  %v2870_v2 = vpop.f32.mrf.mxu1  ;;  %1146 = vst [vmem:[#allocation2 + $0x32c] sm:$0xf] %v933_v1 }
 0x116   : > { %v2957_v33 = vadd.f32 %v2956_v53, %v2868_v20  ;;  %v2871_v27 = vadd.f32 %v2870_v2, %v5810_v35  ;;  %1147 = vst [vmem:[#allocation2 + $0x350] sm:$0xf] %v936_v60  ;;  %v672_v20 = vsel %vm5552_vm2, %v667_v50, %v671_v12  ;;  %v4314_v12 = vld [vmem:[#allocation2 + $0x33c] sm:$0xf0]  ;;  %v684_v53 = vshrl.u32 %v5423_v23, 16 }
 0x117   : > { %v3134_v14 = vpop.f32.mrf.mxu0  ;;  %v3045_v0 = vpop.f32.mrf.mxu3  ;;  %1278 = vst [vmem:[#allocation2 + $0x2f0] sm:$0xf] %v933_v1  ;;  %v687_v2 = vshll.u32 %v5423_v23, 16  ;;  %v4885_v1 = vld [vmem:[#allocation2 + $0x340] sm:$0xf0]  ;;  %v697_v50 = vshrl.u32 %v5427_v24, 16 }
 0x118   : > { %v3046_v29 = vadd.f32 %v3045_v0, %v2957_v33  ;;  %2909 = vmatmul.bf16.gmra.mxu1 %v4281_v46  ;;  %1279 = vst [vmem:[#allocation2 + $0x314] sm:$0xf] %v936_v60  ;;  %v4880_v46 = vld [vmem:[#allocation2 + $0x31c] sm:$0xf]  ;;  %v939_v33 = vrot.slane %v5342_v43, 5  ;;  %v4982_v60 = vld [vmem:[%s6212_s1 + $0x1c8] sm:$0xff] }
 0x119   : > { %1104 = vst [vmem:[#allocation2 + $0x370] sm:$0xf] %v672_v20  ;;  %v5967_v0 = vld [vmem:[%s5224_s28 + $0xb0] sm:$0x1]  ;;  %v3909_v43 = vrot.slane %v5338_v42, 9  ;;  %3391 = vmatpush.bf16.msra.mxu3 %v4982_v60  ;;  %v699_v54 = vrot.slane %v697_v50, 4 }
 0x11a   : > { %2998 = vmatmul.bf16.gmra.mxu2 %v4285_v9  ;;  %v5947_v35 = vadd.f32 %v3134_v14, %v3046_v29  ;;  %1105 = vst [vmem:[#allocation2 + $0x394] sm:$0xf] %v682_v4  ;;  %v689_v9 = vrot.slane %v687_v2, 5  ;;  %v4966_v14 = vld [vmem:[%s6212_s1 + $0x148] sm:$0xff]  ;;  %v941_v57 = vrot.slane %v939_v33, 4 }
 0x11b   : > { %789 = vst [vmem:[#allocation2 + $0x3ac] sm:$0xf] %v672_v20  ;;  %3213 = vmatpush.bf16.msra.mxu1 %v4966_v14 }
 0x11c   : > { %3087 = vmatmul.bf16.gmra.mxu3 %v4289_v58  ;;  %790 = vst [vmem:[#allocation2 + $0x3d0] sm:$0xf] %v682_v4  ;;  %v4317_v58 = vor.u32 %v4880_v46, %v4314_v12 }
 0x11d   : > { %v2959_v40 = vpop.f32.mrf.mxu2  ;;  %v2872_v45 = vpop.f32.mrf.mxu1  ;;  %1236 = vst [vmem:[#allocation2 + $0x334] sm:$0xf] %v672_v20  ;;  %v942_v20 = vrot.slane %v5933_v32, 5 }
 0x11e   : > { %v2960_v59 = vadd.f32 %v2959_v40, %v2871_v27  ;;  %v2873_v17 = vadd.f32 %v2872_v45, %v5840_v52  ;;  %v693_v52 = vshll.u32 %v5427_v24, 16  ;;  %v686_v27 = vrot.slane %v684_v53, 4  ;;  %1237 = vst [vmem:[#allocation2 + $0x358] sm:$0xf] %v682_v4 }
 0x11f   : > { %v3137_v61 = vpop.f32.mrf.mxu0  ;;  %v3048_v11 = vpop.f32.mrf.mxu3  ;;  %v703_v40 = vshll.u32 %v5967_v0, 16  ;;  %v940_v4 = vsel %vm5573_vm5, %v3909_v43, %v939_v33  ;;  %v943_v8 = vsel %vm5573_vm5, %v941_v57, %v942_v20  ;;  %v4328_v33 = vld [vmem:[#allocation2 + $0x328] sm:$0xf] }
 0x120   : > { %v3049_v31 = vadd.f32 %v3048_v11, %v2960_v59  ;;  %v690_v49 = vor.u32 %v689_v9, %v686_v27  ;;  %v695_v47 = vrot.slane %v693_v52, 5  ;;  %v4321_v59 = vor.u32 %v4885_v1, %v4320_v19  ;;  %v4881_v11 = vld [vmem:[#allocation2 + $0x324] sm:$0xf]  ;;  %1016 = vst [vmem:[#allocation2 + $0x3b0] sm:$0xf] %v940_v4 }
 0x121   : > { %1017 = vst [vmem:[#allocation2 + $0x3d4] sm:$0xf] %v943_v8  ;;  %v4886_v27 = vld [vmem:[#allocation2 + $0x348] sm:$0xf0] }
 0x122   : > { %3176 = vmatmul.bf16.gmra.mxu0 %v4293_v10  ;;  %v5969_v29 = vadd.f32 %v3137_v61, %v3049_v31  ;;  %v4322_v61 = vld [vmem:[#allocation2 + $0x344] sm:$0xf0]  ;;  %v691_v46 = vrot.slane %v690_v49, 4  ;;  %v700_v32 = vor.u32 %v699_v54, %v695_v47  ;;  %1148 = vst [vmem:[#allocation2 + $0x374] sm:$0xf] %v940_v4  ;;  %v708_v54 = vshrl.u32 %v5513_v22, 16 }
 0x123   : > { %v4990_v31 = vld [vmem:[%s6212_s1 + $0x208] sm:$0xff]  ;;  %v4325_v1 = vor.u32 %v4881_v11, %v4322_v61  ;;  %1149 = vst [vmem:[#allocation2 + $0x398] sm:$0xf] %v943_v8  ;;  %v721_v11 = vshrl.u32 %v5517_v25, 16 }
 0x124   : > { %v701_v52 = vrot.slane %v700_v32, 4  ;;  %3480 = vmatpush.bf16.msra.mxu0 %v4990_v31  ;;  %1280 = vst [vmem:[#allocation2 + $0x338] sm:$0xf] %v940_v4  ;;  %v4356_v61 = vld [vmem:[#allocation2 + $0x368] sm:$0xf]  ;;  %v710_v4 = vrot.slane %v708_v54, 4 }
 0x125   : > { %v2961_v45 = vpop.f32.mrf.mxu2  ;;  %v2875_v10 = vpop.f32.mrf.mxu1  ;;  %1281 = vst [vmem:[#allocation2 + $0x35c] sm:$0xf] %v943_v8  ;;  %v723_v8 = vrot.slane %v721_v11, 4 }
 0x126   : > { %v2962_v42 = vadd.f32 %v2961_v45, %v2873_v17  ;;  %v2876_v12 = vadd.f32 %v2875_v10, %v5859_v34  ;;  %v705_v17 = vrot.slane %v703_v40, 5  ;;  %v696_v34 = vsel %vm5552_vm2, %v691_v46, %v695_v47  ;;  %v4889_v47 = vld [vmem:[#allocation2 + $0x364] sm:$0xf]  ;;  %v4350_v10 = vld [vmem:[#allocation2 + $0x384] sm:$0xf0] }
 0x127   : > { %v3139_v53 = vpop.f32.mrf.mxu0  ;;  %v3050_v2 = vpop.f32.mrf.mxu3  ;;  %1106 = vst [vmem:[#allocation2 + $0x3b8] sm:$0xf] %v696_v34  ;;  %v711_v40 = vshll.u32 %v5513_v22, 16 }
 0x128   : > { %v3051_v19 = vadd.f32 %v3050_v2, %v2962_v42  ;;  %2914 = vmatmul.bf16.gmra.mxu1 %v4317_v58  ;;  %v706_v9 = vsel %vm5552_vm2, %v701_v52, %v705_v17  ;;  %v4329_v58 = vor.u32 %v4886_v27, %v4328_v33  ;;  %791 = vst [vmem:[#allocation2 + $0x3f4] sm:$0xf] %v696_v34  ;;  %v5995_v42 = vld [vmem:[%s5224_s28 + $0xbc] sm:$0x1]  ;;  %v3910_v2 = vrot.slane %v5423_v23, 9 }
 0x129   : > { %1107 = vst [vmem:[#allocation2 + $0x3dc] sm:$0xf] %v706_v9  ;;  %v713_v46 = vrot.slane %v711_v40, 5  ;;  %v949_v52 = vrot.slane %v5967_v0, 5  ;;  %v727_v17 = vshll.u32 %v5995_v42, 16 }
 0x12a   : > { %3003 = vmatmul.bf16.gmra.mxu2 %v4321_v59  ;;  %v5984_v50 = vadd.f32 %v3139_v53, %v3051_v19  ;;  %v717_v59 = vshll.u32 %v5517_v25, 16  ;;  %792 = vst [vmem:[#allocation2 + $0x418] sm:$0xf] %v706_v9  ;;  %v4894_v53 = vld [vmem:[#allocation2 + $0x388] sm:$0xf0] }
 0x12b   : > { %1238 = vst [vmem:[#allocation2 + $0x37c] sm:$0xf] %v696_v34  ;;  %v714_v19 = vor.u32 %v713_v46, %v710_v4  ;;  %v4890_v27 = vld [vmem:[#allocation2 + $0x36c] sm:$0xf]  ;;  %v729_v40 = vrot.slane %v727_v17, 5 }
 0x12c   : > { %3092 = vmatmul.bf16.gmra.mxu3 %v4325_v1  ;;  %1239 = vst [vmem:[#allocation2 + $0x3a0] sm:$0xf] %v706_v9  ;;  %v4353_v1 = vor.u32 %v4889_v47, %v4350_v10  ;;  %v4357_v9 = vor.u32 %v4894_v53, %v4356_v61  ;;  %v4364_v10 = vld [vmem:[#allocation2 + $0x370] sm:$0xf] }
 0x12d   : > { %v2964_v60 = vpop.f32.mrf.mxu2  ;;  %v2877_v14 = vpop.f32.mrf.mxu1  ;;  %v4386_v53 = vld [vmem:[#allocation2 + $0x3cc] sm:$0xf0] }
 0x12e   : > { %v2965_v43 = vadd.f32 %v2964_v60, %v2876_v12  ;;  %v2878_v57 = vadd.f32 %v2877_v14, %v5880_v15  ;;  %v946_v15 = vrot.slane %v5427_v24, 5  ;;  %v719_v12 = vrot.slane %v717_v59, 5  ;;  %v4358_v60 = vld [vmem:[#allocation2 + $0x38c] sm:$0xf0]  ;;  %v4895_v59 = vld [vmem:[#allocation2 + $0x390] sm:$0xf0] }
 0x12f   : > { %v3142_v49 = vpop.f32.mrf.mxu0  ;;  %v3053_v20 = vpop.f32.mrf.mxu3  ;;  %v4361_v47 = vor.u32 %v4890_v27, %v4358_v60  ;;  %v4365_v46 = vor.u32 %v4895_v59, %v4364_v10 }
 0x130   : > { %v3054_v45 = vadd.f32 %v3053_v20, %v2965_v43  ;;  %v948_v31 = vrot.slane %v946_v15, 4  ;;  %v724_v24 = vor.u32 %v723_v8, %v719_v12  ;;  %v947_v14 = vsel %vm5573_vm5, %v3910_v2, %v946_v15  ;;  %v4898_v8 = vld [vmem:[#allocation2 + $0x3ac] sm:$0xf] }
 0x131   : > { %1018 = vst [vmem:[#allocation2 + $0x3f8] sm:$0xf] %v947_v14 }
 0x132   : > { %3181 = vmatmul.bf16.gmra.mxu0 %v4329_v58  ;;  %v5997_v32 = vadd.f32 %v3142_v49, %v3054_v45  ;;  %v715_v58 = vrot.slane %v714_v19, 4  ;;  %v950_v23 = vsel %vm5573_vm5, %v948_v31, %v949_v52  ;;  %1150 = vst [vmem:[#allocation2 + $0x3bc] sm:$0xf] %v947_v14  ;;  %v725_v54 = vrot.slane %v724_v24, 4  ;;  %v4973_v19 = vld [vmem:[%s6212_s1 + $0x180] sm:$0xff] }
 0x133   : > { %1019 = vst [vmem:[#allocation2 + $0x41c] sm:$0xf] %v950_v23  ;;  %v4392_v52 = vld [vmem:[#allocation2 + $0x3b0] sm:$0xf]  ;;  %v6020_v24 = vld [vmem:[%s5224_s28 + $0xc4] sm:$0xf]  ;;  %3303 = vmatpush.bf16.msra.mxu2 %v4973_v19 }
 0x134   : > { %1151 = vst [vmem:[#allocation2 + $0x3e0] sm:$0xf] %v950_v23  ;;  %v720_v45 = vsel %vm5552_vm2, %v715_v58, %v719_v12  ;;  %v730_v61 = vsel %vm5552_vm2, %v725_v54, %v729_v40  ;;  %v1064_v27 = vshll.u32 %v6020_v24, 16  ;;  %v1068_v60 = vshrl.u32 %v6020_v24, 16  ;;  %v4981_v58 = vld [vmem:[%s6212_s1 + $0x1c0] sm:$0xff] }
 0x135   : > { %v2966_v33 = vpop.f32.mrf.mxu2  ;;  %v2880_v34 = vpop.f32.mrf.mxu1  ;;  %1282 = vst [vmem:[#allocation2 + $0x380] sm:$0xf] %v947_v14  ;;  %v4903_v14 = vld [vmem:[#allocation2 + $0x3d0] sm:$0xf0]  ;;  %3392 = vmatpush.bf16.msra.mxu3 %v4981_v58  ;;  %v956_v54 = vrot.slane %v5995_v42, 5 }
 0x136   : > { %v2967_v43 = vadd.f32 %v2966_v33, %v2878_v57  ;;  %1283 = vst [vmem:[#allocation2 + $0x3a4] sm:$0xf] %v950_v23  ;;  %v2881_v11 = vadd.f32 %v2880_v34, %v5701_v5  ;;  %v6017_v5 = vld [vmem:[%s5224_s28 + $0xc0] sm:$0xf]  ;;  %v953_v34 = vrot.slane %v5517_v25, 5  ;;  %v4389_v25 = vor.u32 %v4898_v8, %v4386_v53 }
 0x137   : > { %v3144_v49 = vpop.f32.mrf.mxu0  ;;  %v3055_v20 = vpop.f32.mrf.mxu3  ;;  %1108 = vst [vmem:[#allocation2 + $0x400] sm:$0xf] %v720_v45  ;;  %v1055_v17 = vshrl.u32 %v6017_v5, 16  ;;  %v1058_v33 = vshll.u32 %v6017_v5, 16  ;;  %v1066_v10 = vrot.slane %v1064_v27, 5 }
 0x138   : > { %v3056_v0 = vadd.f32 %v3055_v20, %v2967_v43  ;;  %2919 = vmatmul.bf16.gmra.mxu1 %v4353_v1  ;;  %1109 = vst [vmem:[#allocation2 + $0x424] sm:$0xf] %v730_v61  ;;  %v4965_v43 = vld [vmem:[%s6212_s1 + $0x140] sm:$0xff]  ;;  %v3911_v20 = vrot.slane %v5513_v22, 9  ;;  %v1070_v22 = vrot.slane %v1068_v60, 4 }
 0x139   : > { %793 = vst [vmem:[#allocation2 + $0x43c] sm:$0xf] %v720_v45  ;;  %3214 = vmatpush.bf16.msra.mxu1 %v4965_v43  ;;  %v1057_v40 = vrot.slane %v1055_v17, 4  ;;  %v4400_v27 = vld [vmem:[#allocation2 + $0x3b8] sm:$0xf] }
 0x13a   : > { %3008 = vmatmul.bf16.gmra.mxu2 %v4357_v9  ;;  %v6008_v57 = vadd.f32 %v3144_v49, %v3056_v0  ;;  %794 = vst [vmem:[#allocation2 + $0x460] sm:$0xf] %v730_v61  ;;  %v4899_v49 = vld [vmem:[#allocation2 + $0x3b4] sm:$0xf]  ;;  %v955_v0 = vrot.slane %v953_v34, 4 }
 0x13b   : > { %1240 = vst [vmem:[#allocation2 + $0x3c4] sm:$0xf] %v720_v45  ;;  %v1060_v45 = vrot.slane %v1058_v33, 5  ;;  %v4904_v60 = vld [vmem:[#allocation2 + $0x3d8] sm:$0xf0] }
 0x13c   : > { %3097 = vmatmul.bf16.gmra.mxu3 %v4361_v47  ;;  %1241 = vst [vmem:[#allocation2 + $0x3e8] sm:$0xf] %v730_v61  ;;  %v308_v47 = vld [vmem:[%s5224_s28 + $0xc8] sm:$0x1]  ;;  %v954_v61 = vsel %vm5573_vm5, %v3911_v20, %v953_v34 }
 0x13d   : > { %v2969_v15 = vpop.f32.mrf.mxu2  ;;  %v2882_v4 = vpop.f32.mrf.mxu1  ;;  %1052 = vst [vmem:[#allocation2 + $0x444] sm:$0xf] %v6017_v5  ;;  %v1061_v42 = vor.u32 %v1060_v45, %v1057_v40  ;;  %v4422_v40 = vld [vmem:[#allocation2 + $0x414] sm:$0xf0] }
 0x13e   : > { %v2970_v12 = vadd.f32 %v2969_v15, %v2881_v11  ;;  %v2883_v23 = vadd.f32 %v2882_v4, %v5713_v21  ;;  %v4393_v15 = vor.u32 %v4903_v14, %v4392_v52  ;;  %v4394_v21 = vld [vmem:[#allocation2 + $0x3d4] sm:$0xf0]  ;;  %1053 = vst [vmem:[#allocation2 + $0x468] sm:$0xf] %v6020_v24 }
 0x13f   : > { %v3147_v2 = vpop.f32.mrf.mxu0  ;;  %v3058_v31 = vpop.f32.mrf.mxu3  ;;  %1020 = vst [vmem:[#allocation2 + $0x440] sm:$0xf] %v954_v61  ;;  %v1062_v52 = vrot.slane %v1061_v42, 4 }
 0x140   : > { %v3059_v1 = vadd.f32 %v3058_v31, %v2970_v12  ;;  %v1074_v12 = vshll.u32 %v308_v47, 16  ;;  %v1071_v31 = vor.u32 %v1070_v22, %v1066_v10  ;;  %1152 = vst [vmem:[#allocation2 + $0x404] sm:$0xf] %v954_v61  ;;  %v4908_v22 = vld [vmem:[#allocation2 + $0x3fc] sm:$0xf] }
 0x141   : > { %1284 = vst [vmem:[#allocation2 + $0x3c8] sm:$0xf] %v954_v61 }
 0x142   : > { %3186 = vmatmul.bf16.gmra.mxu0 %v4365_v46  ;;  %v6033_v9 = vadd.f32 %v3147_v2, %v3059_v1  ;;  %v957_v46 = vsel %vm5573_vm5, %v955_v0, %v956_v54  ;;  %v4989_v2 = vld [vmem:[%s6212_s1 + $0x200] sm:$0xff]  ;;  %v4397_v1 = vor.u32 %v4899_v49, %v4394_v21  ;;  %v1072_v17 = vrot.slane %v1071_v31, 4  ;;  %1184 = vst [vmem:[#allocation2 + $0x408] sm:$0xf] %v6017_v5 }
 0x143   : > { %1021 = vst [vmem:[#allocation2 + $0x464] sm:$0xf] %v957_v46  ;;  %3481 = vmatpush.bf16.msra.mxu0 %v4989_v2  ;;  %v1076_v33 = vrot.slane %v1074_v12, 5 }
 0x144   : > { %1153 = vst [vmem:[#allocation2 + $0x428] sm:$0xf] %v957_v46 }
 0x145   : > { %v2971_v59 = vpop.f32.mrf.mxu2  ;;  %v2885_v11 = vpop.f32.mrf.mxu1  ;;  %1285 = vst [vmem:[#allocation2 + $0x3ec] sm:$0xf] %v957_v46  ;;  %v1077_v20 = vsel %vm5552_vm2, %v1072_v17, %v1076_v33 }
 0x146   : > { %v2972_v4 = vadd.f32 %v2971_v59, %v2883_v23  ;;  %v2886_v14 = vadd.f32 %v2885_v11, %v5732_v3  ;;  %v1067_v23 = vsel %vm5552_vm2, %v1062_v52, %v1066_v10  ;;  %1185 = vst [vmem:[#allocation2 + $0x42c] sm:$0xf] %v6020_v24  ;;  %v4907_v3 = vld [vmem:[#allocation2 + $0x3f4] sm:$0xf]  ;;  %v4428_v59 = vld [vmem:[#allocation2 + $0x3f8] sm:$0xf] }
 0x147   : > { %v3149_v8 = vpop.f32.mrf.mxu0  ;;  %v3060_v53 = vpop.f32.mrf.mxu3  ;;  %1110 = vst [vmem:[#allocation2 + $0x448] sm:$0xf] %v1067_v23  ;;  %v4912_v10 = vld [vmem:[#allocation2 + $0x418] sm:$0xf0] }
 0x148   : > { %v3061_v19 = vadd.f32 %v3060_v53, %v2972_v4  ;;  %2924 = vmatmul.bf16.gmra.mxu1 %v4389_v25  ;;  %v4401_v25 = vor.u32 %v4904_v60, %v4400_v27  ;;  %1111 = vst [vmem:[#allocation2 + $0x46c] sm:$0xf] %v1077_v20  ;;  %v4430_v4 = vld [vmem:[#allocation2 + $0x41c] sm:$0xf0]  ;;  %v4429_v42 = vor.u32 %v4912_v10, %v4428_v59 }
 0x149   : > { %1242 = vst [vmem:[#allocation2 + $0x40c] sm:$0xf] %v1067_v23  ;;  %v4433_v2 = vor.u32 %v4908_v22, %v4430_v4  ;;  %v4458_v23 = vld [vmem:[#allocation2 + $0x45c] sm:$0xf0] }
 0x14a   : > { %3013 = vmatmul.bf16.gmra.mxu2 %v4393_v15  ;;  %v6048_v34 = vadd.f32 %v3149_v8, %v3061_v19  ;;  %1243 = vst [vmem:[#allocation2 + $0x430] sm:$0xf] %v1077_v20  ;;  %v4425_v15 = vor.u32 %v4907_v3, %v4422_v40  ;;  %v4436_v19 = vld [vmem:[#allocation2 + $0x400] sm:$0xf]  ;;  %v4921_v20 = vld [vmem:[#allocation2 + $0x460] sm:$0xf0] }
 0x14b   : > { %v4917_v3 = vld [vmem:[#allocation2 + $0x444] sm:$0xf]  ;;  %v4466_v40 = vld [vmem:[#allocation2 + $0x464] sm:$0xf0] }
 0x14c   : > { %3102 = vmatmul.bf16.gmra.mxu3 %v4397_v1  ;;  %v4913_v1 = vld [vmem:[#allocation2 + $0x420] sm:$0xf0] }
 0x14d   : > { %v2974_v58 = vpop.f32.mrf.mxu2  ;;  %v2887_v43 = vpop.f32.mrf.mxu1  ;;  %v4437_v33 = vor.u32 %v4913_v1, %v4436_v19 }
 0x14e   : > { %v2975_v49 = vadd.f32 %v2974_v58, %v2886_v14  ;;  %v2888_v11 = vadd.f32 %v2887_v43, %v5761_v41  ;;  %v4916_v43 = vld [vmem:[#allocation2 + $0x43c] sm:$0xf]  ;;  %v4472_v4 = vld [vmem:[#allocation2 + $0x448] sm:$0xf] }
 0x14f   : > { %v3152_v0 = vpop.f32.mrf.mxu0  ;;  %v3063_v47 = vpop.f32.mrf.mxu3 }
 0x150   : > { %v3064_v54 = vadd.f32 %v3063_v47, %v2975_v49  ;;  %v4464_v49 = vld [vmem:[#allocation2 + $0x440] sm:$0xf]  ;;  %v4461_v47 = vor.u32 %v4916_v43, %v4458_v23  ;;  %v4784_v43 = vld [vmem:[#allocation2 + $0x1c] sm:$0xf] }
 0x151   : > { %v4465_v10 = vor.u32 %v4921_v20, %v4464_v49  ;;  %v3942_v23 = vld [vmem:[#allocation2 + $0x3c] sm:$0xf0] }
 0x152   : > { %3191 = vmatmul.bf16.gmra.mxu0 %v4401_v25  ;;  %v6057_v45 = vadd.f32 %v3152_v0, %v3064_v54 }
 0x155   : > { %v2976_v21 = vpop.f32.mrf.mxu2  ;;  %v2890_v61 = vpop.f32.mrf.mxu1 }
 0x156   : > { %v2977_v46 = vadd.f32 %v2976_v21, %v2888_v11  ;;  %v2891_v52 = vadd.f32 %v2890_v61, %v5783_v26  ;;  %v4469_v61 = vor.u32 %v4917_v3, %v4466_v40  ;;  %v3948_v40 = vld [vmem:[#allocation2 + $0x20] sm:$0xf] }
 0x157   : > { %v3154_v12 = vpop.f32.mrf.mxu0  ;;  %v3065_v8 = vpop.f32.mrf.mxu3 }
 0x158   : > { %v3066_v53 = vadd.f32 %v3065_v8, %v2977_v46  ;;  %2929 = vmatmul.bf16.gmra.mxu1 %v4425_v15  ;;  %v4922_v46 = vld [vmem:[#allocation2 + $0x468] sm:$0xf0] }
 0x159   : > { %v4473_v8 = vor.u32 %v4922_v46, %v4472_v4 }
 0x15a   : > { %3018 = vmatmul.bf16.gmra.mxu2 %v4429_v42  ;;  %v6060_v31 = vadd.f32 %v3154_v12, %v3066_v53 }
 0x15c   : > { %3107 = vmatmul.bf16.gmra.mxu3 %v4433_v2 }
 0x15d   : > { %v2979_v41 = vpop.f32.mrf.mxu2  ;;  %v2892_v17 = vpop.f32.mrf.mxu1 }
 0x15e   : > { %v2980_v27 = vadd.f32 %v2979_v41, %v2891_v52  ;;  %v2893_v0 = vadd.f32 %v2892_v17, %v5806_v18  ;;  %v4783_v52 = vld [vmem:[#allocation2 + $0x14] sm:$0xf]  ;;  %v3934_v41 = vld [vmem:[#allocation2 + $0x34] sm:$0xf0] }
 0x15f   : > { %v3157_v60 = vpop.f32.mrf.mxu0  ;;  %v3068_v14 = vpop.f32.mrf.mxu3 }
 0x160   : > { %v3069_v58 = vadd.f32 %v3068_v14, %v2980_v27  ;;  %v4788_v27 = vld [vmem:[#allocation2 + $0x38] sm:$0xf0]  ;;  %v3937_v14 = vor.u32 %v4783_v52, %v3934_v41  ;;  %v4793_v52 = vld [vmem:[#allocation2 + $0x64] sm:$0xf]  ;;  %v3978_v41 = vld [vmem:[#allocation2 + $0x84] sm:$0xf0] }
 0x162   : > { %3196 = vmatmul.bf16.gmra.mxu0 %v4437_v33  ;;  %v6063_v25 = vadd.f32 %v3157_v60, %v3069_v58  ;;  %v3940_v33 = vld [vmem:[#allocation2 + $0x18] sm:$0xf] }
 0x163   : > { %v3941_v20 = vor.u32 %v4788_v27, %v3940_v33 }
 0x165   : > { %v2981_v54 = vpop.f32.mrf.mxu2  ;;  %v2895_v26 = vpop.f32.mrf.mxu1 }
 0x166   : > { %v2982_v59 = vadd.f32 %v2981_v54, %v2893_v0  ;;  %v2896_v42 = vadd.f32 %v2895_v26, %v5825_v36  ;;  %v3945_v26 = vor.u32 %v4784_v43, %v3942_v23  ;;  %v3984_v23 = vld [vmem:[#allocation2 + $0x68] sm:$0xf] }
 0x167   : > { %v3159_v11 = vpop.f32.mrf.mxu0  ;;  %v3070_v15 = vpop.f32.mrf.mxu3 }
 0x168   : > { %v3071_v21 = vadd.f32 %v3070_v15, %v2982_v59  ;;  %2934 = vmatmul.bf16.gmra.mxu1 %v4461_v47  ;;  %v4789_v59 = vld [vmem:[#allocation2 + $0x40] sm:$0xf0] }
 0x169   : > { %v3949_v15 = vor.u32 %v4789_v59, %v3948_v40 }
 0x16a   : > { %3023 = vmatmul.bf16.gmra.mxu2 %v4465_v10  ;;  %v6066_v22 = vadd.f32 %v3159_v11, %v3071_v21 }
 0x16c   : > { %3112 = vmatmul.bf16.gmra.mxu3 %v4469_v61 }
 0x16d   : > { %v2984_v18 = vpop.f32.mrf.mxu2  ;;  %v2897_v12 = vpop.f32.mrf.mxu1 }
 0x16e   : > { %v2985_v53 = vadd.f32 %v2984_v18, %v2896_v42  ;;  %v2898_v60 = vadd.f32 %v2897_v12, %v5855_v6  ;;  %v4792_v42 = vld [vmem:[#allocation2 + $0x5c] sm:$0xf]  ;;  %v3970_v18 = vld [vmem:[#allocation2 + $0x7c] sm:$0xf0] }
 0x16f   : > { %v3162_v2 = vpop.f32.mrf.mxu0  ;;  %v3073_v19 = vpop.f32.mrf.mxu3 }
 0x170   : > { %v3074_v1 = vadd.f32 %v3073_v19, %v2985_v53  ;;  %v4797_v53 = vld [vmem:[#allocation2 + $0x80] sm:$0xf0]  ;;  %v3973_v19 = vor.u32 %v4792_v42, %v3970_v18  ;;  %v4802_v42 = vld [vmem:[#allocation2 + $0xac] sm:$0xf]  ;;  %v4014_v18 = vld [vmem:[#allocation2 + $0xcc] sm:$0xf0] }
 0x172   : > { %3201 = vmatmul.bf16.gmra.mxu0 %v4473_v8  ;;  %v6069_v17 = vadd.f32 %v3162_v2, %v3074_v1  ;;  %v3976_v8 = vld [vmem:[#allocation2 + $0x60] sm:$0xf] }
 0x173   : > { %v3977_v27 = vor.u32 %v4797_v53, %v3976_v8 }
 0x175   : > { %v2986_v58 = vpop.f32.mrf.mxu2  ;;  %v2900_v36 = vpop.f32.mrf.mxu1 }
 0x176   : > { %v2987_v49 = vadd.f32 %v2986_v58, %v2898_v60  ;;  %v2901_v10 = vadd.f32 %v2900_v36, %v5707_v37  ;;  %v3981_v36 = vor.u32 %v4793_v52, %v3978_v41  ;;  %v4020_v41 = vld [vmem:[#allocation2 + $0xb0] sm:$0xf] }
 0x177   : > { %v3164_v0 = vpop.f32.mrf.mxu0  ;;  %v3075_v47 = vpop.f32.mrf.mxu3 }
 0x178   : > { %v3076_v54 = vadd.f32 %v3075_v47, %v2987_v49  ;;  %3215 = vmatmul.bf16.vlgmr.msra.gmra.mxu1 %v3937_v14  ;;  %v4798_v49 = vld [vmem:[#allocation2 + $0x88] sm:$0xf0] }
 0x179   : > { %v3985_v47 = vor.u32 %v4798_v49, %v3984_v23 }
 0x17a   : > { %3304 = vmatmul.bf16.vlgmr.msra.gmra.mxu2 %v3941_v20  ;;  %v6072_v3 = vadd.f32 %v3164_v0, %v3076_v54 }
 0x17c   : > { %3393 = vmatmul.bf16.vlgmr.msra.gmra.mxu3 %v3945_v26 }
 0x17d   : > { %v2989_v6 = vpop.f32.mrf.mxu2  ;;  %v2902_v11 = vpop.f32.mrf.mxu1 }
 0x17e   : > { %v2990_v21 = vadd.f32 %v2989_v6, %v2901_v10  ;;  %v2903_v2 = vadd.f32 %v2902_v11, %v5730_v63  ;;  %v4801_v10 = vld [vmem:[#allocation2 + $0xa4] sm:$0xf]  ;;  %v4006_v6 = vld [vmem:[#allocation2 + $0xc4] sm:$0xf0] }
 0x17f   : > { %v3167_v61 = vpop.f32.mrf.mxu0  ;;  %v3078_v4 = vpop.f32.mrf.mxu3 }
 0x180   : > { %v3079_v46 = vadd.f32 %v3078_v4, %v2990_v21  ;;  %v4806_v21 = vld [vmem:[#allocation2 + $0xc8] sm:$0xf0]  ;;  %v4009_v4 = vor.u32 %v4801_v10, %v4006_v6  ;;  %v4811_v10 = vld [vmem:[#allocation2 + $0xf4] sm:$0xf]  ;;  %v4050_v6 = vld [vmem:[#allocation2 + $0x114] sm:$0xf0] }
 0x182   : > { %3482 = vmatmul.bf16.vlgmr.msra.gmra.mxu0 %v3949_v15  ;;  %v6075_v12 = vadd.f32 %v3167_v61, %v3079_v46  ;;  %v4012_v15 = vld [vmem:[#allocation2 + $0xa8] sm:$0xf] }
 0x183   : > { %v4013_v53 = vor.u32 %v4806_v21, %v4012_v15 }
 0x185   : > { %v2991_v1 = vpop.f32.mrf.mxu2  ;;  %v2905_v37 = vpop.f32.mrf.mxu1 }
 0x186   : > { %v2992_v33 = vadd.f32 %v2991_v1, %v2903_v2  ;;  %v2906_v20 = vadd.f32 %v2905_v37, %v5749_v13  ;;  %v4017_v37 = vor.u32 %v4802_v42, %v4014_v18  ;;  %v4056_v18 = vld [vmem:[#allocation2 + $0xf8] sm:$0xf] }
 0x187   : > { %v3169_v60 = vpop.f32.mrf.mxu0  ;;  %v3080_v14 = vpop.f32.mrf.mxu3 }
 0x188   : > { %v3081_v58 = vadd.f32 %v3080_v14, %v2992_v33  ;;  %3220 = vmatmul.bf16.gmra.mxu1 %v3973_v19  ;;  %v4807_v33 = vld [vmem:[#allocation2 + $0xd0] sm:$0xf0] }
 0x189   : > { %v4021_v14 = vor.u32 %v4807_v33, %v4020_v41 }
 0x18a   : > { %3309 = vmatmul.bf16.gmra.mxu2 %v3977_v27  ;;  %v6078_v43 = vadd.f32 %v3169_v60, %v3081_v58 }
 0x18c   : > { %3398 = vmatmul.bf16.gmra.mxu3 %v3981_v36 }
 0x18d   : > { %v2994_v63 = vpop.f32.mrf.mxu2  ;;  %v2907_v0 = vpop.f32.mrf.mxu1 }
 0x18e   : > { %v2995_v54 = vadd.f32 %v2994_v63, %v2906_v20  ;;  %v2908_v61 = vadd.f32 %v2907_v0, %v5779_v51  ;;  %v4810_v20 = vld [vmem:[#allocation2 + $0xec] sm:$0xf]  ;;  %v4042_v63 = vld [vmem:[#allocation2 + $0x10c] sm:$0xf0] }
 0x18f   : > { %v3172_v26 = vpop.f32.mrf.mxu0  ;;  %v3083_v40 = vpop.f32.mrf.mxu3 }
 0x190   : > { %v3084_v59 = vadd.f32 %v3083_v40, %v2995_v54  ;;  %v4815_v54 = vld [vmem:[#allocation2 + $0x110] sm:$0xf0]  ;;  %v4045_v40 = vor.u32 %v4810_v20, %v4042_v63  ;;  %v4820_v20 = vld [vmem:[#allocation2 + $0x13c] sm:$0xf]  ;;  %v4086_v63 = vld [vmem:[#allocation2 + $0x15c] sm:$0xf0] }
 0x192   : > { %3487 = vmatmul.bf16.gmra.mxu0 %v3985_v47  ;;  %v6081_v11 = vadd.f32 %v3172_v26, %v3084_v59  ;;  %v4048_v47 = vld [vmem:[#allocation2 + $0xf0] sm:$0xf] }
 0x193   : > { %v4049_v21 = vor.u32 %v4815_v54, %v4048_v47 }
 0x195   : > { %v2996_v46 = vpop.f32.mrf.mxu2  ;;  %v2910_v13 = vpop.f32.mrf.mxu1 }
 0x196   : > { %v2997_v8 = vadd.f32 %v2996_v46, %v2908_v61  ;;  %v2911_v27 = vadd.f32 %v2910_v13, %v5800_v48  ;;  %v4053_v13 = vor.u32 %v4811_v10, %v4050_v6  ;;  %v4092_v6 = vld [vmem:[#allocation2 + $0x140] sm:$0xf] }
 0x197   : > { %v3174_v2 = vpop.f32.mrf.mxu0  ;;  %v3085_v19 = vpop.f32.mrf.mxu3 }
 0x198   : > { %v3086_v1 = vadd.f32 %v3085_v19, %v2997_v8  ;;  %3225 = vmatmul.bf16.gmra.mxu1 %v4009_v4  ;;  %v4816_v8 = vld [vmem:[#allocation2 + $0x118] sm:$0xf0] }
 0x199   : > { %v4057_v19 = vor.u32 %v4816_v8, %v4056_v18 }
 0x19a   : > { %3314 = vmatmul.bf16.gmra.mxu2 %v4013_v53  ;;  %v6084_v52 = vadd.f32 %v3174_v2, %v3086_v1 }
 0x19c   : > { %3403 = vmatmul.bf16.gmra.mxu3 %v4017_v37 }
 0x19d   : > { %v2999_v51 = vpop.f32.mrf.mxu2  ;;  %v2912_v60 = vpop.f32.mrf.mxu1 }
 0x19e   : > { %v3000_v58 = vadd.f32 %v2999_v51, %v2911_v27  ;;  %v2913_v26 = vadd.f32 %v2912_v60, %v5816_v56  ;;  %v4819_v27 = vld [vmem:[#allocation2 + $0x134] sm:$0xf]  ;;  %v4078_v51 = vld [vmem:[#allocation2 + $0x154] sm:$0xf0] }
 0x19f   : > { %v3177_v36 = vpop.f32.mrf.mxu0  ;;  %v3088_v23 = vpop.f32.mrf.mxu3 }
 0x1a0   : > { %v3089_v49 = vadd.f32 %v3088_v23, %v3000_v58  ;;  %v4824_v58 = vld [vmem:[#allocation2 + $0x158] sm:$0xf0]  ;;  %v4081_v23 = vor.u32 %v4819_v27, %v4078_v51  ;;  %v4829_v27 = vld [vmem:[#allocation2 + $0x184] sm:$0xf]  ;;  %v4122_v51 = vld [vmem:[#allocation2 + $0x1a4] sm:$0xf0] }
 0x1a2   : > { %3492 = vmatmul.bf16.gmra.mxu0 %v4021_v14  ;;  %v6087_v0 = vadd.f32 %v3177_v36, %v3089_v49  ;;  %v4084_v14 = vld [vmem:[#allocation2 + $0x138] sm:$0xf] }
 0x1a3   : > { %v4085_v54 = vor.u32 %v4824_v58, %v4084_v14 }
 0x1a5   : > { %v3001_v59 = vpop.f32.mrf.mxu2  ;;  %v2915_v48 = vpop.f32.mrf.mxu1 }
 0x1a6   : > { %v3002_v15 = vadd.f32 %v3001_v59, %v2913_v26  ;;  %v2916_v53 = vadd.f32 %v2915_v48, %v5851_v39  ;;  %v4089_v48 = vor.u32 %v4820_v20, %v4086_v63  ;;  %v4128_v63 = vld [vmem:[#allocation2 + $0x188] sm:$0xf] }
 0x1a7   : > { %v3179_v61 = vpop.f32.mrf.mxu0  ;;  %v3090_v4 = vpop.f32.mrf.mxu3 }
 0x1a8   : > { %v3091_v46 = vadd.f32 %v3090_v4, %v3002_v15  ;;  %3230 = vmatmul.bf16.gmra.mxu1 %v4045_v40  ;;  %v4825_v15 = vld [vmem:[#allocation2 + $0x160] sm:$0xf0] }
 0x1a9   : > { %v4093_v4 = vor.u32 %v4825_v15, %v4092_v6 }
 0x1aa   : > { %3319 = vmatmul.bf16.gmra.mxu2 %v4049_v21  ;;  %v6090_v42 = vadd.f32 %v3179_v61, %v3091_v46 }
 0x1ac   : > { %3408 = vmatmul.bf16.gmra.mxu3 %v4053_v13 }
 0x1ad   : > { %v3004_v56 = vpop.f32.mrf.mxu2  ;;  %v2917_v2 = vpop.f32.mrf.mxu1 }
 0x1ae   : > { %v3005_v1 = vadd.f32 %v3004_v56, %v2916_v53  ;;  %v2918_v36 = vadd.f32 %v2917_v2, %v5871_v7  ;;  %v4828_v53 = vld [vmem:[#allocation2 + $0x17c] sm:$0xf]  ;;  %v4114_v56 = vld [vmem:[#allocation2 + $0x19c] sm:$0xf0] }
 0x1af   : > { %v3182_v37 = vpop.f32.mrf.mxu0  ;;  %v3093_v41 = vpop.f32.mrf.mxu3 }
 0x1b0   : > { %v3094_v33 = vadd.f32 %v3093_v41, %v3005_v1  ;;  %v4833_v1 = vld [vmem:[#allocation2 + $0x1a0] sm:$0xf0]  ;;  %v4117_v41 = vor.u32 %v4828_v53, %v4114_v56 }
 0x1b2   : > { %3497 = vmatmul.bf16.gmra.mxu0 %v4057_v19  ;;  %v6093_v60 = vadd.f32 %v3182_v37, %v3094_v33  ;;  %v4120_v19 = vld [vmem:[#allocation2 + $0x180] sm:$0xf] }
 0x1b3   : > { %v4121_v58 = vor.u32 %v4833_v1, %v4120_v19  ;;  %v4838_v1 = vld [vmem:[#allocation2 + $0x1cc] sm:$0xf] }
 0x1b5   : > { %v3006_v49 = vpop.f32.mrf.mxu2  ;;  %v2920_v39 = vpop.f32.mrf.mxu1 }
 0x1b6   : > { %v3007_v47 = vadd.f32 %v3006_v49, %v2918_v36  ;;  %v2921_v21 = vadd.f32 %v2920_v39, %v5721_v44  ;;  %v4125_v39 = vor.u32 %v4829_v27, %v4122_v51 }
 0x1b7   : > { %v3184_v26 = vpop.f32.mrf.mxu0  ;;  %v3095_v40 = vpop.f32.mrf.mxu3 }
 0x1b8   : > { %v3096_v59 = vadd.f32 %v3095_v40, %v3007_v47  ;;  %3235 = vmatmul.bf16.gmra.mxu1 %v4081_v23  ;;  %v4834_v47 = vld [vmem:[#allocation2 + $0x1a8] sm:$0xf0] }
 0x1ba   : > { %3324 = vmatmul.bf16.gmra.mxu2 %v4085_v54  ;;  %v6096_v10 = vadd.f32 %v3184_v26, %v3096_v59  ;;  %v6226_v54 = vld [vmem:[#allocation3_spill] sm:$0xff]  ;;  %v4129_v59 = vor.u32 %v4834_v47, %v4128_v63 }
 0x1bc   : > { %3413 = vmatmul.bf16.gmra.mxu3 %v4089_v48 }
 0x1bd   : > { %v3009_v7 = vpop.f32.mrf.mxu2  ;;  %v2922_v61 = vpop.f32.mrf.mxu1 }
 0x1be   : > { %v3010_v46 = vadd.f32 %v3009_v7, %v2921_v21  ;;  %v2923_v37 = vadd.f32 %v2922_v61, %v5743_v55  ;;  %v4837_v7 = vld [vmem:[#allocation2 + $0x1c4] sm:$0xf]  ;;  %v4150_v61 = vld [vmem:[#allocation2 + $0x1e4] sm:$0xf0] }
 0x1bf   : > { %v3187_v13 = vpop.f32.mrf.mxu0  ;;  %v3098_v18 = vpop.f32.mrf.mxu3  ;;  %v4153_v53 = vor.u32 %v4837_v7, %v4150_v61  ;;  %v4851_v7 = vld [vmem:[#allocation2 + $0x230] sm:$0xf0]  ;;  %v6229_v61 = vld [vmem:[#allocation6_spill] sm:$0xff] }
 0x1c0   : > { %v3099_v8 = vadd.f32 %v3098_v18, %v3010_v46  ;;  %v4156_v46 = vld [vmem:[#allocation2 + $0x1c8] sm:$0xf] }
 0x1c1   : > { %v6227_v18 = vld [vmem:[#allocation4_spill] sm:$0xff] }
 0x1c2   : > { %3502 = vmatmul.bf16.gmra.mxu0 %v4093_v4  ;;  %v6099_v2 = vadd.f32 %v3187_v13, %v3099_v8  ;;  %v4842_v13 = vld [vmem:[#allocation2 + $0x1e8] sm:$0xf0] }
 0x1c5   : > { %v3011_v33 = vpop.f32.mrf.mxu2  ;;  %v2925_v44 = vpop.f32.mrf.mxu1 }
 0x1c6   : > { %v3012_v14 = vadd.f32 %v3011_v33, %v2923_v37  ;;  %v2926_v26 = vadd.f32 %v2925_v44, %v6226_v54  ;;  %v4158_v37 = vld [vmem:[#allocation2 + $0x1ec] sm:$0xf0]  ;;  %v4157_v33 = vor.u32 %v4842_v13, %v4156_v46 }
 0x1c7   : > { %v3189_v36 = vpop.f32.mrf.mxu0  ;;  %v3100_v23 = vpop.f32.mrf.mxu3 }
 0x1c8   : > { %v3101_v49 = vadd.f32 %v3100_v23, %v3012_v14  ;;  %3240 = vmatmul.bf16.gmra.mxu1 %v4117_v41  ;;  %v4161_v14 = vor.u32 %v4838_v1, %v4158_v37  ;;  %v4843_v23 = vld [vmem:[#allocation2 + $0x1f0] sm:$0xf0] }
 0x1ca   : > { %3329 = vmatmul.bf16.gmra.mxu2 %v4121_v58  ;;  %v6102_v20 = vadd.f32 %v3189_v36, %v3101_v49  ;;  %v4164_v36 = vld [vmem:[#allocation2 + $0x1d0] sm:$0xf] }
 0x1cb   : > { %v6228_v49 = vld [vmem:[#allocation5_spill] sm:$0xff]  ;;  %v4165_v54 = vor.u32 %v4843_v23, %v4164_v36  ;;  %v6230_v36 = vld [vmem:[#allocation7_spill] sm:$0xff] }
 0x1cc   : > { %3418 = vmatmul.bf16.gmra.mxu3 %v4125_v39 }
 0x1cd   : > { %v3014_v55 = vpop.f32.mrf.mxu2  ;;  %v2927_v40 = vpop.f32.mrf.mxu1 }
 0x1ce   : > { %v3015_v48 = vadd.f32 %v3014_v55, %v2926_v26  ;;  %v2928_v8 = vadd.f32 %v2927_v40, %v6227_v18 }
 0x1cf   : > { %v3192_v6 = vpop.f32.mrf.mxu0  ;;  %v3103_v15 = vpop.f32.mrf.mxu3 }
 0x1d0   : > { %v3104_v21 = vadd.f32 %v3103_v15, %v3015_v48  ;;  %v4846_v48 = vld [vmem:[#allocation2 + $0x20c] sm:$0xf] }
 0x1d2   : > { %3507 = vmatmul.bf16.gmra.mxu0 %v4129_v59  ;;  %v6105_v4 = vadd.f32 %v3192_v6, %v3104_v21  ;;  %v4186_v6 = vld [vmem:[#allocation2 + $0x22c] sm:$0xf0] }
 0x1d3   : > { %v4192_v21 = vld [vmem:[#allocation2 + $0x210] sm:$0xf]  ;;  %v4189_v13 = vor.u32 %v4846_v48, %v4186_v6  ;;  %v4228_v6 = vld [vmem:[#allocation2 + $0x258] sm:$0xf] }
 0x1d4   : > { %v4193_v1 = vor.u32 %v4851_v7, %v4192_v21  ;;  %v4860_v21 = vld [vmem:[#allocation2 + $0x278] sm:$0xf0]  ;;  %v6231_v7 = vld [vmem:[#allocation8_spill] sm:$0xff] }
 0x1d5   : > { %v3016_v56 = vpop.f32.mrf.mxu2  ;;  %v2930_v19 = vpop.f32.mrf.mxu1 }
 0x1d6   : > { %v3017_v41 = vadd.f32 %v3016_v56, %v2928_v8  ;;  %v2931_v39 = vadd.f32 %v2930_v19, %v6228_v49  ;;  %v4194_v56 = vld [vmem:[#allocation2 + $0x234] sm:$0xf0] }
 0x1d7   : > { %v3194_v44 = vpop.f32.mrf.mxu0  ;;  %v3105_v27 = vpop.f32.mrf.mxu3 }
 0x1d8   : > { %v3106_v51 = vadd.f32 %v3105_v27, %v3017_v41  ;;  %3245 = vmatmul.bf16.gmra.mxu1 %v4153_v53  ;;  %v4847_v53 = vld [vmem:[#allocation2 + $0x214] sm:$0xf] }
 0x1da   : > { %3334 = vmatmul.bf16.gmra.mxu2 %v4157_v33  ;;  %v6108_v58 = vadd.f32 %v3194_v44, %v3106_v51  ;;  %v4197_v44 = vor.u32 %v4847_v53, %v4194_v56  ;;  %v4200_v51 = vld [vmem:[#allocation2 + $0x218] sm:$0xf]  ;;  %v4230_v53 = vld [vmem:[#allocation2 + $0x27c] sm:$0xf0] }
 0x1dc   : > { %3423 = vmatmul.bf16.gmra.mxu3 %v4161_v14  ;;  %v4852_v14 = vld [vmem:[#allocation2 + $0x238] sm:$0xf0] }
 0x1dd   : > { %v3019_v63 = vpop.f32.mrf.mxu2  ;;  %v2932_v47 = vpop.f32.mrf.mxu1 }
 0x1de   : > { %v3020_v26 = vadd.f32 %v3019_v63, %v2931_v39  ;;  %v2933_v46 = vadd.f32 %v2932_v47, %v6229_v61  ;;  %v4201_v63 = vor.u32 %v4852_v14, %v4200_v51  ;;  %v4236_v51 = vld [vmem:[#allocation2 + $0x260] sm:$0xf]  ;;  %v4861_v14 = vld [vmem:[#allocation2 + $0x280] sm:$0xf0] }
 0x1df   : > { %v3197_v55 = vpop.f32.mrf.mxu0  ;;  %v3108_v40 = vpop.f32.mrf.mxu3 }
 0x1e0   : > { %v3109_v59 = vadd.f32 %v3108_v40, %v3020_v26  ;;  %v4855_v40 = vld [vmem:[#allocation2 + $0x254] sm:$0xf] }
 0x1e2   : > { %3512 = vmatmul.bf16.gmra.mxu0 %v4165_v54  ;;  %v6111_v15 = vadd.f32 %v3197_v55, %v3109_v59  ;;  %v4222_v59 = vld [vmem:[#allocation2 + $0x274] sm:$0xf0] }
 0x1e5   : > { %v3021_v18 = vpop.f32.mrf.mxu2  ;;  %v2935_v8 = vpop.f32.mrf.mxu1 }
 0x1e6   : > { %v3022_v19 = vadd.f32 %v3021_v18, %v2933_v46  ;;  %v2936_v23 = vadd.f32 %v2935_v8, %v6230_v36  ;;  %v4225_v46 = vor.u32 %v4855_v40, %v4222_v59  ;;  %v4856_v8 = vld [vmem:[#allocation2 + $0x25c] sm:$0xf]  ;;  %v4264_v59 = vld [vmem:[#allocation2 + $0x2a0] sm:$0xf] }
 0x1e7   : > { %v3199_v37 = vpop.f32.mrf.mxu0  ;;  %v3110_v41 = vpop.f32.mrf.mxu3 }
 0x1e8   : > { %v3111_v33 = vadd.f32 %v3110_v41, %v3022_v19  ;;  %3250 = vmatmul.bf16.gmra.mxu1 %v4189_v13  ;;  %v4229_v19 = vor.u32 %v4860_v21, %v4228_v6  ;;  %v4869_v6 = vld [vmem:[#allocation2 + $0x2c0] sm:$0xf0] }
 0x1ea   : > { %3339 = vmatmul.bf16.gmra.mxu2 %v4193_v1  ;;  %v6114_v27 = vadd.f32 %v3199_v37, %v3111_v33  ;;  %v4233_v33 = vor.u32 %v4856_v8, %v4230_v53  ;;  %v4265_v8 = vor.u32 %v4869_v6, %v4264_v59  ;;  %v4873_v6 = vld [vmem:[#allocation2 + $0x2e4] sm:$0xf] }
 0x1ec   : > { %3428 = vmatmul.bf16.gmra.mxu3 %v4197_v44 }
 0x1ed   : > { %v3024_v49 = vpop.f32.mrf.mxu2  ;;  %v2937_v39 = vpop.f32.mrf.mxu1 }
 0x1ee   : > { %v3025_v47 = vadd.f32 %v3024_v49, %v2936_v23  ;;  %v2938_v61 = vadd.f32 %v2937_v39, %v6231_v7  ;;  %v4237_v39 = vor.u32 %v4861_v14, %v4236_v51  ;;  %v4870_v51 = vld [vmem:[#allocation2 + $0x2c8] sm:$0xf0] }
 0x1ef   : > { %v3202_v54 = vpop.f32.mrf.mxu0  ;;  %v3113_v26 = vpop.f32.mrf.mxu3 }
 0x1f0   : > { %v3114_v55 = vadd.f32 %v3113_v26, %v3025_v47  ;;  %v4864_v26 = vld [vmem:[#allocation2 + $0x29c] sm:$0xf] }
 0x1f2   : > { %3517 = vmatmul.bf16.gmra.mxu0 %v4201_v63  ;;  %v6117_v48 = vadd.f32 %v3202_v54, %v3114_v55  ;;  %v4258_v55 = vld [vmem:[#allocation2 + $0x2bc] sm:$0xf0] }
 0x1f3   : > { %v4261_v7 = vor.u32 %v4864_v26, %v4258_v55 }
 0x1f5   : > { %v3026_v13 = vpop.f32.mrf.mxu2  ;;  %v3216_v18 = vpop.f32.mrf.mxu1 }
 0x1f6   : > { %v3027_v56 = vadd.f32 %v3026_v13, %v2938_v61  ;;  %v3217_v36 = vadd.f32 %v3216_v18, %v5906_v38  ;;  %v4865_v13 = vld [vmem:[#allocation2 + $0x2a4] sm:$0xf]  ;;  %v4266_v38 = vld [vmem:[#allocation2 + $0x2c4] sm:$0xf0] }
 0x1f7   : > { %v3204_v1 = vpop.f32.mrf.mxu0  ;;  %v3115_v37 = vpop.f32.mrf.mxu3 }
 0x1f8   : > { %v3116_v41 = vadd.f32 %v3115_v37, %v3027_v56  ;;  %3255 = vmatmul.bf16.gmra.mxu1 %v4225_v46  ;;  %v4269_v37 = vor.u32 %v4865_v13, %v4266_v38  ;;  %v4878_v13 = vld [vmem:[#allocation2 + $0x308] sm:$0xf0] }
 0x1fa   : > { %3344 = vmatmul.bf16.gmra.mxu2 %v4229_v19  ;;  %v6120_v44 = vadd.f32 %v3204_v1, %v3116_v41 }
 0x1fc   : > { %3433 = vmatmul.bf16.gmra.mxu3 %v4233_v33 }
 0x1fd   : > { %v3305_v23 = vpop.f32.mrf.mxu2  ;;  %v3218_v49 = vpop.f32.mrf.mxu1 }
 0x1fe   : > { %v3306_v47 = vadd.f32 %v3305_v23, %v3217_v36  ;;  %v3219_v21 = vadd.f32 %v3218_v49, %v5922_v30  ;;  %v4272_v30 = vld [vmem:[#allocation2 + $0x2a8] sm:$0xf] }
 0x1ff   : > { %v3483_v63 = vpop.f32.mrf.mxu0  ;;  %v3394_v54 = vpop.f32.mrf.mxu3 }
 0x200   : > { %v3395_v40 = vadd.f32 %v3394_v54, %v3306_v47  ;;  %v4273_v54 = vor.u32 %v4870_v51, %v4272_v30 }
 0x202   : > { %3522 = vmatmul.bf16.gmra.mxu0 %v4237_v39  ;;  %v3484_v53 = vadd.f32 %v3483_v63, %v3395_v40 }
 0x204   : > { %v3665_v33 = vmul.f32 %v3484_v53, %v3484_v53 }
 0x205   : > { %v3307_v61 = vpop.f32.mrf.mxu2  ;;  %v3221_v46 = vpop.f32.mrf.mxu1 }
 0x206   : > { %v3308_v18 = vadd.f32 %v3307_v61, %v3219_v21  ;;  %v3222_v49 = vadd.f32 %v3221_v46, %v5935_v16  ;;  %v4294_v21 = vld [vmem:[#allocation2 + $0x304] sm:$0xf0] }
 0x207   : > { %v3485_v56 = vpop.f32.mrf.mxu0  ;;  %v3396_v19 = vpop.f32.mrf.mxu3  ;;  %v4300_v61 = vld [vmem:[#allocation2 + $0x2e8] sm:$0xf]  ;;  %v4297_v46 = vor.u32 %v4873_v6, %v4294_v21 }
 0x208   : > { %v3397_v1 = vadd.f32 %v3396_v19, %v3308_v18  ;;  %3260 = vmatmul.bf16.gmra.mxu1 %v4261_v7  ;;  %v4302_v19 = vld [vmem:[#allocation2 + $0x30c] sm:$0xf0] }
 0x20a   : > { %v3486_v41 = vadd.f32 %v3485_v56, %v3397_v1  ;;  %3349 = vmatmul.bf16.gmra.mxu2 %v4265_v8  ;;  %v4874_v56 = vld [vmem:[#allocation2 + $0x2ec] sm:$0xf] }
 0x20c   : > { %v5000_v14 = vpack.c.bf16 %v3486_v41, %v3484_v53  ;;  %v3627_v36 = vadd.f32 %v3486_v41, %v3484_v53  ;;  %v3666_v23 = vmul.f32 %v3486_v41, %v3486_v41  ;;  %3438 = vmatmul.bf16.gmra.mxu3 %v4269_v37  ;;  %v4301_v41 = vor.u32 %v4878_v13, %v4300_v61  ;;  %v4882_v13 = vld [vmem:[#allocation2 + $0x32c] sm:$0xf] }
 0x20d   : > { %v3310_v39 = vpop.f32.mrf.mxu2  ;;  %v3223_v63 = vpop.f32.mrf.mxu1 }
 0x20e   : > { %5001 = vst [vmem:[%s6128_s22] sm:$0xff] %v5000_v14   ;;  %v3697_v47 = vadd.f32 %v3666_v23, %v3665_v33  ;;  %v3311_v26 = vadd.f32 %v3310_v39, %v3222_v49  ;;  %v3224_v16 = vadd.f32 %v3223_v63, %v5947_v35  ;;  %v4305_v14 = vor.u32 %v4874_v56, %v4302_v19  ;;  %v4879_v49 = vld [vmem:[#allocation2 + $0x310] sm:$0xf0] }
 0x20f   : > { %v3488_v55 = vpop.f32.mrf.mxu0  ;;  %v3399_v40 = vpop.f32.mrf.mxu3 }
 0x210   : > { %v3400_v59 = vadd.f32 %v3399_v40, %v3311_v26 }
 0x212   : > { %3527 = vmatmul.bf16.gmra.mxu0 %v4273_v54  ;;  %v3489_v7 = vadd.f32 %v3488_v55, %v3400_v59 }
 0x214   : > { %v3628_v38 = vadd.f32 %v3627_v36, %v3489_v7  ;;  %v3667_v18 = vmul.f32 %v3489_v7, %v3489_v7  ;;  %v4308_v36 = vld [vmem:[#allocation2 + $0x2f0] sm:$0xf] }
 0x215   : > { %v3312_v8 = vpop.f32.mrf.mxu2  ;;  %v3226_v53 = vpop.f32.mrf.mxu1  ;;  %v4309_v40 = vor.u32 %v4879_v49, %v4308_v36 }
 0x216   : > { %v3698_v1 = vadd.f32 %v3697_v47, %v3667_v18  ;;  %v3313_v37 = vadd.f32 %v3312_v8, %v3224_v16  ;;  %v3227_v54 = vadd.f32 %v3226_v53, %v5969_v29  ;;  %v4330_v18 = vld [vmem:[#allocation2 + $0x34c] sm:$0xf0] }
 0x217   : > { %v3490_v33 = vpop.f32.mrf.mxu0  ;;  %v3401_v30 = vpop.f32.mrf.mxu3  ;;  %v4333_v53 = vor.u32 %v4882_v13, %v4330_v18  ;;  %v4891_v18 = vld [vmem:[#allocation2 + $0x374] sm:$0xf] }
 0x218   : > { %v3402_v51 = vadd.f32 %v3401_v30, %v3313_v37  ;;  %3265 = vmatmul.bf16.gmra.mxu1 %v4297_v46  ;;  %v4336_v46 = vld [vmem:[#allocation2 + $0x330] sm:$0xf]  ;;  %v4883_v37 = vld [vmem:[#allocation2 + $0x334] sm:$0xf] }
 0x21a   : > { %v3491_v23 = vadd.f32 %v3490_v33, %v3402_v51  ;;  %3354 = vmatmul.bf16.gmra.mxu2 %v4301_v41 }
 0x21c   : > { %v5005_v39 = vpack.c.bf16 %v3491_v23, %v3489_v7  ;;  %v3629_v35 = vadd.f32 %v3628_v38, %v3491_v23  ;;  %v3668_v63 = vmul.f32 %v3491_v23, %v3491_v23  ;;  %3443 = vmatmul.bf16.gmra.mxu3 %v4305_v14  ;;  %v4887_v7 = vld [vmem:[#allocation2 + $0x350] sm:$0xf0] }
 0x21d   : > { %v3315_v26 = vpop.f32.mrf.mxu2  ;;  %v3228_v47 = vpop.f32.mrf.mxu1  ;;  %v4337_v30 = vor.u32 %v4887_v7, %v4336_v46  ;;  %v4366_v46 = vld [vmem:[#allocation2 + $0x394] sm:$0xf0] }
 0x21e   : > { %5077 = vst [vmem:[%s6128_s22 + $0x8] sm:$0xff] %v5005_v39   ;;  %v3699_v55 = vadd.f32 %v3698_v1, %v3668_v63  ;;  %v3316_v59 = vadd.f32 %v3315_v26, %v3227_v54  ;;  %v3229_v29 = vadd.f32 %v3228_v47, %v5984_v50  ;;  %v4338_v1 = vld [vmem:[#allocation2 + $0x354] sm:$0xf0] }
 0x21f   : > { %v3493_v6 = vpop.f32.mrf.mxu0  ;;  %v3404_v21 = vpop.f32.mrf.mxu3  ;;  %v4341_v36 = vor.u32 %v4883_v37, %v4338_v1  ;;  %v4344_v39 = vld [vmem:[#allocation2 + $0x338] sm:$0xf] }
 0x220   : > { %v3405_v61 = vadd.f32 %v3404_v21, %v3316_v59 }
 0x222   : > { %3532 = vmatmul.bf16.gmra.mxu0 %v4309_v40  ;;  %v3494_v16 = vadd.f32 %v3493_v6, %v3405_v61 }
 0x224   : > { %v3630_v38 = vadd.f32 %v3629_v35, %v3494_v16  ;;  %v3669_v8 = vmul.f32 %v3494_v16, %v3494_v16  ;;  %v4888_v35 = vld [vmem:[#allocation2 + $0x358] sm:$0xf0] }
 0x225   : > { %v3317_v56 = vpop.f32.mrf.mxu2  ;;  %v3231_v19 = vpop.f32.mrf.mxu1  ;;  %v4345_v59 = vor.u32 %v4888_v35, %v4344_v39 }
 0x226   : > { %v3700_v41 = vadd.f32 %v3699_v55, %v3669_v8  ;;  %v3318_v33 = vadd.f32 %v3317_v56, %v3229_v29  ;;  %v3232_v26 = vadd.f32 %v3231_v19, %v5997_v32  ;;  %v1117_v8 = vrot.slane %v6020_v24, 5  ;;  %v4892_v19 = vld [vmem:[#allocation2 + $0x37c] sm:$0xf] }
 0x227   : > { %v3495_v51 = vpop.f32.mrf.mxu0  ;;  %v3406_v14 = vpop.f32.mrf.mxu3  ;;  %v4369_v56 = vor.u32 %v4891_v18, %v4366_v46 }
 0x228   : > { %v3407_v23 = vadd.f32 %v3406_v14, %v3318_v33  ;;  %3270 = vmatmul.bf16.gmra.mxu1 %v4333_v53  ;;  %v3912_v33 = vrot.slane %v6017_v5, 9 }
 0x22a   : > { %v3496_v49 = vadd.f32 %v3495_v51, %v3407_v23  ;;  %3359 = vmatmul.bf16.gmra.mxu2 %v4337_v30  ;;  %v1119_v30 = vrot.slane %v1117_v8, 4  ;;  %v5141_v51 = vld [vmem:[%s5224_s28 + $0xc8] sm:$0x1]  ;;  %v1118_v24 = vsel %vm5573_vm5, %v3912_v33, %v1117_v8  ;;  %v310_v8 = vld [vmem:[%s5224_s28 + $0xd0] sm:$0xf] }
 0x22b   : > { %v1120_v14 = vrot.slane %v5141_v51, 5  ;;  %1286 = vst [vmem:[#allocation2 + $0x410] sm:$0xf] %v1118_v24  ;;  %v1202_v51 = vshrl.u32 %v310_v8, 16 }
 0x22c   : > { %v5010_v63 = vpack.c.bf16 %v3496_v49, %v3494_v16  ;;  %v3631_v50 = vadd.f32 %v3630_v38, %v3496_v49  ;;  %v3670_v54 = vmul.f32 %v3496_v49, %v3496_v49  ;;  %3448 = vmatmul.bf16.gmra.mxu3 %v4341_v36  ;;  %v4372_v16 = vld [vmem:[#allocation2 + $0x378] sm:$0xf]  ;;  %v4896_v38 = vld [vmem:[#allocation2 + $0x398] sm:$0xf0]  ;;  %1154 = vst [vmem:[#allocation2 + $0x44c] sm:$0xf] %v1118_v24 }
 0x22d   : > { %v3320_v47 = vpop.f32.mrf.mxu2  ;;  %v3233_v55 = vpop.f32.mrf.mxu1  ;;  %v4373_v49 = vor.u32 %v4896_v38, %v4372_v16  ;;  %v309_v38 = vld [vmem:[%s5224_s28 + $0xcc] sm:$0xf]  ;;  %1187 = vst [vmem:[#allocation2 + $0x474] sm:$0xf] %v310_v8 }
 0x22e   : > { %5078 = vst [vmem:[%s6128_s22 + $0x10] sm:$0xff] %v5010_v63   ;;  %v3701_v40 = vadd.f32 %v3700_v41, %v3670_v54  ;;  %v3321_v6 = vadd.f32 %v3320_v47, %v3232_v26  ;;  %v3234_v53 = vadd.f32 %v3233_v55, %v6008_v57  ;;  %v4374_v41 = vld [vmem:[#allocation2 + $0x39c] sm:$0xf0]  ;;  %v1121_v57 = vsel %vm5573_vm5, %v1119_v30, %v1120_v14  ;;  %v4897_v26 = vld [vmem:[#allocation2 + $0x3a0] sm:$0xf0] }
 0x22f   : > { %v3498_v21 = vpop.f32.mrf.mxu0  ;;  %v3409_v61 = vpop.f32.mrf.mxu3  ;;  %1287 = vst [vmem:[#allocation2 + $0x434] sm:$0xf] %v1121_v57  ;;  %v4380_v54 = vld [vmem:[#allocation2 + $0x380] sm:$0xf] }
 0x230   : > { %v3410_v13 = vadd.f32 %v3409_v61, %v3321_v6  ;;  %1155 = vst [vmem:[#allocation2 + $0x470] sm:$0xf] %v1121_v57  ;;  %v4900_v61 = vld [vmem:[#allocation2 + $0x3bc] sm:$0xf]  ;;  %v4381_v46 = vor.u32 %v4897_v26, %v4380_v54  ;;  %v4410_v26 = vld [vmem:[#allocation2 + $0x3e4] sm:$0xf0] }
 0x231   : > { %1186 = vst [vmem:[#allocation2 + $0x450] sm:$0xf] %v309_v38 }
 0x232   : > { %3537 = vmatmul.bf16.gmra.mxu0 %v4345_v59  ;;  %v3499_v7 = vadd.f32 %v3498_v21, %v3410_v13  ;;  %v4402_v13 = vld [vmem:[#allocation2 + $0x3dc] sm:$0xf0] }
 0x234   : > { %v3632_v32 = vadd.f32 %v3631_v50, %v3499_v7  ;;  %v3671_v29 = vmul.f32 %v3499_v7, %v3499_v7  ;;  %v4377_v50 = vor.u32 %v4892_v19, %v4374_v41  ;;  %v4405_v19 = vor.u32 %v4900_v61, %v4402_v13 }
 0x235   : > { %v3322_v37 = vpop.f32.mrf.mxu2  ;;  %v3236_v1 = vpop.f32.mrf.mxu1  ;;  %v1198_v41 = vshll.u32 %v310_v8, 16 }
 0x236   : > { %v3702_v23 = vadd.f32 %v3701_v40, %v3671_v29  ;;  %v3323_v36 = vadd.f32 %v3322_v37, %v3234_v53  ;;  %v3237_v59 = vadd.f32 %v3236_v1, %v6033_v9  ;;  %v311_v9 = vld [vmem:[%s5224_s28 + $0xd4] sm:$0x1]  ;;  %v1189_v37 = vshrl.u32 %v309_v38, 16 }
 0x237   : > { %v3500_v39 = vpop.f32.mrf.mxu0  ;;  %v3411_v35 = vpop.f32.mrf.mxu3  ;;  %v1192_v1 = vshll.u32 %v309_v38, 16  ;;  %v1208_v14 = vshll.u32 %v311_v9, 16 }
 0x238   : > { %v3412_v63 = vadd.f32 %v3411_v35, %v3323_v36  ;;  %3275 = vmatmul.bf16.gmra.mxu1 %v4369_v56  ;;  %v4408_v56 = vld [vmem:[#allocation2 + $0x3c0] sm:$0xf] }
 0x239   : > { %v1194_v36 = vrot.slane %v1192_v1, 5 }
 0x23a   : > { %v3501_v5 = vadd.f32 %v3500_v39, %v3412_v63  ;;  %3364 = vmatmul.bf16.gmra.mxu2 %v4373_v49  ;;  %v1200_v49 = vrot.slane %v1198_v41, 5  ;;  %v1251_v39 = vrot.slane %v310_v8, 5  ;;  %v4901_v63 = vld [vmem:[#allocation2 + $0x3c4] sm:$0xf] }
 0x23c   : > { %v5015_v47 = vpack.c.bf16 %v3501_v5, %v3499_v7  ;;  %v3633_v55 = vadd.f32 %v3632_v32, %v3501_v5  ;;  %v3672_v40 = vmul.f32 %v3501_v5, %v3501_v5  ;;  %3453 = vmatmul.bf16.gmra.mxu3 %v4377_v50  ;;  %v4905_v7 = vld [vmem:[#allocation2 + $0x3e0] sm:$0xf0]  ;;  %v1204_v50 = vrot.slane %v1202_v51, 4 }
 0x23d   : > { %v3325_v6 = vpop.f32.mrf.mxu2  ;;  %v3238_v21 = vpop.f32.mrf.mxu1  ;;  %v4409_v30 = vor.u32 %v4905_v7, %v4408_v56  ;;  %v4413_v56 = vor.u32 %v4901_v63, %v4410_v26 }
 0x23e   : > { %5079 = vst [vmem:[%s6128_s22 + $0x18] sm:$0xff] %v5015_v47   ;;  %v3703_v18 = vadd.f32 %v3702_v23, %v3672_v40  ;;  %v3326_v16 = vadd.f32 %v3325_v6, %v3237_v59  ;;  %v1191_v23 = vrot.slane %v1189_v37, 4  ;;  %v3239_v57 = vadd.f32 %v3238_v21, %v6048_v34  ;;  %v4906_v37 = vld [vmem:[#allocation2 + $0x3e8] sm:$0xf0] }
 0x23f   : > { %v3503_v29 = vpop.f32.mrf.mxu0  ;;  %v3414_v53 = vpop.f32.mrf.mxu3  ;;  %v3913_v40 = vrot.slane %v309_v38, 9  ;;  %v1253_v59 = vrot.slane %v1251_v39, 4  ;;  %v1254_v6 = vrot.slane %v311_v9, 5  ;;  %v4416_v9 = vld [vmem:[#allocation2 + $0x3c8] sm:$0xf] }
 0x240   : > { %v3415_v32 = vadd.f32 %v3414_v53, %v3326_v16  ;;  %v1195_v47 = vor.u32 %v1194_v36, %v1191_v23  ;;  %v1210_v16 = vrot.slane %v1208_v14, 5  ;;  %v4417_v36 = vor.u32 %v4906_v37, %v4416_v9 }
 0x241   : > { %v1255_v34 = vsel %vm5573_vm5, %v1253_v59, %v1254_v6  ;;  %v4446_v59 = vld [vmem:[#allocation2 + $0x42c] sm:$0xf0] }
 0x242   : > { %3542 = vmatmul.bf16.gmra.mxu0 %v4381_v46  ;;  %v3504_v33 = vadd.f32 %v3503_v29, %v3415_v32  ;;  %v1205_v46 = vor.u32 %v1204_v50, %v1200_v49  ;;  %v1196_v8 = vrot.slane %v1195_v47, 4  ;;  %1289 = vst [vmem:[#allocation2 + $0x47c] sm:$0xf] %v1255_v34  ;;  %v4444_v50 = vld [vmem:[#allocation2 + $0x408] sm:$0xf] }
 0x243   : > { %v4915_v34 = vld [vmem:[#allocation2 + $0x430] sm:$0xf0] }
 0x244   : > { %v3634_v35 = vadd.f32 %v3633_v55, %v3504_v33  ;;  %v3673_v24 = vmul.f32 %v3504_v33, %v3504_v33  ;;  %v1252_v55 = vsel %vm5573_vm5, %v3913_v40, %v1251_v39  ;;  %v1206_v7 = vrot.slane %v1205_v46, 4  ;;  %v4910_v40 = vld [vmem:[#allocation2 + $0x40c] sm:$0xf] }
 0x245   : > { %v3327_v5 = vpop.f32.mrf.mxu2  ;;  %v3241_v54 = vpop.f32.mrf.mxu1  ;;  %1288 = vst [vmem:[#allocation2 + $0x458] sm:$0xf] %v1252_v55  ;;  %v4452_v55 = vld [vmem:[#allocation2 + $0x410] sm:$0xf] }
 0x246   : > { %v3704_v61 = vadd.f32 %v3703_v18, %v3673_v24  ;;  %v3328_v13 = vadd.f32 %v3327_v5, %v3239_v57  ;;  %v1201_v18 = vsel %vm5552_vm2, %v1196_v8, %v1200_v49  ;;  %v1211_v32 = vsel %vm5552_vm2, %v1206_v7, %v1210_v16  ;;  %v4909_v24 = vld [vmem:[#allocation2 + $0x404] sm:$0xf]  ;;  %v4438_v57 = vld [vmem:[#allocation2 + $0x424] sm:$0xf0] }
 0x247   : > { %v3505_v29 = vpop.f32.mrf.mxu0  ;;  %v3416_v53 = vpop.f32.mrf.mxu3  ;;  %1244 = vst [vmem:[#allocation2 + $0x454] sm:$0xf] %v1201_v18  ;;  %v3242_v41 = vadd.f32 %v3241_v54, %v6057_v45  ;;  %v4441_v54 = vor.u32 %v4909_v24, %v4438_v57  ;;  %v4453_v9 = vor.u32 %v4915_v34, %v4452_v55 }
 0x248   : > { %v3417_v21 = vadd.f32 %v3416_v53, %v3328_v13  ;;  %3280 = vmatmul.bf16.gmra.mxu1 %v4405_v19  ;;  %1245 = vst [vmem:[#allocation2 + $0x478] sm:$0xf] %v1211_v32  ;;  %v4449_v53 = vor.u32 %v4910_v40, %v4446_v59 }
 0x249   : > { %v4924_v59 = vld [vmem:[#allocation2 + $0x478] sm:$0xf0] }
 0x24a   : > { %v3506_v38 = vadd.f32 %v3505_v29, %v3417_v21  ;;  %3369 = vmatmul.bf16.gmra.mxu2 %v4409_v30 }
 0x24c   : > { %v5020_v28 = vpack.c.bf16 %v3506_v38, %v3504_v33  ;;  %v3635_v1 = vadd.f32 %v3634_v35, %v3506_v38  ;;  %v3674_v19 = vmul.f32 %v3506_v38, %v3506_v38  ;;  %3458 = vmatmul.bf16.gmra.mxu3 %v4413_v56  ;;  %v4914_v33 = vld [vmem:[#allocation2 + $0x428] sm:$0xf0]  ;;  %v4488_v40 = vld [vmem:[#allocation2 + $0x458] sm:$0xf] }
 0x24d   : > { %v3330_v51 = vpop.f32.mrf.mxu2  ;;  %v3243_v14 = vpop.f32.mrf.mxu1  ;;  %v4445_v13 = vor.u32 %v4914_v33, %v4444_v50 }
 0x24e   : > { %5080 = vst [vmem:[%s6128_s22 + $0x20] sm:$0xff] %v5020_v28   ;;  %v3705_v23 = vadd.f32 %v3704_v61, %v3674_v19  ;;  %v3331_v49 = vadd.f32 %v3330_v51, %v3242_v41  ;;  %v3244_v45 = vadd.f32 %v3243_v14, %v6060_v31  ;;  %v4918_v41 = vld [vmem:[#allocation2 + $0x44c] sm:$0xf]  ;;  %v4474_v51 = vld [vmem:[#allocation2 + $0x46c] sm:$0xf0] }
 0x24f   : > { %v3508_v30 = vpop.f32.mrf.mxu0  ;;  %v3419_v39 = vpop.f32.mrf.mxu3  ;;  %v4919_v57 = vld [vmem:[#allocation2 + $0x454] sm:$0xf] }
 0x250   : > { %v3420_v62 = vadd.f32 %v3419_v39, %v3331_v49  ;;  %v4477_v39 = vor.u32 %v4918_v41, %v4474_v51 }
 0x252   : > { %3547 = vmatmul.bf16.gmra.mxu0 %v4417_v36  ;;  %v3509_v63 = vadd.f32 %v3508_v30, %v3420_v62  ;;  %v4923_v36 = vld [vmem:[#allocation2 + $0x470] sm:$0xf0] }
 0x254   : > { %v3636_v35 = vadd.f32 %v3635_v1, %v3509_v63  ;;  %v3675_v5 = vmul.f32 %v3509_v63, %v3509_v63 }
 0x255   : > { %v3332_v26 = vpop.f32.mrf.mxu2  ;;  %v3246_v47 = vpop.f32.mrf.mxu1 }
 0x256   : > { %v3706_v6 = vadd.f32 %v3705_v23, %v3675_v5  ;;  %v3333_v61 = vadd.f32 %v3332_v26, %v3244_v45  ;;  %v3247_v7 = vadd.f32 %v3246_v47, %v6063_v25  ;;  %v4480_v23 = vld [vmem:[#allocation2 + $0x450] sm:$0xf] }
 0x257   : > { %v3510_v46 = vpop.f32.mrf.mxu0  ;;  %v3421_v16 = vpop.f32.mrf.mxu3 }
 0x258   : > { %v3422_v29 = vadd.f32 %v3421_v16, %v3333_v61  ;;  %3285 = vmatmul.bf16.gmra.mxu1 %v4441_v54 }
 0x25a   : > { %v3511_v8 = vadd.f32 %v3510_v46, %v3422_v29  ;;  %3374 = vmatmul.bf16.gmra.mxu2 %v4445_v13 }
 0x25c   : > { %v5025_v21 = vpack.c.bf16 %v3511_v8, %v3509_v63  ;;  %v3637_v31 = vadd.f32 %v3636_v35, %v3511_v8  ;;  %v3676_v56 = vmul.f32 %v3511_v8, %v3511_v8  ;;  %3463 = vmatmul.bf16.gmra.mxu3 %v4449_v53  ;;  %v4482_v63 = vld [vmem:[#allocation2 + $0x474] sm:$0xf0]  ;;  %v4481_v35 = vor.u32 %v4923_v36, %v4480_v23 }
 0x25d   : > { %v3335_v18 = vpop.f32.mrf.mxu2  ;;  %v3248_v38 = vpop.f32.mrf.mxu1  ;;  %v4485_v26 = vor.u32 %v4919_v57, %v4482_v63  ;;  %v4489_v53 = vor.u32 %v4924_v59, %v4488_v40 }
 0x25e   : > { %5081 = vst [vmem:[%s6128_s22 + $0x28] sm:$0xff] %v5025_v21   ;;  %v3707_v32 = vadd.f32 %v3706_v6, %v3676_v56  ;;  %v3336_v37 = vadd.f32 %v3335_v18, %v3247_v7  ;;  %v3249_v25 = vadd.f32 %v3248_v38, %v6066_v22 }
 0x25f   : > { %v3513_v28 = vpop.f32.mrf.mxu0  ;;  %v3424_v1 = vpop.f32.mrf.mxu3 }
 0x260   : > { %v3425_v19 = vadd.f32 %v3424_v1, %v3336_v37 }
 0x262   : > { %3552 = vmatmul.bf16.gmra.mxu0 %v4453_v9  ;;  %v3514_v14 = vadd.f32 %v3513_v28, %v3425_v19 }
 0x264   : > { %v3638_v49 = vadd.f32 %v3637_v31, %v3514_v14  ;;  %v3677_v30 = vmul.f32 %v3514_v14, %v3514_v14 }
 0x265   : > { %v3337_v62 = vpop.f32.mrf.mxu2  ;;  %v3251_v24 = vpop.f32.mrf.mxu1 }
 0x266   : > { %v3708_v50 = vadd.f32 %v3707_v32, %v3677_v30  ;;  %v3338_v33 = vadd.f32 %v3337_v62, %v3249_v25  ;;  %v3252_v13 = vadd.f32 %v3251_v24, %v6069_v17 }
 0x267   : > { %v3515_v5 = vpop.f32.mrf.mxu0  ;;  %v3426_v45 = vpop.f32.mrf.mxu3 }
 0x268   : > { %v3427_v54 = vadd.f32 %v3426_v45, %v3338_v33  ;;  %3290 = vmatmul.bf16.gmra.mxu1 %v4477_v39 }
 0x26a   : > { %v3516_v47 = vadd.f32 %v3515_v5, %v3427_v54  ;;  %3379 = vmatmul.bf16.gmra.mxu2 %v4481_v35 }
 0x26c   : > { %v5030_v6 = vpack.c.bf16 %v3516_v47, %v3514_v14  ;;  %v3639_v22 = vadd.f32 %v3638_v49, %v3516_v47  ;;  %v3678_v61 = vmul.f32 %v3516_v47, %v3516_v47  ;;  %3468 = vmatmul.bf16.gmra.mxu3 %v4485_v26 }
 0x26d   : > { %v3340_v46 = vpop.f32.mrf.mxu2  ;;  %v3253_v16 = vpop.f32.mrf.mxu1 }
 0x26e   : > { %5082 = vst [vmem:[%s6128_s22 + $0x30] sm:$0xff] %v5030_v6   ;;  %v3709_v29 = vadd.f32 %v3708_v50, %v3678_v61  ;;  %v3341_v8 = vadd.f32 %v3340_v46, %v3252_v13  ;;  %v3254_v18 = vadd.f32 %v3253_v16, %v6072_v3 }
 0x26f   : > { %v3518_v55 = vpop.f32.mrf.mxu0  ;;  %v3429_v34 = vpop.f32.mrf.mxu3 }
 0x270   : > { %v3430_v21 = vadd.f32 %v3429_v34, %v3341_v8 }
 0x272   : > { %3557 = vmatmul.bf16.gmra.mxu0 %v4489_v53  ;;  %v3519_v31 = vadd.f32 %v3518_v55, %v3430_v21 }
 0x274   : > { %v3640_v56 = vadd.f32 %v3639_v22, %v3519_v31  ;;  %v3679_v7 = vmul.f32 %v3519_v31, %v3519_v31 }
 0x275   : > { %v3342_v38 = vpop.f32.mrf.mxu2  ;;  %v3256_v32 = vpop.f32.mrf.mxu1 }
 0x276   : > { %v3710_v17 = vadd.f32 %v3709_v29, %v3679_v7  ;;  %v3343_v9 = vadd.f32 %v3342_v38, %v3254_v18  ;;  %v3257_v23 = vadd.f32 %v3256_v32, %v6075_v12 }
 0x277   : > { %v3520_v37 = vpop.f32.mrf.mxu0  ;;  %v3431_v28 = vpop.f32.mrf.mxu3 }
 0x278   : > { %v3432_v1 = vadd.f32 %v3431_v28, %v3343_v9 }
 0x27a   : > { %v3521_v19 = vadd.f32 %v3520_v37, %v3432_v1 }
 0x27c   : > { %v5035_v41 = vpack.c.bf16 %v3521_v19, %v3519_v31  ;;  %v3641_v51 = vadd.f32 %v3640_v56, %v3521_v19  ;;  %v3680_v14 = vmul.f32 %v3521_v19, %v3521_v19 }
 0x27d   : > { %v3345_v36 = vpop.f32.mrf.mxu2  ;;  %v3258_v49 = vpop.f32.mrf.mxu1 }
 0x27e   : > { %5083 = vst [vmem:[%s6128_s22 + $0x38] sm:$0xff] %v5035_v41   ;;  %v3711_v30 = vadd.f32 %v3710_v17, %v3680_v14  ;;  %v3346_v25 = vadd.f32 %v3345_v36, %v3257_v23  ;;  %v3259_v50 = vadd.f32 %v3258_v49, %v6078_v43 }
 0x27f   : > { %v3523_v39 = vpop.f32.mrf.mxu0  ;;  %v3434_v3 = vpop.f32.mrf.mxu3 }
 0x280   : > { %v3435_v62 = vadd.f32 %v3434_v3, %v3346_v25 }
 0x282   : > { %v3524_v24 = vadd.f32 %v3523_v39, %v3435_v62 }
 0x284   : > { %v3642_v57 = vadd.f32 %v3641_v51, %v3524_v24  ;;  %v3681_v63 = vmul.f32 %v3524_v24, %v3524_v24 }
 0x285   : > { %v3347_v33 = vpop.f32.mrf.mxu2  ;;  %v3261_v35 = vpop.f32.mrf.mxu1 }
 0x286   : > { %v3712_v5 = vadd.f32 %v3711_v30, %v3681_v63  ;;  %v3348_v45 = vadd.f32 %v3347_v33, %v3259_v50  ;;  %v3262_v22 = vadd.f32 %v3261_v35, %v6081_v11 }
 0x287   : > { %v3525_v54 = vpop.f32.mrf.mxu0  ;;  %v3436_v12 = vpop.f32.mrf.mxu3 }
 0x288   : > { %v3437_v26 = vadd.f32 %v3436_v12, %v3348_v45 }
 0x28a   : > { %v3526_v47 = vadd.f32 %v3525_v54, %v3437_v26 }
 0x28c   : > { %v5040_v40 = vpack.c.bf16 %v3526_v47, %v3524_v24  ;;  %v3643_v59 = vadd.f32 %v3642_v57, %v3526_v47  ;;  %v3682_v6 = vmul.f32 %v3526_v47, %v3526_v47 }
 0x28d   : > { %v3350_v61 = vpop.f32.mrf.mxu2  ;;  %v3263_v13 = vpop.f32.mrf.mxu1 }
 0x28e   : > { %5084 = vst [vmem:[%s6128_s22 + $0x40] sm:$0xff] %v5040_v40   ;;  %v3713_v46 = vadd.f32 %v3712_v5, %v3682_v6  ;;  %v3351_v16 = vadd.f32 %v3350_v61, %v3262_v22  ;;  %v3264_v21 = vadd.f32 %v3263_v13, %v6084_v52 }
 0x28f   : > { %v3528_v29 = vpop.f32.mrf.mxu0  ;;  %v3439_v43 = vpop.f32.mrf.mxu3 }
 0x290   : > { %v3440_v53 = vadd.f32 %v3439_v43, %v3351_v16 }
 0x292   : > { %v3529_v8 = vadd.f32 %v3528_v29, %v3440_v53 }
 0x294   : > { %v3644_v55 = vadd.f32 %v3643_v59, %v3529_v8  ;;  %v3683_v34 = vmul.f32 %v3529_v8, %v3529_v8 }
 0x295   : > { %v3352_v31 = vpop.f32.mrf.mxu2  ;;  %v3266_v56 = vpop.f32.mrf.mxu1 }
 0x296   : > { %v3714_v7 = vadd.f32 %v3713_v46, %v3683_v34  ;;  %v3353_v18 = vadd.f32 %v3352_v31, %v3264_v21  ;;  %v3267_v1 = vadd.f32 %v3266_v56, %v6087_v0 }
 0x297   : > { %v3530_v38 = vpop.f32.mrf.mxu0  ;;  %v3441_v11 = vpop.f32.mrf.mxu3 }
 0x298   : > { %v3442_v32 = vadd.f32 %v3441_v11, %v3353_v18 }
 0x29a   : > { %v3531_v17 = vadd.f32 %v3530_v38, %v3442_v32 }
 0x29c   : > { %v5045_v9 = vpack.c.bf16 %v3531_v17, %v3529_v8  ;;  %v3645_v37 = vadd.f32 %v3644_v55, %v3531_v17  ;;  %v3684_v28 = vmul.f32 %v3531_v17, %v3531_v17 }
 0x29d   : > { %v3355_v19 = vpop.f32.mrf.mxu2  ;;  %v3268_v41 = vpop.f32.mrf.mxu1 }
 0x29e   : > { %5085 = vst [vmem:[%s6128_s22 + $0x48] sm:$0xff] %v5045_v9   ;;  %v3715_v51 = vadd.f32 %v3714_v7, %v3684_v28  ;;  %v3356_v14 = vadd.f32 %v3355_v19, %v3267_v1  ;;  %v3269_v39 = vadd.f32 %v3268_v41, %v6090_v42 }
 0x29f   : > { %v3533_v23 = vpop.f32.mrf.mxu0  ;;  %v3444_v52 = vpop.f32.mrf.mxu3 }
 0x2a0   : > { %v3445_v36 = vadd.f32 %v3444_v52, %v3356_v14 }
 0x2a2   : > { %v3534_v49 = vadd.f32 %v3533_v23, %v3445_v36 }
 0x2a4   : > { %v3646_v30 = vadd.f32 %v3645_v37, %v3534_v49  ;;  %v3685_v25 = vmul.f32 %v3534_v49, %v3534_v49 }
 0x2a5   : > { %v3357_v3 = vpop.f32.mrf.mxu2  ;;  %v3271_v62 = vpop.f32.mrf.mxu1 }
 0x2a6   : > { %v3716_v24 = vadd.f32 %v3715_v51, %v3685_v25  ;;  %v3358_v57 = vadd.f32 %v3357_v3, %v3269_v39  ;;  %v3272_v54 = vadd.f32 %v3271_v62, %v6093_v60 }
 0x2a7   : > { %v3535_v63 = vpop.f32.mrf.mxu0  ;;  %v3446_v0 = vpop.f32.mrf.mxu3 }
 0x2a8   : > { %v3447_v50 = vadd.f32 %v3446_v0, %v3358_v57 }
 0x2aa   : > { %v3536_v33 = vadd.f32 %v3535_v63, %v3447_v50 }
 0x2ac   : > { %v5050_v35 = vpack.c.bf16 %v3536_v33, %v3534_v49  ;;  %v3647_v5 = vadd.f32 %v3646_v30, %v3536_v33  ;;  %v3686_v45 = vmul.f32 %v3536_v33, %v3536_v33 }
 0x2ad   : > { %v3360_v12 = vpop.f32.mrf.mxu2  ;;  %v3273_v26 = vpop.f32.mrf.mxu1 }
 0x2ae   : > { %5086 = vst [vmem:[%s6128_s22 + $0x50] sm:$0xff] %v5050_v35   ;;  %v3717_v47 = vadd.f32 %v3716_v24, %v3686_v45  ;;  %v3361_v40 = vadd.f32 %v3360_v12, %v3272_v54  ;;  %v3274_v46 = vadd.f32 %v3273_v26, %v6096_v10 }
 0x2af   : > { %v3538_v59 = vpop.f32.mrf.mxu0  ;;  %v3449_v42 = vpop.f32.mrf.mxu3 }
 0x2b0   : > { %v3450_v6 = vadd.f32 %v3449_v42, %v3361_v40 }
 0x2b2   : > { %v3539_v22 = vadd.f32 %v3538_v59, %v3450_v6 }
 0x2b4   : > { %v3648_v61 = vadd.f32 %v3647_v5, %v3539_v22  ;;  %v3687_v13 = vmul.f32 %v3539_v22, %v3539_v22 }
 0x2b5   : > { %v3362_v16 = vpop.f32.mrf.mxu2  ;;  %v3276_v29 = vpop.f32.mrf.mxu1 }
 0x2b6   : > { %v3718_v43 = vadd.f32 %v3717_v47, %v3687_v13  ;;  %v3363_v53 = vadd.f32 %v3362_v16, %v3274_v46  ;;  %v3277_v7 = vadd.f32 %v3276_v29, %v6099_v2 }
 0x2b7   : > { %v3540_v8 = vpop.f32.mrf.mxu0  ;;  %v3451_v60 = vpop.f32.mrf.mxu3 }
 0x2b8   : > { %v3452_v55 = vadd.f32 %v3451_v60, %v3363_v53 }
 0x2ba   : > { %v3541_v34 = vadd.f32 %v3540_v8, %v3452_v55 }
 0x2bc   : > { %v5055_v21 = vpack.c.bf16 %v3541_v34, %v3539_v22  ;;  %v3649_v31 = vadd.f32 %v3648_v61, %v3541_v34  ;;  %v3688_v56 = vmul.f32 %v3541_v34, %v3541_v34 }
 0x2bd   : > { %v3365_v18 = vpop.f32.mrf.mxu2  ;;  %v3278_v38 = vpop.f32.mrf.mxu1 }
 0x2be   : > { %5087 = vst [vmem:[%s6128_s22 + $0x58] sm:$0xff] %v5055_v21   ;;  %v3719_v11 = vadd.f32 %v3718_v43, %v3688_v56  ;;  %v3366_v32 = vadd.f32 %v3365_v18, %v3277_v7  ;;  %v3279_v19 = vadd.f32 %v3278_v38, %v6102_v20 }
 0x2bf   : > { %v3543_v17 = vpop.f32.mrf.mxu0  ;;  %v3454_v10 = vpop.f32.mrf.mxu3 }
 0x2c0   : > { %v3455_v9 = vadd.f32 %v3454_v10, %v3366_v32 }
 0x2c2   : > { %v3544_v37 = vadd.f32 %v3543_v17, %v3455_v9 }
 0x2c4   : > { %v3650_v28 = vadd.f32 %v3649_v31, %v3544_v37  ;;  %v3689_v1 = vmul.f32 %v3544_v37, %v3544_v37 }
 0x2c5   : > { %v3367_v41 = vpop.f32.mrf.mxu2  ;;  %v3281_v51 = vpop.f32.mrf.mxu1 }
 0x2c6   : > { %v3720_v14 = vadd.f32 %v3719_v11, %v3689_v1  ;;  %v3368_v23 = vadd.f32 %v3367_v41, %v3279_v19  ;;  %v3282_v3 = vadd.f32 %v3281_v51, %v6105_v4 }
 0x2c7   : > { %v3545_v52 = vpop.f32.mrf.mxu0  ;;  %v3456_v2 = vpop.f32.mrf.mxu3 }
 0x2c8   : > { %v3457_v36 = vadd.f32 %v3456_v2, %v3368_v23 }
 0x2ca   : > { %v3546_v49 = vadd.f32 %v3545_v52, %v3457_v36 }
 0x2cc   : > { %v5060_v30 = vpack.c.bf16 %v3546_v49, %v3544_v37  ;;  %v3651_v25 = vadd.f32 %v3650_v28, %v3546_v49  ;;  %v3690_v39 = vmul.f32 %v3546_v49, %v3546_v49 }
 0x2cd   : > { %v3370_v62 = vpop.f32.mrf.mxu2  ;;  %v3283_v24 = vpop.f32.mrf.mxu1 }
 0x2ce   : > { %5088 = vst [vmem:[%s6128_s22 + $0x60] sm:$0xff] %v5060_v30   ;;  %v3721_v57 = vadd.f32 %v3720_v14, %v3690_v39  ;;  %v3371_v63 = vadd.f32 %v3370_v62, %v3282_v3  ;;  %v3284_v45 = vadd.f32 %v3283_v24, %v6108_v58 }
 0x2cf   : > { %v3548_v0 = vpop.f32.mrf.mxu0  ;;  %v3459_v20 = vpop.f32.mrf.mxu3 }
 0x2d0   : > { %v3460_v50 = vadd.f32 %v3459_v20, %v3371_v63 }
 0x2d2   : > { %v3549_v33 = vadd.f32 %v3548_v0, %v3460_v50 }
 0x2d4   : > { %v3652_v35 = vadd.f32 %v3651_v25, %v3549_v33  ;;  %v3691_v5 = vmul.f32 %v3549_v33, %v3549_v33 }
 0x2d5   : > { %v3372_v54 = vpop.f32.mrf.mxu2  ;;  %v3286_v12 = vpop.f32.mrf.mxu1 }
 0x2d6   : > { %v3722_v26 = vadd.f32 %v3721_v57, %v3691_v5  ;;  %v3373_v47 = vadd.f32 %v3372_v54, %v3284_v45  ;;  %v3287_v13 = vadd.f32 %v3286_v12, %v6111_v15 }
 0x2d7   : > { %v3550_v40 = vpop.f32.mrf.mxu0  ;;  %v3461_v4 = vpop.f32.mrf.mxu3 }
 0x2d8   : > { %v3462_v59 = vadd.f32 %v3461_v4, %v3373_v47 }
 0x2da   : > { %v3551_v42 = vadd.f32 %v3550_v40, %v3462_v59 }
 0x2dc   : > { %v5065_v6 = vpack.c.bf16 %v3551_v42, %v3549_v33  ;;  %v3653_v22 = vadd.f32 %v3652_v35, %v3551_v42  ;;  %v3692_v61 = vmul.f32 %v3551_v42, %v3551_v42 }
 0x2dd   : > { %v3375_v46 = vpop.f32.mrf.mxu2  ;;  %v3288_v16 = vpop.f32.mrf.mxu1 }
 0x2de   : > { %5089 = vst [vmem:[%s6128_s22 + $0x68] sm:$0xff] %v5065_v6   ;;  %v3723_v29 = vadd.f32 %v3722_v26, %v3692_v61  ;;  %v3376_v43 = vadd.f32 %v3375_v46, %v3287_v13  ;;  %v3289_v21 = vadd.f32 %v3288_v16, %v6114_v27 }
 0x2df   : > { %v3553_v53 = vpop.f32.mrf.mxu0  ;;  %v3464_v58 = vpop.f32.mrf.mxu3 }
 0x2e0   : > { %v3465_v8 = vadd.f32 %v3464_v58, %v3376_v43 }
 0x2e2   : > { %v3554_v60 = vadd.f32 %v3553_v53, %v3465_v8 }
 0x2e4   : > { %v3654_v55 = vadd.f32 %v3653_v22, %v3554_v60  ;;  %v3693_v34 = vmul.f32 %v3554_v60, %v3554_v60 }
 0x2e5   : > { %v3377_v31 = vpop.f32.mrf.mxu2  ;;  %v3291_v18 = vpop.f32.mrf.mxu1 }
 0x2e6   : > { %v3724_v56 = vadd.f32 %v3723_v29, %v3693_v34  ;;  %v3378_v7 = vadd.f32 %v3377_v31, %v3289_v21  ;;  %v3292_v37 = vadd.f32 %v3291_v18, %v6117_v48 }
 0x2e7   : > { %v3555_v38 = vpop.f32.mrf.mxu0  ;;  %v3466_v15 = vpop.f32.mrf.mxu3 }
 0x2e8   : > { %v3467_v11 = vadd.f32 %v3466_v15, %v3378_v7 }
 0x2ea   : > { %v3556_v32 = vadd.f32 %v3555_v38, %v3467_v11 }
 0x2ec   : > { %v5070_v17 = vpack.c.bf16 %v3556_v32, %v3554_v60  ;;  %v3655_v10 = vadd.f32 %v3654_v55, %v3556_v32  ;;  %v3694_v9 = vmul.f32 %v3556_v32, %v3556_v32 }
 0x2ed   : > { %v3380_v28 = vpop.f32.mrf.mxu2  ;;  %v3293_v14 = vpop.f32.mrf.mxu1 }
 0x2ee   : > { %5090 = vst [vmem:[%s6128_s22 + $0x70] sm:$0xff] %v5070_v17   ;;  %v3725_v1 = vadd.f32 %v3724_v56, %v3694_v9  ;;  %v3381_v19 = vadd.f32 %v3380_v28, %v3292_v37  ;;  %v3294_v36 = vadd.f32 %v3293_v14, %v6120_v44 }
 0x2ef   : > { %v3558_v41 = vpop.f32.mrf.mxu0  ;;  %v3469_v51 = vpop.f32.mrf.mxu3 }
 0x2f0   : > { %v3470_v27 = vadd.f32 %v3469_v51, %v3381_v19 }
 0x2f2   : > { %v3559_v23 = vadd.f32 %v3558_v41, %v3470_v27 }
 0x2f4   : > { %v3656_v52 = vadd.f32 %v3655_v10, %v3559_v23  ;;  %v3695_v2 = vmul.f32 %v3559_v23, %v3559_v23 }
 0x2f5   : > { %v3382_v49 = vpop.f32.mrf.mxu2 }
 0x2f6   : > { %v3726_v30 = vadd.f32 %v3725_v1, %v3695_v2  ;;  %v3383_v25 = vadd.f32 %v3382_v49, %v3294_v36 }
 0x2f7   : > { %v3471_v39 = vpop.f32.mrf.mxu3  ;;  %v3560_v48 = vpop.f32.mrf.mxu0 }
 0x2f8   : > { %v3472_v3 = vadd.f32 %v3471_v39, %v3383_v25 }
 0x2fa   : > { %v3561_v62 = vadd.f32 %v3560_v48, %v3472_v3 }
 0x2fc   : > { %v5075_v24 = vpack.c.bf16 %v3561_v62, %v3559_v23  ;;  %v3657_v57 = vadd.f32 %v3656_v52, %v3561_v62  ;;  %v3696_v63 = vmul.f32 %v3561_v62, %v3561_v62 }
 0x2fe   : > { %5091 = vst [vmem:[%s6128_s22 + $0x78] sm:$0xff] %v5075_v24   ;;  %v3658_v0 = vrot.slane %v3657_v57, 4  ;;  %v3727_v20 = vadd.f32 %v3726_v30, %v3696_v63 }
 0x300   : > { %v3659_v50 = vadd.f32 %v3658_v0, %v3657_v57  ;;  %v3728_v33 = vrot.slane %v3727_v20, 4 }
 0x302   : > { %v3660_v35 = vrot.slane %v3659_v50, 2  ;;  %v3729_v5 = vadd.f32 %v3728_v33, %v3727_v20 }
 0x304   : > { %v3661_v44 = vadd.f32 %v3660_v35, %v3659_v50  ;;  %v3730_v45 = vrot.slane %v3729_v5, 2 }
 0x306   : > { %v3662_v54 = vrot.slane %v3661_v44, 1  ;;  %v3731_v12 = vadd.f32 %v3730_v45, %v3729_v5 }
 0x308   : > { %v3663_v26 = vadd.f32 %v3662_v54, %v3661_v44  ;;  %v3732_v47 = vrot.slane %v3731_v12, 1 }
 0x30a   : > { %3664 = vst [vmem:[%s247_s24] sm:$0x1] %v3663_v26  ;;  %v3733_v40 = vadd.f32 %v3732_v47, %v3731_v12 }
 0x30c   : > { %3734 = vst [vmem:[%s253_s27] sm:$0x1] %v3733_v40 }
 0x30d PF: > { %s15_s17 = sadd.s32 1, %s5164_s17   ;;  %s6232_s15 = smov %s5160_s16 }
 0x30e   : > { %p12_p5 = scmp.ge.s32.totalorder %s15_s17, 4   ;;  %s6233_s16 = smov %s6235_s18 }
 0x310   :  { %14 = sbr.rel (!%p12_p5) target bundleno = 2 (0x2), region = 83 }

// kernel: up_forward.4
= control target key start
LH: loop header
LB: loop body
LE: loop exit
PB: predicated region body
PF: predicated region fallthrough
CT: control target
= control target key end

     0   :  { %s4928_s18 = smov 0   ;;  %s4930_s19 = smov 0   ;;  %s8010_s0 = inlined_call_operand.vmem [shape: bf16[2,18,18,4], index: 0, kind: input, shape index: {}]   ;;  %s8011_s1 = inlined_call_operand.vmem [shape: bf16[2,18,18,4], index: 1, kind: input, shape index: {}]   ;;  %s8012_s2 = inlined_call_operand.vmem [shape: bf16[72,128], index: 2, kind: input, shape index: {}]   ;;  %s8013_s3 = inlined_call_operand.vmem [shape: bf16[2,256,128], index: 3, kind: output, shape index: {0}]   ;;  %s8014_s4 = inlined_call_operand.vmem [shape: f32[2,1,1,128], index: 4, kind: output, shape index: {1}]   ;;  %s8015_s5 = inlined_call_operand.vmem [shape: f32[2,1,1,128], index: 5, kind: output, shape index: {2}]  }
   0x1   :  { %s4932_s20 = smov 0  }
   0x2 LB: > { %s28_s21 = sadd.s32 1, %s4875_s19  ;;  %p4505_p0 = scmp.ge.s32.totalorder %s4879_s20, 1  ;;  %s4879_s20 = sphi %s4932_s20, %s16_s20   ;;  %s4875_s19 = sphi %s4930_s19, %s8411_s19   ;;  %s4871_s18 = sphi %s4928_s18, %s8410_s18  }
   0x3   : > { %p30_p1 = scmp.ge.s32.totalorder %s28_s21, 2  ;;  %p220_p2 = scmp.lt.s32.totalorder %s4879_s20, 3 }
   0x5   : > { %s8413_s21 = smov (%p30_p1, %s28_s21), 0  ;;  %p221_p3 = pnand %p4505_p0, %p220_p2 }
   0x7   : > { %224 = sbr.rel (%p221_p3) target bundleno = 1757 (0x6dd), region = 32 }
   0xc   : > { %p269_p4 = scmp.lt.s32.totalorder %s4871_s18, 1  ;;  %vm393_vm0 = vsmask.f32 3328  ;;  %vm394_vm1 = vsmask.f32 7440  ;;  %s4881_s26 = smov 4  }
   0xd   : > { %vm4990_vm2 = vmor %vm393_vm0, %vm394_vm1  ;;  %vm957_vm3 = vcmask 1042432   ;;  %vm958_vm4 = vcmask 1046532   ;;  %vm360_vm5 = vcmask 27648   ;;  %s4882_s27 = smov 8   ;;  %vm876_vm7 = vcmask 60448   ;;  %s4883_s28 = smov 12  }
   0xe   : > { %s8415_s18 = smov (!%p269_p4, %s4871_s18), 1  ;;  %vm5377_vm6 = vmor %vm957_vm3, %vm958_vm4  ;;  %vm1168_vm8 = vcmask 93248   ;;  %s4884_s29 = smov 16   ;;  %vm1299_vm9 = vcmask 126048   ;;  %vm1452_vm10 = vcmask 158848   ;;  %vm1589_vm11 = vcmask 191648  }
   0xf   : > { %s4775_s22 = smul.u32 216, %s8415_s18  ;;  %s4885_s30 = smov 20   ;;  %vm1720_vm12 = vcmask 224448   ;;  %vm1873_vm13 = vcmask 257248   ;;  %vm2010_vm14 = vcmask 290048   ;;  %vm2227_vm15 = vcmask 322848  }
  0x10   : > { %s4886_s6 = smov 24   ;;  %s4887_s7 = smov 28   ;;  %vm2740_vm0 = vcmask 355648   ;;  %vm2997_vm1 = vcmask 388448   ;;  %vm3128_vm3 = vcmask 421248   ;;  %vm3281_vm4 = vcmask 454048  }
  0x11   : > { %s4954_s25 = scalar_lea.vmem %s8010_s0, %s4775_s22  ;;  %s4888_s8 = smov 32  }
  0x12   : > { %v4957_v0 = vld [vmem:[%s4954_s25 + $0xc] sm:$0xf]  ;;  %v4960_v1 = vld [vmem:[%s4954_s25 + $0x10] sm:$0xf]  ;;  %v4963_v2 = vld [vmem:[%s4954_s25] sm:$0xf]  ;;  %s6326_s11 = scalar_lea.vmem %s8011_s1, %s4775_s22 }
  0x13   : > { %v421_v3 = vshrl.u32 %v4957_v0, 16  ;;  %v424_v4 = vshll.u32 %v4957_v0, 16  ;;  %v430_v5 = vshll.u32 %v4960_v1, 16  ;;  %v4969_v6 = vld [vmem:[%s4954_s25 + $0x4] sm:$0xf]  ;;  %v397_v7 = vshrl.u32 %v4963_v2, 16 }
  0x14   : > { %v400_v8 = vshll.u32 %v4963_v2, 16  ;;  %v406_v9 = vshll.u32 %v4969_v6, 16  ;;  %v4975_v10 = vld [vmem:[%s4954_s25 + $0x14] sm:$0x1]  ;;  %v434_v11 = vshrl.u32 %v4960_v1, 16  ;;  %v410_v12 = vshrl.u32 %v4969_v6, 16 }
  0x15   : > { %v423_v13 = vrot.slane %v421_v3, 4  ;;  %v426_v14 = vrot.slane %v424_v4, 5  ;;  %v432_v15 = vrot.slane %v430_v5, 5  ;;  %v399_v16 = vrot.slane %v397_v7, 4  ;;  %v4980_v17 = vld [vmem:[%s4954_s25 + $0x8] sm:$0x1] }
  0x16   : > { %v402_v18 = vrot.slane %v400_v8, 5  ;;  %v408_v19 = vrot.slane %v406_v9, 5  ;;  %v436_v20 = vrot.slane %v434_v11, 4  ;;  %v440_v21 = vshll.u32 %v4975_v10, 16  ;;  %v4984_v22 = vld [vmem:[%s4954_s25 + $0x28] sm:$0xf] }
  0x17   : > { %v427_v23 = vor.u32 %v426_v14, %v423_v13  ;;  %v412_v24 = vrot.slane %v410_v12, 4  ;;  %v416_v25 = vshll.u32 %v4980_v17, 16  ;;  %v478_v26 = vshll.u32 %v4984_v22, 16  ;;  %v4996_v31 = vld [vmem:[%s4954_s25 + $0x24] sm:$0xf]  ;;  %s4889_s12 = smov 36  }
  0x18   : > { %v403_v28 = vor.u32 %v402_v18, %v399_v16  ;;  %v437_v29 = vor.u32 %v436_v20, %v432_v15  ;;  %v482_v30 = vshrl.u32 %v4984_v22, 16  ;;  %v442_v35 = vrot.slane %v440_v21, 5  ;;  %v4999_v37 = vld [vmem:[%s4954_s25 + $0x18] sm:$0xf]  ;;  %v5010_v42 = vld [vmem:[%s4954_s25 + $0x1c] sm:$0xf] }
  0x19   : > { %v428_v32 = vrot.slane %v427_v23, 4  ;;  %v413_v33 = vor.u32 %v412_v24, %v408_v19  ;;  %v418_v36 = vrot.slane %v416_v25, 5  ;;  %v5005_v39 = vrot.slane %v478_v26, 5  ;;  %v5017_v46 = vld [vmem:[%s4954_s25 + $0x2c] sm:$0x1]  ;;  %s4890_s13 = smov 40  }
  0x1a   : > { %v404_v34 = vrot.slane %v403_v28, 4  ;;  %v469_v40 = vshrl.u32 %v4996_v31, 16  ;;  %v472_v41 = vshll.u32 %v4996_v31, 16  ;;  %v438_v44 = vrot.slane %v437_v29, 4  ;;  %v5024_v53 = vld [vmem:[%s4954_s25 + $0x3c] sm:$0xf] }
  0x1b   : > { %v5003_v38 = vsel %vm4990_vm2, %v428_v32, %v432_v15  ;;  %v414_v45 = vrot.slane %v413_v33, 4  ;;  %v484_v47 = vrot.slane %v482_v30, 4  ;;  %v445_v50 = vshrl.u32 %v4999_v37, 16  ;;  %v5028_v56 = vld [vmem:[%s4954_s25 + $0x34] sm:$0xf]  ;;  %s4891_s14 = smov 44  }
  0x1c   : > { %8180 = vst [vmem:[#allocation3_spill] sm:$0xff] %v5003_v38  ;;  %784 = vrot.lane.b32.xlu1 %v5003_v38, %s4881_s26  ;;  %v409_v43 = vsel %vm4990_vm2, %v404_v34, %v408_v19  ;;  %v471_v48 = vrot.slane %v469_v40, 4  ;;  %v474_v49 = vrot.slane %v472_v41, 5  ;;  %v448_v51 = vshll.u32 %v4999_v37, 16  ;;  %v5040_v4 = vld [vmem:[%s4954_s25 + $0x20] sm:$0x1] }
  0x1d   : > { %780 = vrot.lane.b32.xlu0 %v409_v43, %s4881_s26  ;;  %v454_v52 = vshll.u32 %v5010_v42, 16  ;;  %v488_v54 = vshll.u32 %v5017_v46, 16  ;;  %v447_v55 = vrot.slane %v445_v50, 4  ;;  %v5032_v57 = vsel %vm4990_vm2, %v438_v44, %v442_v35  ;;  %v5049_v16 = vld [vmem:[%s4954_s25 + $0x4c] sm:$0xf]  ;;  %s4892_s15 = smov 48  }
  0x1e   : > { %8181 = vst [vmem:[#allocation4_spill] sm:$0xff] %v5032_v57  ;;  %v419_v58 = vsel %vm4990_vm2, %v414_v45, %v418_v36  ;;  %v485_v59 = vor.u32 %v484_v47, %v5005_v39  ;;  %v450_v60 = vrot.slane %v448_v51, 5  ;;  %v475_v61 = vor.u32 %v474_v49, %v471_v48  ;;  %v5053_v19 = vld [vmem:[%s4954_s25 + $0x40] sm:$0xf]  ;;  %v5060_v24 = vld [vmem:[%s4954_s25 + $0x38] sm:$0x1] }
  0x1f   : > { %v456_v62 = vrot.slane %v454_v52, 5  ;;  %v517_v63 = vshrl.u32 %v5024_v53, 16  ;;  %v520_v3 = vshll.u32 %v5024_v53, 16  ;;  %v502_v7 = vshll.u32 %v5028_v56, 16  ;;  %v5063_v29 = vld [vmem:[%s4954_s25 + $0x30] sm:$0xf] }
  0x20   : > { %v451_v5 = vor.u32 %v450_v60, %v447_v55  ;;  %v506_v8 = vshrl.u32 %v5028_v56, 16  ;;  %v458_v9 = vshrl.u32 %v5010_v42, 16  ;;  %v490_v11 = vrot.slane %v488_v54, 5  ;;  %v5070_v33 = vld [vmem:[%s4954_s25 + $0x48] sm:$0xf]  ;;  %s4893_s16 = smov 52  }
  0x21   : > { %v486_v12 = vrot.slane %v485_v59, 4  ;;  %v464_v15 = vshll.u32 %v5040_v4, 16  ;;  %v476_v18 = vrot.slane %v475_v61, 4  ;;  %v519_v20 = vrot.slane %v517_v63, 4  ;;  %v5256_v38 = vld [vmem:[%s4954_s25 + $0xa8] sm:$0xf] }
  0x22   : > { %v452_v13 = vrot.slane %v451_v5, 4  ;;  %v460_v14 = vrot.slane %v458_v9, 4  ;;  %v522_v21 = vrot.slane %v520_v3, 5  ;;  %v504_v25 = vrot.slane %v502_v7, 5  ;;  %v5099_v7 = vld [vmem:[%s4954_s25 + $0x60] sm:$0xf] }
  0x23   : > { %v508_v26 = vrot.slane %v506_v8, 4  ;;  %v550_v30 = vshll.u32 %v5049_v16, 16  ;;  %v554_v32 = vshrl.u32 %v5049_v16, 16  ;;  %v5074_v34 = vsel %vm4990_vm2, %v486_v12, %v490_v11  ;;  %v5105_v11 = vld [vmem:[%s4954_s25 + $0x58] sm:$0xf]  ;;  %s4894_s17 = smov 56  }
  0x24   : > { %786 = vrot.lane.b32.xlu1 %v5032_v57, %s4881_s26  ;;  %v5057_v23 = vsel %vm4990_vm2, %v452_v13, %v456_v62  ;;  %v461_v28 = vor.u32 %v460_v14, %v456_v62  ;;  %8183 = vst [vmem:[#allocation6_spill] sm:$0xff] %v5074_v34  ;;  %v526_v35 = vshll.u32 %v5053_v19, 16  ;;  %v466_v40 = vrot.slane %v464_v15, 5  ;;  %v5109_v14 = vld [vmem:[%s4954_s25 + $0x44] sm:$0x1]  ;;  %s4895_s22 = smov 60  }
  0x25   : > { %782 = vrot.lane.b32.xlu0 %v419_v58, %s4881_s26  ;;  %8182 = vst [vmem:[#allocation5_spill] sm:$0xff] %v5057_v23  ;;  %788 = vrot.lane.b32.xlu2 %v5057_v23, %s4881_s26  ;;  %v523_v41 = vor.u32 %v522_v21, %v519_v20  ;;  %v512_v43 = vshll.u32 %v5060_v24, 16  ;;  %v493_v44 = vshrl.u32 %v5063_v29, 16  ;;  %v496_v45 = vshll.u32 %v5063_v29, 16  ;;  %s4896_s23 = smov 64   ;;  %s4897_s24 = smov 68  }
  0x26   : > { %v462_v36 = vrot.slane %v461_v28, 4  ;;  %v5083_v47 = vsel %vm4990_vm2, %v476_v18, %v5005_v39  ;;  %v509_v48 = vor.u32 %v508_v26, %v504_v25  ;;  %v541_v49 = vshrl.u32 %v5070_v33, 16  ;;  %v5094_v39 = vld [vmem:[%s4954_s25 + $0x50] sm:$0x1]  ;;  %v5118_v26 = vld [vmem:[%s4954_s25 + $0x54] sm:$0xf] }
  0x27   : > { %8184 = vst [vmem:[#allocation7_spill] sm:$0xff] %v5083_v47  ;;  %v544_v50 = vshll.u32 %v5070_v33, 16  ;;  %v552_v51 = vrot.slane %v550_v30, 5  ;;  %v556_v52 = vrot.slane %v554_v32, 4  ;;  %v495_v54 = vrot.slane %v493_v44, 4  ;;  %s4644_s10 = sshll.u32 %s8415_s18, 7 }
  0x28   : > { %v498_v55 = vrot.slane %v496_v45, 5  ;;  %v5091_v58 = vsel %vm4990_vm2, %v462_v36, %v466_v40  ;;  %8186 = vst [vmem:[#allocation9_spill] sm:$0xff] %v5094_v39  ;;  %v524_v59 = vrot.slane %v523_v41, 4  ;;  %v528_v60 = vrot.slane %v526_v35, 5 }
  0x29   : > { %8185 = vst [vmem:[#allocation8_spill] sm:$0xff] %v5091_v58  ;;  %v510_v62 = vrot.slane %v509_v48, 4  ;;  %v514_v63 = vrot.slane %v512_v43, 5  ;;  %v543_v3 = vrot.slane %v541_v49, 4  ;;  %v546_v5 = vrot.slane %v544_v50, 5 }
  0x2a   : > { %v499_v61 = vor.u32 %v498_v55, %v495_v54  ;;  %v557_v8 = vor.u32 %v556_v52, %v552_v51  ;;  %v560_v9 = vshll.u32 %v5094_v39, 16  ;;  %v530_v12 = vshrl.u32 %v5053_v19, 16  ;;  %v5133_v43 = vld [vmem:[%s4954_s25 + $0x64] sm:$0xf]  ;;  %v5140_v52 = vld [vmem:[%s4954_s25 + $0x5c] sm:$0x1] }
  0x2b   : > { %v5113_v15 = vsel %vm4990_vm2, %v524_v59, %v528_v60  ;;  %v589_v18 = vshrl.u32 %v5099_v7, 16  ;;  %v592_v20 = vshll.u32 %v5099_v7, 16  ;;  %v5122_v28 = vsel %vm4990_vm2, %v510_v62, %v514_v63  ;;  %8190 = vst [vmem:[#allocation13_spill] sm:$0xff] %v5140_v52  ;;  %v5154_v63 = vld [vmem:[%s4954_s25 + $0x6c] sm:$0xf] }
  0x2c   : > { %794 = vrot.lane.b32.xlu1 %v5074_v34, %s4881_s26  ;;  %v500_v13 = vrot.slane %v499_v61, 4  ;;  %8187 = vst [vmem:[#allocation10_spill] sm:$0xff] %v5113_v15  ;;  %v532_v21 = vrot.slane %v530_v12, 4  ;;  %v547_v30 = vor.u32 %v546_v5, %v543_v3  ;;  %v574_v32 = vshll.u32 %v5105_v11, 16  ;;  %v5144_v61 = vld [vmem:[%s4954_s25 + $0x70] sm:$0xf] }
  0x2d   : > { %792 = vrot.lane.b32.xlu0 %v5083_v47, %s4881_s26  ;;  %790 = vrot.lane.b32.xlu2 %v5091_v58, %s4881_s26  ;;  %8188 = vst [vmem:[#allocation11_spill] sm:$0xff] %v5122_v28  ;;  %v578_v35 = vshrl.u32 %v5105_v11, 16  ;;  %v558_v36 = vrot.slane %v557_v8, 4  ;;  %v562_v40 = vrot.slane %v560_v9, 5  ;;  %v536_v45 = vshll.u32 %v5109_v14, 16 }
  0x2e   : > { %v5130_v41 = vsel %vm4990_vm2, %v500_v13, %v504_v25  ;;  %v533_v44 = vor.u32 %v532_v21, %v528_v60  ;;  %v565_v48 = vshrl.u32 %v5118_v26, 16  ;;  %v591_v49 = vrot.slane %v589_v18, 4  ;;  %v5219_v34 = vld [vmem:[%s4954_s25 + $0x88] sm:$0xf]  ;;  %v5229_v58 = vld [vmem:[%s4954_s25 + $0x90] sm:$0xf] }
  0x2f   : > { %8189 = vst [vmem:[#allocation12_spill] sm:$0xff] %v5130_v41  ;;  %v594_v50 = vrot.slane %v592_v20, 5  ;;  %v568_v54 = vshll.u32 %v5118_v26, 16  ;;  %v548_v55 = vrot.slane %v547_v30, 4  ;;  %v576_v25 = vrot.slane %v574_v32, 5 }
  0x30   : > { %v580_v59 = vrot.slane %v578_v35, 4  ;;  %v5148_v60 = vsel %vm4990_vm2, %v558_v36, %v562_v40  ;;  %v598_v62 = vshll.u32 %v5133_v43, 16  ;;  %v534_v3 = vrot.slane %v533_v44, 4  ;;  %v5331_v39 = vld [vmem:[%s4954_s25 + $0xbc] sm:$0x1] }
  0x31   : > { %8191 = vst [vmem:[#allocation14_spill] sm:$0xff] %v5148_v60  ;;  %v538_v5 = vrot.slane %v536_v45, 5  ;;  %v567_v8 = vrot.slane %v565_v48, 4  ;;  %v570_v9 = vrot.slane %v568_v54, 5  ;;  %v595_v12 = vor.u32 %v594_v50, %v591_v49  ;;  %v5175_v48 = vld [vmem:[%s4954_s25 + $0x74] sm:$0x1] }
  0x32   : > { %v584_v13 = vshll.u32 %v5140_v52, 16  ;;  %v622_v18 = vshll.u32 %v5144_v61, 16  ;;  %v626_v20 = vshrl.u32 %v5144_v61, 16  ;;  %v5161_v21 = vsel %vm4990_vm2, %v548_v55, %v552_v51  ;;  %8194 = vst [vmem:[#allocation17_spill] sm:$0xff] %v5175_v48 }
  0x33   : > { %8192 = vst [vmem:[#allocation15_spill] sm:$0xff] %v5161_v21  ;;  %v581_v30 = vor.u32 %v580_v59, %v576_v25  ;;  %v613_v32 = vshrl.u32 %v5154_v63, 16  ;;  %v616_v35 = vshll.u32 %v5154_v63, 16  ;;  %v5169_v36 = vsel %vm4990_vm2, %v534_v3, %v538_v5  ;;  %v5178_v3 = vld [vmem:[%s4954_s25 + $0x84] sm:$0xf] }
  0x34   : > { %800 = vrot.lane.b32.xlu1 %v5113_v15, %s4881_s26  ;;  %8193 = vst [vmem:[#allocation16_spill] sm:$0xff] %v5169_v36  ;;  %v571_v40 = vor.u32 %v570_v9, %v567_v8  ;;  %v602_v44 = vshrl.u32 %v5133_v43, 16  ;;  %v596_v51 = vrot.slane %v595_v12, 4  ;;  %v600_v45 = vrot.slane %v598_v62, 5  ;;  %v5183_v5 = vld [vmem:[%s4954_s25 + $0x7c] sm:$0xf] }
  0x35   : > { %798 = vrot.lane.b32.xlu0 %v5122_v28, %s4881_s26  ;;  %796 = vrot.lane.b32.xlu2 %v5130_v41, %s4881_s26  ;;  %v624_v49 = vrot.slane %v622_v18, 5  ;;  %v628_v50 = vrot.slane %v626_v20, 4  ;;  %v582_v54 = vrot.slane %v581_v30, 4  ;;  %v586_v55 = vrot.slane %v584_v13, 5  ;;  %v5187_v62 = vld [vmem:[%s4954_s25 + $0x68] sm:$0x1] }
  0x36   : > { %v615_v59 = vrot.slane %v613_v32, 4  ;;  %v632_v8 = vshll.u32 %v5175_v48, 16  ;;  %v572_v9 = vrot.slane %v571_v40, 4  ;;  %8195 = vst [vmem:[#allocation18_spill] sm:$0xff] %v5187_v62  ;;  %v604_v12 = vrot.slane %v602_v44, 4 }
  0x37   : > { %v5191_v18 = vsel %vm4990_vm2, %v596_v51, %v600_v45  ;;  %v629_v13 = vor.u32 %v628_v50, %v624_v49  ;;  %v661_v20 = vshrl.u32 %v5178_v3, 16  ;;  %v664_v30 = vshll.u32 %v5178_v3, 16  ;;  %v5196_v32 = vld [vmem:[%s4954_s25 + $0x78] sm:$0xf]  ;;  %365 = vst.msk [vmem:[#allocation2 + $0x10] sm:$0xf] %vm360_vm5, %v4999_v37 }
  0x38   : > { %8196 = vst [vmem:[#allocation19_spill] sm:$0xff] %v5191_v18  ;;  %v646_v15 = vshll.u32 %v5183_v5, 16  ;;  %v650_v44 = vshrl.u32 %v5183_v5, 16  ;;  %v608_v51 = vshll.u32 %v5187_v62, 16  ;;  %v5209_v50 = vsel %vm4990_vm2, %v572_v9, %v576_v25  ;;  %v5222_v25 = vld [vmem:[%s4954_s25 + $0x80] sm:$0x1] }
  0x39   : > { %8198 = vst [vmem:[#allocation21_spill] sm:$0xff] %v5209_v50  ;;  %v666_v41 = vrot.slane %v664_v30, 5 }
  0x3a   : > { %8199 = vst [vmem:[#allocation22_spill] sm:$0xff] %v5222_v25  ;;  %v652_v9 = vrot.slane %v650_v44, 4  ;;  %v656_v44 = vshll.u32 %v5222_v25, 16  ;;  %v5297_v25 = vld [vmem:[%s4954_s25 + $0xa4] sm:$0x1] }
  0x3b   : > { %8209 = vst [vmem:[#allocation32_spill] sm:$0xff] %v5297_v25 }
  0x3c   : > { %806 = vrot.lane.b32.xlu1 %v5148_v60, %s4881_s26  ;;  %v618_v60 = vrot.slane %v616_v35, 5  ;;  %v5200_v35 = vsel %vm4990_vm2, %v582_v54, %v586_v55  ;;  %v640_v54 = vshll.u32 %v5196_v32, 16  ;;  %v630_v55 = vrot.slane %v629_v13, 4  ;;  %361 = vst.msk [vmem:[#allocation2] sm:$0xf] %vm360_vm5, %v4963_v2 }
  0x3d   : > { %804 = vrot.lane.b32.xlu0 %v5161_v21, %s4881_s26  ;;  %802 = vrot.lane.b32.xlu2 %v5169_v36, %s4881_s26  ;;  %8197 = vst [vmem:[#allocation20_spill] sm:$0xff] %v5200_v35  ;;  %v605_v36 = vor.u32 %v604_v12, %v600_v45  ;;  %v5212_v21 = vld [vmem:[%s4954_s25 + $0x94] sm:$0xf]  ;;  %v648_v45 = vrot.slane %v646_v15, 5 }
  0x3e   : > { %v619_v40 = vor.u32 %v618_v60, %v615_v59  ;;  %v637_v60 = vshrl.u32 %v5196_v32, 16  ;;  %v634_v59 = vrot.slane %v632_v8, 5  ;;  %v694_v12 = vshll.u32 %v5212_v21, 16  ;;  %362 = vst.msk [vmem:[#allocation2 + $0x4] sm:$0xf] %vm360_vm5, %v4969_v6 }
  0x3f   : > { %v698_v23 = vshrl.u32 %v5212_v21, 16  ;;  %v606_v13 = vrot.slane %v605_v36, 4  ;;  %v610_v8 = vrot.slane %v608_v51, 5  ;;  %v653_v47 = vor.u32 %v652_v9, %v648_v45  ;;  %363 = vst.msk [vmem:[#allocation2 + $0x8] sm:$0xf] %vm360_vm5, %v4957_v0 }
  0x40   : > { %v620_v28 = vrot.slane %v619_v40, 4  ;;  %v5233_v30 = vsel %vm4990_vm2, %v630_v55, %v634_v59  ;;  %v670_v40 = vshll.u32 %v5219_v34, 16  ;;  %v685_v36 = vshrl.u32 %v5229_v58, 16  ;;  %364 = vst.msk [vmem:[#allocation2 + $0xc] sm:$0xf] %vm360_vm5, %v4960_v1 }
  0x41   : > { %8200 = vst [vmem:[#allocation23_spill] sm:$0xff] %v5233_v30  ;;  %v688_v51 = vshll.u32 %v5229_v58, 16  ;;  %v658_v9 = vrot.slane %v656_v44, 5  ;;  %v736_v44 = vshll.u32 %v5256_v38, 16 }
  0x42   : > { %v672_v59 = vrot.slane %v670_v40, 5  ;;  %v733_v40 = vshrl.u32 %v5256_v38, 16  ;;  %366 = vst.msk [vmem:[#allocation2 + $0x14] sm:$0xf] %vm360_vm5, %v5010_v42 }
  0x43   : > { %367 = vst.msk [vmem:[#allocation2 + $0x18] sm:$0xf] %vm360_vm5, %v4996_v31 }
  0x44   : > { %812 = vrot.lane.b32.xlu1 %v5191_v18, %s4881_s26  ;;  %v663_v18 = vrot.slane %v661_v20, 4  ;;  %v642_v20 = vrot.slane %v640_v54, 5  ;;  %v700_v54 = vrot.slane %v698_v23, 4  ;;  %v654_v23 = vrot.slane %v653_v47, 4  ;;  %368 = vst.msk [vmem:[#allocation2 + $0x1c] sm:$0xf] %vm360_vm5, %v4984_v22 }
  0x45   : > { %810 = vrot.lane.b32.xlu0 %v5200_v35, %s4881_s26  ;;  %808 = vrot.lane.b32.xlu2 %v5209_v50, %s4881_s26  ;;  %v639_v35 = vrot.slane %v637_v60, 4  ;;  %v5239_v50 = vsel %vm4990_vm2, %v620_v28, %v624_v49  ;;  %v696_v60 = vrot.slane %v694_v12, 5  ;;  %v674_v49 = vshrl.u32 %v5219_v34, 16  ;;  %369 = vst.msk [vmem:[#allocation2 + $0x20] sm:$0xf] %vm360_vm5, %v5063_v29 }
  0x46   : > { %v667_v15 = vor.u32 %v666_v41, %v663_v18  ;;  %8201 = vst [vmem:[#allocation24_spill] sm:$0xff] %v5239_v50  ;;  %v5247_v41 = vsel %vm4990_vm2, %v606_v13, %v610_v8  ;;  %v5250_v18 = vld [vmem:[%s4954_s25 + $0x98] sm:$0x1]  ;;  %v687_v12 = vrot.slane %v685_v36, 4  ;;  %v5262_v8 = vld [vmem:[%s4954_s25 + $0xa0] sm:$0xf] }
  0x47   : > { %8202 = vst [vmem:[#allocation25_spill] sm:$0xff] %v5247_v41  ;;  %v643_v28 = vor.u32 %v642_v20, %v639_v35  ;;  %v701_v13 = vor.u32 %v700_v54, %v696_v60  ;;  %v704_v35 = vshll.u32 %v5250_v18, 16  ;;  %v5274_v36 = vld [vmem:[%s4954_s25 + $0x9c] sm:$0xf] }
  0x48   : > { %8203 = vst [vmem:[#allocation26_spill] sm:$0xff] %v5250_v18  ;;  %v668_v55 = vrot.slane %v667_v15, 4  ;;  %v676_v15 = vrot.slane %v674_v49, 4  ;;  %v722_v49 = vshrl.u32 %v5262_v8, 16 }
  0x49   : > { %v644_v20 = vrot.slane %v643_v28, 4  ;;  %v718_v28 = vshll.u32 %v5262_v8, 16  ;;  %370 = vst.msk [vmem:[#allocation2 + $0x24] sm:$0xf] %vm360_vm5, %v5028_v56 }
  0x4a   : > { %v5269_v47 = vsel %vm4990_vm2, %v668_v55, %v672_v59  ;;  %v706_v55 = vrot.slane %v704_v35, 5  ;;  %v738_v35 = vrot.slane %v736_v44, 5  ;;  %v724_v48 = vrot.slane %v722_v49, 4  ;;  %371 = vst.msk [vmem:[#allocation2 + $0x28] sm:$0xf] %vm360_vm5, %v5024_v53 }
  0x4b   : > { %8205 = vst [vmem:[#allocation28_spill] sm:$0xff] %v5269_v47  ;;  %v5287_v18 = vsel %vm4990_vm2, %v644_v20, %v648_v45  ;;  %v5300_v45 = vld [vmem:[%s4954_s25 + $0xb8] sm:$0xf] }
  0x4c   : > { %818 = vrot.lane.b32.xlu1 %v5233_v30, %s4881_s26  ;;  %v690_v30 = vrot.slane %v688_v51, 5  ;;  %v5278_v51 = vsel %vm4990_vm2, %v654_v23, %v658_v9  ;;  %8207 = vst [vmem:[#allocation30_spill] sm:$0xff] %v5287_v18  ;;  %v5290_v23 = vld [vmem:[%s4954_s25 + $0xac] sm:$0xf]  ;;  %v709_v9 = vshrl.u32 %v5274_v36, 16  ;;  %v766_v49 = vshll.u32 %v5300_v45, 16 }
  0x4d   : > { %816 = vrot.lane.b32.xlu0 %v5239_v50, %s4881_s26  ;;  %814 = vrot.lane.b32.xlu2 %v5247_v41, %s4881_s26  ;;  %v5265_v50 = vld [vmem:[%s4954_s25 + $0x8c] sm:$0x1]  ;;  %8206 = vst [vmem:[#allocation29_spill] sm:$0xff] %v5278_v51  ;;  %v702_v41 = vrot.slane %v701_v13, 4  ;;  %v735_v13 = vrot.slane %v733_v40, 4  ;;  %v770_v62 = vshrl.u32 %v5300_v45, 16 }
  0x4e   : > { %8204 = vst [vmem:[#allocation27_spill] sm:$0xff] %v5265_v50  ;;  %v691_v54 = vor.u32 %v690_v30, %v687_v12  ;;  %v680_v57 = vshll.u32 %v5265_v50, 16  ;;  %v677_v30 = vor.u32 %v676_v15, %v672_v59  ;;  %v712_v12 = vshll.u32 %v5274_v36, 16  ;;  %v5310_v15 = vld [vmem:[%s4954_s25 + $0xb4] sm:$0xf] }
  0x4f   : > { %8208 = vst [vmem:[#allocation31_spill] sm:$0xff] %v5290_v23  ;;  %v720_v50 = vrot.slane %v718_v28, 5  ;;  %v5304_v20 = vsel %vm4990_vm2, %v702_v41, %v706_v55  ;;  %v742_v59 = vshll.u32 %v5290_v23, 16  ;;  %v728_v28 = vshll.u32 %v5297_v25, 16 }
  0x50   : > { %8210 = vst [vmem:[#allocation33_spill] sm:$0xff] %v5300_v45  ;;  %v678_v40 = vrot.slane %v677_v30, 4  ;;  %v682_v44 = vrot.slane %v680_v57, 5  ;;  %v714_v52 = vrot.slane %v712_v12, 5  ;;  %v760_v30 = vshll.u32 %v5310_v15, 16 }
  0x51   : > { %8211 = vst [vmem:[#allocation34_spill] sm:$0xff] %v5304_v20  ;;  %v725_v55 = vor.u32 %v724_v48, %v720_v50  ;;  %v746_v12 = vshrl.u32 %v5290_v23, 16  ;;  %v744_v48 = vrot.slane %v742_v59, 5  ;;  %v730_v25 = vrot.slane %v728_v28, 5 }
  0x52   : > { %8212 = vst [vmem:[#allocation35_spill] sm:$0xff] %v5310_v15  ;;  %v5325_v57 = vsel %vm4990_vm2, %v678_v40, %v682_v44  ;;  %v762_v45 = vrot.slane %v760_v30, 5  ;;  %v776_v59 = vshll.u32 %v5331_v39, 16 }
  0x53   : > { %8214 = vst [vmem:[#allocation37_spill] sm:$0xff] %v5325_v57 }
  0x54   : > { %824 = vrot.lane.b32.xlu1 %v5269_v47, %s4881_s26  ;;  %v692_v47 = vrot.slane %v691_v54, 4  ;;  %v739_v54 = vor.u32 %v738_v35, %v735_v13  ;;  %v772_v13 = vrot.slane %v770_v62, 4  ;;  %v726_v35 = vrot.slane %v725_v55, 4  ;;  %372 = vst.msk [vmem:[#allocation2 + $0x2c] sm:$0xf] %vm360_vm5, %v5053_v19 }
  0x55   : > { %822 = vrot.lane.b32.xlu0 %v5278_v51, %s4881_s26  ;;  %820 = vrot.lane.b32.xlu2 %v5287_v18, %s4881_s26  ;;  %v711_v51 = vrot.slane %v709_v9, 4  ;;  %v757_v18 = vshrl.u32 %v5310_v15, 16  ;;  %373 = vst.msk [vmem:[#allocation2 + $0x30] sm:$0xf] %vm360_vm5, %v5070_v33 }
  0x56   : > { %v5317_v41 = vsel %vm4990_vm2, %v692_v47, %v696_v60  ;;  %v740_v60 = vrot.slane %v739_v54, 4  ;;  %v768_v47 = vrot.slane %v766_v49, 5  ;;  %v5341_v54 = vld [vmem:[%s4954_s25 + $0xb0] sm:$0x1]  ;;  %v5345_v62 = vsel %vm4990_vm2, %v726_v35, %v730_v25  ;;  %374 = vst.msk [vmem:[#allocation2 + $0x34] sm:$0xf] %vm360_vm5, %v5049_v16 }
  0x57   : > { %8213 = vst [vmem:[#allocation36_spill] sm:$0xff] %v5317_v41  ;;  %v715_v9 = vor.u32 %v714_v52, %v711_v51  ;;  %v748_v51 = vrot.slane %v746_v12, 4  ;;  %v752_v55 = vshll.u32 %v5341_v54, 16  ;;  %v969_v35 = vrot.slane %v4960_v1, 5 }
  0x58   : > { %v5337_v40 = vsel %vm4990_vm2, %v740_v60, %v744_v48  ;;  %v773_v44 = vor.u32 %v772_v13, %v768_v47  ;;  %8215 = vst [vmem:[#allocation38_spill] sm:$0xff] %v5345_v62  ;;  %v962_v60 = vrot.slane %v4969_v6, 5  ;;  %v4511_v13 = vrot.slane %v4957_v0, 9 }
  0x59   : > { %v716_v52 = vrot.slane %v715_v9, 4  ;;  %v749_v49 = vor.u32 %v748_v51, %v744_v48  ;;  %v778_v9 = vrot.slane %v776_v59, 5  ;;  %v965_v51 = vrot.slane %v4980_v17, 5  ;;  %375 = vst.msk [vmem:[#allocation2 + $0x38] sm:$0xf] %vm360_vm5, %v5118_v26 }
  0x5a   : > { %v774_v30 = vrot.slane %v773_v44, 4  ;;  %v4510_v44 = vrot.slane %v4963_v2, 9  ;;  %v5393_v59 = vsel %vm5377_vm6, %v4511_v13, %v969_v35  ;;  %v976_v17 = vrot.slane %v5010_v42, 5  ;;  %376 = vst.msk [vmem:[#allocation2 + $0x3c] sm:$0xf] %vm360_vm5, %v5105_v11 }
  0x5b   : > { %v5351_v28 = vsel %vm4990_vm2, %v716_v52, %v720_v50  ;;  %v750_v25 = vrot.slane %v749_v49, 4  ;;  %v964_v52 = vrot.slane %v962_v60, 4  ;;  %v979_v49 = vrot.slane %v5040_v4, 5  ;;  %377 = vst.msk [vmem:[#allocation2 + $0x40] sm:$0xf] %vm360_vm5, %v5099_v7 }
  0x5c   : > { %830 = vrot.lane.b32.xlu1 %v5304_v20, %s4881_s26  ;;  %v759_v20 = vrot.slane %v757_v18, 4  ;;  %8216 = vst [vmem:[#allocation39_spill] sm:$0xff] %v5351_v28  ;;  %v963_v2 = vsel %vm5377_vm6, %v4510_v44, %v962_v60  ;;  %v978_v6 = vrot.slane %v976_v17, 4  ;;  %v990_v60 = vrot.slane %v5028_v56, 5 }
  0x5d   : > { %828 = vrot.lane.b32.xlu0 %v5317_v41, %s4881_s26  ;;  %826 = vrot.lane.b32.xlu2 %v5325_v57, %s4881_s26  ;;  %378 = vst.msk [vmem:[#allocation2 + $0x44] sm:$0xf] %vm360_vm5, %v5133_v43 }
  0x5e   : > { %v763_v18 = vor.u32 %v762_v45, %v759_v20  ;;  %v754_v45 = vrot.slane %v752_v55, 5  ;;  %v5360_v20 = vsel %vm4990_vm2, %v774_v30, %v778_v9  ;;  %v4512_v55 = vrot.slane %v4999_v37, 9  ;;  %379 = vst.msk [vmem:[#allocation2 + $0x48] sm:$0xf] %vm360_vm5, %v5154_v63 }
  0x5f   : > { %v971_v30 = vrot.slane %v969_v35, 4  ;;  %v972_v9 = vrot.slane %v4975_v10, 5  ;;  %v5425_v4 = vsel %vm5377_vm6, %v978_v6, %v979_v49  ;;  %v986_v35 = vrot.slane %v5017_v46, 5  ;;  %380 = vst.msk [vmem:[#allocation2 + $0x4c] sm:$0xf] %vm360_vm5, %v5144_v61 }
  0x60   : > { %v764_v12 = vrot.slane %v763_v18, 4  ;;  %v5371_v48 = vsel %vm4990_vm2, %v750_v25, %v754_v45  ;;  %v966_v18 = vsel %vm5377_vm6, %v964_v52, %v965_v51  ;;  %v983_v25 = vrot.slane %v4984_v22, 5  ;;  %381 = vst.msk [vmem:[#allocation2 + $0x50] sm:$0xf] %vm360_vm5, %v5196_v32 }
  0x61   : > { %v5442_v10 = vsel %vm5377_vm6, %v971_v30, %v972_v9  ;;  %v4514_v45 = vrot.slane %v5063_v29, 9  ;;  %v4513_v52 = vrot.slane %v4996_v31, 9  ;;  %v997_v46 = vrot.slane %v5053_v19, 5  ;;  %382 = vst.msk [vmem:[#allocation2 + $0x54] sm:$0xf] %vm360_vm5, %v5183_v5 }
  0x62   : > { %v5364_v50 = vsel %vm4990_vm2, %v764_v12, %v768_v47  ;;  %v8217_v47 = vmov 0  ;;  %v5431_v12 = vsel %vm5377_vm6, %v4512_v55, %v976_v17  ;;  %v985_v13 = vrot.slane %v983_v25, 4  ;;  %383 = vst.msk [vmem:[#allocation2 + $0x58] sm:$0xf] %vm360_vm5, %v5178_v3 }
  0x63   : > { %v8218_v47 = vsel %vm5377_vm6, 4294967295, %v8217_v47  ;;  %v5464_v51 = vsel %vm5377_vm6, %v4514_v45, %v990_v60  ;;  %v1000_v6 = vrot.slane %v5109_v14, 5  ;;  %v4515_v49 = vrot.slane %v5024_v53, 9  ;;  %384 = vst.msk [vmem:[#allocation2 + $0x5c] sm:$0xf] %vm360_vm5, %v5219_v34 }
  0x64   : > { %836 = vrot.lane.b32.xlu1 %v5337_v40, %s4881_s26  ;;  %8219 = vst [vmem:[#allocation40_spill] sm:$0xff] %v8218_v47  ;;  %v5471_v17 = vsel %vm5377_vm6, %v985_v13, %v986_v35  ;;  %v992_v55 = vrot.slane %v990_v60, 4  ;;  %v993_v14 = vrot.slane %v5060_v24, 5  ;;  %v1004_v45 = vrot.slane %v5049_v16, 5  ;;  %v8223_v35 = vld [vmem:[#allocation33_spill] sm:$0xff] }
  0x65   : > { %834 = vrot.lane.b32.xlu0 %v5345_v62, %s4881_s26  ;;  %832 = vrot.lane.b32.xlu2 %v5351_v28, %s4881_s26  ;;  %8220 = vst [vmem:[#allocation41_spill] sm:$0xff] %v5464_v51  ;;  %v4517_v60 = vrot.slane %v5118_v26, 9  ;;  %v1011_v13 = vrot.slane %v5105_v11, 5 }
  0x66   : > { %385 = vst.msk [vmem:[#allocation2 + $0x60] sm:$0xf] %vm360_vm5, %v5229_v58  ;;  %v5520_v24 = vsel %vm5377_vm6, %v992_v55, %v993_v14  ;;  %v1018_v14 = vrot.slane %v5133_v43, 5 }
  0x67   : > { %386 = vst.msk [vmem:[#allocation2 + $0x64] sm:$0xf] %vm360_vm5, %v5212_v21  ;;  %v5538_v55 = vsel %vm5377_vm6, %v4517_v60, %v1011_v13  ;;  %v8228_v60 = vld [vmem:[#allocation18_spill] sm:$0xff] }
  0x68   : > { %387 = vst.msk [vmem:[#allocation2 + $0x68] sm:$0xf] %vm360_vm5, %v5274_v36 }
  0x69   : > { %388 = vst.msk [vmem:[#allocation2 + $0x6c] sm:$0xf] %vm360_vm5, %v5262_v8 }
  0x6a   : > { %389 = vst.msk [vmem:[#allocation2 + $0x70] sm:$0xf] %vm360_vm5, %v5256_v38 }
  0x6b   : > { %390 = vst.msk [vmem:[#allocation2 + $0x74] sm:$0xf] %vm360_vm5, %v5290_v23 }
  0x6c   : > { %842 = vrot.lane.b32.xlu1 %v5360_v20, %s4881_s26  ;;  %8222 = vst [vmem:[#allocation43_spill] sm:$0xff] %v5520_v24 }
  0x6d   : > { %840 = vrot.lane.b32.xlu0 %v5364_v50, %s4881_s26  ;;  %838 = vrot.lane.b32.xlu2 %v5371_v48, %s4881_s26  ;;  %391 = vst.msk [vmem:[#allocation2 + $0x78] sm:$0xf] %vm360_vm5, %v5310_v15 }
  0x6e   : > { %392 = vst.msk [vmem:[#allocation2 + $0x7c] sm:$0xf] %vm360_vm5, %v8223_v35  ;;  %vm3418_vm5 = vcmask 486848  }
  0x74   : > { %1076 = vrot.lane.b32.xlu1 %v5393_v59, %s4882_s27 }
  0x75   : > { %1074 = vrot.lane.b32.xlu0 %v966_v18, %s4882_s27  ;;  %1072 = vrot.lane.b32.xlu2 %v963_v2, %s4882_s27  ;;  %v5482_v18 = vsel %vm5377_vm6, %v4513_v52, %v983_v25  ;;  %v999_v2 = vrot.slane %v997_v46, 4  ;;  %v5507_v25 = vsel %vm5377_vm6, %v4515_v49, %v997_v46  ;;  %v1006_v46 = vrot.slane %v1004_v45, 4 }
  0x76   : > { %v4516_v49 = vrot.slane %v5070_v33, 9 }
  0x77   : > { %v5501_v30 = vsel %vm5377_vm6, %v999_v2, %v1000_v6 }
  0x78   : > { %8221 = vst [vmem:[#allocation42_spill] sm:$0xff] %v5501_v30 }
  0x7c   : > { %1082 = vrot.lane.b32.xlu1 %v5425_v4, %s4882_s27 }
  0x7d   : > { %1080 = vrot.lane.b32.xlu0 %v5431_v12, %s4882_s27  ;;  %1078 = vrot.lane.b32.xlu2 %v5442_v10, %s4882_s27 }
  0x7f   : > { %v789_v44 = vpop.permute.xlu2 %788 }
  0x80   : > { %881 = vst.msk [vmem:[#allocation2 + $0x10] sm:$0xf] %vm876_vm7, %v789_v44  ;;  %v8224_v44 = vld [vmem:[#allocation9_spill] sm:$0xff] }
  0x81   : > { %v1007_v2 = vrot.slane %v8224_v44, 5  ;;  %8225 = vst [vmem:[#allocation9_spill] sm:$0xff] %v5538_v55  ;;  %v5551_v44 = vsel %vm5377_vm6, %v4516_v49, %v1004_v45  ;;  %v8229_v45 = vld [vmem:[#allocation13_spill] sm:$0xff] }
  0x82   : > { %8227 = vst [vmem:[#allocation45_spill] sm:$0xff] %v5551_v44 }
  0x84   : > { %1088 = vrot.lane.b32.xlu1 %v5464_v51, %s4882_s27 }
  0x85   : > { %1086 = vrot.lane.b32.xlu0 %v5471_v17, %s4882_s27  ;;  %1084 = vrot.lane.b32.xlu2 %v5482_v18, %s4882_s27 }
  0x87   : > { %v791_v9 = vpop.permute.xlu2 %790 }
  0x88   : > { %882 = vst.msk [vmem:[#allocation2 + $0x14] sm:$0xf] %vm876_vm7, %v791_v9  ;;  %v1020_v9 = vrot.slane %v1018_v14, 4 }
  0x8c   : > { %1094 = vrot.lane.b32.xlu1 %v5501_v30, %s4882_s27 }
  0x8d   : > { %1092 = vrot.lane.b32.xlu0 %v5507_v25, %s4882_s27  ;;  %1090 = vrot.lane.b32.xlu2 %v5520_v24, %s4882_s27  ;;  %v4518_v24 = vrot.slane %v5099_v7, 9 }
  0x8e   : > { %v785_v52 = vpop.permute.xlu1 %784 }
  0x8f   : > { %879 = vst.msk [vmem:[#allocation2 + $0x8] sm:$0xf] %vm876_vm7, %v785_v52  ;;  %v781_v6 = vpop.permute.xlu0 %780  ;;  %v797_v30 = vpop.permute.xlu2 %796  ;;  %v5544_v52 = vsel %vm5377_vm6, %v1006_v46, %v1007_v2  ;;  %v1014_v2 = vrot.slane %v8229_v45, 5 }
  0x90   : > { %877 = vst.msk [vmem:[#allocation2] sm:$0xf] %vm876_vm7, %v781_v6  ;;  %v1021_v6 = vrot.slane %v8228_v60, 5  ;;  %v5568_v60 = vsel %vm5377_vm6, %v4518_v24, %v1018_v14 }
  0x91   : > { %8226 = vst [vmem:[#allocation44_spill] sm:$0xff] %v5544_v52 }
  0x92   : > { %885 = vst.msk [vmem:[#allocation2 + $0x20] sm:$0xf] %vm876_vm7, %v797_v30  ;;  %v1013_v30 = vrot.slane %v1011_v13, 4  ;;  %v5564_v49 = vsel %vm5377_vm6, %v1020_v9, %v1021_v6  ;;  %v4520_v9 = vrot.slane %v5196_v32, 9  ;;  %v1032_v6 = vrot.slane %v5183_v5, 5 }
  0x93   : > { %8230 = vst [vmem:[#allocation18_spill] sm:$0xff] %v5564_v49 }
  0x94   : > { %1100 = vrot.lane.b32.xlu1 %v5538_v55, %s4882_s27  ;;  %8231 = vst [vmem:[#allocation13_spill] sm:$0xff] %v5568_v60  ;;  %v5576_v13 = vsel %vm5377_vm6, %v1013_v30, %v1014_v2  ;;  %v4519_v30 = vrot.slane %v5154_v63, 9  ;;  %v5590_v2 = vsel %vm5377_vm6, %v4520_v9, %v1032_v6 }
  0x95   : > { %1098 = vrot.lane.b32.xlu0 %v5544_v52, %s4882_s27  ;;  %1096 = vrot.lane.b32.xlu2 %v5551_v44, %s4882_s27  ;;  %8232 = vst [vmem:[#allocation46_spill] sm:$0xff] %v5576_v13  ;;  %v4521_v52 = vrot.slane %v5178_v3, 9 }
  0x96   : > { %v787_v51 = vpop.permute.xlu1 %786 }
  0x97   : > { %880 = vst.msk [vmem:[#allocation2 + $0xc] sm:$0xf] %vm876_vm7, %v787_v51  ;;  %v783_v46 = vpop.permute.xlu0 %782  ;;  %v803_v55 = vpop.permute.xlu2 %802  ;;  %v1025_v51 = vrot.slane %v5144_v61, 5 }
  0x98   : > { %878 = vst.msk [vmem:[#allocation2 + $0x4] sm:$0xf] %vm876_vm7, %v783_v46  ;;  %v8233_v46 = vld [vmem:[#allocation17_spill] sm:$0xff] }
  0x99   : > { %888 = vst.msk [vmem:[#allocation2 + $0x2c] sm:$0xf] %vm876_vm7, %v803_v55  ;;  %v1027_v14 = vrot.slane %v1025_v51, 4  ;;  %v1028_v45 = vrot.slane %v8233_v46, 5 }
  0x9a   : > { %8234 = vst [vmem:[#allocation17_spill] sm:$0xff] %v5590_v2 }
  0x9b   : > { %v5595_v46 = vsel %vm5377_vm6, %v1027_v14, %v1028_v45 }
  0x9c   : > { %1106 = vrot.lane.b32.xlu1 %v5564_v49, %s4882_s27  ;;  %v1039_v49 = vrot.slane %v5219_v34, 5  ;;  %8235 = vst [vmem:[#allocation47_spill] sm:$0xff] %v5595_v46 }
  0x9d   : > { %1104 = vrot.lane.b32.xlu0 %v5568_v60, %s4882_s27  ;;  %1102 = vrot.lane.b32.xlu2 %v5576_v13, %s4882_s27 }
  0x9e   : > { %v795_v24 = vpop.permute.xlu1 %794  ;;  %v1041_v9 = vrot.slane %v1039_v49, 4 }
  0x9f   : > { %884 = vst.msk [vmem:[#allocation2 + $0x1c] sm:$0xf] %vm876_vm7, %v795_v24  ;;  %v793_v55 = vpop.permute.xlu0 %792  ;;  %v809_v60 = vpop.permute.xlu2 %808  ;;  %v5602_v24 = vsel %vm5377_vm6, %v4519_v30, %v1025_v51  ;;  %v8238_v51 = vld [vmem:[#allocation22_spill] sm:$0xff] }
  0xa0   : > { %883 = vst.msk [vmem:[#allocation2 + $0x18] sm:$0xf] %vm876_vm7, %v793_v55  ;;  %v8237_v55 = vld [vmem:[#allocation27_spill] sm:$0xff]  ;;  %v1035_v45 = vrot.slane %v8238_v51, 5 }
  0xa1   : > { %891 = vst.msk [vmem:[#allocation2 + $0x38] sm:$0xf] %vm876_vm7, %v809_v60  ;;  %v1042_v13 = vrot.slane %v8237_v55, 5  ;;  %v1034_v60 = vrot.slane %v1032_v6, 4  ;;  %v5619_v55 = vsel %vm5377_vm6, %v4521_v52, %v1039_v49 }
  0xa2   : > { %8236 = vst [vmem:[#allocation48_spill] sm:$0xff] %v5602_v24 }
  0xa3   : > { %v5615_v30 = vsel %vm5377_vm6, %v1041_v9, %v1042_v13  ;;  %8240 = vst [vmem:[#allocation22_spill] sm:$0xff] %v5619_v55  ;;  %v5627_v6 = vsel %vm5377_vm6, %v1034_v60, %v1035_v45  ;;  %v4523_v13 = vrot.slane %v5274_v36, 9  ;;  %v1053_v9 = vrot.slane %v5262_v8, 5 }
  0xa4   : > { %1112 = vrot.lane.b32.xlu1 %v5590_v2, %s4882_s27  ;;  %8239 = vst [vmem:[#allocation27_spill] sm:$0xff] %v5615_v30  ;;  %v4522_v60 = vrot.slane %v5229_v58, 9 }
  0xa5   : > { %1110 = vrot.lane.b32.xlu0 %v5595_v46, %s4882_s27  ;;  %1108 = vrot.lane.b32.xlu2 %v5602_v24, %s4882_s27  ;;  %8241 = vst [vmem:[#allocation49_spill] sm:$0xff] %v5627_v6  ;;  %v5641_v45 = vsel %vm5377_vm6, %v4523_v13, %v1053_v9  ;;  %v4524_v24 = vrot.slane %v5256_v38, 9 }
  0xa6   : > { %v801_v44 = vpop.permute.xlu1 %800 }
  0xa7   : > { %887 = vst.msk [vmem:[#allocation2 + $0x28] sm:$0xf] %vm876_vm7, %v801_v44  ;;  %v799_v14 = vpop.permute.xlu0 %798  ;;  %v815_v2 = vpop.permute.xlu2 %814  ;;  %v1046_v44 = vrot.slane %v5212_v21, 5 }
  0xa8   : > { %886 = vst.msk [vmem:[#allocation2 + $0x24] sm:$0xf] %vm876_vm7, %v799_v14  ;;  %v8242_v14 = vld [vmem:[#allocation26_spill] sm:$0xff] }
  0xa9   : > { %894 = vst.msk [vmem:[#allocation2 + $0x44] sm:$0xf] %vm876_vm7, %v815_v2  ;;  %v1048_v49 = vrot.slane %v1046_v44, 4  ;;  %v1049_v51 = vrot.slane %v8242_v14, 5 }
  0xaa   : > { %8243 = vst [vmem:[#allocation26_spill] sm:$0xff] %v5641_v45 }
  0xab   : > { %v5646_v14 = vsel %vm5377_vm6, %v1048_v49, %v1049_v51 }
  0xac   : > { %1118 = vrot.lane.b32.xlu1 %v5615_v30, %s4882_s27  ;;  %v1060_v30 = vrot.slane %v5290_v23, 5  ;;  %8244 = vst [vmem:[#allocation50_spill] sm:$0xff] %v5646_v14 }
  0xad   : > { %1116 = vrot.lane.b32.xlu0 %v5619_v55, %s4882_s27  ;;  %1114 = vrot.lane.b32.xlu2 %v5627_v6, %s4882_s27 }
  0xae   : > { %v807_v52 = vpop.permute.xlu1 %806  ;;  %v1062_v13 = vrot.slane %v1060_v30, 4 }
  0xaf   : > { %890 = vst.msk [vmem:[#allocation2 + $0x34] sm:$0xf] %vm876_vm7, %v807_v52  ;;  %v805_v2 = vpop.permute.xlu0 %804  ;;  %v821_v55 = vpop.permute.xlu2 %820  ;;  %v5653_v52 = vsel %vm5377_vm6, %v4522_v60, %v1046_v44  ;;  %v8245_v44 = vld [vmem:[#allocation32_spill] sm:$0xff] }
  0xb0   : > { %889 = vst.msk [vmem:[#allocation2 + $0x30] sm:$0xf] %vm876_vm7, %v805_v2  ;;  %v1063_v2 = vrot.slane %v5341_v54, 5  ;;  %v1056_v51 = vrot.slane %v8245_v44, 5  ;;  %v5670_v54 = vsel %vm5377_vm6, %v4524_v24, %v1060_v30  ;;  %v4525_v30 = vrot.slane %v5310_v15, 9 }
  0xb1   : > { %897 = vst.msk [vmem:[#allocation2 + $0x50] sm:$0xf] %vm876_vm7, %v821_v55  ;;  %v1055_v55 = vrot.slane %v1053_v9, 4 }
  0xb2   : > { %v5666_v60 = vsel %vm5377_vm6, %v1062_v13, %v1063_v2  ;;  %8246 = vst [vmem:[#allocation32_spill] sm:$0xff] %v5670_v54 }
  0xb3   : > { %v5678_v9 = vsel %vm5377_vm6, %v1055_v55, %v1056_v51 }
  0xb4   : > { %1124 = vrot.lane.b32.xlu1 %v5641_v45, %s4882_s27 }
  0xb5   : > { %1122 = vrot.lane.b32.xlu0 %v5646_v14, %s4882_s27  ;;  %1120 = vrot.lane.b32.xlu2 %v5653_v52, %s4882_s27 }
  0xb6   : > { %v813_v6 = vpop.permute.xlu1 %812 }
  0xb7   : > { %893 = vst.msk [vmem:[#allocation2 + $0x40] sm:$0xf] %vm876_vm7, %v813_v6  ;;  %v811_v49 = vpop.permute.xlu0 %810  ;;  %v827_v45 = vpop.permute.xlu2 %826  ;;  %v1067_v6 = vrot.slane %v8223_v35, 5 }
  0xb8   : > { %892 = vst.msk [vmem:[#allocation2 + $0x3c] sm:$0xf] %vm876_vm7, %v811_v49  ;;  %v1070_v49 = vrot.slane %v5331_v39, 5 }
  0xb9   : > { %900 = vst.msk [vmem:[#allocation2 + $0x5c] sm:$0xf] %vm876_vm7, %v827_v45  ;;  %v1069_v2 = vrot.slane %v1067_v6, 4  ;;  %v5697_v39 = vsel %vm5377_vm6, %v4525_v30, %v1067_v6 }
  0xbb   : > { %v5690_v55 = vsel %vm5377_vm6, %v1069_v2, %v1070_v49 }
  0xbc   : > { %1130 = vrot.lane.b32.xlu1 %v5666_v60, %s4882_s27  ;;  %8247 = vst [vmem:[#allocation51_spill] sm:$0xff] %v5690_v55 }
  0xbd   : > { %1128 = vrot.lane.b32.xlu0 %v5670_v54, %s4882_s27  ;;  %1126 = vrot.lane.b32.xlu2 %v5678_v9, %s4882_s27 }
  0xbe   : > { %v819_v13 = vpop.permute.xlu1 %818 }
  0xbf   : > { %896 = vst.msk [vmem:[#allocation2 + $0x4c] sm:$0xf] %vm876_vm7, %v819_v13  ;;  %v817_v24 = vpop.permute.xlu0 %816  ;;  %v833_v45 = vpop.permute.xlu2 %832 }
  0xc0   : > { %895 = vst.msk [vmem:[#allocation2 + $0x48] sm:$0xf] %vm876_vm7, %v817_v24 }
  0xc1   : > { %903 = vst.msk [vmem:[#allocation2 + $0x68] sm:$0xf] %vm876_vm7, %v833_v45 }
  0xc4   : > { %1203 = vrot.lane.b32.xlu1 %v4957_v0, %s4883_s28 }
  0xc5   : > { %1134 = vrot.lane.b32.xlu0 %v5690_v55, %s4882_s27  ;;  %1132 = vrot.lane.b32.xlu2 %v5697_v39, %s4882_s27 }
  0xc6   : > { %v825_v44 = vpop.permute.xlu1 %824 }
  0xc7   : > { %899 = vst.msk [vmem:[#allocation2 + $0x58] sm:$0xf] %vm876_vm7, %v825_v44  ;;  %v823_v51 = vpop.permute.xlu0 %822  ;;  %v839_v13 = vpop.permute.xlu2 %838 }
  0xc8   : > { %898 = vst.msk [vmem:[#allocation2 + $0x54] sm:$0xf] %vm876_vm7, %v823_v51 }
  0xc9   : > { %906 = vst.msk [vmem:[#allocation2 + $0x74] sm:$0xf] %vm876_vm7, %v839_v13 }
  0xcc   : > { %1209 = vrot.lane.b32.xlu1 %v5010_v42, %s4883_s28 }
  0xcd   : > { %1207 = vrot.lane.b32.xlu0 %v4999_v37, %s4883_s28  ;;  %1205 = vrot.lane.b32.xlu2 %v4960_v1, %s4883_s28 }
  0xce   : > { %v831_v0 = vpop.permute.xlu1 %830 }
  0xcf   : > { %902 = vst.msk [vmem:[#allocation2 + $0x64] sm:$0xf] %vm876_vm7, %v831_v0  ;;  %v829_v6 = vpop.permute.xlu0 %828  ;;  %v1073_v2 = vpop.permute.xlu2 %1072 }
  0xd0   : > { %901 = vst.msk [vmem:[#allocation2 + $0x60] sm:$0xf] %vm876_vm7, %v829_v6 }
  0xd1   : > { %1169 = vst.msk [vmem:[#allocation2] sm:$0xf] %vm1168_vm8, %v1073_v2 }
  0xd4   : > { %1215 = vrot.lane.b32.xlu1 %v5063_v29, %s4883_s28 }
  0xd5   : > { %1213 = vrot.lane.b32.xlu0 %v4984_v22, %s4883_s28  ;;  %1211 = vrot.lane.b32.xlu2 %v4996_v31, %s4883_s28 }
  0xd6   : > { %v837_v49 = vpop.permute.xlu1 %836 }
  0xd7   : > { %905 = vst.msk [vmem:[#allocation2 + $0x70] sm:$0xf] %vm876_vm7, %v837_v49  ;;  %v835_v24 = vpop.permute.xlu0 %834  ;;  %v1079_v1 = vpop.permute.xlu2 %1078 }
  0xd8   : > { %904 = vst.msk [vmem:[#allocation2 + $0x6c] sm:$0xf] %vm876_vm7, %v835_v24 }
  0xd9   : > { %1172 = vst.msk [vmem:[#allocation2 + $0xc] sm:$0xf] %vm1168_vm8, %v1079_v1 }
  0xdc   : > { %1221 = vrot.lane.b32.xlu1 %v5053_v19, %s4883_s28 }
  0xdd   : > { %1219 = vrot.lane.b32.xlu0 %v5024_v53, %s4883_s28  ;;  %1217 = vrot.lane.b32.xlu2 %v5028_v56, %s4883_s28 }
  0xde   : > { %v843_v30 = vpop.permute.xlu1 %842 }
  0xdf   : > { %908 = vst.msk [vmem:[#allocation2 + $0x7c] sm:$0xf] %vm876_vm7, %v843_v30  ;;  %v841_v45 = vpop.permute.xlu0 %840  ;;  %v1085_v44 = vpop.permute.xlu2 %1084 }
  0xe0   : > { %907 = vst.msk [vmem:[#allocation2 + $0x78] sm:$0xf] %vm876_vm7, %v841_v45  ;;  %vm4069_vm7 = vcmask 1043456  }
  0xe1   : > { %1175 = vst.msk [vmem:[#allocation2 + $0x18] sm:$0xf] %vm1168_vm8, %v1085_v44 }
  0xe4   : > { %1227 = vrot.lane.b32.xlu1 %v5118_v26, %s4883_s28 }
  0xe5   : > { %1225 = vrot.lane.b32.xlu0 %v5049_v16, %s4883_s28  ;;  %1223 = vrot.lane.b32.xlu2 %v5070_v33, %s4883_s28 }
  0xe6   : > { %v1077_v51 = vpop.permute.xlu1 %1076 }
  0xe7   : > { %1171 = vst.msk [vmem:[#allocation2 + $0x8] sm:$0xf] %vm1168_vm8, %v1077_v51  ;;  %v1075_v13 = vpop.permute.xlu0 %1074  ;;  %v1091_v0 = vpop.permute.xlu2 %1090 }
  0xe8   : > { %1170 = vst.msk [vmem:[#allocation2 + $0x4] sm:$0xf] %vm1168_vm8, %v1075_v13 }
  0xe9   : > { %1178 = vst.msk [vmem:[#allocation2 + $0x24] sm:$0xf] %vm1168_vm8, %v1091_v0 }
  0xec   : > { %1233 = vrot.lane.b32.xlu1 %v5133_v43, %s4883_s28 }
  0xed   : > { %1231 = vrot.lane.b32.xlu0 %v5099_v7, %s4883_s28  ;;  %1229 = vrot.lane.b32.xlu2 %v5105_v11, %s4883_s28 }
  0xee   : > { %v1083_v6 = vpop.permute.xlu1 %1082 }
  0xef   : > { %1174 = vst.msk [vmem:[#allocation2 + $0x14] sm:$0xf] %vm1168_vm8, %v1083_v6  ;;  %v1081_v2 = vpop.permute.xlu0 %1080  ;;  %v1097_v49 = vpop.permute.xlu2 %1096 }
  0xf0   : > { %1173 = vst.msk [vmem:[#allocation2 + $0x10] sm:$0xf] %vm1168_vm8, %v1081_v2 }
  0xf1   : > { %1181 = vst.msk [vmem:[#allocation2 + $0x30] sm:$0xf] %vm1168_vm8, %v1097_v49 }
  0xf4   : > { %1239 = vrot.lane.b32.xlu1 %v5196_v32, %s4883_s28 }
  0xf5   : > { %1237 = vrot.lane.b32.xlu0 %v5144_v61, %s4883_s28  ;;  %1235 = vrot.lane.b32.xlu2 %v5154_v63, %s4883_s28 }
  0xf6   : > { %v1089_v24 = vpop.permute.xlu1 %1088 }
  0xf7   : > { %1177 = vst.msk [vmem:[#allocation2 + $0x20] sm:$0xf] %vm1168_vm8, %v1089_v24  ;;  %v1087_v1 = vpop.permute.xlu0 %1086  ;;  %v1103_v30 = vpop.permute.xlu2 %1102  ;;  %v5787_v24 = vld [vmem:[%s4954_s25 + $0xc0] sm:$0xf] }
  0xf8   : > { %1176 = vst.msk [vmem:[#allocation2 + $0x1c] sm:$0xf] %vm1168_vm8, %v1087_v1 }
  0xf9   : > { %1184 = vst.msk [vmem:[#allocation2 + $0x3c] sm:$0xf] %vm1168_vm8, %v1103_v30 }
  0xfc   : > { %1245 = vrot.lane.b32.xlu1 %v5219_v34, %s4883_s28 }
  0xfd   : > { %1243 = vrot.lane.b32.xlu0 %v5178_v3, %s4883_s28  ;;  %1241 = vrot.lane.b32.xlu2 %v5183_v5, %s4883_s28 }
  0xfe   : > { %v1095_v45 = vpop.permute.xlu1 %1094 }
  0xff   : > { %1180 = vst.msk [vmem:[#allocation2 + $0x2c] sm:$0xf] %vm1168_vm8, %v1095_v45  ;;  %v1093_v44 = vpop.permute.xlu0 %1092  ;;  %v1109_v51 = vpop.permute.xlu2 %1108 }
 0x100   : > { %1179 = vst.msk [vmem:[#allocation2 + $0x28] sm:$0xf] %vm1168_vm8, %v1093_v44 }
 0x101   : > { %1187 = vst.msk [vmem:[#allocation2 + $0x48] sm:$0xf] %vm1168_vm8, %v1109_v51  ;;  %v8248_v51 = vld [vmem:[#allocation4_spill] sm:$0xff] }
 0x104   : > { %1251 = vrot.lane.b32.xlu1 %v5274_v36, %s4883_s28 }
 0x105   : > { %1249 = vrot.lane.b32.xlu0 %v5212_v21, %s4883_s28  ;;  %1247 = vrot.lane.b32.xlu2 %v5229_v58, %s4883_s28 }
 0x106   : > { %v1101_v13 = vpop.permute.xlu1 %1100 }
 0x107   : > { %1183 = vst.msk [vmem:[#allocation2 + $0x38] sm:$0xf] %vm1168_vm8, %v1101_v13  ;;  %v1099_v0 = vpop.permute.xlu0 %1098  ;;  %v1115_v6 = vpop.permute.xlu2 %1114  ;;  %v5802_v13 = vld [vmem:[%s4954_s25 + $0xc4] sm:$0xf] }
 0x108   : > { %1182 = vst.msk [vmem:[#allocation2 + $0x34] sm:$0xf] %vm1168_vm8, %v1099_v0  ;;  %v8249_v0 = vld [vmem:[#allocation3_spill] sm:$0xff] }
 0x109   : > { %1190 = vst.msk [vmem:[#allocation2 + $0x54] sm:$0xf] %vm1168_vm8, %v1115_v6 }
 0x10c   : > { %1257 = vrot.lane.b32.xlu1 %v5290_v23, %s4883_s28  ;;  %v8269_v23 = vld [vmem:[#allocation34_spill] sm:$0xff] }
 0x10d   : > { %1255 = vrot.lane.b32.xlu0 %v5256_v38, %s4883_s28  ;;  %1253 = vrot.lane.b32.xlu2 %v5262_v8, %s4883_s28 }
 0x10e   : > { %v1107_v2 = vpop.permute.xlu1 %1106 }
 0x10f   : > { %1186 = vst.msk [vmem:[#allocation2 + $0x44] sm:$0xf] %vm1168_vm8, %v1107_v2  ;;  %v1105_v49 = vpop.permute.xlu0 %1104  ;;  %v1121_v1 = vpop.permute.xlu2 %1120 }
 0x110   : > { %1185 = vst.msk [vmem:[#allocation2 + $0x40] sm:$0xf] %vm1168_vm8, %v1105_v49 }
 0x111   : > { %1193 = vst.msk [vmem:[#allocation2 + $0x60] sm:$0xf] %vm1168_vm8, %v1121_v1  ;;  %v8250_v1 = vld [vmem:[#allocation7_spill] sm:$0xff] }
 0x114   : > { %1263 = vrot.lane.b32.xlu1 %v5787_v24, %s4883_s28 }
 0x115   : > { %1261 = vrot.lane.b32.xlu0 %v8223_v35, %s4883_s28  ;;  %1259 = vrot.lane.b32.xlu2 %v5310_v15, %s4883_s28 }
 0x116   : > { %v1113_v30 = vpop.permute.xlu1 %1112 }
 0x117   : > { %1189 = vst.msk [vmem:[#allocation2 + $0x50] sm:$0xf] %vm1168_vm8, %v1113_v30  ;;  %v1111_v45 = vpop.permute.xlu0 %1110  ;;  %v1127_v44 = vpop.permute.xlu2 %1126  ;;  %v8251_v30 = vld [vmem:[#allocation8_spill] sm:$0xff] }
 0x118   : > { %1188 = vst.msk [vmem:[#allocation2 + $0x4c] sm:$0xf] %vm1168_vm8, %v1111_v45 }
 0x119   : > { %1196 = vst.msk [vmem:[#allocation2 + $0x6c] sm:$0xf] %vm1168_vm8, %v1127_v44 }
 0x11c   : > { %1358 = vrot.lane.b32.xlu1 %v8248_v51, %s4884_s29  ;;  %v8252_v51 = vld [vmem:[#allocation5_spill] sm:$0xff] }
 0x11d   : > { %1356 = vrot.lane.b32.xlu0 %v8249_v0, %s4884_s29  ;;  %1265 = vrot.lane.b32.xlu2 %v5802_v13, %s4883_s28 }
 0x11e   : > { %v1119_v6 = vpop.permute.xlu1 %1118 }
 0x11f   : > { %1192 = vst.msk [vmem:[#allocation2 + $0x5c] sm:$0xf] %vm1168_vm8, %v1119_v6  ;;  %v1117_v2 = vpop.permute.xlu0 %1116  ;;  %v1133_v49 = vpop.permute.xlu2 %1132  ;;  %v8253_v6 = vld [vmem:[#allocation11_spill] sm:$0xff] }
 0x120   : > { %1191 = vst.msk [vmem:[#allocation2 + $0x58] sm:$0xf] %vm1168_vm8, %v1117_v2  ;;  %v8254_v2 = vld [vmem:[#allocation12_spill] sm:$0xff] }
 0x121   : > { %1199 = vst.msk [vmem:[#allocation2 + $0x78] sm:$0xf] %vm1168_vm8, %v1133_v49 }
 0x124   : > { %1364 = vrot.lane.b32.xlu1 %v8250_v1, %s4884_s29  ;;  %v8255_v1 = vld [vmem:[#allocation6_spill] sm:$0xff] }
 0x125   : > { %1362 = vrot.lane.b32.xlu0 %v8251_v30, %s4884_s29  ;;  %1360 = vrot.lane.b32.xlu2 %v8252_v51, %s4884_s29 }
 0x126   : > { %v1125_v45 = vpop.permute.xlu1 %1124 }
 0x127   : > { %1195 = vst.msk [vmem:[#allocation2 + $0x68] sm:$0xf] %vm1168_vm8, %v1125_v45  ;;  %v1123_v44 = vpop.permute.xlu0 %1122  ;;  %v1206_v0 = vpop.permute.xlu2 %1205 }
 0x128   : > { %1194 = vst.msk [vmem:[#allocation2 + $0x64] sm:$0xf] %vm1168_vm8, %v1123_v44  ;;  %v8256_v44 = vld [vmem:[#allocation15_spill] sm:$0xff] }
 0x129   : > { %1301 = vst.msk [vmem:[#allocation2 + $0x4] sm:$0xf] %vm1299_vm9, %v1206_v0  ;;  %v8257_v0 = vld [vmem:[#allocation16_spill] sm:$0xff] }
 0x12c   : > { %1370 = vrot.lane.b32.xlu1 %v8253_v6, %s4884_s29 }
 0x12d   : > { %1368 = vrot.lane.b32.xlu0 %v8254_v2, %s4884_s29  ;;  %1366 = vrot.lane.b32.xlu2 %v8255_v1, %s4884_s29 }
 0x12e   : > { %v1131_v49 = vpop.permute.xlu1 %1130 }
 0x12f   : > { %1198 = vst.msk [vmem:[#allocation2 + $0x74] sm:$0xf] %vm1168_vm8, %v1131_v49  ;;  %v1129_v45 = vpop.permute.xlu0 %1128  ;;  %v1212_v51 = vpop.permute.xlu2 %1211  ;;  %v8258_v49 = vld [vmem:[#allocation10_spill] sm:$0xff] }
 0x130   : > { %1197 = vst.msk [vmem:[#allocation2 + $0x70] sm:$0xf] %vm1168_vm8, %v1129_v45  ;;  %v8260_v45 = vld [vmem:[#allocation21_spill] sm:$0xff] }
 0x131   : > { %1304 = vst.msk [vmem:[#allocation2 + $0x10] sm:$0xf] %vm1299_vm9, %v1212_v51  ;;  %v8259_v51 = vld [vmem:[#allocation20_spill] sm:$0xff] }
 0x134   : > { %1376 = vrot.lane.b32.xlu1 %v8256_v44, %s4884_s29 }
 0x135   : > { %1374 = vrot.lane.b32.xlu0 %v8257_v0, %s4884_s29  ;;  %1372 = vrot.lane.b32.xlu2 %v8258_v49, %s4884_s29 }
 0x136   : > { %v1204_v6 = vpop.permute.xlu1 %1203 }
 0x137   : > { %1300 = vst.msk [vmem:[#allocation2] sm:$0xf] %vm1299_vm9, %v1204_v6  ;;  %v1135_v2 = vpop.permute.xlu0 %1134  ;;  %v1218_v1 = vpop.permute.xlu2 %1217  ;;  %v8261_v6 = vld [vmem:[#allocation14_spill] sm:$0xff] }
 0x138   : > { %1200 = vst.msk [vmem:[#allocation2 + $0x7c] sm:$0xf] %vm1168_vm8, %v1135_v2  ;;  %v8263_v2 = vld [vmem:[#allocation25_spill] sm:$0xff]  ;;  %vm3549_vm8 = vcmask 519648  }
 0x139   : > { %1307 = vst.msk [vmem:[#allocation2 + $0x1c] sm:$0xf] %vm1299_vm9, %v1218_v1  ;;  %v8262_v1 = vld [vmem:[#allocation24_spill] sm:$0xff] }
 0x13c   : > { %1382 = vrot.lane.b32.xlu1 %v8259_v51, %s4884_s29 }
 0x13d   : > { %1380 = vrot.lane.b32.xlu0 %v8260_v45, %s4884_s29  ;;  %1378 = vrot.lane.b32.xlu2 %v8261_v6, %s4884_s29 }
 0x13e   : > { %v1210_v44 = vpop.permute.xlu1 %1209 }
 0x13f   : > { %1303 = vst.msk [vmem:[#allocation2 + $0xc] sm:$0xf] %vm1299_vm9, %v1210_v44  ;;  %v1208_v0 = vpop.permute.xlu0 %1207  ;;  %v1224_v49 = vpop.permute.xlu2 %1223  ;;  %v8264_v44 = vld [vmem:[#allocation19_spill] sm:$0xff] }
 0x140   : > { %1302 = vst.msk [vmem:[#allocation2 + $0x8] sm:$0xf] %vm1299_vm9, %v1208_v0  ;;  %v8265_v0 = vld [vmem:[#allocation29_spill] sm:$0xff] }
 0x141   : > { %1310 = vst.msk [vmem:[#allocation2 + $0x28] sm:$0xf] %vm1299_vm9, %v1224_v49  ;;  %v8266_v49 = vld [vmem:[#allocation30_spill] sm:$0xff] }
 0x144   : > { %1388 = vrot.lane.b32.xlu1 %v8262_v1, %s4884_s29 }
 0x145   : > { %1386 = vrot.lane.b32.xlu0 %v8263_v2, %s4884_s29  ;;  %1384 = vrot.lane.b32.xlu2 %v8264_v44, %s4884_s29 }
 0x146   : > { %v1216_v51 = vpop.permute.xlu1 %1215 }
 0x147   : > { %1306 = vst.msk [vmem:[#allocation2 + $0x18] sm:$0xf] %vm1299_vm9, %v1216_v51  ;;  %v1214_v45 = vpop.permute.xlu0 %1213  ;;  %v1230_v6 = vpop.permute.xlu2 %1229  ;;  %v8267_v51 = vld [vmem:[#allocation23_spill] sm:$0xff] }
 0x148   : > { %1305 = vst.msk [vmem:[#allocation2 + $0x14] sm:$0xf] %vm1299_vm9, %v1214_v45 }
 0x149   : > { %1313 = vst.msk [vmem:[#allocation2 + $0x34] sm:$0xf] %vm1299_vm9, %v1230_v6 }
 0x14c   : > { %1394 = vrot.lane.b32.xlu1 %v8265_v0, %s4884_s29  ;;  %v1342_v0 = vshll.u32 %v5802_v13, 16 }
 0x14d   : > { %1392 = vrot.lane.b32.xlu0 %v8266_v49, %s4884_s29  ;;  %1390 = vrot.lane.b32.xlu2 %v8267_v51, %s4884_s29  ;;  %v5883_v51 = vld [vmem:[%s4954_s25 + $0xc8] sm:$0x1] }
 0x14e   : > { %v1222_v1 = vpop.permute.xlu1 %1221 }
 0x14f   : > { %1309 = vst.msk [vmem:[#allocation2 + $0x24] sm:$0xf] %vm1299_vm9, %v1222_v1  ;;  %v1220_v2 = vpop.permute.xlu0 %1219  ;;  %v1236_v44 = vpop.permute.xlu2 %1235  ;;  %v8268_v1 = vld [vmem:[#allocation28_spill] sm:$0xff] }
 0x150   : > { %1308 = vst.msk [vmem:[#allocation2 + $0x20] sm:$0xf] %vm1299_vm9, %v1220_v2 }
 0x151   : > { %1316 = vst.msk [vmem:[#allocation2 + $0x40] sm:$0xf] %vm1299_vm9, %v1236_v44  ;;  %v1346_v44 = vshrl.u32 %v5802_v13, 16 }
 0x154   : > { %1400 = vrot.lane.b32.xlu1 %v5317_v41, %s4884_s29  ;;  %v1333_v41 = vshrl.u32 %v5787_v24, 16 }
 0x155   : > { %1398 = vrot.lane.b32.xlu0 %v5325_v57, %s4884_s29  ;;  %1396 = vrot.lane.b32.xlu2 %v8268_v1, %s4884_s29  ;;  %v1336_v57 = vshll.u32 %v5787_v24, 16  ;;  %v1348_v1 = vrot.slane %v1346_v44, 4 }
 0x156   : > { %v1228_v45 = vpop.permute.xlu1 %1227  ;;  %v1335_v49 = vrot.slane %v1333_v41, 4 }
 0x157   : > { %1312 = vst.msk [vmem:[#allocation2 + $0x30] sm:$0xf] %vm1299_vm9, %v1228_v45  ;;  %v1226_v6 = vpop.permute.xlu0 %1225  ;;  %v1242_v2 = vpop.permute.xlu2 %1241  ;;  %v1344_v45 = vrot.slane %v1342_v0, 5  ;;  %v1338_v30 = vrot.slane %v1336_v57, 5 }
 0x158   : > { %1311 = vst.msk [vmem:[#allocation2 + $0x2c] sm:$0xf] %vm1299_vm9, %v1226_v6 }
 0x159   : > { %1319 = vst.msk [vmem:[#allocation2 + $0x4c] sm:$0xf] %vm1299_vm9, %v1242_v2  ;;  %v1349_v15 = vor.u32 %v1348_v1, %v1344_v45 }
 0x15b   : > { %v1350_v41 = vrot.slane %v1349_v15, 4 }
 0x15c   : > { %1406 = vrot.lane.b32.xlu1 %v5345_v62, %s4884_s29  ;;  %v1352_v62 = vshll.u32 %v5883_v51, 16 }
 0x15d   : > { %1404 = vrot.lane.b32.xlu0 %v5351_v28, %s4884_s29  ;;  %1402 = vrot.lane.b32.xlu2 %v8269_v23, %s4884_s29  ;;  %v1339_v28 = vor.u32 %v1338_v30, %v1335_v49 }
 0x15e   : > { %v1234_v6 = vpop.permute.xlu1 %1233  ;;  %v1354_v57 = vrot.slane %v1352_v62, 5 }
 0x15f   : > { %1315 = vst.msk [vmem:[#allocation2 + $0x3c] sm:$0xf] %vm1299_vm9, %v1234_v6  ;;  %v1232_v2 = vpop.permute.xlu0 %1231  ;;  %v1248_v35 = vpop.permute.xlu2 %1247  ;;  %v1340_v44 = vrot.slane %v1339_v28, 4 }
 0x160   : > { %1314 = vst.msk [vmem:[#allocation2 + $0x38] sm:$0xf] %vm1299_vm9, %v1232_v2 }
 0x161   : > { %1322 = vst.msk [vmem:[#allocation2 + $0x58] sm:$0xf] %vm1299_vm9, %v1248_v35  ;;  %v5901_v35 = vsel %vm4990_vm2, %v1350_v41, %v1354_v57  ;;  %v5905_v49 = vsel %vm4990_vm2, %v1340_v44, %v1344_v45  ;;  %v8270_v57 = vld [vmem:[#allocation43_spill] sm:$0xff] }
 0x164   : > { %1412 = vrot.lane.b32.xlu1 %v5364_v50, %s4884_s29 }
 0x165   : > { %1410 = vrot.lane.b32.xlu0 %v5371_v48, %s4884_s29  ;;  %1408 = vrot.lane.b32.xlu2 %v5337_v40, %s4884_s29 }
 0x166   : > { %v1240_v0 = vpop.permute.xlu1 %1239 }
 0x167   : > { %1318 = vst.msk [vmem:[#allocation2 + $0x48] sm:$0xf] %vm1299_vm9, %v1240_v0  ;;  %v1238_v6 = vpop.permute.xlu0 %1237  ;;  %v1254_v30 = vpop.permute.xlu2 %1253 }
 0x168   : > { %1317 = vst.msk [vmem:[#allocation2 + $0x44] sm:$0xf] %vm1299_vm9, %v1238_v6  ;;  %v8271_v6 = vld [vmem:[#allocation41_spill] sm:$0xff] }
 0x169   : > { %1325 = vst.msk [vmem:[#allocation2 + $0x64] sm:$0xf] %vm1299_vm9, %v1254_v30 }
 0x16c   : > { %1418 = vrot.lane.b32.xlu1 %v5901_v35, %s4884_s29 }
 0x16d   : > { %1416 = vrot.lane.b32.xlu0 %v5905_v49, %s4884_s29  ;;  %1414 = vrot.lane.b32.xlu2 %v5360_v20, %s4884_s29 }
 0x16e   : > { %v1246_v15 = vpop.permute.xlu1 %1245 }
 0x16f   : > { %1321 = vst.msk [vmem:[#allocation2 + $0x54] sm:$0xf] %vm1299_vm9, %v1246_v15  ;;  %v1244_v62 = vpop.permute.xlu0 %1243  ;;  %v1260_v28 = vpop.permute.xlu2 %1259  ;;  %v8272_v15 = vld [vmem:[#allocation44_spill] sm:$0xff] }
 0x170   : > { %1320 = vst.msk [vmem:[#allocation2 + $0x50] sm:$0xf] %vm1299_vm9, %v1244_v62  ;;  %v8273_v62 = vld [vmem:[#allocation45_spill] sm:$0xff] }
 0x171   : > { %1328 = vst.msk [vmem:[#allocation2 + $0x70] sm:$0xf] %vm1299_vm9, %v1260_v28 }
 0x174   : > { %1497 = vrot.lane.b32.xlu1 %v5431_v12, %s4885_s30 }
 0x175   : > { %1495 = vrot.lane.b32.xlu0 %v5442_v10, %s4885_s30  ;;  %1493 = vrot.lane.b32.xlu2 %v5393_v59, %s4885_s30 }
 0x176   : > { %v1252_v1 = vpop.permute.xlu1 %1251 }
 0x177   : > { %1324 = vst.msk [vmem:[#allocation2 + $0x60] sm:$0xf] %vm1299_vm9, %v1252_v1  ;;  %v1250_v45 = vpop.permute.xlu0 %1249  ;;  %v1266_v2 = vpop.permute.xlu2 %1265 }
 0x178   : > { %1323 = vst.msk [vmem:[#allocation2 + $0x5c] sm:$0xf] %vm1299_vm9, %v1250_v45  ;;  %v8274_v45 = vld [vmem:[#allocation42_spill] sm:$0xff] }
 0x179   : > { %1331 = vst.msk [vmem:[#allocation2 + $0x7c] sm:$0xf] %vm1299_vm9, %v1266_v2 }
 0x17c   : > { %1503 = vrot.lane.b32.xlu1 %v5471_v17, %s4885_s30 }
 0x17d   : > { %1501 = vrot.lane.b32.xlu0 %v5482_v18, %s4885_s30  ;;  %1499 = vrot.lane.b32.xlu2 %v5425_v4, %s4885_s30 }
 0x17e   : > { %v1258_v41 = vpop.permute.xlu1 %1257 }
 0x17f   : > { %1327 = vst.msk [vmem:[#allocation2 + $0x6c] sm:$0xf] %vm1299_vm9, %v1258_v41  ;;  %v1256_v10 = vpop.permute.xlu0 %1255  ;;  %v1361_v59 = vpop.permute.xlu2 %1360  ;;  %v8275_v41 = vld [vmem:[#allocation13_spill] sm:$0xff] }
 0x180   : > { %1326 = vst.msk [vmem:[#allocation2 + $0x68] sm:$0xf] %vm1299_vm9, %v1256_v10  ;;  %v8276_v10 = vld [vmem:[#allocation46_spill] sm:$0xff] }
 0x181   : > { %1455 = vst.msk [vmem:[#allocation2 + $0x8] sm:$0xf] %vm1452_vm10, %v1361_v59 }
 0x184   : > { %1509 = vrot.lane.b32.xlu1 %v5507_v25, %s4885_s30 }
 0x185   : > { %1507 = vrot.lane.b32.xlu0 %v8270_v57, %s4885_s30  ;;  %1505 = vrot.lane.b32.xlu2 %v8271_v6, %s4885_s30 }
 0x186   : > { %v1264_v0 = vpop.permute.xlu1 %1263 }
 0x187   : > { %1330 = vst.msk [vmem:[#allocation2 + $0x78] sm:$0xf] %vm1299_vm9, %v1264_v0  ;;  %v1262_v44 = vpop.permute.xlu0 %1261  ;;  %v1367_v30 = vpop.permute.xlu2 %1366 }
 0x188   : > { %1329 = vst.msk [vmem:[#allocation2 + $0x74] sm:$0xf] %vm1299_vm9, %v1262_v44  ;;  %v8277_v44 = vld [vmem:[#allocation9_spill] sm:$0xff]  ;;  %vm3702_vm9 = vcmask 552448  }
 0x189   : > { %1458 = vst.msk [vmem:[#allocation2 + $0x14] sm:$0xf] %vm1452_vm10, %v1367_v30 }
 0x18c   : > { %1515 = vrot.lane.b32.xlu1 %v8272_v15, %s4885_s30 }
 0x18d   : > { %1513 = vrot.lane.b32.xlu0 %v8273_v62, %s4885_s30  ;;  %1511 = vrot.lane.b32.xlu2 %v8274_v45, %s4885_s30 }
 0x18e   : > { %v1359_v28 = vpop.permute.xlu1 %1358 }
 0x18f   : > { %1454 = vst.msk [vmem:[#allocation2 + $0x4] sm:$0xf] %vm1452_vm10, %v1359_v28  ;;  %v1357_v1 = vpop.permute.xlu0 %1356  ;;  %v1373_v2 = vpop.permute.xlu2 %1372  ;;  %v8278_v28 = vld [vmem:[#allocation48_spill] sm:$0xff] }
 0x190   : > { %1453 = vst.msk [vmem:[#allocation2] sm:$0xf] %vm1452_vm10, %v1357_v1 }
 0x191   : > { %1461 = vst.msk [vmem:[#allocation2 + $0x20] sm:$0xf] %vm1452_vm10, %v1373_v2 }
 0x194   : > { %1521 = vrot.lane.b32.xlu1 %v8275_v41, %s4885_s30 }
 0x195   : > { %1519 = vrot.lane.b32.xlu0 %v8276_v10, %s4885_s30  ;;  %1517 = vrot.lane.b32.xlu2 %v8277_v44, %s4885_s30 }
 0x196   : > { %v1365_v59 = vpop.permute.xlu1 %1364 }
 0x197   : > { %1457 = vst.msk [vmem:[#allocation2 + $0x10] sm:$0xf] %vm1452_vm10, %v1365_v59  ;;  %v1363_v0 = vpop.permute.xlu0 %1362  ;;  %v1379_v30 = vpop.permute.xlu2 %1378  ;;  %v8279_v59 = vld [vmem:[#allocation18_spill] sm:$0xff] }
 0x198   : > { %1456 = vst.msk [vmem:[#allocation2 + $0xc] sm:$0xf] %vm1452_vm10, %v1363_v0  ;;  %v8280_v0 = vld [vmem:[#allocation22_spill] sm:$0xff] }
 0x199   : > { %1464 = vst.msk [vmem:[#allocation2 + $0x2c] sm:$0xf] %vm1452_vm10, %v1379_v30  ;;  %v8281_v30 = vld [vmem:[#allocation49_spill] sm:$0xff] }
 0x19c   : > { %1527 = vrot.lane.b32.xlu1 %v5595_v46, %s4885_s30 }
 0x19d   : > { %1525 = vrot.lane.b32.xlu0 %v8278_v28, %s4885_s30  ;;  %1523 = vrot.lane.b32.xlu2 %v8279_v59, %s4885_s30 }
 0x19e   : > { %v1371_v1 = vpop.permute.xlu1 %1370 }
 0x19f   : > { %1460 = vst.msk [vmem:[#allocation2 + $0x1c] sm:$0xf] %vm1452_vm10, %v1371_v1  ;;  %v1369_v2 = vpop.permute.xlu0 %1368  ;;  %v1385_v41 = vpop.permute.xlu2 %1384  ;;  %v8282_v1 = vld [vmem:[#allocation17_spill] sm:$0xff] }
 0x1a0   : > { %1459 = vst.msk [vmem:[#allocation2 + $0x18] sm:$0xf] %vm1452_vm10, %v1369_v2 }
 0x1a1   : > { %1467 = vst.msk [vmem:[#allocation2 + $0x38] sm:$0xf] %vm1452_vm10, %v1385_v41 }
 0x1a4   : > { %1533 = vrot.lane.b32.xlu1 %v8280_v0, %s4885_s30 }
 0x1a5   : > { %1531 = vrot.lane.b32.xlu0 %v8281_v30, %s4885_s30  ;;  %1529 = vrot.lane.b32.xlu2 %v8282_v1, %s4885_s30 }
 0x1a6   : > { %v1377_v46 = vpop.permute.xlu1 %1376 }
 0x1a7   : > { %1463 = vst.msk [vmem:[#allocation2 + $0x28] sm:$0xf] %vm1452_vm10, %v1377_v46  ;;  %v1375_v28 = vpop.permute.xlu0 %1374  ;;  %v1391_v59 = vpop.permute.xlu2 %1390  ;;  %v8283_v46 = vld [vmem:[#allocation27_spill] sm:$0xff] }
 0x1a8   : > { %1462 = vst.msk [vmem:[#allocation2 + $0x24] sm:$0xf] %vm1452_vm10, %v1375_v28 }
 0x1a9   : > { %1470 = vst.msk [vmem:[#allocation2 + $0x44] sm:$0xf] %vm1452_vm10, %v1391_v59 }
 0x1ac   : > { %1539 = vrot.lane.b32.xlu1 %v5646_v14, %s4885_s30 }
 0x1ad   : > { %1537 = vrot.lane.b32.xlu0 %v5653_v52, %s4885_s30  ;;  %1535 = vrot.lane.b32.xlu2 %v8283_v46, %s4885_s30 }
 0x1ae   : > { %v1383_v41 = vpop.permute.xlu1 %1382 }
 0x1af   : > { %1466 = vst.msk [vmem:[#allocation2 + $0x34] sm:$0xf] %vm1452_vm10, %v1383_v41  ;;  %v1381_v2 = vpop.permute.xlu0 %1380  ;;  %v1397_v0 = vpop.permute.xlu2 %1396  ;;  %v8284_v41 = vld [vmem:[#allocation26_spill] sm:$0xff] }
 0x1b0   : > { %1465 = vst.msk [vmem:[#allocation2 + $0x30] sm:$0xf] %vm1452_vm10, %v1381_v2  ;;  %v1488_v2 = vrot.slane %v5802_v13, 5 }
 0x1b1   : > { %1473 = vst.msk [vmem:[#allocation2 + $0x50] sm:$0xf] %vm1452_vm10, %v1397_v0 }
 0x1b4   : > { %1545 = vrot.lane.b32.xlu1 %v5670_v54, %s4885_s30  ;;  %v1490_v54 = vrot.slane %v1488_v2, 4 }
 0x1b5   : > { %1543 = vrot.lane.b32.xlu0 %v5678_v9, %s4885_s30  ;;  %1541 = vrot.lane.b32.xlu2 %v8284_v41, %s4885_s30 }
 0x1b6   : > { %v1389_v28 = vpop.permute.xlu1 %1388 }
 0x1b7   : > { %1469 = vst.msk [vmem:[#allocation2 + $0x40] sm:$0xf] %vm1452_vm10, %v1389_v28  ;;  %v1387_v59 = vpop.permute.xlu0 %1386  ;;  %v1403_v14 = vpop.permute.xlu2 %1402  ;;  %v1491_v28 = vrot.slane %v5883_v51, 5 }
 0x1b8   : > { %1468 = vst.msk [vmem:[#allocation2 + $0x3c] sm:$0xf] %vm1452_vm10, %v1387_v59 }
 0x1b9   : > { %1476 = vst.msk [vmem:[#allocation2 + $0x5c] sm:$0xf] %vm1452_vm10, %v1403_v14  ;;  %v4526_v14 = vrot.slane %v5787_v24, 9 }
 0x1bb   : > { %v6018_v51 = vsel %vm5377_vm6, %v4526_v14, %v1488_v2  ;;  %v8285_v14 = vld [vmem:[#allocation33_spill] sm:$0xff] }
 0x1bc   : > { %1551 = vrot.lane.b32.xlu1 %v5690_v55, %s4885_s30  ;;  %v6011_v55 = vsel %vm5377_vm6, %v1490_v54, %v1491_v28 }
 0x1bd   : > { %1549 = vrot.lane.b32.xlu0 %v5697_v39, %s4885_s30  ;;  %1547 = vrot.lane.b32.xlu2 %v5666_v60, %s4885_s30 }
 0x1be   : > { %v1395_v0 = vpop.permute.xlu1 %1394 }
 0x1bf   : > { %1472 = vst.msk [vmem:[#allocation2 + $0x4c] sm:$0xf] %vm1452_vm10, %v1395_v0  ;;  %v1393_v41 = vpop.permute.xlu0 %1392  ;;  %v1409_v59 = vpop.permute.xlu2 %1408 }
 0x1c0   : > { %1471 = vst.msk [vmem:[#allocation2 + $0x48] sm:$0xf] %vm1452_vm10, %v1393_v41 }
 0x1c1   : > { %1479 = vst.msk [vmem:[#allocation2 + $0x68] sm:$0xf] %vm1452_vm10, %v1409_v59 }
 0x1c4   : > { %1624 = vrot.lane.b32.xlu1 %v4999_v37, %s4886_s6 }
 0x1c5   : > { %1555 = vrot.lane.b32.xlu0 %v6011_v55, %s4885_s30  ;;  %1553 = vrot.lane.b32.xlu2 %v6018_v51, %s4885_s30 }
 0x1c6   : > { %v1401_v41 = vpop.permute.xlu1 %1400 }
 0x1c7   : > { %1475 = vst.msk [vmem:[#allocation2 + $0x58] sm:$0xf] %vm1452_vm10, %v1401_v41  ;;  %v1399_v0 = vpop.permute.xlu0 %1398  ;;  %v1415_v54 = vpop.permute.xlu2 %1414  ;;  %v8287_v41 = vld [vmem:[#allocation31_spill] sm:$0xff] }
 0x1c8   : > { %1474 = vst.msk [vmem:[#allocation2 + $0x54] sm:$0xf] %vm1452_vm10, %v1399_v0 }
 0x1c9   : > { %1482 = vst.msk [vmem:[#allocation2 + $0x74] sm:$0xf] %vm1452_vm10, %v1415_v54 }
 0x1cc   : > { %1630 = vrot.lane.b32.xlu1 %v4984_v22, %s4886_s6 }
 0x1cd   : > { %1628 = vrot.lane.b32.xlu0 %v4996_v31, %s4886_s6  ;;  %1626 = vrot.lane.b32.xlu2 %v5010_v42, %s4886_s6 }
 0x1ce   : > { %v1407_v37 = vpop.permute.xlu1 %1406 }
 0x1cf   : > { %1478 = vst.msk [vmem:[#allocation2 + $0x64] sm:$0xf] %vm1452_vm10, %v1407_v37  ;;  %v1405_v2 = vpop.permute.xlu0 %1404  ;;  %v1494_v28 = vpop.permute.xlu2 %1493 }
 0x1d0   : > { %1477 = vst.msk [vmem:[#allocation2 + $0x60] sm:$0xf] %vm1452_vm10, %v1405_v2 }
 0x1d1   : > { %1590 = vst.msk [vmem:[#allocation2] sm:$0xf] %vm1589_vm11, %v1494_v28  ;;  %v8288_v28 = vld [vmem:[#allocation8_spill] sm:$0xff] }
 0x1d4   : > { %1636 = vrot.lane.b32.xlu1 %v5024_v53, %s4886_s6 }
 0x1d5   : > { %1634 = vrot.lane.b32.xlu0 %v5028_v56, %s4886_s6  ;;  %1632 = vrot.lane.b32.xlu2 %v5063_v29, %s4886_s6 }
 0x1d6   : > { %v1413_v22 = vpop.permute.xlu1 %1412 }
 0x1d7   : > { %1481 = vst.msk [vmem:[#allocation2 + $0x70] sm:$0xf] %vm1452_vm10, %v1413_v22  ;;  %v1411_v31 = vpop.permute.xlu0 %1410  ;;  %v1500_v42 = vpop.permute.xlu2 %1499  ;;  %v6123_v22 = vld [vmem:[%s4954_s25 + $0xd0] sm:$0xf] }
 0x1d8   : > { %1480 = vst.msk [vmem:[#allocation2 + $0x6c] sm:$0xf] %vm1452_vm10, %v1411_v31 }
 0x1d9   : > { %1593 = vst.msk [vmem:[#allocation2 + $0xc] sm:$0xf] %vm1589_vm11, %v1500_v42 }
 0x1dc   : > { %1642 = vrot.lane.b32.xlu1 %v5049_v16, %s4886_s6 }
 0x1dd   : > { %1640 = vrot.lane.b32.xlu0 %v5070_v33, %s4886_s6  ;;  %1638 = vrot.lane.b32.xlu2 %v5053_v19, %s4886_s6 }
 0x1de   : > { %v1419_v53 = vpop.permute.xlu1 %1418 }
 0x1df   : > { %1484 = vst.msk [vmem:[#allocation2 + $0x7c] sm:$0xf] %vm1452_vm10, %v1419_v53  ;;  %v1417_v56 = vpop.permute.xlu0 %1416  ;;  %v1506_v29 = vpop.permute.xlu2 %1505  ;;  %v8290_v53 = vld [vmem:[#allocation12_spill] sm:$0xff] }
 0x1e0   : > { %1483 = vst.msk [vmem:[#allocation2 + $0x78] sm:$0xf] %vm1452_vm10, %v1417_v56  ;;  %v8291_v56 = vld [vmem:[#allocation6_spill] sm:$0xff]  ;;  %vm3839_vm10 = vcmask 585248  }
 0x1e1   : > { %1596 = vst.msk [vmem:[#allocation2 + $0x18] sm:$0xf] %vm1589_vm11, %v1506_v29 }
 0x1e4   : > { %1648 = vrot.lane.b32.xlu1 %v5099_v7, %s4886_s6 }
 0x1e5   : > { %1646 = vrot.lane.b32.xlu0 %v5105_v11, %s4886_s6  ;;  %1644 = vrot.lane.b32.xlu2 %v5118_v26, %s4886_s6 }
 0x1e6   : > { %v1498_v16 = vpop.permute.xlu1 %1497 }
 0x1e7   : > { %1592 = vst.msk [vmem:[#allocation2 + $0x8] sm:$0xf] %vm1589_vm11, %v1498_v16  ;;  %v1496_v33 = vpop.permute.xlu0 %1495  ;;  %v1512_v19 = vpop.permute.xlu2 %1511 }
 0x1e8   : > { %1591 = vst.msk [vmem:[#allocation2 + $0x4] sm:$0xf] %vm1589_vm11, %v1496_v33  ;;  %v8292_v33 = vld [vmem:[#allocation7_spill] sm:$0xff] }
 0x1e9   : > { %1599 = vst.msk [vmem:[#allocation2 + $0x24] sm:$0xf] %vm1589_vm11, %v1512_v19 }
 0x1ec   : > { %1654 = vrot.lane.b32.xlu1 %v5144_v61, %s4886_s6 }
 0x1ed   : > { %1652 = vrot.lane.b32.xlu0 %v5154_v63, %s4886_s6  ;;  %1650 = vrot.lane.b32.xlu2 %v5133_v43, %s4886_s6 }
 0x1ee   : > { %v1504_v7 = vpop.permute.xlu1 %1503 }
 0x1ef   : > { %1595 = vst.msk [vmem:[#allocation2 + $0x14] sm:$0xf] %vm1589_vm11, %v1504_v7  ;;  %v1502_v11 = vpop.permute.xlu0 %1501  ;;  %v1518_v26 = vpop.permute.xlu2 %1517  ;;  %v8293_v7 = vld [vmem:[#allocation16_spill] sm:$0xff] }
 0x1f0   : > { %1594 = vst.msk [vmem:[#allocation2 + $0x10] sm:$0xf] %vm1589_vm11, %v1502_v11  ;;  %v8294_v11 = vld [vmem:[#allocation10_spill] sm:$0xff] }
 0x1f1   : > { %1602 = vst.msk [vmem:[#allocation2 + $0x30] sm:$0xf] %vm1589_vm11, %v1518_v26 }
 0x1f4   : > { %1660 = vrot.lane.b32.xlu1 %v5178_v3, %s4886_s6 }
 0x1f5   : > { %1658 = vrot.lane.b32.xlu0 %v5183_v5, %s4886_s6  ;;  %1656 = vrot.lane.b32.xlu2 %v5196_v32, %s4886_s6 }
 0x1f6   : > { %v1510_v61 = vpop.permute.xlu1 %1509 }
 0x1f7   : > { %1598 = vst.msk [vmem:[#allocation2 + $0x20] sm:$0xf] %vm1589_vm11, %v1510_v61  ;;  %v1508_v63 = vpop.permute.xlu0 %1507  ;;  %v1524_v43 = vpop.permute.xlu2 %1523 }
 0x1f8   : > { %1597 = vst.msk [vmem:[#allocation2 + $0x1c] sm:$0xf] %vm1589_vm11, %v1508_v63  ;;  %v8295_v63 = vld [vmem:[#allocation11_spill] sm:$0xff] }
 0x1f9   : > { %1605 = vst.msk [vmem:[#allocation2 + $0x3c] sm:$0xf] %vm1589_vm11, %v1524_v43 }
 0x1fc   : > { %1666 = vrot.lane.b32.xlu1 %v5212_v21, %s4886_s6 }
 0x1fd   : > { %1664 = vrot.lane.b32.xlu0 %v5229_v58, %s4886_s6  ;;  %1662 = vrot.lane.b32.xlu2 %v5219_v34, %s4886_s6 }
 0x1fe   : > { %v1516_v3 = vpop.permute.xlu1 %1515 }
 0x1ff   : > { %1601 = vst.msk [vmem:[#allocation2 + $0x2c] sm:$0xf] %vm1589_vm11, %v1516_v3  ;;  %v1514_v5 = vpop.permute.xlu0 %1513  ;;  %v1530_v32 = vpop.permute.xlu2 %1529  ;;  %v8296_v3 = vld [vmem:[#allocation21_spill] sm:$0xff] }
 0x200   : > { %1600 = vst.msk [vmem:[#allocation2 + $0x28] sm:$0xf] %vm1589_vm11, %v1514_v5  ;;  %v8297_v5 = vld [vmem:[#allocation14_spill] sm:$0xff] }
 0x201   : > { %1608 = vst.msk [vmem:[#allocation2 + $0x48] sm:$0xf] %vm1589_vm11, %v1530_v32 }
 0x204   : > { %1672 = vrot.lane.b32.xlu1 %v5256_v38, %s4886_s6  ;;  %v8286_v38 = vld [vmem:[#allocation35_spill] sm:$0xff] }
 0x205   : > { %1670 = vrot.lane.b32.xlu0 %v5262_v8, %s4886_s6  ;;  %1668 = vrot.lane.b32.xlu2 %v5274_v36, %s4886_s6  ;;  %v6108_v36 = vld [vmem:[%s4954_s25 + $0xcc] sm:$0xf] }
 0x206   : > { %v1522_v58 = vpop.permute.xlu1 %1521 }
 0x207   : > { %1604 = vst.msk [vmem:[#allocation2 + $0x38] sm:$0xf] %vm1589_vm11, %v1522_v58  ;;  %v1520_v21 = vpop.permute.xlu0 %1519  ;;  %v1536_v34 = vpop.permute.xlu2 %1535 }
 0x208   : > { %1603 = vst.msk [vmem:[#allocation2 + $0x34] sm:$0xf] %vm1589_vm11, %v1520_v21  ;;  %v8298_v21 = vld [vmem:[#allocation15_spill] sm:$0xff] }
 0x209   : > { %1611 = vst.msk [vmem:[#allocation2 + $0x54] sm:$0xf] %vm1589_vm11, %v1536_v34 }
 0x20c   : > { %1678 = vrot.lane.b32.xlu1 %v8285_v14, %s4886_s6  ;;  %v8299_v14 = vld [vmem:[#allocation25_spill] sm:$0xff] }
 0x20d   : > { %1676 = vrot.lane.b32.xlu0 %v8286_v38, %s4886_s6  ;;  %1674 = vrot.lane.b32.xlu2 %v8287_v41, %s4886_s6  ;;  %v8300_v38 = vld [vmem:[#allocation19_spill] sm:$0xff]  ;;  %v8301_v41 = vld [vmem:[#allocation20_spill] sm:$0xff] }
 0x20e   : > { %v1528_v59 = vpop.permute.xlu1 %1527 }
 0x20f   : > { %1607 = vst.msk [vmem:[#allocation2 + $0x44] sm:$0xf] %vm1589_vm11, %v1528_v59  ;;  %v1526_v8 = vpop.permute.xlu0 %1525  ;;  %v1542_v0 = vpop.permute.xlu2 %1541 }
 0x210   : > { %1606 = vst.msk [vmem:[#allocation2 + $0x40] sm:$0xf] %vm1589_vm11, %v1526_v8 }
 0x211   : > { %1614 = vst.msk [vmem:[#allocation2 + $0x60] sm:$0xf] %vm1589_vm11, %v1542_v0  ;;  %v1754_v0 = vshrl.u32 %v6108_v36, 16 }
 0x214   : > { %1684 = vrot.lane.b32.xlu1 %v6108_v36, %s4886_s6 }
 0x215   : > { %1682 = vrot.lane.b32.xlu0 %v5802_v13, %s4886_s6  ;;  %1680 = vrot.lane.b32.xlu2 %v5787_v24, %s4886_s6  ;;  %v8289_v13 = vld [vmem:[#allocation5_spill] sm:$0xff] }
 0x216   : > { %v1534_v54 = vpop.permute.xlu1 %1533 }
 0x217   : > { %1610 = vst.msk [vmem:[#allocation2 + $0x50] sm:$0xf] %vm1589_vm11, %v1534_v54  ;;  %v1532_v37 = vpop.permute.xlu0 %1531  ;;  %v1548_v2 = vpop.permute.xlu2 %1547  ;;  %v1757_v54 = vshll.u32 %v6108_v36, 16 }
 0x218   : > { %1609 = vst.msk [vmem:[#allocation2 + $0x4c] sm:$0xf] %vm1589_vm11, %v1532_v37 }
 0x219   : > { %1617 = vst.msk [vmem:[#allocation2 + $0x6c] sm:$0xf] %vm1589_vm11, %v1548_v2  ;;  %v1756_v2 = vrot.slane %v1754_v0, 4 }
 0x21c   : > { %1779 = vrot.lane.b32.xlu1 %v8288_v28, %s4887_s7  ;;  %v1759_v28 = vrot.slane %v1757_v54, 5 }
 0x21d   : > { %1777 = vrot.lane.b32.xlu0 %v8289_v13, %s4887_s7  ;;  %1686 = vrot.lane.b32.xlu2 %v6123_v22, %s4886_s6  ;;  %v8302_v13 = vld [vmem:[#allocation30_spill] sm:$0xff] }
 0x21e   : > { %v1540_v31 = vpop.permute.xlu1 %1539 }
 0x21f   : > { %1613 = vst.msk [vmem:[#allocation2 + $0x5c] sm:$0xf] %vm1589_vm11, %v1540_v31  ;;  %v1538_v42 = vpop.permute.xlu0 %1537  ;;  %v1554_v24 = vpop.permute.xlu2 %1553  ;;  %v8303_v31 = vld [vmem:[#allocation23_spill] sm:$0xff] }
 0x220   : > { %1612 = vst.msk [vmem:[#allocation2 + $0x58] sm:$0xf] %vm1589_vm11, %v1538_v42  ;;  %v1763_v42 = vshll.u32 %v6123_v22, 16 }
 0x221   : > { %1620 = vst.msk [vmem:[#allocation2 + $0x78] sm:$0xf] %vm1589_vm11, %v1554_v24 }
 0x224   : > { %1785 = vrot.lane.b32.xlu1 %v8290_v53, %s4887_s7 }
 0x225   : > { %1783 = vrot.lane.b32.xlu0 %v8291_v56, %s4887_s7  ;;  %1781 = vrot.lane.b32.xlu2 %v8292_v33, %s4887_s7  ;;  %v8304_v56 = vld [vmem:[#allocation24_spill] sm:$0xff]  ;;  %v1765_v33 = vrot.slane %v1763_v42, 5 }
 0x226   : > { %v1546_v29 = vpop.permute.xlu1 %1545 }
 0x227   : > { %1616 = vst.msk [vmem:[#allocation2 + $0x68] sm:$0xf] %vm1589_vm11, %v1546_v29  ;;  %v1544_v16 = vpop.permute.xlu0 %1543  ;;  %v1627_v19 = vpop.permute.xlu2 %1626  ;;  %v1760_v29 = vor.u32 %v1759_v28, %v1756_v2 }
 0x228   : > { %1615 = vst.msk [vmem:[#allocation2 + $0x64] sm:$0xf] %vm1589_vm11, %v1544_v16 }
 0x229   : > { %1722 = vst.msk [vmem:[#allocation2 + $0x4] sm:$0xf] %vm1720_vm12, %v1627_v19  ;;  %v1761_v19 = vrot.slane %v1760_v29, 4  ;;  %v8313_v29 = vld [vmem:[#allocation13_spill] sm:$0xff] }
 0x22c   : > { %1791 = vrot.lane.b32.xlu1 %v8293_v7, %s4887_s7  ;;  %v8305_v7 = vld [vmem:[#allocation37_spill] sm:$0xff] }
 0x22d   : > { %1789 = vrot.lane.b32.xlu0 %v8294_v11, %s4887_s7  ;;  %1787 = vrot.lane.b32.xlu2 %v8295_v63, %s4887_s7  ;;  %v1766_v11 = vsel %vm4990_vm2, %v1761_v19, %v1765_v33  ;;  %v8314_v19 = vld [vmem:[#allocation47_spill] sm:$0xff] }
 0x22e   : > { %v1552_v26 = vpop.permute.xlu1 %1551 }
 0x22f   : > { %1619 = vst.msk [vmem:[#allocation2 + $0x74] sm:$0xf] %vm1589_vm11, %v1552_v26  ;;  %v1550_v61 = vpop.permute.xlu0 %1549  ;;  %v1633_v43 = vpop.permute.xlu2 %1632  ;;  %v8306_v26 = vld [vmem:[#allocation28_spill] sm:$0xff] }
 0x230   : > { %1618 = vst.msk [vmem:[#allocation2 + $0x70] sm:$0xf] %vm1589_vm11, %v1550_v61 }
 0x231   : > { %1725 = vst.msk [vmem:[#allocation2 + $0x10] sm:$0xf] %vm1720_vm12, %v1633_v43  ;;  %v8307_v43 = vld [vmem:[#allocation29_spill] sm:$0xff] }
 0x234   : > { %1797 = vrot.lane.b32.xlu1 %v8296_v3, %s4887_s7 }
 0x235   : > { %1795 = vrot.lane.b32.xlu0 %v8297_v5, %s4887_s7  ;;  %1793 = vrot.lane.b32.xlu2 %v8298_v21, %s4887_s7  ;;  %v8308_v5 = vld [vmem:[#allocation39_spill] sm:$0xff]  ;;  %v8309_v21 = vld [vmem:[#allocation36_spill] sm:$0xff] }
 0x236   : > { %v1625_v32 = vpop.permute.xlu1 %1624 }
 0x237   : > { %1721 = vst.msk [vmem:[#allocation2] sm:$0xf] %vm1720_vm12, %v1625_v32  ;;  %v1556_v58 = vpop.permute.xlu0 %1555  ;;  %v1639_v34 = vpop.permute.xlu2 %1638 }
 0x238   : > { %1621 = vst.msk [vmem:[#allocation2 + $0x7c] sm:$0xf] %vm1589_vm11, %v1556_v58  ;;  %vm4020_vm11 = vcmask 588800  }
 0x239   : > { %1728 = vst.msk [vmem:[#allocation2 + $0x1c] sm:$0xf] %vm1720_vm12, %v1639_v34  ;;  %v1767_v34 = vshrl.u32 %v6123_v22, 16 }
 0x23c   : > { %1803 = vrot.lane.b32.xlu1 %v8299_v14, %s4887_s7 }
 0x23d   : > { %1801 = vrot.lane.b32.xlu0 %v8300_v38, %s4887_s7  ;;  %1799 = vrot.lane.b32.xlu2 %v8301_v41, %s4887_s7  ;;  %v1769_v38 = vrot.slane %v1767_v34, 4  ;;  %v8310_v41 = vld [vmem:[#allocation38_spill] sm:$0xff] }
 0x23e   : > { %v1631_v59 = vpop.permute.xlu1 %1630 }
 0x23f   : > { %1724 = vst.msk [vmem:[#allocation2 + $0xc] sm:$0xf] %vm1720_vm12, %v1631_v59  ;;  %v1629_v8 = vpop.permute.xlu0 %1628  ;;  %v1645_v37 = vpop.permute.xlu2 %1644  ;;  %v6206_v59 = vld [vmem:[%s4954_s25 + $0xd4] sm:$0x1]  ;;  %v1770_v0 = vor.u32 %v1769_v38, %v1765_v33 }
 0x240   : > { %1723 = vst.msk [vmem:[#allocation2 + $0x8] sm:$0xf] %vm1720_vm12, %v1629_v8  ;;  %v1773_v54 = vshll.u32 %v6206_v59, 16 }
 0x241   : > { %1731 = vst.msk [vmem:[#allocation2 + $0x28] sm:$0xf] %vm1720_vm12, %v1645_v37 }
 0x244   : > { %1809 = vrot.lane.b32.xlu1 %v8302_v13, %s4887_s7 }
 0x245   : > { %1807 = vrot.lane.b32.xlu0 %v8303_v31, %s4887_s7  ;;  %1805 = vrot.lane.b32.xlu2 %v8304_v56, %s4887_s7 }
 0x246   : > { %v1637_v24 = vpop.permute.xlu1 %1636 }
 0x247   : > { %1727 = vst.msk [vmem:[#allocation2 + $0x18] sm:$0xf] %vm1720_vm12, %v1637_v24  ;;  %v1635_v53 = vpop.permute.xlu0 %1634  ;;  %v1651_v16 = vpop.permute.xlu2 %1650 }
 0x248   : > { %1726 = vst.msk [vmem:[#allocation2 + $0x14] sm:$0xf] %vm1720_vm12, %v1635_v53  ;;  %v8311_v53 = vld [vmem:[#allocation48_spill] sm:$0xff] }
 0x249   : > { %1734 = vst.msk [vmem:[#allocation2 + $0x34] sm:$0xf] %vm1720_vm12, %v1651_v16 }
 0x24c   : > { %1815 = vrot.lane.b32.xlu1 %v8305_v7, %s4887_s7 }
 0x24d   : > { %1813 = vrot.lane.b32.xlu0 %v8306_v26, %s4887_s7  ;;  %1811 = vrot.lane.b32.xlu2 %v8307_v43, %s4887_s7  ;;  %v4527_v43 = vrot.slane %v6108_v36, 9 }
 0x24e   : > { %v1643_v61 = vpop.permute.xlu1 %1642 }
 0x24f   : > { %1730 = vst.msk [vmem:[#allocation2 + $0x24] sm:$0xf] %vm1720_vm12, %v1643_v61  ;;  %v1641_v63 = vpop.permute.xlu0 %1640  ;;  %v1657_v3 = vpop.permute.xlu2 %1656 }
 0x250   : > { %1729 = vst.msk [vmem:[#allocation2 + $0x20] sm:$0xf] %vm1720_vm12, %v1641_v63  ;;  %v8317_v63 = vld [vmem:[#allocation50_spill] sm:$0xff] }
 0x251   : > { %1737 = vst.msk [vmem:[#allocation2 + $0x40] sm:$0xf] %vm1720_vm12, %v1657_v3 }
 0x254   : > { %1821 = vrot.lane.b32.xlu1 %v8308_v5, %s4887_s7  ;;  %v1909_v5 = vrot.slane %v6123_v22, 5 }
 0x255   : > { %1819 = vrot.lane.b32.xlu0 %v8269_v23, %s4887_s7  ;;  %1817 = vrot.lane.b32.xlu2 %v8309_v21, %s4887_s7  ;;  %v1912_v21 = vrot.slane %v6206_v59, 5 }
 0x256   : > { %v1649_v32 = vpop.permute.xlu1 %1648 }
 0x257   : > { %1733 = vst.msk [vmem:[#allocation2 + $0x30] sm:$0xf] %vm1720_vm12, %v1649_v32  ;;  %v1647_v58 = vpop.permute.xlu0 %1646  ;;  %v1663_v14 = vpop.permute.xlu2 %1662 }
 0x258   : > { %1732 = vst.msk [vmem:[#allocation2 + $0x2c] sm:$0xf] %vm1720_vm12, %v1647_v58  ;;  %v8318_v58 = vld [vmem:[#allocation32_spill] sm:$0xff] }
 0x259   : > { %1740 = vst.msk [vmem:[#allocation2 + $0x4c] sm:$0xf] %vm1720_vm12, %v1663_v14 }
 0x25c   : > { %1827 = vrot.lane.b32.xlu1 %v5371_v48, %s4887_s7  ;;  %v1775_v48 = vrot.slane %v1773_v54, 5  ;;  %v6355_v54 = vld [vmem:[%s6326_s11 + $0x4] sm:$0xf] }
 0x25d   : > { %1825 = vrot.lane.b32.xlu0 %v5337_v40, %s4887_s7  ;;  %1823 = vrot.lane.b32.xlu2 %v8310_v41, %s4887_s7  ;;  %v1771_v40 = vrot.slane %v1770_v0, 4  ;;  %v6349_v0 = vld [vmem:[%s6326_s11 + $0xc] sm:$0xf] }
 0x25e   : > { %v1655_v23 = vpop.permute.xlu1 %1654 }
 0x25f   : > { %1736 = vst.msk [vmem:[#allocation2 + $0x3c] sm:$0xf] %vm1720_vm12, %v1655_v23  ;;  %v1653_v8 = vpop.permute.xlu0 %1652  ;;  %v1669_v37 = vpop.permute.xlu2 %1668  ;;  %v1776_v13 = vsel %vm4990_vm2, %v1771_v40, %v1775_v48  ;;  %v6364_v48 = vld [vmem:[%s6326_s11 + $0x24] sm:$0xf] }
 0x260   : > { %1735 = vst.msk [vmem:[#allocation2 + $0x38] sm:$0xf] %vm1720_vm12, %v1653_v8  ;;  %v6346_v8 = vld [vmem:[%s6326_s11 + $0x10] sm:$0xf] }
 0x261   : > { %1743 = vst.msk [vmem:[#allocation2 + $0x58] sm:$0xf] %vm1720_vm12, %v1669_v37 }
 0x264   : > { %1833 = vrot.lane.b32.xlu1 %v5905_v49, %s4887_s7 }
 0x265   : > { %1831 = vrot.lane.b32.xlu0 %v5360_v20, %s4887_s7  ;;  %1829 = vrot.lane.b32.xlu2 %v5364_v50, %s4887_s7 }
 0x266   : > { %v1661_v2 = vpop.permute.xlu1 %1660 }
 0x267   : > { %1739 = vst.msk [vmem:[#allocation2 + $0x48] sm:$0xf] %vm1720_vm12, %v1661_v2  ;;  %v1659_v28 = vpop.permute.xlu0 %1658  ;;  %v1675_v31 = vpop.permute.xlu2 %1674 }
 0x268   : > { %1738 = vst.msk [vmem:[#allocation2 + $0x44] sm:$0xf] %vm1720_vm12, %v1659_v28  ;;  %v6367_v28 = vld [vmem:[%s6326_s11 + $0x1c] sm:$0xf] }
 0x269   : > { %1746 = vst.msk [vmem:[#allocation2 + $0x64] sm:$0xf] %vm1720_vm12, %v1675_v31 }
 0x26c   : > { %1839 = vrot.lane.b32.xlu1 %v1776_v13, %s4887_s7  ;;  %v6373_v13 = vld [vmem:[%s6326_s11 + $0x18] sm:$0xf] }
 0x26d   : > { %1837 = vrot.lane.b32.xlu0 %v1766_v11, %s4887_s7  ;;  %1835 = vrot.lane.b32.xlu2 %v5901_v35, %s4887_s7  ;;  %v8315_v11 = vld [vmem:[#allocation22_spill] sm:$0xff] }
 0x26e   : > { %v1667_v20 = vpop.permute.xlu1 %1666 }
 0x26f   : > { %1742 = vst.msk [vmem:[#allocation2 + $0x54] sm:$0xf] %vm1720_vm12, %v1667_v20  ;;  %v1665_v49 = vpop.permute.xlu0 %1664  ;;  %v1681_v50 = vpop.permute.xlu2 %1680 }
 0x270   : > { %1741 = vst.msk [vmem:[#allocation2 + $0x50] sm:$0xf] %vm1720_vm12, %v1665_v49  ;;  %v6382_v49 = vld [vmem:[%s6326_s11 + $0x34] sm:$0xf] }
 0x271   : > { %1749 = vst.msk [vmem:[#allocation2 + $0x70] sm:$0xf] %vm1720_vm12, %v1681_v50 }
 0x274   : > { %1918 = vrot.lane.b32.xlu1 %v5482_v18, %s4888_s8 }
 0x275   : > { %1916 = vrot.lane.b32.xlu0 %v5425_v4, %s4888_s8  ;;  %1914 = vrot.lane.b32.xlu2 %v5431_v12, %s4888_s8 }
 0x276   : > { %v1673_v42 = vpop.permute.xlu1 %1672 }
 0x277   : > { %1745 = vst.msk [vmem:[#allocation2 + $0x60] sm:$0xf] %vm1720_vm12, %v1673_v42  ;;  %v1671_v24 = vpop.permute.xlu0 %1670  ;;  %v1687_v35 = vpop.permute.xlu2 %1686  ;;  %v6385_v42 = vld [vmem:[%s6326_s11 + $0x30] sm:$0xf] }
 0x278   : > { %1744 = vst.msk [vmem:[#allocation2 + $0x5c] sm:$0xf] %vm1720_vm12, %v1671_v24  ;;  %v6391_v24 = vld [vmem:[%s6326_s11 + $0x28] sm:$0xf] }
 0x279   : > { %1752 = vst.msk [vmem:[#allocation2 + $0x7c] sm:$0xf] %vm1720_vm12, %v1687_v35 }
 0x27c   : > { %1924 = vrot.lane.b32.xlu1 %v8270_v57, %s4888_s8 }
 0x27d   : > { %1922 = vrot.lane.b32.xlu0 %v8271_v6, %s4888_s8  ;;  %1920 = vrot.lane.b32.xlu2 %v5471_v17, %s4888_s8 }
 0x27e   : > { %v1679_v18 = vpop.permute.xlu1 %1678 }
 0x27f   : > { %1748 = vst.msk [vmem:[#allocation2 + $0x6c] sm:$0xf] %vm1720_vm12, %v1679_v18  ;;  %v1677_v4 = vpop.permute.xlu0 %1676  ;;  %v1782_v12 = vpop.permute.xlu2 %1781 }
 0x280   : > { %1747 = vst.msk [vmem:[#allocation2 + $0x68] sm:$0xf] %vm1720_vm12, %v1677_v4  ;;  %v6400_v4 = vld [vmem:[%s6326_s11 + $0x48] sm:$0xf] }
 0x281   : > { %1876 = vst.msk [vmem:[#allocation2 + $0x8] sm:$0xf] %vm1873_vm13, %v1782_v12 }
 0x284   : > { %1930 = vrot.lane.b32.xlu1 %v8273_v62, %s4888_s8 }
 0x285   : > { %1928 = vrot.lane.b32.xlu0 %v8274_v45, %s4888_s8  ;;  %1926 = vrot.lane.b32.xlu2 %v5507_v25, %s4888_s8 }
 0x286   : > { %v1685_v57 = vpop.permute.xlu1 %1684 }
 0x287   : > { %1751 = vst.msk [vmem:[#allocation2 + $0x78] sm:$0xf] %vm1720_vm12, %v1685_v57  ;;  %v1683_v6 = vpop.permute.xlu0 %1682  ;;  %v1788_v17 = vpop.permute.xlu2 %1787  ;;  %v6403_v57 = vld [vmem:[%s6326_s11 + $0x40] sm:$0xf] }
 0x288   : > { %1750 = vst.msk [vmem:[#allocation2 + $0x74] sm:$0xf] %vm1720_vm12, %v1683_v6  ;;  %v6409_v6 = vld [vmem:[%s6326_s11 + $0x3c] sm:$0xf] }
 0x289   : > { %1879 = vst.msk [vmem:[#allocation2 + $0x14] sm:$0xf] %vm1873_vm13, %v1788_v17 }
 0x28c   : > { %1936 = vrot.lane.b32.xlu1 %v8276_v10, %s4888_s8  ;;  %v8312_v10 = vld [vmem:[#allocation18_spill] sm:$0xff] }
 0x28d   : > { %1934 = vrot.lane.b32.xlu0 %v8277_v44, %s4888_s8  ;;  %1932 = vrot.lane.b32.xlu2 %v8272_v15, %s4888_s8 }
 0x28e   : > { %v1780_v62 = vpop.permute.xlu1 %1779 }
 0x28f   : > { %1875 = vst.msk [vmem:[#allocation2 + $0x4] sm:$0xf] %vm1873_vm13, %v1780_v62  ;;  %v1778_v45 = vpop.permute.xlu0 %1777  ;;  %v1794_v25 = vpop.permute.xlu2 %1793 }
 0x290   : > { %1874 = vst.msk [vmem:[#allocation2] sm:$0xf] %vm1873_vm13, %v1778_v45  ;;  %v6418_v45 = vld [vmem:[%s6326_s11 + $0x58] sm:$0xf] }
 0x291   : > { %1882 = vst.msk [vmem:[#allocation2 + $0x20] sm:$0xf] %vm1873_vm13, %v1794_v25 }
 0x294   : > { %1942 = vrot.lane.b32.xlu1 %v8311_v53, %s4888_s8  ;;  %v6421_v53 = vld [vmem:[%s6326_s11 + $0x54] sm:$0xf] }
 0x295   : > { %1940 = vrot.lane.b32.xlu0 %v8312_v10, %s4888_s8  ;;  %1938 = vrot.lane.b32.xlu2 %v8313_v29, %s4888_s8  ;;  %v6427_v10 = vld [vmem:[%s6326_s11 + $0x4c] sm:$0xf] }
 0x296   : > { %v1786_v56 = vpop.permute.xlu1 %1785 }
 0x297   : > { %1878 = vst.msk [vmem:[#allocation2 + $0x10] sm:$0xf] %vm1873_vm13, %v1786_v56  ;;  %v1784_v44 = vpop.permute.xlu0 %1783  ;;  %v1800_v15 = vpop.permute.xlu2 %1799 }
 0x298   : > { %1877 = vst.msk [vmem:[#allocation2 + $0xc] sm:$0xf] %vm1873_vm13, %v1784_v44 }
 0x299   : > { %1885 = vst.msk [vmem:[#allocation2 + $0x2c] sm:$0xf] %vm1873_vm13, %v1800_v15 }
 0x29c   : > { %1948 = vrot.lane.b32.xlu1 %v8281_v30, %s4888_s8 }
 0x29d   : > { %1946 = vrot.lane.b32.xlu0 %v8282_v1, %s4888_s8  ;;  %1944 = vrot.lane.b32.xlu2 %v8314_v19, %s4888_s8  ;;  %v6441_v19 = vld [vmem:[%s6326_s11 + $0x64] sm:$0xf] }
 0x29e   : > { %v1792_v16 = vpop.permute.xlu1 %1791 }
 0x29f   : > { %1881 = vst.msk [vmem:[#allocation2 + $0x1c] sm:$0xf] %vm1873_vm13, %v1792_v16  ;;  %v1790_v33 = vpop.permute.xlu0 %1789  ;;  %v1806_v7 = vpop.permute.xlu2 %1805  ;;  %v6438_v16 = vld [vmem:[%s6326_s11 + $0x6c] sm:$0xf] }
 0x2a0   : > { %1880 = vst.msk [vmem:[#allocation2 + $0x18] sm:$0xf] %vm1873_vm13, %v1790_v33 }
 0x2a1   : > { %1888 = vst.msk [vmem:[#allocation2 + $0x38] sm:$0xf] %vm1873_vm13, %v1806_v7 }
 0x2a4   : > { %1954 = vrot.lane.b32.xlu1 %v5653_v52, %s4888_s8  ;;  %v8316_v52 = vld [vmem:[#allocation26_spill] sm:$0xff] }
 0x2a5   : > { %1952 = vrot.lane.b32.xlu0 %v8283_v46, %s4888_s8  ;;  %1950 = vrot.lane.b32.xlu2 %v8315_v11, %s4888_s8  ;;  %v2270_v11 = vshll.u32 %v6355_v54, 16 }
 0x2a6   : > { %v1798_v30 = vpop.permute.xlu1 %1797 }
 0x2a7   : > { %1884 = vst.msk [vmem:[#allocation2 + $0x28] sm:$0xf] %vm1873_vm13, %v1798_v30  ;;  %v1796_v1 = vpop.permute.xlu0 %1795  ;;  %v1812_v26 = vpop.permute.xlu2 %1811 }
 0x2a8   : > { %1883 = vst.msk [vmem:[#allocation2 + $0x24] sm:$0xf] %vm1873_vm13, %v1796_v1  ;;  %v6447_v1 = vld [vmem:[%s6326_s11 + $0x60] sm:$0xf] }
 0x2a9   : > { %1891 = vst.msk [vmem:[#allocation2 + $0x44] sm:$0xf] %vm1873_vm13, %v1812_v26 }
 0x2ac   : > { %1960 = vrot.lane.b32.xlu1 %v5678_v9, %s4888_s8  ;;  %v1910_v9 = vsel %vm5377_vm6, %v4527_v43, %v1909_v5  ;;  %v6459_v43 = vrot.slane %v2270_v11, 5 }
 0x2ad   : > { %1958 = vrot.lane.b32.xlu0 %v8316_v52, %s4888_s8  ;;  %1956 = vrot.lane.b32.xlu2 %v8317_v63, %s4888_s8 }
 0x2ae   : > { %v1804_v61 = vpop.permute.xlu1 %1803 }
 0x2af   : > { %1887 = vst.msk [vmem:[#allocation2 + $0x34] sm:$0xf] %vm1873_vm13, %v1804_v61  ;;  %v1802_v46 = vpop.permute.xlu0 %1801  ;;  %v1818_v3 = vpop.permute.xlu2 %1817 }
 0x2b0   : > { %1886 = vst.msk [vmem:[#allocation2 + $0x30] sm:$0xf] %vm1873_vm13, %v1802_v46  ;;  %v6457_v46 = vld [vmem:[%s6326_s11 + $0x7c] sm:$0xf] }
 0x2b1   : > { %1894 = vst.msk [vmem:[#allocation2 + $0x50] sm:$0xf] %vm1873_vm13, %v1818_v3  ;;  %v6462_v3 = vld [vmem:[%s6326_s11 + $0x78] sm:$0xf] }
 0x2b4   : > { %1966 = vrot.lane.b32.xlu1 %v5697_v39, %s4888_s8 }
 0x2b5   : > { %1964 = vrot.lane.b32.xlu0 %v5666_v60, %s4888_s8  ;;  %1962 = vrot.lane.b32.xlu2 %v8318_v58, %s4888_s8  ;;  %v1911_v60 = vrot.slane %v1909_v5, 4 }
 0x2b6   : > { %v1810_v32 = vpop.permute.xlu1 %1809 }
 0x2b7   : > { %1890 = vst.msk [vmem:[#allocation2 + $0x40] sm:$0xf] %vm1873_vm13, %v1810_v32  ;;  %v1808_v36 = vpop.permute.xlu0 %1807  ;;  %v1824_v22 = vpop.permute.xlu2 %1823  ;;  %v1913_v38 = vsel %vm5377_vm6, %v1911_v60, %v1912_v21  ;;  %v6486_v60 = vld [vmem:[%s6326_s11 + $0x88] sm:$0xf]  ;;  %v6492_v21 = vld [vmem:[%s6326_s11 + $0x84] sm:$0xf] }
 0x2b8   : > { %1889 = vst.msk [vmem:[#allocation2 + $0x3c] sm:$0xf] %vm1873_vm13, %v1808_v36 }
 0x2b9   : > { %1897 = vst.msk [vmem:[#allocation2 + $0x5c] sm:$0xf] %vm1873_vm13, %v1824_v22  ;;  %v6483_v22 = vld [vmem:[%s6326_s11 + $0x90] sm:$0xf] }
 0x2bc   : > { %1972 = vrot.lane.b32.xlu1 %v6011_v55, %s4888_s8  ;;  %v8319_v55 = vld [vmem:[#allocation51_spill] sm:$0xff] }
 0x2bd   : > { %1970 = vrot.lane.b32.xlu0 %v6018_v51, %s4888_s8  ;;  %1968 = vrot.lane.b32.xlu2 %v8319_v55, %s4888_s8  ;;  %v6334_v51 = vld [vmem:[%s6326_s11] sm:$0xf] }
 0x2be   : > { %v1816_v39 = vpop.permute.xlu1 %1815  ;;  %v2261_v29 = vshrl.u32 %v6334_v51, 16  ;;  %v2264_v15 = vshll.u32 %v6334_v51, 16 }
 0x2bf   : > { %1893 = vst.msk [vmem:[#allocation2 + $0x4c] sm:$0xf] %vm1873_vm13, %v1816_v39  ;;  %v1814_v34 = vpop.permute.xlu0 %1813  ;;  %v1830_v14 = vpop.permute.xlu2 %1829 }
 0x2c0   : > { %1892 = vst.msk [vmem:[#allocation2 + $0x48] sm:$0xf] %vm1873_vm13, %v1814_v34  ;;  %v2263_v7 = vrot.slane %v2261_v29, 4  ;;  %v2266_v30 = vrot.slane %v2264_v15, 5  ;;  %v2285_v29 = vshrl.u32 %v6349_v0, 16  ;;  %v2288_v15 = vshll.u32 %v6349_v0, 16 }
 0x2c1   : > { %1900 = vst.msk [vmem:[#allocation2 + $0x68] sm:$0xf] %vm1873_vm13, %v1830_v14  ;;  %v2274_v14 = vshrl.u32 %v6355_v54, 16 }
 0x2c2   : > { %v2267_v61 = vor.u32 %v2266_v30, %v2263_v7 }
 0x2c4   : > { %2131 = vrot.lane.b32.xlu1 %v6334_v51, %s4889_s12  ;;  %v6465_v5 = vrot.slane %v2267_v61, 4 }
 0x2c5   : > { %1976 = vrot.lane.b32.xlu0 %v1913_v38, %s4888_s8  ;;  %1974 = vrot.lane.b32.xlu2 %v1910_v9, %s4888_s8  ;;  %v6470_v9 = vld [vmem:[%s6326_s11 + $0x70] sm:$0xf]  ;;  %v6502_v38 = vld [vmem:[%s6326_s11 + $0xa0] sm:$0xf] }
 0x2c6   : > { %v1822_v23 = vpop.permute.xlu1 %1821  ;;  %v2273_v32 = vsel %vm4990_vm2, %v6465_v5, %v6459_v43 }
 0x2c7   : > { %1896 = vst.msk [vmem:[#allocation2 + $0x58] sm:$0xf] %vm1873_vm13, %v1822_v23  ;;  %v1820_v59 = vpop.permute.xlu0 %1819  ;;  %v1836_v41 = vpop.permute.xlu2 %1835 }
 0x2c8   : > { %1895 = vst.msk [vmem:[#allocation2 + $0x54] sm:$0xf] %vm1873_vm13, %v1820_v59  ;;  %v6505_v59 = vld [vmem:[%s6326_s11 + $0x9c] sm:$0xf] }
 0x2c9   : > { %1903 = vst.msk [vmem:[#allocation2 + $0x74] sm:$0xf] %vm1873_vm13, %v1836_v41  ;;  %v6511_v41 = vld [vmem:[%s6326_s11 + $0x94] sm:$0xf] }
 0x2cc   : > { %2137 = vrot.lane.b32.xlu1 %v6346_v8, %s4889_s12 }
 0x2cd   : > { %2135 = vrot.lane.b32.xlu0 %v6349_v0, %s4889_s12  ;;  %2133 = vrot.lane.b32.xlu2 %v6355_v54, %s4889_s12 }
 0x2ce   : > { %v1828_v37 = vpop.permute.xlu1 %1827 }
 0x2cf   : > { %1899 = vst.msk [vmem:[#allocation2 + $0x64] sm:$0xf] %vm1873_vm13, %v1828_v37  ;;  %v1826_v40 = vpop.permute.xlu0 %1825  ;;  %v1915_v2 = vpop.permute.xlu2 %1914  ;;  %v2276_v37 = vrot.slane %v2274_v14, 4  ;;  %v2287_v14 = vrot.slane %v2285_v29, 4 }
 0x2d0   : > { %1898 = vst.msk [vmem:[#allocation2 + $0x60] sm:$0xf] %vm1873_vm13, %v1826_v40 }
 0x2d1   : > { %2011 = vst.msk [vmem:[#allocation2] sm:$0xf] %vm2010_vm14, %v1915_v2  ;;  %v6516_v2 = vld [vmem:[%s6326_s11 + $0x8] sm:$0x1] }
 0x2d4   : > { %2143 = vrot.lane.b32.xlu1 %v6364_v48, %s4889_s12 }
 0x2d5   : > { %2141 = vrot.lane.b32.xlu0 %v6367_v28, %s4889_s12  ;;  %2139 = vrot.lane.b32.xlu2 %v6373_v13, %s4889_s12 }
 0x2d6   : > { %v1834_v31 = vpop.permute.xlu1 %1833 }
 0x2d7   : > { %1902 = vst.msk [vmem:[#allocation2 + $0x70] sm:$0xf] %vm1873_vm13, %v1834_v31  ;;  %v1832_v20 = vpop.permute.xlu0 %1831  ;;  %v1921_v50 = vpop.permute.xlu2 %1920 }
 0x2d8   : > { %1901 = vst.msk [vmem:[#allocation2 + $0x6c] sm:$0xf] %vm1873_vm13, %v1832_v20  ;;  %v6523_v20 = vld [vmem:[%s6326_s11 + $0xb4] sm:$0xf] }
 0x2d9   : > { %2014 = vst.msk [vmem:[#allocation2 + $0xc] sm:$0xf] %vm2010_vm14, %v1921_v50  ;;  %v2277_v50 = vor.u32 %v2276_v37, %v6459_v43 }
 0x2dc   : > { %2149 = vrot.lane.b32.xlu1 %v6382_v49, %s4889_s12 }
 0x2dd   : > { %2147 = vrot.lane.b32.xlu0 %v6385_v42, %s4889_s12  ;;  %2145 = vrot.lane.b32.xlu2 %v6391_v24, %s4889_s12 }
 0x2de   : > { %v1840_v35 = vpop.permute.xlu1 %1839 }
 0x2df   : > { %1905 = vst.msk [vmem:[#allocation2 + $0x7c] sm:$0xf] %vm1873_vm13, %v1840_v35  ;;  %v1838_v18 = vpop.permute.xlu0 %1837  ;;  %v1927_v12 = vpop.permute.xlu2 %1926  ;;  %v2280_v35 = vshll.u32 %v6516_v2, 16 }
 0x2e0   : > { %1904 = vst.msk [vmem:[#allocation2 + $0x78] sm:$0xf] %vm1873_vm13, %v1838_v18 }
 0x2e1   : > { %2017 = vst.msk [vmem:[#allocation2 + $0x18] sm:$0xf] %vm2010_vm14, %v1927_v12  ;;  %v2309_v12 = vshrl.u32 %v6373_v13, 16  ;;  %v2282_v7 = vrot.slane %v2280_v35, 5 }
 0x2e3   : > { %v2311_v30 = vrot.slane %v2309_v12, 4 }
 0x2e4   : > { %2155 = vrot.lane.b32.xlu1 %v6400_v4, %s4889_s12 }
 0x2e5   : > { %2153 = vrot.lane.b32.xlu0 %v6403_v57, %s4889_s12  ;;  %2151 = vrot.lane.b32.xlu2 %v6409_v6, %s4889_s12 }
 0x2e6   : > { %v1919_v17 = vpop.permute.xlu1 %1918 }
 0x2e7   : > { %2013 = vst.msk [vmem:[#allocation2 + $0x8] sm:$0xf] %vm2010_vm14, %v1919_v17  ;;  %v1917_v62 = vpop.permute.xlu0 %1916  ;;  %v1933_v25 = vpop.permute.xlu2 %1932  ;;  %v2312_v17 = vshll.u32 %v6373_v13, 16 }
 0x2e8   : > { %2012 = vst.msk [vmem:[#allocation2 + $0x4] sm:$0xf] %vm2010_vm14, %v1917_v62  ;;  %v6530_v62 = vld [vmem:[%s6326_s11 + $0xac] sm:$0xf] }
 0x2e9   : > { %2020 = vst.msk [vmem:[#allocation2 + $0x24] sm:$0xf] %vm2010_vm14, %v1933_v25  ;;  %v2294_v25 = vshll.u32 %v6346_v8, 16  ;;  %v2314_v11 = vrot.slane %v2312_v17, 5 }
 0x2eb   : > { %v2296_v61 = vrot.slane %v2294_v25, 5 }
 0x2ec   : > { %2161 = vrot.lane.b32.xlu1 %v6418_v45, %s4889_s12 }
 0x2ed   : > { %2159 = vrot.lane.b32.xlu0 %v6421_v53, %s4889_s12  ;;  %2157 = vrot.lane.b32.xlu2 %v6427_v10, %s4889_s12 }
 0x2ee   : > { %v1925_v56 = vpop.permute.xlu1 %1924 }
 0x2ef   : > { %2016 = vst.msk [vmem:[#allocation2 + $0x14] sm:$0xf] %vm2010_vm14, %v1925_v56  ;;  %v1923_v44 = vpop.permute.xlu0 %1922  ;;  %v1939_v33 = vpop.permute.xlu2 %1938  ;;  %v2298_v56 = vshrl.u32 %v6346_v8, 16 }
 0x2f0   : > { %2015 = vst.msk [vmem:[#allocation2 + $0x10] sm:$0xf] %vm2010_vm14, %v1923_v44  ;;  %v6538_v44 = vld [vmem:[%s6326_s11 + $0xa8] sm:$0xf] }
 0x2f1   : > { %2023 = vst.msk [vmem:[#allocation2 + $0x30] sm:$0xf] %vm2010_vm14, %v1939_v33  ;;  %v2278_v33 = vrot.slane %v2277_v50, 4 }
 0x2f3   : > { %v2283_v37 = vsel %vm4990_vm2, %v2278_v33, %v2282_v7  ;;  %v2322_v33 = vshrl.u32 %v6367_v28, 16 }
 0x2f4   : > { %2167 = vrot.lane.b32.xlu1 %v6438_v16, %s4889_s12 }
 0x2f5   : > { %2165 = vrot.lane.b32.xlu0 %v6441_v19, %s4889_s12  ;;  %2163 = vrot.lane.b32.xlu2 %v6447_v1, %s4889_s12  ;;  %v2324_v5 = vrot.slane %v2322_v33, 4 }
 0x2f6   : > { %v1931_v26 = vpop.permute.xlu1 %1930 }
 0x2f7   : > { %2019 = vst.msk [vmem:[#allocation2 + $0x20] sm:$0xf] %vm2010_vm14, %v1931_v26  ;;  %v1929_v52 = vpop.permute.xlu0 %1928  ;;  %v1945_v63 = vpop.permute.xlu2 %1944 }
 0x2f8   : > { %2018 = vst.msk [vmem:[#allocation2 + $0x1c] sm:$0xf] %vm2010_vm14, %v1929_v52  ;;  %v6545_v52 = vld [vmem:[%s6326_s11 + $0x14] sm:$0x1] }
 0x2f9   : > { %2026 = vst.msk [vmem:[#allocation2 + $0x3c] sm:$0xf] %vm2010_vm14, %v1945_v63  ;;  %v2300_v63 = vrot.slane %v2298_v56, 4  ;;  %v6565_v56 = vld [vmem:[%s6326_s11 + $0xb8] sm:$0xf] }
 0x2fb   : > { %v2301_v35 = vor.u32 %v2300_v63, %v2296_v61 }
 0x2fc   : > { %2173 = vrot.lane.b32.xlu1 %v6457_v46, %s4889_s12 }
 0x2fd   : > { %2171 = vrot.lane.b32.xlu0 %v6462_v3, %s4889_s12  ;;  %2169 = vrot.lane.b32.xlu2 %v6470_v9, %s4889_s12 }
 0x2fe   : > { %v1937_v36 = vpop.permute.xlu1 %1936 }
 0x2ff   : > { %2022 = vst.msk [vmem:[#allocation2 + $0x2c] sm:$0xf] %vm2010_vm14, %v1937_v36  ;;  %v1935_v58 = vpop.permute.xlu0 %1934  ;;  %v1951_v39 = vpop.permute.xlu2 %1950 }
 0x300   : > { %2021 = vst.msk [vmem:[#allocation2 + $0x28] sm:$0xf] %vm2010_vm14, %v1935_v58  ;;  %v2342_v58 = vshll.u32 %v6391_v24, 16 }
 0x301   : > { %2029 = vst.msk [vmem:[#allocation2 + $0x48] sm:$0xf] %vm2010_vm14, %v1951_v39  ;;  %v2346_v39 = vshrl.u32 %v6391_v24, 16 }
 0x302   : > { %v2344_v12 = vrot.slane %v2342_v58, 5 }
 0x303   : > { %v2348_v17 = vrot.slane %v2346_v39, 4 }
 0x304   : > { %2179 = vrot.lane.b32.xlu1 %v6483_v22, %s4889_s12 }
 0x305   : > { %2177 = vrot.lane.b32.xlu0 %v6486_v60, %s4889_s12  ;;  %2175 = vrot.lane.b32.xlu2 %v6492_v21, %s4889_s12  ;;  %v2349_v58 = vor.u32 %v2348_v17, %v2344_v12  ;;  %v2357_v17 = vshrl.u32 %v6385_v42, 16 }
 0x306   : > { %v1943_v34 = vpop.permute.xlu1 %1942 }
 0x307   : > { %2025 = vst.msk [vmem:[#allocation2 + $0x38] sm:$0xf] %vm2010_vm14, %v1943_v34  ;;  %v1941_v55 = vpop.permute.xlu0 %1940  ;;  %v1957_v23 = vpop.permute.xlu2 %1956  ;;  %v2333_v34 = vshrl.u32 %v6364_v48, 16 }
 0x308   : > { %2024 = vst.msk [vmem:[#allocation2 + $0x34] sm:$0xf] %vm2010_vm14, %v1941_v55  ;;  %v2336_v55 = vshll.u32 %v6364_v48, 16  ;;  %v6562_v48 = vld [vmem:[%s6326_s11 + $0x2c] sm:$0x1] }
 0x309   : > { %2032 = vst.msk [vmem:[#allocation2 + $0x54] sm:$0xf] %vm2010_vm14, %v1957_v23  ;;  %v2290_v23 = vrot.slane %v2288_v15, 5  ;;  %v2335_v25 = vrot.slane %v2333_v34, 4  ;;  %v2352_v39 = vshll.u32 %v6562_v48, 16 }
 0x30a   : > { %v2338_v29 = vrot.slane %v2336_v55, 5 }
 0x30b   : > { %v2291_v15 = vor.u32 %v2290_v23, %v2287_v14  ;;  %v2381_v14 = vshrl.u32 %v6409_v6, 16  ;;  %v2384_v23 = vshll.u32 %v6409_v6, 16 }
 0x30c   : > { %2185 = vrot.lane.b32.xlu1 %v6502_v38, %s4889_s12  ;;  %v2339_v34 = vor.u32 %v2338_v29, %v2335_v25  ;;  %v2360_v25 = vshll.u32 %v6385_v42, 16 }
 0x30d   : > { %2183 = vrot.lane.b32.xlu0 %v6505_v59, %s4889_s12  ;;  %2181 = vrot.lane.b32.xlu2 %v6511_v41, %s4889_s12  ;;  %v2292_v43 = vrot.slane %v2291_v15, 4 }
 0x30e   : > { %v1949_v40 = vpop.permute.xlu1 %1948  ;;  %v2340_v29 = vrot.slane %v2339_v34, 4 }
 0x30f   : > { %2028 = vst.msk [vmem:[#allocation2 + $0x44] sm:$0xf] %vm2010_vm14, %v1949_v40  ;;  %v1947_v31 = vpop.permute.xlu0 %1946  ;;  %v1963_v18 = vpop.permute.xlu2 %1962  ;;  %v2315_v40 = vor.u32 %v2314_v11, %v2311_v30  ;;  %v6601_v15 = vsel %vm4990_vm2, %v2292_v43, %v2296_v61  ;;  %v2359_v61 = vrot.slane %v2357_v17, 4  ;;  %v2418_v17 = vshrl.u32 %v6427_v10, 16 }
 0x310   : > { %2027 = vst.msk [vmem:[#allocation2 + $0x40] sm:$0xf] %vm2010_vm14, %v1947_v31  ;;  %v2318_v31 = vshll.u32 %v6367_v28, 16 }
 0x311   : > { %2035 = vst.msk [vmem:[#allocation2 + $0x60] sm:$0xf] %vm2010_vm14, %v1963_v18  ;;  %v2304_v18 = vshll.u32 %v6545_v52, 16  ;;  %v2316_v7 = vrot.slane %v2315_v40, 4 }
 0x312   : > { %v2320_v30 = vrot.slane %v2318_v31, 5  ;;  %v2366_v31 = vshll.u32 %v6382_v49, 16 }
 0x313   : > { %v2306_v63 = vrot.slane %v2304_v18, 5  ;;  %v2354_v18 = vrot.slane %v2352_v39, 5 }
 0x314   : > { %2191 = vrot.lane.b32.xlu1 %v6523_v20, %s4889_s12  ;;  %v2325_v33 = vor.u32 %v2324_v5, %v2320_v30  ;;  %v6619_v5 = vsel %vm4990_vm2, %v2340_v29, %v2344_v12  ;;  %v2408_v12 = vshll.u32 %v6400_v4, 16 }
 0x315   : > { %2189 = vrot.lane.b32.xlu0 %v6530_v62, %s4889_s12  ;;  %2187 = vrot.lane.b32.xlu2 %v6538_v44, %s4889_s12  ;;  %8322 = vst [vmem:[#allocation34_spill] sm:$0xff] %v6619_v5 }
 0x316   : > { %v1955_v26 = vpop.permute.xlu1 %1954 }
 0x317   : > { %2031 = vst.msk [vmem:[#allocation2 + $0x50] sm:$0xf] %vm2010_vm14, %v1955_v26  ;;  %v1953_v36 = vpop.permute.xlu0 %1952  ;;  %v1969_v50 = vpop.permute.xlu2 %1968  ;;  %v2302_v26 = vrot.slane %v2301_v35, 4  ;;  %v2350_v35 = vrot.slane %v2349_v58, 4  ;;  %v2368_v58 = vrot.slane %v2366_v31, 5  ;;  %v2390_v31 = vshll.u32 %v6403_v57, 16 }
 0x318   : > { %2030 = vst.msk [vmem:[#allocation2 + $0x4c] sm:$0xf] %vm2010_vm14, %v1953_v36 }
 0x319   : > { %2038 = vst.msk [vmem:[#allocation2 + $0x6c] sm:$0xf] %vm2010_vm14, %v1969_v50  ;;  %v6590_v40 = vsel %vm4990_vm2, %v2302_v26, %v2306_v63  ;;  %v2370_v50 = vshrl.u32 %v6382_v49, 16  ;;  %v2386_v26 = vrot.slane %v2384_v23, 5  ;;  %v6615_v43 = vsel %vm4990_vm2, %v2350_v35, %v2354_v18 }
 0x31a   : > { %8321 = vst [vmem:[#allocation3_spill] sm:$0xff] %v6615_v43  ;;  %v2405_v35 = vshrl.u32 %v6400_v4, 16 }
 0x31b   : > { %v2372_v39 = vrot.slane %v2370_v50, 4 }
 0x31c   : > { %2646 = vrot.lane.b32.xlu1 %v2283_v37, %s4890_s13  ;;  %v6586_v37 = vld [vmem:[%s6326_s11 + $0x20] sm:$0x1] }
 0x31d   : > { %2644 = vrot.lane.b32.xlu0 %v2273_v32, %s4890_s13  ;;  %2193 = vrot.lane.b32.xlu2 %v6565_v56, %s4889_s12  ;;  %v6581_v32 = vsel %vm4990_vm2, %v2316_v7, %v2320_v30  ;;  %v2328_v7 = vshll.u32 %v6586_v37, 16  ;;  %v2362_v30 = vrot.slane %v2360_v25, 5  ;;  %v2373_v25 = vor.u32 %v2372_v39, %v2368_v58 }
 0x31e   : > { %v1961_v11 = vpop.permute.xlu1 %1960  ;;  %8320 = vst [vmem:[#allocation4_spill] sm:$0xff] %v6581_v32  ;;  %v2420_v39 = vrot.slane %v2418_v17, 4 }
 0x31f   : > { %2034 = vst.msk [vmem:[#allocation2 + $0x5c] sm:$0xf] %vm2010_vm14, %v1961_v11  ;;  %v1959_v36 = vpop.permute.xlu0 %1958  ;;  %v1975_v55 = vpop.permute.xlu2 %1974  ;;  %v2383_v11 = vrot.slane %v2381_v14, 4  ;;  %v2330_v14 = vrot.slane %v2328_v7, 5  ;;  %v2363_v18 = vor.u32 %v2362_v30, %v2359_v61  ;;  %v6638_v61 = vld [vmem:[%s6326_s11 + $0x50] sm:$0x1] }
 0x320   : > { %2033 = vst.msk [vmem:[#allocation2 + $0x58] sm:$0xf] %vm2010_vm14, %v1959_v36  ;;  %v6607_v36 = vld [vmem:[%s6326_s11 + $0x38] sm:$0x1]  ;;  %v2407_v30 = vrot.slane %v2405_v35, 4 }
 0x321   : > { %2041 = vst.msk [vmem:[#allocation2 + $0x78] sm:$0xf] %vm2010_vm14, %v1975_v55  ;;  %v2326_v55 = vrot.slane %v2325_v33, 4  ;;  %v2387_v23 = vor.u32 %v2386_v26, %v2383_v11  ;;  %v2394_v33 = vshrl.u32 %v6403_v57, 16  ;;  %v2392_v11 = vrot.slane %v2390_v31, 5 }
 0x322   : > { %v2364_v31 = vrot.slane %v2363_v18, 4  ;;  %v2442_v18 = vshrl.u32 %v6418_v45, 16 }
 0x323   : > { %v6632_v29 = vsel %vm4990_vm2, %v2326_v55, %v2330_v14  ;;  %v2388_v7 = vrot.slane %v2387_v23, 4  ;;  %v2453_v14 = vshrl.u32 %v6447_v1, 16  ;;  %v2456_v23 = vshll.u32 %v6447_v1, 16 }
 0x324   : > { %2652 = vrot.lane.b32.xlu1 %v6581_v32, %s4890_s13  ;;  %8323 = vst [vmem:[#allocation43_spill] sm:$0xff] %v6632_v29  ;;  %v2374_v32 = vrot.slane %v2373_v25, 4  ;;  %v2438_v1 = vshll.u32 %v6418_v45, 16 }
 0x325   : > { %2650 = vrot.lane.b32.xlu0 %v6590_v40, %s4890_s13  ;;  %2648 = vrot.lane.b32.xlu2 %v6601_v15, %s4890_s13  ;;  %v6648_v17 = vsel %vm4990_vm2, %v2388_v7, %v2392_v11  ;;  %v2458_v7 = vrot.slane %v2456_v23, 5 }
 0x326   : > { %v1967_v63 = vpop.permute.xlu1 %1966  ;;  %8324 = vst [vmem:[#allocation41_spill] sm:$0xff] %v6648_v17 }
 0x327   : > { %2037 = vst.msk [vmem:[#allocation2 + $0x68] sm:$0xf] %vm2010_vm14, %v1967_v63  ;;  %v1965_v34 = vpop.permute.xlu0 %1964  ;;  %v2134_v50 = vpop.permute.xlu2 %2133  ;;  %v2414_v63 = vshll.u32 %v6427_v10, 16 }
 0x328   : > { %2036 = vst.msk [vmem:[#allocation2 + $0x64] sm:$0xf] %vm2010_vm14, %v1965_v34  ;;  %v2376_v34 = vshll.u32 %v6607_v36, 16 }
 0x329   : > { %2229 = vst.msk [vmem:[#allocation2 + $0x4] sm:$0xf] %vm2227_vm15, %v2134_v50  ;;  %v2416_v26 = vrot.slane %v2414_v63, 5  ;;  %v2396_v63 = vrot.slane %v2394_v33, 4  ;;  %v2455_v33 = vrot.slane %v2453_v14, 4 }
 0x32a   : > { %v2378_v4 = vrot.slane %v2376_v34, 5  ;;  %v2424_v34 = vshll.u32 %v6638_v61, 16 }
 0x32b   : > { %v2421_v25 = vor.u32 %v2420_v39, %v2416_v26  ;;  %v6663_v39 = vsel %vm4990_vm2, %v2364_v31, %v2368_v58  ;;  %v2440_v58 = vrot.slane %v2438_v1, 5  ;;  %v2444_v31 = vrot.slane %v2442_v18, 4 }
 0x32c   : > { %2658 = vrot.lane.b32.xlu1 %v6615_v43, %s4890_s13  ;;  %v2410_v43 = vrot.slane %v2408_v12, 5  ;;  %v6652_v12 = vld [vmem:[%s6326_s11 + $0x44] sm:$0x1]  ;;  %8326 = vst [vmem:[#allocation45_spill] sm:$0xff] %v6663_v39 }
 0x32d   : > { %2656 = vrot.lane.b32.xlu0 %v6619_v5, %s4890_s13  ;;  %2654 = vrot.lane.b32.xlu2 %v6632_v29, %s4890_s13  ;;  %v2422_v45 = vrot.slane %v2421_v25, 4  ;;  %v2490_v25 = vshrl.u32 %v6470_v9, 16  ;;  %v2445_v5 = vor.u32 %v2444_v31, %v2440_v58 }
 0x32e   : > { %v1973_v50 = vpop.permute.xlu1 %1972  ;;  %v2411_v29 = vor.u32 %v2410_v43, %v2407_v30  ;;  %v2429_v43 = vshrl.u32 %v6421_v53, 16  ;;  %v2426_v30 = vrot.slane %v2424_v34, 5 }
 0x32f   : > { %2040 = vst.msk [vmem:[#allocation2 + $0x74] sm:$0xf] %vm2010_vm14, %v1973_v50  ;;  %v1971_v55 = vpop.permute.xlu0 %1970  ;;  %v2140_v35 = vpop.permute.xlu2 %2139  ;;  %v6656_v50 = vsel %vm4990_vm2, %v2374_v32, %v2378_v4  ;;  %v2400_v32 = vshll.u32 %v6652_v12, 16  ;;  %v2432_v4 = vshll.u32 %v6421_v53, 16  ;;  %v2486_v53 = vshll.u32 %v6470_v9, 16 }
 0x330   : > { %2039 = vst.msk [vmem:[#allocation2 + $0x70] sm:$0xf] %vm2010_vm14, %v1971_v55  ;;  %v2397_v55 = vor.u32 %v2396_v63, %v2392_v11  ;;  %v2412_v23 = vrot.slane %v2411_v29, 4  ;;  %v2459_v63 = vor.u32 %v2458_v7, %v2455_v33  ;;  %v6684_v18 = vsel %vm4990_vm2, %v2422_v45, %v2426_v30 }
 0x331   : > { %8325 = vst [vmem:[#allocation44_spill] sm:$0xff] %v6656_v50  ;;  %v2402_v34 = vrot.slane %v2400_v32, 5  ;;  %v2434_v1 = vrot.slane %v2432_v4, 5  ;;  %v2477_v7 = vshrl.u32 %v6438_v16, 16  ;;  %v2492_v4 = vrot.slane %v2490_v25, 4 }
 0x332   : > { %2232 = vst.msk [vmem:[#allocation2 + $0x10] sm:$0xf] %vm2227_vm15, %v2140_v35  ;;  %v6673_v35 = vld [vmem:[%s6326_s11 + $0x5c] sm:$0x1]  ;;  %v2398_v29 = vrot.slane %v2397_v55, 4  ;;  %v2460_v55 = vrot.slane %v2459_v63, 4 }
 0x333   : > { %8327 = vst [vmem:[#allocation42_spill] sm:$0xff] %v6684_v18  ;;  %v2466_v45 = vshrl.u32 %v6441_v19, 16  ;;  %v2479_v30 = vrot.slane %v2477_v7, 4 }
 0x334   : > { %2664 = vrot.lane.b32.xlu1 %v6648_v17, %s4890_s13  ;;  %v2462_v17 = vshll.u32 %v6441_v19, 16 }
 0x335   : > { %2662 = vrot.lane.b32.xlu0 %v6656_v50, %s4890_s13  ;;  %2660 = vrot.lane.b32.xlu2 %v6663_v39, %s4890_s13  ;;  %v2431_v50 = vrot.slane %v2429_v43, 4  ;;  %v6690_v39 = vsel %vm4990_vm2, %v2412_v23, %v2416_v26  ;;  %v6694_v43 = vrot.slane %v2486_v53, 5  ;;  %v6706_v53 = vld [vmem:[%s6326_s11 + $0x74] sm:$0x1] }
 0x336   : > { %v2132_v14 = vpop.permute.xlu1 %2131  ;;  %8328 = vst [vmem:[#allocation46_spill] sm:$0xff] %v6690_v39  ;;  %v2464_v32 = vrot.slane %v2462_v17, 5  ;;  %v2446_v17 = vrot.slane %v2445_v5, 4  ;;  %v2468_v5 = vrot.slane %v2466_v45, 4  ;;  %v2504_v45 = vshll.u32 %v6462_v3, 16 }
 0x337   : > { %2228 = vst.msk [vmem:[#allocation2] sm:$0xf] %vm2227_vm15, %v2132_v14  ;;  %v1977_v11 = vpop.permute.xlu0 %1976  ;;  %v2146_v33 = vpop.permute.xlu2 %2145  ;;  %v2480_v14 = vshll.u32 %v6438_v16, 16  ;;  %v6700_v16 = vsel %vm4990_vm2, %v2398_v29, %v2402_v34  ;;  %v2435_v26 = vor.u32 %v2434_v1, %v2431_v50  ;;  %v2493_v29 = vor.u32 %v2492_v4, %v6694_v43 }
 0x338   : > { %2042 = vst.msk [vmem:[#allocation2 + $0x7c] sm:$0xf] %vm2010_vm14, %v1977_v11  ;;  %v2448_v11 = vshll.u32 %v6673_v35, 16  ;;  %v6714_v50 = vsel %vm4990_vm2, %v2460_v55, %v2464_v32  ;;  %v2496_v1 = vshll.u32 %v6706_v53, 16  ;;  %v2510_v55 = vshll.u32 %v6457_v46, 16 }
 0x339   : > { %2235 = vst.msk [vmem:[#allocation2 + $0x1c] sm:$0xf] %vm2227_vm15, %v2146_v33  ;;  %v2482_v23 = vrot.slane %v2480_v14, 5  ;;  %v2436_v34 = vrot.slane %v2435_v26, 4  ;;  %v2525_v14 = vshrl.u32 %v6492_v21, 16  ;;  %v2514_v4 = vshrl.u32 %v6457_v46, 16 }
 0x33a   : > { %8329 = vst [vmem:[#allocation9_spill] sm:$0xff] %v6700_v16  ;;  %v2450_v63 = vrot.slane %v2448_v11, 5  ;;  %v2528_v11 = vshll.u32 %v6492_v21, 16  ;;  %v2501_v26 = vshrl.u32 %v6462_v3, 16  ;;  %v2494_v21 = vrot.slane %v2493_v29, 4 }
 0x33b   : > { %8330 = vst [vmem:[#allocation49_spill] sm:$0xff] %v6714_v50  ;;  %v2483_v33 = vor.u32 %v2482_v23, %v2479_v30  ;;  %v6736_v30 = vsel %vm4990_vm2, %v2436_v34, %v2440_v58  ;;  %v2469_v23 = vor.u32 %v2468_v5, %v2464_v32  ;;  %v6742_v3 = vld [vmem:[%s6326_s11 + $0x80] sm:$0x1]  ;;  %v2558_v29 = vshll.u32 %v6511_v41, 16 }
 0x33c   : > { %2670 = vrot.lane.b32.xlu1 %v6684_v18, %s4890_s13  ;;  %8332 = vst [vmem:[#allocation27_spill] sm:$0xff] %v6736_v30  ;;  %v2530_v18 = vrot.slane %v2528_v11, 5  ;;  %v2562_v58 = vshrl.u32 %v6511_v41, 16  ;;  %v2549_v34 = vshrl.u32 %v6483_v22, 16  ;;  %v2552_v5 = vshll.u32 %v6483_v22, 16 }
 0x33d   : > { %2668 = vrot.lane.b32.xlu0 %v6690_v39, %s4890_s13  ;;  %2666 = vrot.lane.b32.xlu2 %v6700_v16, %s4890_s13  ;;  %v2484_v46 = vrot.slane %v2483_v33, 4  ;;  %v2512_v39 = vrot.slane %v2510_v55, 5  ;;  %v2506_v33 = vrot.slane %v2504_v45, 5  ;;  %v2534_v55 = vshll.u32 %v6486_v60, 16 }
 0x33e   : > { %v2138_v31 = vpop.permute.xlu1 %2137  ;;  %v2560_v45 = vrot.slane %v2558_v29, 5 }
 0x33f   : > { %2231 = vst.msk [vmem:[#allocation2 + $0xc] sm:$0xf] %vm2227_vm15, %v2138_v31  ;;  %v2136_v25 = vpop.permute.xlu0 %2135  ;;  %v2152_v7 = vpop.permute.xlu2 %2151  ;;  %v6721_v31 = vld [vmem:[%s6326_s11 + $0x68] sm:$0x1] }
 0x340   : > { %2230 = vst.msk [vmem:[#allocation2 + $0x8] sm:$0xf] %vm2227_vm15, %v2136_v25  ;;  %v6725_v25 = vsel %vm4990_vm2, %v2446_v17, %v2450_v63  ;;  %v2472_v17 = vshll.u32 %v6721_v31, 16  ;;  %v2498_v63 = vrot.slane %v2496_v1, 5  ;;  %v2503_v1 = vrot.slane %v2501_v26, 4 }
 0x341   : > { %8331 = vst [vmem:[#allocation17_spill] sm:$0xff] %v6725_v25  ;;  %v2520_v26 = vshll.u32 %v6742_v3, 16 }
 0x342   : > { %2238 = vst.msk [vmem:[#allocation2 + $0x28] sm:$0xf] %vm2227_vm15, %v2152_v7  ;;  %v2527_v7 = vrot.slane %v2525_v14, 4  ;;  %v2470_v14 = vrot.slane %v2469_v23, 4  ;;  %v2474_v11 = vrot.slane %v2472_v17, 5  ;;  %v6754_v41 = vsel %vm4990_vm2, %v2494_v21, %v2498_v63 }
 0x343   : > { %8333 = vst [vmem:[#allocation33_spill] sm:$0xff] %v6754_v41  ;;  %v2564_v23 = vrot.slane %v2562_v58, 4  ;;  %v2551_v17 = vrot.slane %v2549_v34, 4  ;;  %v2507_v21 = vor.u32 %v2506_v33, %v2503_v1  ;;  %v2522_v58 = vrot.slane %v2520_v26, 5 }
 0x344   : > { %2676 = vrot.lane.b32.xlu1 %v6714_v50, %s4890_s13  ;;  %v2516_v50 = vrot.slane %v2514_v4, 4  ;;  %v6771_v63 = vsel %vm4990_vm2, %v2470_v14, %v2474_v11 }
 0x345   : > { %2674 = vrot.lane.b32.xlu0 %v6725_v25, %s4890_s13  ;;  %2672 = vrot.lane.b32.xlu2 %v6736_v30, %s4890_s13  ;;  %v6760_v30 = vsel %vm4990_vm2, %v2484_v46, %v6694_v43  ;;  %8335 = vst [vmem:[#allocation31_spill] sm:$0xff] %v6771_v63  ;;  %v2538_v43 = vshrl.u32 %v6486_v60, 16  ;;  %v2536_v46 = vrot.slane %v2534_v55, 5  ;;  %v2508_v60 = vrot.slane %v2507_v21, 4 }
 0x346   : > { %v2144_v16 = vpop.permute.xlu1 %2143  ;;  %8334 = vst [vmem:[#allocation35_spill] sm:$0xff] %v6760_v30  ;;  %v2517_v22 = vor.u32 %v2516_v50, %v2512_v39  ;;  %v2597_v55 = vshrl.u32 %v6538_v44, 16 }
 0x347   : > { %2234 = vst.msk [vmem:[#allocation2 + $0x18] sm:$0xf] %vm2227_vm15, %v2144_v16  ;;  %v2142_v32 = vpop.permute.xlu0 %2141  ;;  %v2531_v16 = vor.u32 %v2530_v18, %v2527_v7  ;;  %v2158_v4 = vpop.permute.xlu2 %2157  ;;  %v6767_v18 = vld [vmem:[%s6326_s11 + $0x98] sm:$0x1]  ;;  %v2540_v14 = vrot.slane %v2538_v43, 4 }
 0x348   : > { %2233 = vst.msk [vmem:[#allocation2 + $0x14] sm:$0xf] %vm2227_vm15, %v2142_v32  ;;  %v2554_v32 = vrot.slane %v2552_v5, 5  ;;  %v2518_v29 = vrot.slane %v2517_v22, 4  ;;  %v2565_v5 = vor.u32 %v2564_v23, %v2560_v45  ;;  %v2568_v1 = vshll.u32 %v6767_v18, 16 }
 0x349   : > { %2241 = vst.msk [vmem:[#allocation2 + $0x34] sm:$0xf] %vm2227_vm15, %v2158_v4  ;;  %v2532_v50 = vrot.slane %v2531_v16, 4  ;;  %v2600_v4 = vshll.u32 %v6538_v44, 16  ;;  %v6788_v22 = vld [vmem:[%s6326_s11 + $0x8c] sm:$0x1]  ;;  %v2541_v44 = vor.u32 %v2540_v14, %v2536_v46 }
 0x34a   : > { %v2555_v33 = vor.u32 %v2554_v32, %v2551_v17  ;;  %v6792_v26 = vsel %vm4990_vm2, %v2518_v29, %v2522_v58  ;;  %v2582_v23 = vshll.u32 %v6502_v38, 16  ;;  %v2586_v17 = vshrl.u32 %v6502_v38, 16 }
 0x34b   : > { %v6783_v11 = vsel %vm4990_vm2, %v2532_v50, %v2536_v46  ;;  %8337 = vst [vmem:[#allocation5_spill] sm:$0xff] %v6792_v26  ;;  %v2566_v32 = vrot.slane %v2565_v5, 4  ;;  %v2570_v21 = vrot.slane %v2568_v1, 5  ;;  %v6799_v50 = vsel %vm4990_vm2, %v2508_v60, %v2512_v39 }
 0x34c   : > { %2682 = vrot.lane.b32.xlu1 %v6754_v41, %s4890_s13  ;;  %8336 = vst [vmem:[#allocation8_spill] sm:$0xff] %v6783_v11  ;;  %v2556_v43 = vrot.slane %v2555_v33, 4  ;;  %v2573_v29 = vshrl.u32 %v6505_v59, 16  ;;  %v2576_v58 = vshll.u32 %v6505_v59, 16  ;;  %v2599_v38 = vrot.slane %v2597_v55, 4 }
 0x34d   : > { %2680 = vrot.lane.b32.xlu0 %v6760_v30, %s4890_s13  ;;  %2678 = vrot.lane.b32.xlu2 %v6771_v63, %s4890_s13  ;;  %8338 = vst [vmem:[#allocation12_spill] sm:$0xff] %v6799_v50  ;;  %v2584_v1 = vrot.slane %v2582_v23, 5  ;;  %v2588_v39 = vrot.slane %v2586_v17, 4  ;;  %v6811_v46 = vsel %vm4990_vm2, %v2566_v32, %v2570_v21  ;;  %v6820_v59 = vld [vmem:[%s6326_s11 + $0xa4] sm:$0x1]  ;;  %v2542_v14 = vrot.slane %v2541_v44, 4 }
 0x34e   : > { %v2150_v7 = vpop.permute.xlu1 %2149  ;;  %8339 = vst [vmem:[#allocation6_spill] sm:$0xff] %v6811_v46  ;;  %v6815_v60 = vsel %vm4990_vm2, %v2556_v43, %v2560_v45  ;;  %v2575_v55 = vrot.slane %v2573_v29, 4  ;;  %v2606_v17 = vshll.u32 %v6530_v62, 16  ;;  %v2630_v21 = vshll.u32 %v6565_v56, 16 }
 0x34f   : > { %2237 = vst.msk [vmem:[#allocation2 + $0x24] sm:$0xf] %vm2227_vm15, %v2150_v7  ;;  %v2148_v34 = vpop.permute.xlu0 %2147  ;;  %v2164_v16 = vpop.permute.xlu2 %2163  ;;  %v2544_v7 = vshll.u32 %v6788_v22, 16  ;;  %v2634_v45 = vshrl.u32 %v6565_v56, 16  ;;  %v2589_v43 = vor.u32 %v2588_v39, %v2584_v1  ;;  %v2624_v44 = vshll.u32 %v6523_v20, 16 }
 0x350   : > { %2236 = vst.msk [vmem:[#allocation2 + $0x20] sm:$0xf] %vm2227_vm15, %v2148_v34  ;;  %v2602_v34 = vrot.slane %v2600_v4, 5  ;;  %v2578_v4 = vrot.slane %v2576_v58, 5  ;;  %v2610_v58 = vshrl.u32 %v6530_v62, 16  ;;  %v2632_v39 = vrot.slane %v2630_v21, 5 }
 0x351   : > { %2244 = vst.msk [vmem:[#allocation2 + $0x40] sm:$0xf] %vm2227_vm15, %v2164_v16  ;;  %v2546_v16 = vrot.slane %v2544_v7, 5  ;;  %v2590_v41 = vrot.slane %v2589_v43, 4  ;;  %v4528_v62 = vrot.slane %v6334_v51, 9 }
 0x352   : > { %8340 = vst [vmem:[#allocation7_spill] sm:$0xff] %v6815_v60  ;;  %v2603_v23 = vor.u32 %v2602_v34, %v2599_v38  ;;  %v2579_v29 = vor.u32 %v2578_v4, %v2575_v55  ;;  %v2608_v34 = vrot.slane %v2606_v17, 5  ;;  %v2612_v55 = vrot.slane %v2610_v58, 4 }
 0x353   : > { %v6834_v7 = vsel %vm4990_vm2, %v2542_v14, %v2546_v16 }
 0x354   : > { %2688 = vrot.lane.b32.xlu1 %v6783_v11, %s4890_s13  ;;  %8341 = vst [vmem:[#allocation16_spill] sm:$0xff] %v6834_v7  ;;  %v2604_v38 = vrot.slane %v2603_v23, 4  ;;  %v2580_v16 = vrot.slane %v2579_v29, 4 }
 0x355   : > { %2686 = vrot.lane.b32.xlu0 %v6792_v26, %s4890_s13  ;;  %2684 = vrot.lane.b32.xlu2 %v6799_v50, %s4890_s13  ;;  %v6840_v50 = vld [vmem:[%s6326_s11 + $0xbc] sm:$0x1]  ;;  %v2626_v26 = vrot.slane %v2624_v44, 5 }
 0x356   : > { %v2156_v5 = vpop.permute.xlu1 %2155  ;;  %v6849_v4 = vsel %vm4990_vm2, %v2604_v38, %v2608_v34  ;;  %v2640_v17 = vshll.u32 %v6840_v50, 16 }
 0x357   : > { %2240 = vst.msk [vmem:[#allocation2 + $0x30] sm:$0xf] %vm2227_vm15, %v2156_v5  ;;  %v2154_v33 = vpop.permute.xlu0 %2153  ;;  %v2170_v32 = vpop.permute.xlu2 %2169  ;;  %v2592_v5 = vshll.u32 %v6820_v59, 16 }
 0x358   : > { %2239 = vst.msk [vmem:[#allocation2 + $0x2c] sm:$0xf] %vm2227_vm15, %v2154_v33  ;;  %v2621_v33 = vshrl.u32 %v6523_v20, 16 }
 0x359   : > { %2247 = vst.msk [vmem:[#allocation2 + $0x4c] sm:$0xf] %vm2227_vm15, %v2170_v32  ;;  %v2636_v32 = vrot.slane %v2634_v45, 4  ;;  %v2594_v20 = vrot.slane %v2592_v5, 5  ;;  %v6853_v45 = vld [vmem:[%s6326_s11 + $0xb0] sm:$0x1]  ;;  %v6865_v5 = vsel %vm4990_vm2, %v2580_v16, %v2584_v1 }
 0x35a   : > { %8343 = vst [vmem:[#allocation11_spill] sm:$0xff] %v6865_v5  ;;  %v2616_v44 = vshll.u32 %v6853_v45, 16  ;;  %v2798_v16 = vrot.slane %v6346_v8, 5 }
 0x35b   : > { %v2637_v23 = vor.u32 %v2636_v32, %v2632_v39  ;;  %v6858_v43 = vsel %vm4990_vm2, %v2590_v41, %v2594_v20 }
 0x35c   : > { %2694 = vrot.lane.b32.xlu1 %v6811_v46, %s4890_s13  ;;  %v2623_v46 = vrot.slane %v2621_v33, 4  ;;  %8342 = vst [vmem:[#allocation10_spill] sm:$0xff] %v6858_v43  ;;  %v2613_v33 = vor.u32 %v2612_v55, %v2608_v34  ;;  %v2618_v38 = vrot.slane %v2616_v44, 5  ;;  %v4530_v44 = vrot.slane %v6373_v13, 9 }
 0x35d   : > { %2692 = vrot.lane.b32.xlu0 %v6815_v60, %s4890_s13  ;;  %2690 = vrot.lane.b32.xlu2 %v6834_v7, %s4890_s13  ;;  %v2638_v41 = vrot.slane %v2637_v23, 4  ;;  %v2812_v13 = vrot.slane %v6391_v24, 5  ;;  %v2815_v24 = vrot.slane %v6562_v48, 5 }
 0x35e   : > { %v2162_v11 = vpop.permute.xlu1 %2161  ;;  %v2627_v51 = vor.u32 %v2626_v26, %v2623_v46  ;;  %v2642_v26 = vrot.slane %v2640_v17, 5  ;;  %v2614_v1 = vrot.slane %v2613_v33, 4 }
 0x35f   : > { %2243 = vst.msk [vmem:[#allocation2 + $0x3c] sm:$0xf] %vm2227_vm15, %v2162_v11  ;;  %v2160_v14 = vpop.permute.xlu0 %2159  ;;  %v2176_v21 = vpop.permute.xlu2 %2175  ;;  %v2791_v11 = vrot.slane %v6355_v54, 5 }
 0x360   : > { %2242 = vst.msk [vmem:[#allocation2 + $0x38] sm:$0xf] %vm2227_vm15, %v2160_v14  ;;  %v2628_v29 = vrot.slane %v2627_v51, 4  ;;  %v6878_v34 = vsel %vm4990_vm2, %v2638_v41, %v2642_v26  ;;  %v6889_v14 = vsel %vm4990_vm2, %v2614_v1, %v2618_v38  ;;  %v2800_v41 = vrot.slane %v2798_v16, 4 }
 0x361   : > { %2250 = vst.msk [vmem:[#allocation2 + $0x58] sm:$0xf] %vm2227_vm15, %v2176_v21  ;;  %v2792_v54 = vsel %vm5377_vm6, %v4528_v62, %v2791_v11  ;;  %v4529_v62 = vrot.slane %v6349_v0, 9  ;;  %v2793_v23 = vrot.slane %v2791_v11, 4  ;;  %v2805_v0 = vrot.slane %v6367_v28, 5 }
 0x362   : > { %v6882_v20 = vsel %vm4990_vm2, %v2628_v29, %v2632_v39  ;;  %v2794_v39 = vrot.slane %v6516_v2, 5  ;;  %v2808_v11 = vrot.slane %v6586_v37, 5  ;;  %v2801_v26 = vrot.slane %v6545_v52, 5 }
 0x363   : > { %v6902_v21 = vsel %vm5377_vm6, %v4529_v62, %v2798_v16  ;;  %v2807_v2 = vrot.slane %v2805_v0, 4  ;;  %v6923_v37 = vsel %vm5377_vm6, %v4530_v44, %v2805_v0  ;;  %v2814_v38 = vrot.slane %v2812_v13, 4  ;;  %v6943_v62 = vld [vmem:[%s6326_s11 + $0x24] sm:$0xf]  ;;  %v6990_v44 = vld [vmem:[%s6326_s11 + $0x54] sm:$0xf] }
 0x364   : > { %2700 = vrot.lane.b32.xlu1 %v6849_v4, %s4890_s13  ;;  %v2795_v8 = vsel %vm5377_vm6, %v2793_v23, %v2794_v39  ;;  %v6931_v52 = vsel %vm5377_vm6, %v2800_v41, %v2801_v26  ;;  %v4531_v16 = vrot.slane %v6943_v62, 9  ;;  %v4533_v0 = vrot.slane %v6409_v6, 9  ;;  %v6994_v41 = vld [vmem:[%s6326_s11 + $0x58] sm:$0xf] }
 0x365   : > { %2698 = vrot.lane.b32.xlu0 %v6858_v43, %s4890_s13  ;;  %2696 = vrot.lane.b32.xlu2 %v6865_v5, %s4890_s13 }
 0x366   : > { %v2168_v46 = vpop.permute.xlu1 %2167  ;;  %v6960_v23 = vsel %vm5377_vm6, %v4531_v16, %v2812_v13  ;;  %v2836_v13 = vrot.slane %v6638_v61, 5 }
 0x367   : > { %2246 = vst.msk [vmem:[#allocation2 + $0x48] sm:$0xf] %vm2227_vm15, %v2168_v46  ;;  %v2166_v58 = vpop.permute.xlu0 %2165  ;;  %v2182_v32 = vpop.permute.xlu2 %2181  ;;  %v6919_v46 = vsel %vm5377_vm6, %v2807_v2, %v2808_v11  ;;  %v2822_v2 = vrot.slane %v6607_v36, 5 }
 0x368   : > { %2245 = vst.msk [vmem:[#allocation2 + $0x44] sm:$0xf] %vm2227_vm15, %v2166_v58  ;;  %v2819_v58 = vrot.slane %v6382_v49, 5  ;;  %v2826_v49 = vrot.slane %v6403_v57, 5  ;;  %v2829_v57 = vrot.slane %v6652_v12, 5 }
 0x369   : > { %2253 = vst.msk [vmem:[#allocation2 + $0x64] sm:$0xf] %vm2227_vm15, %v2182_v32 }
 0x36a   : > { %v2828_v39 = vrot.slane %v2826_v49, 4  ;;  %v6977_v6 = vsel %vm5377_vm6, %v4533_v0, %v2826_v49 }
 0x36c   : > { %2706 = vrot.lane.b32.xlu1 %v6878_v34, %s4890_s13  ;;  %v6973_v11 = vsel %vm5377_vm6, %v2828_v39, %v2829_v57  ;;  %v7026_v39 = vld [vmem:[%s6326_s11 + $0x60] sm:$0xf] }
 0x36d   : > { %2704 = vrot.lane.b32.xlu0 %v6882_v20, %s4890_s13  ;;  %2702 = vrot.lane.b32.xlu2 %v6889_v14, %s4890_s13  ;;  %v4536_v57 = vrot.slane %v7026_v39, 9  ;;  %s7874_s13 = scalar_lea.vmem %s8013_s3, %s4644_s10 }
 0x36e   : > { %v2174_v55 = vpop.permute.xlu1 %2173 }
 0x36f   : > { %2249 = vst.msk [vmem:[#allocation2 + $0x54] sm:$0xf] %vm2227_vm15, %v2174_v55  ;;  %v2172_v17 = vpop.permute.xlu0 %2171  ;;  %v2188_v51 = vpop.permute.xlu2 %2187  ;;  %v6953_v55 = vsel %vm5377_vm6, %v2814_v38, %v2815_v24  ;;  %v2847_v24 = vrot.slane %v6441_v19, 5  ;;  %v2850_v19 = vrot.slane %v6721_v31, 5 }
 0x370   : > { %2248 = vst.msk [vmem:[#allocation2 + $0x50] sm:$0xf] %vm2227_vm15, %v2172_v17 }
 0x371   : > { %2256 = vst.msk [vmem:[#allocation2 + $0x70] sm:$0xf] %vm2227_vm15, %v2188_v51  ;;  %v2849_v49 = vrot.slane %v2847_v24, 4 }
 0x373   : > { %v7036_v31 = vsel %vm5377_vm6, %v2849_v49, %v2850_v19  ;;  %v7074_v49 = vld [vmem:[%s6326_s11 + $0x88] sm:$0xf] }
 0x374   : > { %2905 = vrot.lane.b32.xlu1 %v6902_v21, %s4891_s14  ;;  %8344 = vst [vmem:[#allocation21_spill] sm:$0xff] %v7036_v31 }
 0x375   : > { %2903 = vrot.lane.b32.xlu0 %v2795_v8, %s4891_s14  ;;  %2901 = vrot.lane.b32.xlu2 %v2792_v54, %s4891_s14  ;;  %v4532_v54 = vrot.slane %v6385_v42, 9  ;;  %v2821_v8 = vrot.slane %v2819_v58, 4 }
 0x376   : > { %v2180_v33 = vpop.permute.xlu1 %2179 }
 0x377   : > { %2252 = vst.msk [vmem:[#allocation2 + $0x60] sm:$0xf] %vm2227_vm15, %v2180_v33  ;;  %v2178_v28 = vpop.permute.xlu0 %2177  ;;  %v2194_v29 = vpop.permute.xlu2 %2193  ;;  %v6948_v42 = vsel %vm5377_vm6, %v4532_v54, %v2819_v58  ;;  %v2833_v33 = vrot.slane %v6427_v10, 5  ;;  %v6985_v36 = vsel %vm5377_vm6, %v2821_v8, %v2822_v2  ;;  %v2840_v10 = vrot.slane %v6994_v41, 5  ;;  %v7003_v58 = vld [vmem:[%s6326_s11 + $0x48] sm:$0xf] }
 0x378   : > { %2251 = vst.msk [vmem:[#allocation2 + $0x5c] sm:$0xf] %vm2227_vm15, %v2178_v28  ;;  %v4535_v28 = vrot.slane %v6990_v44, 9  ;;  %v7040_v2 = vsel %vm5377_vm6, %v4536_v57, %v2847_v24 }
 0x379   : > { %2259 = vst.msk [vmem:[#allocation2 + $0x7c] sm:$0xf] %vm2227_vm15, %v2194_v29  ;;  %v2835_v29 = vrot.slane %v2833_v33, 4  ;;  %v2842_v0 = vrot.slane %v2840_v10, 4 }
 0x37a   : > { %v7008_v38 = vsel %vm5377_vm6, %v4535_v28, %v2840_v10  ;;  %v7057_v10 = vld [vmem:[%s6326_s11 + $0x7c] sm:$0xf] }
 0x37c   : > { %2911 = vrot.lane.b32.xlu1 %v6919_v46, %s4891_s14 }
 0x37d   : > { %2909 = vrot.lane.b32.xlu0 %v6923_v37, %s4891_s14  ;;  %2907 = vrot.lane.b32.xlu2 %v6931_v52, %s4891_s14 }
 0x37e   : > { %v2186_v1 = vpop.permute.xlu1 %2185 }
 0x37f   : > { %2255 = vst.msk [vmem:[#allocation2 + $0x6c] sm:$0xf] %vm2227_vm15, %v2186_v1  ;;  %v2184_v32 = vpop.permute.xlu0 %2183  ;;  %v2649_v48 = vpop.permute.xlu2 %2648  ;;  %v4534_v1 = vrot.slane %v7003_v58, 9 }
 0x380   : > { %2254 = vst.msk [vmem:[#allocation2 + $0x68] sm:$0xf] %vm2227_vm15, %v2184_v32  ;;  %v7013_v32 = vsel %vm5377_vm6, %v2835_v29, %v2836_v13  ;;  %v2857_v13 = vrot.slane %v6706_v53, 5  ;;  %v2868_v53 = vrot.slane %v7074_v49, 5 }
 0x381   : > { %2743 = vst.msk [vmem:[#allocation2 + $0x8] sm:$0xf] %vm2740_vm0, %v2649_v48  ;;  %v7020_v16 = vsel %vm5377_vm6, %v4534_v1, %v2833_v33  ;;  %v7053_v33 = vld [vmem:[%s6326_s11 + $0x78] sm:$0xf]  ;;  %v7066_v1 = vld [vmem:[%s6326_s11 + $0x6c] sm:$0xf] }
 0x382   : > { %v4538_v28 = vrot.slane %v7053_v33, 9  ;;  %v4537_v24 = vrot.slane %v7066_v1, 9 }
 0x384   : > { %2917 = vrot.lane.b32.xlu1 %v6948_v42, %s4891_s14 }
 0x385   : > { %2915 = vrot.lane.b32.xlu0 %v6953_v55, %s4891_s14  ;;  %2913 = vrot.lane.b32.xlu2 %v6960_v23, %s4891_s14 }
 0x386   : > { %v2192_v17 = vpop.permute.xlu1 %2191 }
 0x387   : > { %2258 = vst.msk [vmem:[#allocation2 + $0x78] sm:$0xf] %vm2227_vm15, %v2192_v17  ;;  %v2190_v51 = vpop.permute.xlu0 %2189  ;;  %v2655_v12 = vpop.permute.xlu2 %2654 }
 0x388   : > { %2257 = vst.msk [vmem:[#allocation2 + $0x74] sm:$0xf] %vm2227_vm15, %v2190_v51  ;;  %v2843_v51 = vrot.slane %v6673_v35, 5 }
 0x389   : > { %2746 = vst.msk [vmem:[#allocation2 + $0x14] sm:$0xf] %vm2740_vm0, %v2655_v12  ;;  %v2854_v12 = vrot.slane %v6470_v9, 5  ;;  %v2861_v9 = vrot.slane %v7057_v10, 5 }
 0x38a   : > { %v7048_v35 = vsel %vm5377_vm6, %v2842_v0, %v2843_v51  ;;  %v2871_v0 = vrot.slane %v6788_v22, 5 }
 0x38b   : > { %v2856_v29 = vrot.slane %v2854_v12, 4  ;;  %v7086_v57 = vsel %vm5377_vm6, %v4537_v24, %v2854_v12  ;;  %v2863_v12 = vrot.slane %v2861_v9, 4  ;;  %v7109_v24 = vld [vmem:[%s6326_s11 + $0x94] sm:$0xf] }
 0x38c   : > { %2923 = vrot.lane.b32.xlu1 %v6973_v11, %s4891_s14  ;;  %8346 = vst [vmem:[#allocation15_spill] sm:$0xff] %v7086_v57 }
 0x38d   : > { %2921 = vrot.lane.b32.xlu0 %v6977_v6, %s4891_s14  ;;  %2919 = vrot.lane.b32.xlu2 %v6985_v36, %s4891_s14 }
 0x38e   : > { %v2647_v26 = vpop.permute.xlu1 %2646 }
 0x38f   : > { %2742 = vst.msk [vmem:[#allocation2 + $0x4] sm:$0xf] %vm2740_vm0, %v2647_v26  ;;  %v2645_v54 = vpop.permute.xlu0 %2644  ;;  %v2661_v61 = vpop.permute.xlu2 %2660 }
 0x390   : > { %2741 = vst.msk [vmem:[#allocation2] sm:$0xf] %vm2740_vm0, %v2645_v54 }
 0x391   : > { %2749 = vst.msk [vmem:[#allocation2 + $0x20] sm:$0xf] %vm2740_vm0, %v2661_v61  ;;  %v7071_v61 = vsel %vm5377_vm6, %v4538_v28, %v2861_v9  ;;  %v7122_v9 = vld [vmem:[%s6326_s11 + $0x9c] sm:$0xf] }
 0x392   : > { %8345 = vst [vmem:[#allocation14_spill] sm:$0xff] %v7071_v61 }
 0x394   : > { %2929 = vrot.lane.b32.xlu1 %v7008_v38, %s4891_s14 }
 0x395   : > { %2927 = vrot.lane.b32.xlu0 %v7013_v32, %s4891_s14  ;;  %2925 = vrot.lane.b32.xlu2 %v7020_v16, %s4891_s14 }
 0x396   : > { %v2653_v48 = vpop.permute.xlu1 %2652 }
 0x397   : > { %2745 = vst.msk [vmem:[#allocation2 + $0x10] sm:$0xf] %vm2740_vm0, %v2653_v48  ;;  %v2651_v17 = vpop.permute.xlu0 %2650  ;;  %v2667_v8 = vpop.permute.xlu2 %2666  ;;  %v7079_v48 = vsel %vm5377_vm6, %v2856_v29, %v2857_v13  ;;  %v2864_v29 = vrot.slane %v6742_v3, 5 }
 0x398   : > { %2744 = vst.msk [vmem:[#allocation2 + $0xc] sm:$0xf] %vm2740_vm0, %v2651_v17  ;;  %v2870_v17 = vrot.slane %v2868_v53, 4 }
 0x399   : > { %2752 = vst.msk [vmem:[#allocation2 + $0x2c] sm:$0xf] %vm2740_vm0, %v2667_v8  ;;  %v7092_v8 = vld [vmem:[%s6326_s11 + $0x84] sm:$0xf]  ;;  %v7117_v3 = vsel %vm5377_vm6, %v2863_v12, %v2864_v29  ;;  %v7135_v29 = vld [vmem:[%s6326_s11 + $0x90] sm:$0xf] }
 0x39a   : > { %8347 = vst [vmem:[#allocation25_spill] sm:$0xff] %v7092_v8  ;;  %v4539_v28 = vrot.slane %v7092_v8, 9  ;;  %v7102_v22 = vsel %vm5377_vm6, %v2870_v17, %v2871_v0  ;;  %v7126_v17 = vld [vmem:[%s6326_s11 + $0xa0] sm:$0xf] }
 0x39b   : > { %8348 = vst [vmem:[#allocation19_spill] sm:$0xff] %v7102_v22  ;;  %v2882_v0 = vrot.slane %v7126_v17, 5 }
 0x39c   : > { %2935 = vrot.lane.b32.xlu1 %v7036_v31, %s4891_s14  ;;  %8350 = vst [vmem:[#allocation30_spill] sm:$0xff] %v7117_v3 }
 0x39d   : > { %2933 = vrot.lane.b32.xlu0 %v7040_v2, %s4891_s14  ;;  %2931 = vrot.lane.b32.xlu2 %v7048_v35, %s4891_s14 }
 0x39e   : > { %v2659_v26 = vpop.permute.xlu1 %2658 }
 0x39f   : > { %2748 = vst.msk [vmem:[#allocation2 + $0x1c] sm:$0xf] %vm2740_vm0, %v2659_v26  ;;  %v2657_v54 = vpop.permute.xlu0 %2656  ;;  %v2673_v19 = vpop.permute.xlu2 %2672 }
 0x3a0   : > { %2747 = vst.msk [vmem:[#allocation2 + $0x18] sm:$0xf] %vm2740_vm0, %v2657_v54  ;;  %v7106_v54 = vsel %vm5377_vm6, %v4539_v28, %v2868_v53  ;;  %v4541_v53 = vrot.slane %v7122_v9, 9 }
 0x3a1   : > { %2755 = vst.msk [vmem:[#allocation2 + $0x38] sm:$0xf] %vm2740_vm0, %v2673_v19  ;;  %v2875_v19 = vrot.slane %v7109_v24, 5 }
 0x3a2   : > { %8349 = vst [vmem:[#allocation20_spill] sm:$0xff] %v7106_v54 }
 0x3a3   : > { %v2877_v28 = vrot.slane %v2875_v19, 4 }
 0x3a4   : > { %2941 = vrot.lane.b32.xlu1 %v7071_v61, %s4891_s14  ;;  %v7143_v61 = vld [vmem:[%s6326_s11 + $0xac] sm:$0xf] }
 0x3a5   : > { %2939 = vrot.lane.b32.xlu0 %v7079_v48, %s4891_s14  ;;  %2937 = vrot.lane.b32.xlu2 %v7086_v57, %s4891_s14  ;;  %8352 = vst [vmem:[#allocation24_spill] sm:$0xff] %v7143_v61  ;;  %v7161_v57 = vld [vmem:[%s6326_s11 + $0xa8] sm:$0xf] }
 0x3a6   : > { %v2665_v51 = vpop.permute.xlu1 %2664  ;;  %8353 = vst [vmem:[#allocation37_spill] sm:$0xff] %v7161_v57 }
 0x3a7   : > { %2751 = vst.msk [vmem:[#allocation2 + $0x28] sm:$0xf] %vm2740_vm0, %v2665_v51  ;;  %v2663_v26 = vpop.permute.xlu0 %2662  ;;  %v2679_v13 = vpop.permute.xlu2 %2678 }
 0x3a8   : > { %2750 = vst.msk [vmem:[#allocation2 + $0x24] sm:$0xf] %vm2740_vm0, %v2663_v26  ;;  %v2878_v26 = vrot.slane %v6767_v18, 5  ;;  %v2889_v18 = vrot.slane %v7143_v61, 5 }
 0x3a9   : > { %2758 = vst.msk [vmem:[#allocation2 + $0x44] sm:$0xf] %vm2740_vm0, %v2679_v13  ;;  %v4540_v13 = vrot.slane %v7135_v29, 9 }
 0x3ac   : > { %2947 = vrot.lane.b32.xlu1 %v7102_v22, %s4891_s14  ;;  %v7140_v22 = vsel %vm5377_vm6, %v4541_v53, %v2882_v0  ;;  %v2891_v53 = vrot.slane %v2889_v18, 4 }
 0x3ad   : > { %2945 = vrot.lane.b32.xlu0 %v7106_v54, %s4891_s14  ;;  %2943 = vrot.lane.b32.xlu2 %v7117_v3, %s4891_s14  ;;  %8351 = vst [vmem:[#allocation23_spill] sm:$0xff] %v7140_v22  ;;  %v7148_v54 = vsel %vm5377_vm6, %v2877_v28, %v2878_v26  ;;  %v2892_v3 = vrot.slane %v6853_v45, 5  ;;  %v4542_v28 = vrot.slane %v7161_v57, 9 }
 0x3ae   : > { %v2671_v51 = vpop.permute.xlu1 %2670 }
 0x3af   : > { %2754 = vst.msk [vmem:[#allocation2 + $0x34] sm:$0xf] %vm2740_vm0, %v2671_v51  ;;  %v2669_v12 = vpop.permute.xlu0 %2668  ;;  %v2685_v51 = vpop.permute.xlu2 %2684  ;;  %v7171_v45 = vsel %vm5377_vm6, %v2891_v53, %v2892_v3  ;;  %v7193_v53 = vld [vmem:[%s6326_s11 + $0xb4] sm:$0xf] }
 0x3b0   : > { %2753 = vst.msk [vmem:[#allocation2 + $0x30] sm:$0xf] %vm2740_vm0, %v2669_v12  ;;  %v7155_v12 = vsel %vm5377_vm6, %v4540_v13, %v2875_v19  ;;  %v2884_v19 = vrot.slane %v2882_v0, 4  ;;  %v2885_v13 = vrot.slane %v6820_v59, 5 }
 0x3b1   : > { %2761 = vst.msk [vmem:[#allocation2 + $0x50] sm:$0xf] %vm2740_vm0, %v2685_v51 }
 0x3b2   : > { %v7183_v59 = vsel %vm5377_vm6, %v2884_v19, %v2885_v13 }
 0x3b4   : > { %2953 = vrot.lane.b32.xlu1 %v7140_v22, %s4891_s14  ;;  %v7175_v22 = vsel %vm5377_vm6, %v4542_v28, %v2889_v18  ;;  %v2899_v18 = vrot.slane %v6840_v50, 5  ;;  %v4543_v28 = vrot.slane %v7193_v53, 9  ;;  %v4834_v50 = vld [vmem:[%s6326_s11 + $0xc] sm:$0xf] }
 0x3b5   : > { %2951 = vrot.lane.b32.xlu0 %v7148_v54, %s4891_s14  ;;  %2949 = vrot.lane.b32.xlu2 %v7155_v12, %s4891_s14 }
 0x3b6   : > { %v2677_v31 = vpop.permute.xlu1 %2676 }
 0x3b7   : > { %2757 = vst.msk [vmem:[#allocation2 + $0x40] sm:$0xf] %vm2740_vm0, %v2677_v31  ;;  %v2675_v26 = vpop.permute.xlu0 %2674  ;;  %v2691_v51 = vpop.permute.xlu2 %2690  ;;  %v2896_v31 = vrot.slane %v6565_v56, 5 }
 0x3b8   : > { %2756 = vst.msk [vmem:[#allocation2 + $0x3c] sm:$0xf] %vm2740_vm0, %v2675_v26 }
 0x3b9   : > { %2764 = vst.msk [vmem:[#allocation2 + $0x5c] sm:$0xf] %vm2740_vm0, %v2691_v51  ;;  %v2898_v0 = vrot.slane %v2896_v31, 4  ;;  %v7205_v13 = vsel %vm5377_vm6, %v4543_v28, %v2896_v31  ;;  %v7215_v31 = vld [vmem:[%s6326_s11 + $0x1c] sm:$0xf] }
 0x3bb   : > { %v7198_v19 = vsel %vm5377_vm6, %v2898_v0, %v2899_v18  ;;  %v7220_v18 = vld [vmem:[%s6326_s11 + $0x18] sm:$0xf] }
 0x3bc   : > { %2959 = vrot.lane.b32.xlu1 %v7171_v45, %s4891_s14  ;;  %8354 = vst [vmem:[#allocation28_spill] sm:$0xff] %v7198_v19 }
 0x3bd   : > { %2957 = vrot.lane.b32.xlu0 %v7175_v22, %s4891_s14  ;;  %2955 = vrot.lane.b32.xlu2 %v7183_v59, %s4891_s14 }
 0x3be   : > { %v2683_v3 = vpop.permute.xlu1 %2682 }
 0x3bf   : > { %2760 = vst.msk [vmem:[#allocation2 + $0x4c] sm:$0xf] %vm2740_vm0, %v2683_v3  ;;  %v2681_v56 = vpop.permute.xlu0 %2680  ;;  %v2697_v26 = vpop.permute.xlu2 %2696 }
 0x3c0   : > { %2759 = vst.msk [vmem:[#allocation2 + $0x48] sm:$0xf] %vm2740_vm0, %v2681_v56 }
 0x3c1   : > { %2767 = vst.msk [vmem:[#allocation2 + $0x68] sm:$0xf] %vm2740_vm0, %v2697_v26  ;;  %v4837_v26 = vld [vmem:[%s6326_s11 + $0x10] sm:$0xf] }
 0x3c4   : > { %3032 = vrot.lane.b32.xlu1 %v4834_v50, %s4892_s15 }
 0x3c5   : > { %2963 = vrot.lane.b32.xlu0 %v7198_v19, %s4891_s14  ;;  %2961 = vrot.lane.b32.xlu2 %v7205_v13, %s4891_s14  ;;  %v7265_v19 = vld [vmem:[%s6326_s11 + $0x4c] sm:$0xf] }
 0x3c6   : > { %v2689_v51 = vpop.permute.xlu1 %2688 }
 0x3c7   : > { %2763 = vst.msk [vmem:[#allocation2 + $0x58] sm:$0xf] %vm2740_vm0, %v2689_v51  ;;  %v2687_v3 = vpop.permute.xlu0 %2686  ;;  %v2703_v0 = vpop.permute.xlu2 %2702  ;;  %v7230_v51 = vld [vmem:[%s6326_s11 + $0x30] sm:$0xf] }
 0x3c8   : > { %2762 = vst.msk [vmem:[#allocation2 + $0x54] sm:$0xf] %vm2740_vm0, %v2687_v3  ;;  %v7235_v3 = vld [vmem:[%s6326_s11 + $0x28] sm:$0xf] }
 0x3c9   : > { %2770 = vst.msk [vmem:[#allocation2 + $0x74] sm:$0xf] %vm2740_vm0, %v2703_v0 }
 0x3cc   : > { %3038 = vrot.lane.b32.xlu1 %v7215_v31, %s4892_s15 }
 0x3cd   : > { %3036 = vrot.lane.b32.xlu0 %v7220_v18, %s4892_s15  ;;  %3034 = vrot.lane.b32.xlu2 %v4837_v26, %s4892_s15  ;;  %v7245_v26 = vld [vmem:[%s6326_s11 + $0x40] sm:$0xf] }
 0x3ce   : > { %v2695_v56 = vpop.permute.xlu1 %2694  ;;  %8355 = vst [vmem:[#allocation29_spill] sm:$0xff] %v7245_v26 }
 0x3cf   : > { %2766 = vst.msk [vmem:[#allocation2 + $0x64] sm:$0xf] %vm2740_vm0, %v2695_v56  ;;  %v2693_v28 = vpop.permute.xlu0 %2692  ;;  %v2902_v50 = vpop.permute.xlu2 %2901 }
 0x3d0   : > { %2765 = vst.msk [vmem:[#allocation2 + $0x60] sm:$0xf] %vm2740_vm0, %v2693_v28 }
 0x3d1   : > { %2998 = vst.msk [vmem:[#allocation2] sm:$0xf] %vm2997_vm1, %v2902_v50  ;;  %v7250_v50 = vld [vmem:[%s6326_s11 + $0x3c] sm:$0xf] }
 0x3d2   : > { %8356 = vst [vmem:[#allocation39_spill] sm:$0xff] %v7250_v50 }
 0x3d4   : > { %3044 = vrot.lane.b32.xlu1 %v7230_v51, %s4892_s15 }
 0x3d5   : > { %3042 = vrot.lane.b32.xlu0 %v7235_v3, %s4892_s15  ;;  %3040 = vrot.lane.b32.xlu2 %v6943_v62, %s4892_s15 }
 0x3d6   : > { %v2701_v0 = vpop.permute.xlu1 %2700 }
 0x3d7   : > { %2769 = vst.msk [vmem:[#allocation2 + $0x70] sm:$0xf] %vm2740_vm0, %v2701_v0  ;;  %v2699_v56 = vpop.permute.xlu0 %2698  ;;  %v2908_v28 = vpop.permute.xlu2 %2907 }
 0x3d8   : > { %2768 = vst.msk [vmem:[#allocation2 + $0x6c] sm:$0xf] %vm2740_vm0, %v2699_v56  ;;  %v7256_v56 = vld [vmem:[%s6326_s11 + $0x34] sm:$0xf] }
 0x3d9   : > { %3001 = vst.msk [vmem:[#allocation2 + $0xc] sm:$0xf] %vm2997_vm1, %v2908_v28 }
 0x3dc   : > { %3050 = vrot.lane.b32.xlu1 %v7245_v26, %s4892_s15 }
 0x3dd   : > { %3048 = vrot.lane.b32.xlu0 %v7250_v50, %s4892_s15  ;;  %3046 = vrot.lane.b32.xlu2 %v7256_v56, %s4892_s15 }
 0x3de   : > { %v2707_v0 = vpop.permute.xlu1 %2706 }
 0x3df   : > { %2772 = vst.msk [vmem:[#allocation2 + $0x7c] sm:$0xf] %vm2740_vm0, %v2707_v0  ;;  %v2705_v47 = vpop.permute.xlu0 %2704  ;;  %v2914_v28 = vpop.permute.xlu2 %2913 }
 0x3e0   : > { %2771 = vst.msk [vmem:[#allocation2 + $0x78] sm:$0xf] %vm2740_vm0, %v2705_v47 }
 0x3e1   : > { %3004 = vst.msk [vmem:[#allocation2 + $0x18] sm:$0xf] %vm2997_vm1, %v2914_v28  ;;  %v7275_v28 = vld [vmem:[%s6326_s11 + $0x64] sm:$0xf] }
 0x3e2   : > { %8357 = vst [vmem:[#allocation36_spill] sm:$0xff] %v7275_v28 }
 0x3e4   : > { %3056 = vrot.lane.b32.xlu1 %v6990_v44, %s4892_s15 }
 0x3e5   : > { %3054 = vrot.lane.b32.xlu0 %v7265_v19, %s4892_s15  ;;  %3052 = vrot.lane.b32.xlu2 %v7003_v58, %s4892_s15 }
 0x3e6   : > { %v2906_v0 = vpop.permute.xlu1 %2905 }
 0x3e7   : > { %3000 = vst.msk [vmem:[#allocation2 + $0x8] sm:$0xf] %vm2997_vm1, %v2906_v0  ;;  %v2904_v26 = vpop.permute.xlu0 %2903  ;;  %v2920_v47 = vpop.permute.xlu2 %2919 }
 0x3e8   : > { %2999 = vst.msk [vmem:[#allocation2 + $0x4] sm:$0xf] %vm2997_vm1, %v2904_v26 }
 0x3e9   : > { %3007 = vst.msk [vmem:[#allocation2 + $0x24] sm:$0xf] %vm2997_vm1, %v2920_v47  ;;  %v4845_v47 = vld [vmem:[%s6326_s11 + $0x70] sm:$0xf] }
 0x3ec   : > { %3062 = vrot.lane.b32.xlu1 %v7275_v28, %s4892_s15 }
 0x3ed   : > { %3060 = vrot.lane.b32.xlu0 %v7026_v39, %s4892_s15  ;;  %3058 = vrot.lane.b32.xlu2 %v6994_v41, %s4892_s15 }
 0x3ee   : > { %v2912_v50 = vpop.permute.xlu1 %2911 }
 0x3ef   : > { %3003 = vst.msk [vmem:[#allocation2 + $0x14] sm:$0xf] %vm2997_vm1, %v2912_v50  ;;  %v2910_v0 = vpop.permute.xlu0 %2909  ;;  %v2926_v26 = vpop.permute.xlu2 %2925 }
 0x3f0   : > { %3002 = vst.msk [vmem:[#allocation2 + $0x10] sm:$0xf] %vm2997_vm1, %v2910_v0 }
 0x3f1   : > { %3010 = vst.msk [vmem:[#allocation2 + $0x30] sm:$0xf] %vm2997_vm1, %v2926_v26 }
 0x3f4   : > { %3068 = vrot.lane.b32.xlu1 %v7053_v33, %s4892_s15 }
 0x3f5   : > { %3066 = vrot.lane.b32.xlu0 %v4845_v47, %s4892_s15  ;;  %3064 = vrot.lane.b32.xlu2 %v7066_v1, %s4892_s15 }
 0x3f6   : > { %v2918_v28 = vpop.permute.xlu1 %2917 }
 0x3f7   : > { %3006 = vst.msk [vmem:[#allocation2 + $0x20] sm:$0xf] %vm2997_vm1, %v2918_v28  ;;  %v2916_v39 = vpop.permute.xlu0 %2915  ;;  %v2932_v50 = vpop.permute.xlu2 %2931 }
 0x3f8   : > { %3005 = vst.msk [vmem:[#allocation2 + $0x1c] sm:$0xf] %vm2997_vm1, %v2916_v39 }
 0x3f9   : > { %3013 = vst.msk [vmem:[#allocation2 + $0x3c] sm:$0xf] %vm2997_vm1, %v2932_v50  ;;  %v7328_v50 = vld [vmem:[%s6326_s11 + $0xb8] sm:$0xf] }
 0x3fa   : > { %8359 = vst [vmem:[#allocation48_spill] sm:$0xff] %v7328_v50 }
 0x3fc   : > { %3074 = vrot.lane.b32.xlu1 %v7074_v49, %s4892_s15 }
 0x3fd   : > { %3072 = vrot.lane.b32.xlu0 %v7092_v8, %s4892_s15  ;;  %3070 = vrot.lane.b32.xlu2 %v7057_v10, %s4892_s15  ;;  %v7421_v8 = vld [vmem:[%s6326_s11 + $0xc8] sm:$0x1] }
 0x3fe   : > { %v2924_v0 = vpop.permute.xlu1 %2923 }
 0x3ff   : > { %3009 = vst.msk [vmem:[#allocation2 + $0x2c] sm:$0xf] %vm2997_vm1, %v2924_v0  ;;  %v2922_v26 = vpop.permute.xlu0 %2921  ;;  %v2938_v1 = vpop.permute.xlu2 %2937 }
 0x400   : > { %3008 = vst.msk [vmem:[#allocation2 + $0x28] sm:$0xf] %vm2997_vm1, %v2922_v26 }
 0x401   : > { %3016 = vst.msk [vmem:[#allocation2 + $0x48] sm:$0xf] %vm2997_vm1, %v2938_v1  ;;  %v7340_v1 = vld [vmem:[%s6326_s11 + $0xc4] sm:$0xf] }
 0x402   : > { %8360 = vst [vmem:[#allocation18_spill] sm:$0xff] %v7340_v1 }
 0x404   : > { %3080 = vrot.lane.b32.xlu1 %v7122_v9, %s4892_s15 }
 0x405   : > { %3078 = vrot.lane.b32.xlu0 %v7109_v24, %s4892_s15  ;;  %3076 = vrot.lane.b32.xlu2 %v7135_v29, %s4892_s15  ;;  %v7322_v29 = vld [vmem:[%s6326_s11 + $0xc0] sm:$0xf] }
 0x406   : > { %v2930_v49 = vpop.permute.xlu1 %2929  ;;  %8358 = vst [vmem:[#allocation38_spill] sm:$0xff] %v7322_v29 }
 0x407   : > { %3012 = vst.msk [vmem:[#allocation2 + $0x38] sm:$0xf] %vm2997_vm1, %v2930_v49  ;;  %v2928_v28 = vpop.permute.xlu0 %2927  ;;  %v2944_v47 = vpop.permute.xlu2 %2943 }
 0x408   : > { %3011 = vst.msk [vmem:[#allocation2 + $0x34] sm:$0xf] %vm2997_vm1, %v2928_v28 }
 0x409   : > { %3019 = vst.msk [vmem:[#allocation2 + $0x54] sm:$0xf] %vm2997_vm1, %v2944_v47  ;;  %v8361_v47 = vld [vmem:[#allocation34_spill] sm:$0xff] }
 0x40c   : > { %3086 = vrot.lane.b32.xlu1 %v7143_v61, %s4892_s15 }
 0x40d   : > { %3084 = vrot.lane.b32.xlu0 %v7161_v57, %s4892_s15  ;;  %3082 = vrot.lane.b32.xlu2 %v7126_v17, %s4892_s15 }
 0x40e   : > { %v2936_v24 = vpop.permute.xlu1 %2935 }
 0x40f   : > { %3015 = vst.msk [vmem:[#allocation2 + $0x44] sm:$0xf] %vm2997_vm1, %v2936_v24  ;;  %v2934_v9 = vpop.permute.xlu0 %2933  ;;  %v2950_v39 = vpop.permute.xlu2 %2949 }
 0x410   : > { %3014 = vst.msk [vmem:[#allocation2 + $0x40] sm:$0xf] %vm2997_vm1, %v2934_v9  ;;  %v8363_v9 = vld [vmem:[#allocation4_spill] sm:$0xff] }
 0x411   : > { %3022 = vst.msk [vmem:[#allocation2 + $0x60] sm:$0xf] %vm2997_vm1, %v2950_v39 }
 0x414   : > { %3092 = vrot.lane.b32.xlu1 %v7322_v29, %s4892_s15 }
 0x415   : > { %3090 = vrot.lane.b32.xlu0 %v7328_v50, %s4892_s15  ;;  %3088 = vrot.lane.b32.xlu2 %v7193_v53, %s4892_s15 }
 0x416   : > { %v2942_v0 = vpop.permute.xlu1 %2941 }
 0x417   : > { %3018 = vst.msk [vmem:[#allocation2 + $0x50] sm:$0xf] %vm2997_vm1, %v2942_v0  ;;  %v2940_v17 = vpop.permute.xlu0 %2939  ;;  %v2956_v26 = vpop.permute.xlu2 %2955  ;;  %v8364_v0 = vld [vmem:[#allocation44_spill] sm:$0xff] }
 0x418   : > { %3017 = vst.msk [vmem:[#allocation2 + $0x4c] sm:$0xf] %vm2997_vm1, %v2940_v17  ;;  %v8365_v17 = vld [vmem:[#allocation45_spill] sm:$0xff] }
 0x419   : > { %3025 = vst.msk [vmem:[#allocation2 + $0x6c] sm:$0xf] %vm2997_vm1, %v2956_v26 }
 0x41c   : > { %3187 = vrot.lane.b32.xlu1 %v6590_v40, %s4893_s16  ;;  %v8362_v40 = vld [vmem:[#allocation43_spill] sm:$0xff] }
 0x41d   : > { %3185 = vrot.lane.b32.xlu0 %v6601_v15, %s4893_s16  ;;  %3094 = vrot.lane.b32.xlu2 %v7340_v1, %s4892_s15 }
 0x41e   : > { %v2948_v49 = vpop.permute.xlu1 %2947 }
 0x41f   : > { %3021 = vst.msk [vmem:[#allocation2 + $0x5c] sm:$0xf] %vm2997_vm1, %v2948_v49  ;;  %v2946_v28 = vpop.permute.xlu0 %2945  ;;  %v2962_v53 = vpop.permute.xlu2 %2961 }
 0x420   : > { %3020 = vst.msk [vmem:[#allocation2 + $0x58] sm:$0xf] %vm2997_vm1, %v2946_v28  ;;  %v8366_v28 = vld [vmem:[#allocation3_spill] sm:$0xff] }
 0x421   : > { %3028 = vst.msk [vmem:[#allocation2 + $0x78] sm:$0xf] %vm2997_vm1, %v2962_v53 }
 0x424   : > { %3193 = vrot.lane.b32.xlu1 %v8361_v47, %s4893_s16 }
 0x425   : > { %3191 = vrot.lane.b32.xlu0 %v8362_v40, %s4893_s16  ;;  %3189 = vrot.lane.b32.xlu2 %v8363_v9, %s4893_s16 }
 0x426   : > { %v2954_v24 = vpop.permute.xlu1 %2953 }
 0x427   : > { %3024 = vst.msk [vmem:[#allocation2 + $0x68] sm:$0xf] %vm2997_vm1, %v2954_v24  ;;  %v2952_v15 = vpop.permute.xlu0 %2951  ;;  %v3035_v39 = vpop.permute.xlu2 %3034  ;;  %v8367_v24 = vld [vmem:[#allocation46_spill] sm:$0xff] }
 0x428   : > { %3023 = vst.msk [vmem:[#allocation2 + $0x64] sm:$0xf] %vm2997_vm1, %v2952_v15  ;;  %v8368_v15 = vld [vmem:[#allocation9_spill] sm:$0xff] }
 0x429   : > { %3130 = vst.msk [vmem:[#allocation2 + $0x4] sm:$0xf] %vm3128_vm3, %v3035_v39 }
 0x42c   : > { %3199 = vrot.lane.b32.xlu1 %v8364_v0, %s4893_s16 }
 0x42d   : > { %3197 = vrot.lane.b32.xlu0 %v8365_v17, %s4893_s16  ;;  %3195 = vrot.lane.b32.xlu2 %v8366_v28, %s4893_s16 }
 0x42e   : > { %v2960_v26 = vpop.permute.xlu1 %2959 }
 0x42f   : > { %3027 = vst.msk [vmem:[#allocation2 + $0x74] sm:$0xf] %vm2997_vm1, %v2960_v26  ;;  %v2958_v49 = vpop.permute.xlu0 %2957  ;;  %v3041_v53 = vpop.permute.xlu2 %3040  ;;  %v8369_v26 = vld [vmem:[#allocation41_spill] sm:$0xff] }
 0x430   : > { %3026 = vst.msk [vmem:[#allocation2 + $0x70] sm:$0xf] %vm2997_vm1, %v2958_v49  ;;  %v8370_v49 = vld [vmem:[#allocation27_spill] sm:$0xff] }
 0x431   : > { %3133 = vst.msk [vmem:[#allocation2 + $0x10] sm:$0xf] %vm3128_vm3, %v3041_v53 }
 0x434   : > { %3205 = vrot.lane.b32.xlu1 %v8367_v24, %s4893_s16 }
 0x435   : > { %3203 = vrot.lane.b32.xlu0 %v8368_v15, %s4893_s16  ;;  %3201 = vrot.lane.b32.xlu2 %v8369_v26, %s4893_s16 }
 0x436   : > { %v3033_v39 = vpop.permute.xlu1 %3032 }
 0x437   : > { %3129 = vst.msk [vmem:[#allocation2] sm:$0xf] %vm3128_vm3, %v3033_v39  ;;  %v2964_v50 = vpop.permute.xlu0 %2963  ;;  %v3047_v57 = vpop.permute.xlu2 %3046  ;;  %v8371_v39 = vld [vmem:[#allocation42_spill] sm:$0xff] }
 0x438   : > { %3029 = vst.msk [vmem:[#allocation2 + $0x7c] sm:$0xf] %vm2997_vm1, %v2964_v50 }
 0x439   : > { %3136 = vst.msk [vmem:[#allocation2 + $0x1c] sm:$0xf] %vm3128_vm3, %v3047_v57 }
 0x43c   : > { %3211 = vrot.lane.b32.xlu1 %v6725_v25, %s4893_s16 }
 0x43d   : > { %3209 = vrot.lane.b32.xlu0 %v8370_v49, %s4893_s16  ;;  %3207 = vrot.lane.b32.xlu2 %v8371_v39, %s4893_s16 }
 0x43e   : > { %v3039_v53 = vpop.permute.xlu1 %3038 }
 0x43f   : > { %3132 = vst.msk [vmem:[#allocation2 + $0xc] sm:$0xf] %vm3128_vm3, %v3039_v53  ;;  %v3037_v15 = vpop.permute.xlu0 %3036  ;;  %v3053_v26 = vpop.permute.xlu2 %3052  ;;  %v8372_v53 = vld [vmem:[#allocation49_spill] sm:$0xff] }
 0x440   : > { %3131 = vst.msk [vmem:[#allocation2 + $0x8] sm:$0xf] %vm3128_vm3, %v3037_v15  ;;  %v8373_v15 = vld [vmem:[#allocation5_spill] sm:$0xff] }
 0x441   : > { %3139 = vst.msk [vmem:[#allocation2 + $0x28] sm:$0xf] %vm3128_vm3, %v3053_v26  ;;  %v8374_v26 = vld [vmem:[#allocation12_spill] sm:$0xff] }
 0x444   : > { %3217 = vrot.lane.b32.xlu1 %v6760_v30, %s4893_s16 }
 0x445   : > { %3215 = vrot.lane.b32.xlu0 %v6771_v63, %s4893_s16  ;;  %3213 = vrot.lane.b32.xlu2 %v8372_v53, %s4893_s16 }
 0x446   : > { %v3045_v57 = vpop.permute.xlu1 %3044 }
 0x447   : > { %3135 = vst.msk [vmem:[#allocation2 + $0x18] sm:$0xf] %vm3128_vm3, %v3045_v57  ;;  %v3043_v50 = vpop.permute.xlu0 %3042  ;;  %v3059_v61 = vpop.permute.xlu2 %3058  ;;  %v8375_v57 = vld [vmem:[#allocation33_spill] sm:$0xff] }
 0x448   : > { %3134 = vst.msk [vmem:[#allocation2 + $0x14] sm:$0xf] %vm3128_vm3, %v3043_v50  ;;  %v8376_v50 = vld [vmem:[#allocation8_spill] sm:$0xff] }
 0x449   : > { %3142 = vst.msk [vmem:[#allocation2 + $0x34] sm:$0xf] %vm3128_vm3, %v3059_v61 }
 0x44c   : > { %3223 = vrot.lane.b32.xlu1 %v8373_v15, %s4893_s16 }
 0x44d   : > { %3221 = vrot.lane.b32.xlu0 %v8374_v26, %s4893_s16  ;;  %3219 = vrot.lane.b32.xlu2 %v8375_v57, %s4893_s16  ;;  %v3171_v57 = vshll.u32 %v7340_v1, 16 }
 0x44e   : > { %v3051_v30 = vpop.permute.xlu1 %3050 }
 0x44f   : > { %3138 = vst.msk [vmem:[#allocation2 + $0x24] sm:$0xf] %vm3128_vm3, %v3051_v30  ;;  %v3049_v63 = vpop.permute.xlu0 %3048  ;;  %v3065_v53 = vpop.permute.xlu2 %3064 }
 0x450   : > { %3137 = vst.msk [vmem:[#allocation2 + $0x20] sm:$0xf] %vm3128_vm3, %v3049_v63 }
 0x451   : > { %3145 = vst.msk [vmem:[#allocation2 + $0x40] sm:$0xf] %vm3128_vm3, %v3065_v53  ;;  %v3175_v53 = vshrl.u32 %v7340_v1, 16  ;;  %v8377_v1 = vld [vmem:[#allocation6_spill] sm:$0xff] }
 0x454   : > { %3229 = vrot.lane.b32.xlu1 %v6815_v60, %s4893_s16  ;;  %v3162_v60 = vshrl.u32 %v7322_v29, 16 }
 0x455   : > { %3227 = vrot.lane.b32.xlu0 %v6834_v7, %s4893_s16  ;;  %3225 = vrot.lane.b32.xlu2 %v8376_v50, %s4893_s16  ;;  %v3165_v7 = vshll.u32 %v7322_v29, 16  ;;  %v3177_v50 = vrot.slane %v3175_v53, 4 }
 0x456   : > { %v3057_v61 = vpop.permute.xlu1 %3056  ;;  %v3164_v25 = vrot.slane %v3162_v60, 4 }
 0x457   : > { %3141 = vst.msk [vmem:[#allocation2 + $0x30] sm:$0xf] %vm3128_vm3, %v3057_v61  ;;  %v3055_v30 = vpop.permute.xlu0 %3054  ;;  %v3071_v63 = vpop.permute.xlu2 %3070  ;;  %v3173_v61 = vrot.slane %v3171_v57, 5  ;;  %v3167_v17 = vrot.slane %v3165_v7, 5 }
 0x458   : > { %3140 = vst.msk [vmem:[#allocation2 + $0x2c] sm:$0xf] %vm3128_vm3, %v3055_v30 }
 0x459   : > { %3148 = vst.msk [vmem:[#allocation2 + $0x4c] sm:$0xf] %vm3128_vm3, %v3071_v63  ;;  %v3178_v29 = vor.u32 %v3177_v50, %v3173_v61 }
 0x45b   : > { %v3179_v60 = vrot.slane %v3178_v29, 4 }
 0x45c   : > { %3235 = vrot.lane.b32.xlu1 %v6858_v43, %s4893_s16  ;;  %v3181_v43 = vshll.u32 %v7421_v8, 16 }
 0x45d   : > { %3233 = vrot.lane.b32.xlu0 %v6865_v5, %s4893_s16  ;;  %3231 = vrot.lane.b32.xlu2 %v8377_v1, %s4893_s16  ;;  %v3168_v5 = vor.u32 %v3167_v17, %v3164_v25 }
 0x45e   : > { %v3063_v30 = vpop.permute.xlu1 %3062  ;;  %v3183_v7 = vrot.slane %v3181_v43, 5 }
 0x45f   : > { %3144 = vst.msk [vmem:[#allocation2 + $0x3c] sm:$0xf] %vm3128_vm3, %v3063_v30  ;;  %v3061_v63 = vpop.permute.xlu0 %3060  ;;  %v3077_v0 = vpop.permute.xlu2 %3076  ;;  %v3169_v53 = vrot.slane %v3168_v5, 4 }
 0x460   : > { %3143 = vst.msk [vmem:[#allocation2 + $0x38] sm:$0xf] %vm3128_vm3, %v3061_v63  ;;  %v7439_v25 = vsel %vm4990_vm2, %v3179_v60, %v3183_v7 }
 0x461   : > { %3151 = vst.msk [vmem:[#allocation2 + $0x58] sm:$0xf] %vm3128_vm3, %v3077_v0  ;;  %v7443_v17 = vsel %vm4990_vm2, %v3169_v53, %v3173_v61 }
 0x464   : > { %3241 = vrot.lane.b32.xlu1 %v6882_v20, %s4893_s16 }
 0x465   : > { %3239 = vrot.lane.b32.xlu0 %v6889_v14, %s4893_s16  ;;  %3237 = vrot.lane.b32.xlu2 %v6849_v4, %s4893_s16 }
 0x466   : > { %v3069_v57 = vpop.permute.xlu1 %3068 }
 0x467   : > { %3147 = vst.msk [vmem:[#allocation2 + $0x48] sm:$0xf] %vm3128_vm3, %v3069_v57  ;;  %v3067_v30 = vpop.permute.xlu0 %3066  ;;  %v3083_v0 = vpop.permute.xlu2 %3082 }
 0x468   : > { %3146 = vst.msk [vmem:[#allocation2 + $0x44] sm:$0xf] %vm3128_vm3, %v3067_v30 }
 0x469   : > { %3154 = vst.msk [vmem:[#allocation2 + $0x64] sm:$0xf] %vm3128_vm3, %v3083_v0 }
 0x46c   : > { %3247 = vrot.lane.b32.xlu1 %v7439_v25, %s4893_s16 }
 0x46d   : > { %3245 = vrot.lane.b32.xlu0 %v7443_v17, %s4893_s16  ;;  %3243 = vrot.lane.b32.xlu2 %v6878_v34, %s4893_s16  ;;  %s294_s16 = scalar_lea.vmem %s8014_s4, %s8415_s18 }
 0x46e   : > { %v3075_v43 = vpop.permute.xlu1 %3074 }
 0x46f   : > { %3150 = vst.msk [vmem:[#allocation2 + $0x54] sm:$0xf] %vm3128_vm3, %v3075_v43  ;;  %v3073_v5 = vpop.permute.xlu0 %3072  ;;  %v3089_v29 = vpop.permute.xlu2 %3088 }
 0x470   : > { %3149 = vst.msk [vmem:[#allocation2 + $0x50] sm:$0xf] %vm3128_vm3, %v3073_v5 }
 0x471   : > { %3157 = vst.msk [vmem:[#allocation2 + $0x70] sm:$0xf] %vm3128_vm3, %v3089_v29 }
 0x474   : > { %3326 = vrot.lane.b32.xlu1 %v6923_v37, %s4894_s17 }
 0x475   : > { %3324 = vrot.lane.b32.xlu0 %v6931_v52, %s4894_s17  ;;  %3322 = vrot.lane.b32.xlu2 %v6902_v21, %s4894_s17 }
 0x476   : > { %v3081_v50 = vpop.permute.xlu1 %3080 }
 0x477   : > { %3153 = vst.msk [vmem:[#allocation2 + $0x60] sm:$0xf] %vm3128_vm3, %v3081_v50  ;;  %v3079_v61 = vpop.permute.xlu0 %3078  ;;  %v3095_v63 = vpop.permute.xlu2 %3094 }
 0x478   : > { %3152 = vst.msk [vmem:[#allocation2 + $0x5c] sm:$0xf] %vm3128_vm3, %v3079_v61  ;;  %v8378_v61 = vld [vmem:[#allocation15_spill] sm:$0xff] }
 0x479   : > { %3160 = vst.msk [vmem:[#allocation2 + $0x7c] sm:$0xf] %vm3128_vm3, %v3095_v63 }
 0x47c   : > { %3332 = vrot.lane.b32.xlu1 %v6953_v55, %s4894_s17 }
 0x47d   : > { %3330 = vrot.lane.b32.xlu0 %v6960_v23, %s4894_s17  ;;  %3328 = vrot.lane.b32.xlu2 %v6919_v46, %s4894_s17 }
 0x47e   : > { %v3087_v60 = vpop.permute.xlu1 %3086 }
 0x47f   : > { %3156 = vst.msk [vmem:[#allocation2 + $0x6c] sm:$0xf] %vm3128_vm3, %v3087_v60  ;;  %v3085_v52 = vpop.permute.xlu0 %3084  ;;  %v3190_v21 = vpop.permute.xlu2 %3189 }
 0x480   : > { %3155 = vst.msk [vmem:[#allocation2 + $0x68] sm:$0xf] %vm3128_vm3, %v3085_v52  ;;  %v8379_v52 = vld [vmem:[#allocation21_spill] sm:$0xff] }
 0x481   : > { %3284 = vst.msk [vmem:[#allocation2 + $0x8] sm:$0xf] %vm3281_vm4, %v3190_v21 }
 0x484   : > { %3338 = vrot.lane.b32.xlu1 %v6977_v6, %s4894_s17 }
 0x485   : > { %3336 = vrot.lane.b32.xlu0 %v6985_v36, %s4894_s17  ;;  %3334 = vrot.lane.b32.xlu2 %v6948_v42, %s4894_s17 }
 0x486   : > { %v3093_v7 = vpop.permute.xlu1 %3092 }
 0x487   : > { %3159 = vst.msk [vmem:[#allocation2 + $0x78] sm:$0xf] %vm3128_vm3, %v3093_v7  ;;  %v3091_v57 = vpop.permute.xlu0 %3090  ;;  %v3196_v53 = vpop.permute.xlu2 %3195  ;;  %v8380_v7 = vld [vmem:[#allocation20_spill] sm:$0xff] }
 0x488   : > { %3158 = vst.msk [vmem:[#allocation2 + $0x74] sm:$0xf] %vm3128_vm3, %v3091_v57  ;;  %v8381_v57 = vld [vmem:[#allocation30_spill] sm:$0xff] }
 0x489   : > { %3287 = vst.msk [vmem:[#allocation2 + $0x14] sm:$0xf] %vm3281_vm4, %v3196_v53 }
 0x48c   : > { %3344 = vrot.lane.b32.xlu1 %v7013_v32, %s4894_s17 }
 0x48d   : > { %3342 = vrot.lane.b32.xlu0 %v7020_v16, %s4894_s17  ;;  %3340 = vrot.lane.b32.xlu2 %v6973_v11, %s4894_s17 }
 0x48e   : > { %v3188_v30 = vpop.permute.xlu1 %3187 }
 0x48f   : > { %3283 = vst.msk [vmem:[#allocation2 + $0x4] sm:$0xf] %vm3281_vm4, %v3188_v30  ;;  %v3186_v0 = vpop.permute.xlu0 %3185  ;;  %v3202_v43 = vpop.permute.xlu2 %3201 }
 0x490   : > { %3282 = vst.msk [vmem:[#allocation2] sm:$0xf] %vm3281_vm4, %v3186_v0  ;;  %v8382_v0 = vld [vmem:[#allocation14_spill] sm:$0xff] }
 0x491   : > { %3290 = vst.msk [vmem:[#allocation2 + $0x20] sm:$0xf] %vm3281_vm4, %v3202_v43 }
 0x494   : > { %3350 = vrot.lane.b32.xlu1 %v7040_v2, %s4894_s17 }
 0x495   : > { %3348 = vrot.lane.b32.xlu0 %v7048_v35, %s4894_s17  ;;  %3346 = vrot.lane.b32.xlu2 %v7008_v38, %s4894_s17 }
 0x496   : > { %v3194_v5 = vpop.permute.xlu1 %3193 }
 0x497   : > { %3286 = vst.msk [vmem:[#allocation2 + $0x10] sm:$0xf] %vm3281_vm4, %v3194_v5  ;;  %v3192_v29 = vpop.permute.xlu0 %3191  ;;  %v3208_v50 = vpop.permute.xlu2 %3207 }
 0x498   : > { %3285 = vst.msk [vmem:[#allocation2 + $0xc] sm:$0xf] %vm3281_vm4, %v3192_v29 }
 0x499   : > { %3293 = vst.msk [vmem:[#allocation2 + $0x2c] sm:$0xf] %vm3281_vm4, %v3208_v50  ;;  %v8383_v50 = vld [vmem:[#allocation19_spill] sm:$0xff] }
 0x49c   : > { %3356 = vrot.lane.b32.xlu1 %v7079_v48, %s4894_s17 }
 0x49d   : > { %3354 = vrot.lane.b32.xlu0 %v8378_v61, %s4894_s17  ;;  %3352 = vrot.lane.b32.xlu2 %v8379_v52, %s4894_s17 }
 0x49e   : > { %v3200_v63 = vpop.permute.xlu1 %3199 }
 0x49f   : > { %3289 = vst.msk [vmem:[#allocation2 + $0x1c] sm:$0xf] %vm3281_vm4, %v3200_v63  ;;  %v3198_v60 = vpop.permute.xlu0 %3197  ;;  %v3214_v21 = vpop.permute.xlu2 %3213 }
 0x4a0   : > { %3288 = vst.msk [vmem:[#allocation2 + $0x18] sm:$0xf] %vm3281_vm4, %v3198_v60 }
 0x4a1   : > { %3296 = vst.msk [vmem:[#allocation2 + $0x38] sm:$0xf] %vm3281_vm4, %v3214_v21 }
 0x4a4   : > { %3362 = vrot.lane.b32.xlu1 %v8380_v7, %s4894_s17 }
 0x4a5   : > { %3360 = vrot.lane.b32.xlu0 %v8381_v57, %s4894_s17  ;;  %3358 = vrot.lane.b32.xlu2 %v8382_v0, %s4894_s17 }
 0x4a6   : > { %v3206_v53 = vpop.permute.xlu1 %3205 }
 0x4a7   : > { %3292 = vst.msk [vmem:[#allocation2 + $0x28] sm:$0xf] %vm3281_vm4, %v3206_v53  ;;  %v3204_v30 = vpop.permute.xlu0 %3203  ;;  %v3220_v43 = vpop.permute.xlu2 %3219  ;;  %v8384_v53 = vld [vmem:[#allocation23_spill] sm:$0xff] }
 0x4a8   : > { %3291 = vst.msk [vmem:[#allocation2 + $0x24] sm:$0xf] %vm3281_vm4, %v3204_v30 }
 0x4a9   : > { %3299 = vst.msk [vmem:[#allocation2 + $0x44] sm:$0xf] %vm3281_vm4, %v3220_v43 }
 0x4ac   : > { %3368 = vrot.lane.b32.xlu1 %v7148_v54, %s4894_s17 }
 0x4ad   : > { %3366 = vrot.lane.b32.xlu0 %v7155_v12, %s4894_s17  ;;  %3364 = vrot.lane.b32.xlu2 %v8383_v50, %s4894_s17 }
 0x4ae   : > { %v3212_v5 = vpop.permute.xlu1 %3211 }
 0x4af   : > { %3295 = vst.msk [vmem:[#allocation2 + $0x34] sm:$0xf] %vm3281_vm4, %v3212_v5  ;;  %v3210_v29 = vpop.permute.xlu0 %3209  ;;  %v3226_v63 = vpop.permute.xlu2 %3225 }
 0x4b0   : > { %3294 = vst.msk [vmem:[#allocation2 + $0x30] sm:$0xf] %vm3281_vm4, %v3210_v29 }
 0x4b1   : > { %3302 = vst.msk [vmem:[#allocation2 + $0x50] sm:$0xf] %vm3281_vm4, %v3226_v63 }
 0x4b4   : > { %3374 = vrot.lane.b32.xlu1 %v7175_v22, %s4894_s17 }
 0x4b5   : > { %3372 = vrot.lane.b32.xlu0 %v7183_v59, %s4894_s17  ;;  %3370 = vrot.lane.b32.xlu2 %v8384_v53, %s4894_s17 }
 0x4b6   : > { %v3218_v60 = vpop.permute.xlu1 %3217 }
 0x4b7   : > { %3298 = vst.msk [vmem:[#allocation2 + $0x40] sm:$0xf] %vm3281_vm4, %v3218_v60  ;;  %v3216_v21 = vpop.permute.xlu0 %3215  ;;  %v3232_v30 = vpop.permute.xlu2 %3231 }
 0x4b8   : > { %3297 = vst.msk [vmem:[#allocation2 + $0x3c] sm:$0xf] %vm3281_vm4, %v3216_v21 }
 0x4b9   : > { %3305 = vst.msk [vmem:[#allocation2 + $0x5c] sm:$0xf] %vm3281_vm4, %v3232_v30  ;;  %v8386_v30 = vld [vmem:[#allocation45_spill] sm:$0xff] }
 0x4bc   : > { %3453 = vrot.lane.b32.xlu1 %v7220_v18, %s4895_s22 }
 0x4bd   : > { %3378 = vrot.lane.b32.xlu0 %v7205_v13, %s4894_s17  ;;  %3376 = vrot.lane.b32.xlu2 %v7171_v45, %s4894_s17 }
 0x4be   : > { %v3224_v43 = vpop.permute.xlu1 %3223 }
 0x4bf   : > { %3301 = vst.msk [vmem:[#allocation2 + $0x4c] sm:$0xf] %vm3281_vm4, %v3224_v43  ;;  %v3222_v5 = vpop.permute.xlu0 %3221  ;;  %v3238_v29 = vpop.permute.xlu2 %3237 }
 0x4c0   : > { %3300 = vst.msk [vmem:[#allocation2 + $0x48] sm:$0xf] %vm3281_vm4, %v3222_v5 }
 0x4c1   : > { %3308 = vst.msk [vmem:[#allocation2 + $0x68] sm:$0xf] %vm3281_vm4, %v3238_v29 }
 0x4c4   : > { %3608 = vrot.lane.b32.xlu1 %v8362_v40, %s4896_s23 }
 0x4c5   : > { %3606 = vrot.lane.b32.xlu0 %v8363_v9, %s4896_s23  ;;  %3455 = vrot.lane.b32.xlu2 %v7215_v31, %s4895_s22 }
 0x4c6   : > { %v3230_v18 = vpop.permute.xlu1 %3229 }
 0x4c7   : > { %3304 = vst.msk [vmem:[#allocation2 + $0x58] sm:$0xf] %vm3281_vm4, %v3230_v18  ;;  %v3228_v63 = vpop.permute.xlu0 %3227  ;;  %v3244_v60 = vpop.permute.xlu2 %3243 }
 0x4c8   : > { %3303 = vst.msk [vmem:[#allocation2 + $0x54] sm:$0xf] %vm3281_vm4, %v3228_v63 }
 0x4c9   : > { %3311 = vst.msk [vmem:[#allocation2 + $0x74] sm:$0xf] %vm3281_vm4, %v3244_v60  ;;  %v8387_v60 = vld [vmem:[#allocation17_spill] sm:$0xff] }
 0x4cc   : > { %3457 = vrot.lane.b32.xlu1 %v6943_v62, %s4895_s22 }
 0x4cd   : > { %3745 = vrot.lane.b32.xlu0 %v6919_v46, %s4897_s24  ;;  %3743 = vrot.lane.b32.xlu2 %v6923_v37, %s4897_s24 }
 0x4ce   : > { %v3236_v40 = vpop.permute.xlu1 %3235 }
 0x4cf   : > { %3307 = vst.msk [vmem:[#allocation2 + $0x64] sm:$0xf] %vm3281_vm4, %v3236_v40  ;;  %v3234_v9 = vpop.permute.xlu0 %3233  ;;  %v3323_v31 = vpop.permute.xlu2 %3322 }
 0x4d0   : > { %3306 = vst.msk [vmem:[#allocation2 + $0x60] sm:$0xf] %vm3281_vm4, %v3234_v9  ;;  %v4663_v9 = vld [vmem:[%s8012_s2 + $0x10] sm:$0xff] }
 0x4d1   : > { %3419 = vst.msk [vmem:[#allocation2] sm:$0xf] %vm3418_vm5, %v3323_v31 }
 0x4d4   : > { %3471 = vrot.lane.b32.xlu1 %v7265_v19, %s4895_s22 }
 0x4d5   : > { %3469 = vrot.lane.b32.xlu0 %v7003_v58, %s4895_s22  ;;  %3459 = vrot.lane.b32.xlu2 %v7235_v3, %s4895_s22 }
 0x4d6   : > { %v3242_v46 = vpop.permute.xlu1 %3241 }
 0x4d7   : > { %3310 = vst.msk [vmem:[#allocation2 + $0x70] sm:$0xf] %vm3281_vm4, %v3242_v46  ;;  %v3240_v62 = vpop.permute.xlu0 %3239  ;;  %v3329_v37 = vpop.permute.xlu2 %3328 }
 0x4d8   : > { %3309 = vst.msk [vmem:[#allocation2 + $0x6c] sm:$0xf] %vm3281_vm4, %v3240_v62  ;;  %v4662_v62 = vld [vmem:[%s8012_s2 + $0x8] sm:$0xff] }
 0x4d9   : > { %3422 = vst.msk [vmem:[#allocation2 + $0xc] sm:$0xf] %vm3418_vm5, %v3329_v37  ;;  %v8389_v37 = vld [vmem:[#allocation24_spill] sm:$0xff] }
 0x4dc   : > { %3622 = vrot.lane.b32.xlu1 %v8367_v24, %s4896_s23 }
 0x4dd   : > { %3612 = vrot.lane.b32.xlu0 %v8366_v28, %s4896_s23  ;;  %3610 = vrot.lane.b32.xlu2 %v8361_v47, %s4896_s23 }
 0x4de   : > { %v3248_v19 = vpop.permute.xlu1 %3247 }
 0x4df   : > { %3313 = vst.msk [vmem:[#allocation2 + $0x7c] sm:$0xf] %vm3281_vm4, %v3248_v19  ;;  %v3246_v58 = vpop.permute.xlu0 %3245  ;;  %v3335_v3 = vpop.permute.xlu2 %3334  ;;  %v8390_v19 = vld [vmem:[#allocation37_spill] sm:$0xff] }
 0x4e0   : > { %3312 = vst.msk [vmem:[#allocation2 + $0x78] sm:$0xf] %vm3281_vm4, %v3246_v58 }
 0x4e1   : > { %3425 = vst.msk [vmem:[#allocation2 + $0x18] sm:$0xf] %vm3418_vm5, %v3335_v3 }
 0x4e4   : > { %3749 = vrot.lane.b32.xlu1 %v6953_v55, %s4897_s24 }
 0x4e5   : > { %3747 = vrot.lane.b32.xlu0 %v6960_v23, %s4897_s24  ;;  %3624 = vrot.lane.b32.xlu2 %v8371_v39, %s4896_s23 }
 0x4e6   : > { %v3327_v24 = vpop.permute.xlu1 %3326 }
 0x4e7   : > { %3421 = vst.msk [vmem:[#allocation2 + $0x8] sm:$0xf] %vm3418_vm5, %v3327_v24  ;;  %v3325_v28 = vpop.permute.xlu0 %3324  ;;  %v3341_v47 = vpop.permute.xlu2 %3340  ;;  %v4847_v24 = vld [vmem:[%s6326_s11 + $0x88] sm:$0xf] }
 0x4e8   : > { %3420 = vst.msk [vmem:[#allocation2 + $0x4] sm:$0xf] %vm3418_vm5, %v3325_v28 }
 0x4e9   : > { %3428 = vst.msk [vmem:[#allocation2 + $0x24] sm:$0xf] %vm3418_vm5, %v3341_v47  ;;  %v8391_v47 = vld [vmem:[#allocation16_spill] sm:$0xff] }
 0x4ec   : > { %3485 = vrot.lane.b32.xlu1 %v7053_v33, %s4895_s22 }
 0x4ed   : > { %3761 = vrot.lane.b32.xlu0 %v7013_v32, %s4897_s24  ;;  %3759 = vrot.lane.b32.xlu2 %v7020_v16, %s4897_s24 }
 0x4ee   : > { %v3333_v55 = vpop.permute.xlu1 %3332 }
 0x4ef   : > { %3424 = vst.msk [vmem:[#allocation2 + $0x14] sm:$0xf] %vm3418_vm5, %v3333_v55  ;;  %v3331_v23 = vpop.permute.xlu0 %3330  ;;  %v3347_v39 = vpop.permute.xlu2 %3346 }
 0x4f0   : > { %3423 = vst.msk [vmem:[#allocation2 + $0x10] sm:$0xf] %vm3418_vm5, %v3331_v23 }
 0x4f1   : > { %3431 = vst.msk [vmem:[#allocation2 + $0x30] sm:$0xf] %vm3418_vm5, %v3347_v39  ;;  %v8392_v39 = vld [vmem:[#allocation8_spill] sm:$0xff] }
 0x4f4   : > { %3640 = vrot.lane.b32.xlu1 %v8373_v15, %s4896_s23 }
 0x4f5   : > { %3638 = vrot.lane.b32.xlu0 %v8374_v26, %s4896_s23  ;;  %3487 = vrot.lane.b32.xlu2 %v7057_v10, %s4895_s22 }
 0x4f6   : > { %v3339_v33 = vpop.permute.xlu1 %3338 }
 0x4f7   : > { %3427 = vst.msk [vmem:[#allocation2 + $0x20] sm:$0xf] %vm3418_vm5, %v3339_v33  ;;  %v3337_v32 = vpop.permute.xlu0 %3336  ;;  %v3353_v16 = vpop.permute.xlu2 %3352 }
 0x4f8   : > { %3426 = vst.msk [vmem:[#allocation2 + $0x1c] sm:$0xf] %vm3418_vm5, %v3337_v32 }
 0x4f9   : > { %3434 = vst.msk [vmem:[#allocation2 + $0x3c] sm:$0xf] %vm3418_vm5, %v3353_v16 }
 0x4fc   : > { %3461 = vrot.lane.b32.xlu1 %v7230_v51, %s4895_s22 }
 0x4fd   : > { %3777 = vrot.lane.b32.xlu0 %v8381_v57, %s4897_s24  ;;  %3775 = vrot.lane.b32.xlu2 %v8382_v0, %s4897_s24 }
 0x4fe   : > { %v3345_v15 = vpop.permute.xlu1 %3344 }
 0x4ff   : > { %3430 = vst.msk [vmem:[#allocation2 + $0x2c] sm:$0xf] %vm3418_vm5, %v3345_v15  ;;  %v3343_v26 = vpop.permute.xlu0 %3342  ;;  %v3359_v10 = vpop.permute.xlu2 %3358 }
 0x500   : > { %3429 = vst.msk [vmem:[#allocation2 + $0x28] sm:$0xf] %vm3418_vm5, %v3343_v26  ;;  %v8394_v26 = vld [vmem:[#allocation36_spill] sm:$0xff] }
 0x501   : > { %3437 = vst.msk [vmem:[#allocation2 + $0x48] sm:$0xf] %vm3418_vm5, %v3359_v10  ;;  %v4848_v10 = vld [vmem:[%s6326_s11 + $0x60] sm:$0xf] }
 0x504   : > { %3475 = vrot.lane.b32.xlu1 %v6994_v41, %s4895_s22  ;;  %v8385_v41 = vld [vmem:[#allocation44_spill] sm:$0xff] }
 0x505   : > { %3473 = vrot.lane.b32.xlu0 %v6990_v44, %s4895_s22  ;;  %3463 = vrot.lane.b32.xlu2 %v7256_v56, %s4895_s22  ;;  %v3912_v56 = vld [vmem:[%s8012_s2 + $0x20] sm:$0xf] }
 0x506   : > { %v3351_v51 = vpop.permute.xlu1 %3350  ;;  %v4010_v5 = vunpack.c.l.b16 %v3912_v56  ;;  %v8398_v56 = vld [vmem:[#allocation41_spill] sm:$0xff] }
 0x507   : > { %3433 = vst.msk [vmem:[#allocation2 + $0x38] sm:$0xf] %vm3418_vm5, %v3351_v51  ;;  %v3349_v57 = vpop.permute.xlu0 %3348  ;;  %v3365_v0 = vpop.permute.xlu2 %3364 }
 0x508   : > { %3432 = vst.msk [vmem:[#allocation2 + $0x34] sm:$0xf] %vm3418_vm5, %v3349_v57 }
 0x509   : > { %3440 = vst.msk [vmem:[#allocation2 + $0x54] sm:$0xf] %vm3418_vm5, %v3365_v0  ;;  %v8395_v0 = vld [vmem:[#allocation29_spill] sm:$0xff] }
 0x50c   : > { %3626 = vrot.lane.b32.xlu1 %v8370_v49, %s4896_s23  ;;  %v4015_v49 = vpack.c.b16 %v4010_v5, %v4010_v5 }
 0x50d   : > { %3616 = vrot.lane.b32.xlu0 %v8385_v41, %s4896_s23  ;;  %3614 = vrot.lane.b32.xlu2 %v8386_v30, %s4896_s23  ;;  %v8396_v41 = vld [vmem:[#allocation49_spill] sm:$0xff] }
 0x50e   : > { %v3357_v21 = vpop.permute.xlu1 %3356  ;;  %v4071_v29 = vsel %vm4069_vm7, %v4015_v49, 0 }
 0x50f   : > { %3436 = vst.msk [vmem:[#allocation2 + $0x44] sm:$0xf] %vm3418_vm5, %v3357_v21  ;;  %v3355_v44 = vpop.permute.xlu0 %3354  ;;  %v3371_v43 = vpop.permute.xlu2 %3370  ;;  %4076 = vmatpush.bf16.msra.mxu0 %v4071_v29  ;;  %4760 = vmatpush.bf16.msra.mxu1 %v4071_v29  ;;  %v8397_v21 = vld [vmem:[#allocation9_spill] sm:$0xff] }
 0x510   : > { %3435 = vst.msk [vmem:[#allocation2 + $0x40] sm:$0xf] %vm3418_vm5, %v3355_v44  ;;  %4761 = vmatpush.bf16.msra.mxu2 %v4071_v29  ;;  %4762 = vmatpush.bf16.msra.mxu3 %v4071_v29  ;;  %v8399_v29 = vld [vmem:[#allocation31_spill] sm:$0xff] }
 0x511   : > { %3443 = vst.msk [vmem:[#allocation2 + $0x60] sm:$0xf] %vm3418_vm5, %v3371_v43 }
 0x514   : > { %3753 = vrot.lane.b32.xlu1 %v6985_v36, %s4897_s24  ;;  %v4664_v36 = vld [vmem:[%s8012_s2 + $0x18] sm:$0xff] }
 0x515   : > { %3751 = vrot.lane.b32.xlu0 %v6948_v42, %s4897_s24  ;;  %3628 = vrot.lane.b32.xlu2 %v8387_v60, %s4896_s23  ;;  %v8388_v42 = vld [vmem:[#allocation25_spill] sm:$0xff] }
 0x516   : > { %v3363_v18 = vpop.permute.xlu1 %3362  ;;  %4077 = vmatpush.bf16.msra.mxu0 %v4664_v36  ;;  %4763 = vmatpush.bf16.msra.mxu1 %v4664_v36 }
 0x517   : > { %3439 = vst.msk [vmem:[#allocation2 + $0x50] sm:$0xf] %vm3418_vm5, %v3363_v18  ;;  %v3361_v63 = vpop.permute.xlu0 %3360  ;;  %v3377_v40 = vpop.permute.xlu2 %3376  ;;  %4764 = vmatpush.bf16.msra.mxu2 %v4664_v36  ;;  %4765 = vmatpush.bf16.msra.mxu3 %v4664_v36 }
 0x518   : > { %3438 = vst.msk [vmem:[#allocation2 + $0x4c] sm:$0xf] %vm3418_vm5, %v3361_v63  ;;  %v4849_v63 = vld [vmem:[%s6326_s11 + $0x90] sm:$0xf] }
 0x519   : > { %3446 = vst.msk [vmem:[#allocation2 + $0x6c] sm:$0xf] %vm3418_vm5, %v3377_v40  ;;  %v8400_v40 = vld [vmem:[#allocation48_spill] sm:$0xff] }
 0x51a   : > { %4078 = vmatpush.bf16.msra.mxu0 %v4663_v9  ;;  %4766 = vmatpush.bf16.msra.mxu1 %v4663_v9 }
 0x51b   : > { %4767 = vmatpush.bf16.msra.mxu2 %v4663_v9  ;;  %4768 = vmatpush.bf16.msra.mxu3 %v4663_v9 }
 0x51c   : > { %3489 = vrot.lane.b32.xlu1 %v8388_v42, %s4895_s22 }
 0x51d   : > { %3765 = vrot.lane.b32.xlu0 %v7048_v35, %s4897_s24  ;;  %3763 = vrot.lane.b32.xlu2 %v7008_v38, %s4897_s24  ;;  %v4661_v38 = vld [vmem:[%s8012_s2] sm:$0xff] }
 0x51e   : > { %v3369_v31 = vpop.permute.xlu1 %3368  ;;  %4079 = vmatpush.bf16.msra.mxu0 %v4662_v62  ;;  %4769 = vmatpush.bf16.msra.mxu1 %v4662_v62 }
 0x51f   : > { %3442 = vst.msk [vmem:[#allocation2 + $0x5c] sm:$0xf] %vm3418_vm5, %v3369_v31  ;;  %v3367_v46 = vpop.permute.xlu0 %3366  ;;  %v3456_v35 = vpop.permute.xlu2 %3455  ;;  %4770 = vmatpush.bf16.msra.mxu2 %v4662_v62  ;;  %4771 = vmatpush.bf16.msra.mxu3 %v4662_v62 }
 0x520   : > { %3441 = vst.msk [vmem:[#allocation2 + $0x58] sm:$0xf] %vm3418_vm5, %v3367_v46  ;;  %v4851_v46 = vld [vmem:[%s6326_s11 + $0x94] sm:$0xf] }
 0x521   : > { %3551 = vst.msk [vmem:[#allocation2 + $0x4] sm:$0xf] %vm3549_vm8, %v3456_v35 }
 0x522   : > { %4080 = vmatpush.bf16.msra.mxu0 %v4661_v38  ;;  %4772 = vmatpush.bf16.msra.mxu1 %v4661_v38 }
 0x523   : > { %4773 = vmatpush.bf16.msra.mxu2 %v4661_v38  ;;  %4774 = vmatpush.bf16.msra.mxu3 %v4661_v38 }
 0x524   : > { %3503 = vrot.lane.b32.xlu1 %v8389_v37, %s4895_s22  ;;  %v8401_v37 = vld [vmem:[#allocation7_spill] sm:$0xff] }
 0x525   : > { %3501 = vrot.lane.b32.xlu0 %v8390_v19, %s4895_s22  ;;  %3491 = vrot.lane.b32.xlu2 %v4847_v24, %s4895_s22 }
 0x526   : > { %v3375_v58 = vpop.permute.xlu1 %3374 }
 0x527   : > { %3445 = vst.msk [vmem:[#allocation2 + $0x68] sm:$0xf] %vm3418_vm5, %v3375_v58  ;;  %v3373_v3 = vpop.permute.xlu0 %3372  ;;  %v3744_v28 = vpop.permute.xlu2 %3743 }
 0x528   : > { %3444 = vst.msk [vmem:[#allocation2 + $0x64] sm:$0xf] %vm3418_vm5, %v3373_v3  ;;  %v4852_v3 = vld [vmem:[%s6326_s11 + $0x6c] sm:$0xf] }
 0x52c   : > { %3654 = vrot.lane.b32.xlu1 %v6849_v4, %s4896_s23 }
 0x52d   : > { %3644 = vrot.lane.b32.xlu0 %v8391_v47, %s4896_s23  ;;  %3642 = vrot.lane.b32.xlu2 %v8392_v39, %s4896_s23  ;;  %v8404_v47 = vld [vmem:[#allocation35_spill] sm:$0xff]  ;;  %v4853_v39 = vld [vmem:[%s6326_s11 + $0x70] sm:$0xf] }
 0x52e   : > { %v3454_v55 = vpop.permute.xlu1 %3453 }
 0x52f   : > { %3550 = vst.msk [vmem:[#allocation2] sm:$0xf] %vm3549_vm8, %v3454_v55  ;;  %v3379_v23 = vpop.permute.xlu0 %3378  ;;  %v3460_v33 = vpop.permute.xlu2 %3459 }
 0x530   : > { %3447 = vst.msk [vmem:[#allocation2 + $0x70] sm:$0xf] %vm3418_vm5, %v3379_v23 }
 0x531   : > { %3553 = vst.msk [vmem:[#allocation2 + $0xc] sm:$0xf] %vm3549_vm8, %v3460_v33 }
 0x534   : > { %3781 = vrot.lane.b32.xlu1 %v8383_v50, %s4897_s24  ;;  %v8393_v50 = vld [vmem:[#allocation39_spill] sm:$0xff] }
 0x535   : > { %3779 = vrot.lane.b32.xlu0 %v8380_v7, %s4897_s24  ;;  %3656 = vrot.lane.b32.xlu2 %v6889_v14, %s4896_s23 }
 0x536   : > { %v3609_v4 = vpop.permute.xlu1 %3608 }
 0x537   : > { %3704 = vst.msk [vmem:[#allocation2 + $0x4] sm:$0xf] %vm3702_vm9, %v3609_v4  ;;  %v3607_v32 = vpop.permute.xlu0 %3606  ;;  %v3611_v16 = vpop.permute.xlu2 %3610 }
 0x538   : > { %3703 = vst.msk [vmem:[#allocation2] sm:$0xf] %vm3702_vm9, %v3607_v32 }
 0x539   : > { %3840 = vst.msk [vmem:[#allocation2] sm:$0xf] %vm3839_vm10, %v3744_v28  ;;  %v8403_v28 = vld [vmem:[#allocation33_spill] sm:$0xff] }
 0x53c   : > { %3465 = vrot.lane.b32.xlu1 %v8393_v50, %s4895_s22  ;;  %v8405_v50 = vld [vmem:[#allocation38_spill] sm:$0xff] }
 0x53d   : > { %3793 = vrot.lane.b32.xlu0 %v7171_v45, %s4897_s24  ;;  %3791 = vrot.lane.b32.xlu2 %v7175_v22, %s4897_s24 }
 0x53e   : > { %v3458_v7 = vpop.permute.xlu1 %3457 }
 0x53f   : > { %3552 = vst.msk [vmem:[#allocation2 + $0x8] sm:$0xf] %vm3549_vm8, %v3458_v7  ;;  %v3746_v15 = vpop.permute.xlu0 %3745  ;;  %v3625_v14 = vpop.permute.xlu2 %3624 }
 0x540   : > { %3841 = vst.msk [vmem:[#allocation2 + $0x4] sm:$0xf] %vm3839_vm10, %v3746_v15 }
 0x541   : > { %3705 = vst.msk [vmem:[#allocation2 + $0x8] sm:$0xf] %vm3702_vm9, %v3611_v16 }
 0x544   : > { %3479 = vrot.lane.b32.xlu1 %v8394_v26, %s4895_s22  ;;  %v4855_v26 = vld [vmem:[%s6326_s11 + $0x9c] sm:$0xf] }
 0x545   : > { %3477 = vrot.lane.b32.xlu0 %v4848_v10, %s4895_s22  ;;  %3467 = vrot.lane.b32.xlu2 %v8395_v0, %s4895_s22  ;;  %v8406_v10 = vld [vmem:[#allocation10_spill] sm:$0xff] }
 0x546   : > { %v3472_v51 = vpop.permute.xlu1 %3471  ;;  %v8408_v0 = vld [vmem:[#allocation18_spill] sm:$0xff] }
 0x547   : > { %3559 = vst.msk [vmem:[#allocation2 + $0x24] sm:$0xf] %vm3549_vm8, %v3472_v51  ;;  %v3470_v45 = vpop.permute.xlu0 %3469  ;;  %v4645_v57 = vld [vmem:[#allocation2] sm:$0xff]  ;;  %v3760_v22 = vpop.permute.xlu2 %3759 }
 0x548   : > { %3558 = vst.msk [vmem:[#allocation2 + $0x20] sm:$0xf] %vm3549_vm8, %v3470_v45  ;;  %4626 = vmatmul.msk.bf16.vlgmr.msra.gmra.mxu0 %vm4020_vm11, %v4645_v57  ;;  %v8407_v51 = vld [vmem:[#allocation11_spill] sm:$0xff] }
 0x549   : > { %3712 = vst.msk [vmem:[#allocation2 + $0x24] sm:$0xf] %vm3702_vm9, %v3625_v14 }
 0x54c   : > { %3630 = vrot.lane.b32.xlu1 %v8396_v41, %s4896_s23 }
 0x54d   : > { %3620 = vrot.lane.b32.xlu0 %v8397_v21, %s4896_s23  ;;  %3618 = vrot.lane.b32.xlu2 %v8398_v56, %s4896_s23  ;;  %v4856_v56 = vld [vmem:[%s6326_s11 + $0xc0] sm:$0xf] }
 0x54e   : > { %v3623_v44 = vpop.permute.xlu1 %3622 }
 0x54f   : > { %3711 = vst.msk [vmem:[#allocation2 + $0x20] sm:$0xf] %vm3702_vm9, %v3623_v44  ;;  %v3613_v30 = vpop.permute.xlu0 %3612  ;;  %v3488_v43 = vpop.permute.xlu2 %3487  ;;  %v3320_v44 = vrot.slane %v7421_v8, 5 }
 0x550   : > { %3706 = vst.msk [vmem:[#allocation2 + $0xc] sm:$0xf] %vm3702_vm9, %v3613_v30 }
 0x551   : > { %3848 = vst.msk [vmem:[#allocation2 + $0x20] sm:$0xf] %vm3839_vm10, %v3760_v22  ;;  %v3317_v22 = vrot.slane %v8408_v0, 5 }
 0x552   : > { %3567 = vst.msk [vmem:[#allocation2 + $0x44] sm:$0xf] %vm3549_vm8, %v3488_v43  ;;  %v4544_v43 = vrot.slane %v4856_v56, 9 }
 0x553   : > { %v3319_v21 = vrot.slane %v3317_v22, 4 }
 0x554   : > { %3757 = vrot.lane.b32.xlu1 %v6973_v11, %s4897_s24  ;;  %v3318_v8 = vsel %vm5377_vm6, %v4544_v43, %v3317_v22 }
 0x555   : > { %3755 = vrot.lane.b32.xlu0 %v6977_v6, %s4897_s24  ;;  %3632 = vrot.lane.b32.xlu2 %v8399_v29, %s4896_s23 }
 0x556   : > { %v3750_v5 = vpop.permute.xlu1 %3749 }
 0x557   : > { %3843 = vst.msk [vmem:[#allocation2 + $0xc] sm:$0xf] %vm3839_vm10, %v3750_v5  ;;  %v3748_v49 = vpop.permute.xlu0 %3747  ;;  %v3776_v18 = vpop.permute.xlu2 %3775 }
 0x558   : > { %3842 = vst.msk [vmem:[#allocation2 + $0x8] sm:$0xf] %vm3839_vm10, %v3748_v49  ;;  %v2096_v49 = vld [vmem:[%s6326_s11 + $0xcc] sm:$0xf] }
 0x55c   : > { %3493 = vrot.lane.b32.xlu1 %v4849_v63, %s4895_s22 }
 0x55d   : > { %3769 = vrot.lane.b32.xlu0 %v8379_v52, %s4897_s24  ;;  %3767 = vrot.lane.b32.xlu2 %v7040_v2, %s4897_s24  ;;  %v4850_v52 = vld [vmem:[%s6326_s11 + $0xb4] sm:$0xf] }
 0x55e   : > { %v3486_v11 = vpop.permute.xlu1 %3485 }
 0x55f   : > { %3566 = vst.msk [vmem:[#allocation2 + $0x40] sm:$0xf] %vm3549_vm8, %v3486_v11  ;;  %v3762_v6 = vpop.permute.xlu0 %3761  ;;  %v4646_v60 = vld [vmem:[#allocation2 + $0x8] sm:$0xff]  ;;  %v3464_v36 = vpop.permute.xlu2 %3463  ;;  %v3583_v11 = vshrl.u32 %v2096_v49, 16 }
 0x560   : > { %3849 = vst.msk [vmem:[#allocation2 + $0x24] sm:$0xf] %vm3839_vm10, %v3762_v6  ;;  %4627 = vmatmul.msk.bf16.gmra.mxu0 %vm4020_vm11, %v4646_v60  ;;  %v3586_v6 = vshll.u32 %v2096_v49, 16 }
 0x561   : > { %3555 = vst.msk [vmem:[#allocation2 + $0x14] sm:$0xf] %vm3549_vm8, %v3464_v36 }
 0x564   : > { %3507 = vrot.lane.b32.xlu1 %v8400_v40, %s4895_s22  ;;  %v3585_v40 = vrot.slane %v3583_v11, 4 }
 0x565   : > { %3505 = vrot.lane.b32.xlu0 %v4850_v52, %s4895_s22  ;;  %3495 = vrot.lane.b32.xlu2 %v4851_v46, %s4895_s22  ;;  %v3588_v52 = vrot.slane %v3586_v6, 5 }
 0x566   : > { %v3641_v42 = vpop.permute.xlu1 %3640 }
 0x567   : > { %3720 = vst.msk [vmem:[#allocation2 + $0x44] sm:$0xf] %vm3702_vm9, %v3641_v42  ;;  %v3639_v9 = vpop.permute.xlu0 %3638  ;;  %v4649_v31 = vld [vmem:[#allocation2 + $0x20] sm:$0xff]  ;;  %v3615_v2 = vpop.permute.xlu2 %3614  ;;  %v2098_v42 = vld [vmem:[%s6326_s11 + $0xd4] sm:$0x1] }
 0x568   : > { %3719 = vst.msk [vmem:[#allocation2 + $0x40] sm:$0xf] %vm3702_vm9, %v3639_v9  ;;  %4630 = vmatmul.msk.bf16.vlgmr.msra.gmra.mxu1 %vm4020_vm11, %v4649_v31 }
 0x569   : > { %3856 = vst.msk [vmem:[#allocation2 + $0x40] sm:$0xf] %vm3839_vm10, %v3776_v18 }
 0x56c   : > { %3658 = vrot.lane.b32.xlu1 %v6882_v20, %s4896_s23 }
 0x56d   : > { %3648 = vrot.lane.b32.xlu0 %v8377_v1, %s4896_s23  ;;  %3646 = vrot.lane.b32.xlu2 %v8401_v37, %s4896_s23  ;;  %v3589_v37 = vor.u32 %v3588_v52, %v3585_v40 }
 0x56e   : > { %v3462_v62 = vpop.permute.xlu1 %3461 }
 0x56f   : > { %3554 = vst.msk [vmem:[#allocation2 + $0x10] sm:$0xf] %vm3549_vm8, %v3462_v62  ;;  %v3778_v35 = vpop.permute.xlu0 %3777  ;;  %v3629_v38 = vpop.permute.xlu2 %3628 }
 0x570   : > { %3857 = vst.msk [vmem:[#allocation2 + $0x44] sm:$0xf] %vm3839_vm10, %v3778_v35  ;;  %v3602_v35 = vshll.u32 %v2098_v42, 16 }
 0x571   : > { %3707 = vst.msk [vmem:[#allocation2 + $0x10] sm:$0xf] %vm3702_vm9, %v3615_v2 }
 0x574   : > { %3785 = vrot.lane.b32.xlu1 %v7148_v54, %s4897_s24  ;;  %v8402_v54 = vld [vmem:[#allocation28_spill] sm:$0xff] }
 0x575   : > { %3783 = vrot.lane.b32.xlu0 %v7155_v12, %s4897_s24  ;;  %3660 = vrot.lane.b32.xlu2 %v6878_v34, %s4896_s23 }
 0x576   : > { %v3476_v20 = vpop.permute.xlu1 %3475 }
 0x577   : > { %3561 = vst.msk [vmem:[#allocation2 + $0x2c] sm:$0xf] %vm3549_vm8, %v3476_v20  ;;  %v3474_v1 = vpop.permute.xlu0 %3473  ;;  %v4653_v19 = vld [vmem:[#allocation2 + $0x40] sm:$0xff]  ;;  %v3764_v58 = vpop.permute.xlu2 %3763  ;;  %v3604_v20 = vrot.slane %v3602_v35, 5 }
 0x578   : > { %3560 = vst.msk [vmem:[#allocation2 + $0x28] sm:$0xf] %vm3549_vm8, %v3474_v1  ;;  %4634 = vmatmul.msk.bf16.vlgmr.msra.gmra.mxu2 %vm4020_vm11, %v4653_v19  ;;  %v3590_v19 = vrot.slane %v3589_v37, 4 }
 0x579   : > { %3714 = vst.msk [vmem:[#allocation2 + $0x2c] sm:$0xf] %vm3702_vm9, %v3629_v38 }
 0x57c   : > { %3481 = vrot.lane.b32.xlu1 %v4852_v3, %s4895_s22 }
 0x57d   : > { %3797 = vrot.lane.b32.xlu0 %v8402_v54, %s4897_s24  ;;  %3795 = vrot.lane.b32.xlu2 %v7205_v13, %s4897_s24 }
 0x57e   : > { %v3627_v12 = vpop.permute.xlu1 %3626 }
 0x57f   : > { %3713 = vst.msk [vmem:[#allocation2 + $0x28] sm:$0xf] %vm3702_vm9, %v3627_v12  ;;  %v3617_v24 = vpop.permute.xlu0 %3616  ;;  %v3492_v34 = vpop.permute.xlu2 %3491 }
 0x580   : > { %3708 = vst.msk [vmem:[#allocation2 + $0x14] sm:$0xf] %vm3702_vm9, %v3617_v24 }
 0x581   : > { %3850 = vst.msk [vmem:[#allocation2 + $0x28] sm:$0xf] %vm3839_vm10, %v3764_v58 }
 0x582   : > { %3569 = vst.msk [vmem:[#allocation2 + $0x4c] sm:$0xf] %vm3549_vm8, %v3492_v34 }
 0x584   : > { %3636 = vrot.lane.b32.xlu1 %v8403_v28, %s4896_s23 }
 0x585   : > { %3634 = vrot.lane.b32.xlu0 %v8404_v47, %s4896_s23  ;;  %3483 = vrot.lane.b32.xlu2 %v4853_v39, %s4895_s22  ;;  %v3741_v47 = vrot.slane %v2098_v42, 5 }
 0x586   : > { %v3754_v55 = vpop.permute.xlu1 %3753 }
 0x587   : > { %3845 = vst.msk [vmem:[#allocation2 + $0x14] sm:$0xf] %vm3839_vm10, %v3754_v55  ;;  %v3752_v23 = vpop.permute.xlu0 %3751  ;;  %v3643_v13 = vpop.permute.xlu2 %3642 }
 0x588   : > { %3844 = vst.msk [vmem:[#allocation2 + $0x10] sm:$0xf] %vm3839_vm10, %v3752_v23  ;;  %v4545_v23 = vrot.slane %v2096_v49, 9 }
 0x58c   : > { %3380 = vrot.lane.b32.xlu1 %v8402_v54, %s4894_s17 }
 0x58d   : > { %3773 = vrot.lane.b32.xlu0 %v7079_v48, %s4897_s24  ;;  %3771 = vrot.lane.b32.xlu2 %v8378_v61, %s4897_s24  ;;  %v4854_v48 = vld [vmem:[%s6326_s11 + $0xa0] sm:$0xf] }
 0x58e   : > { %v3490_v33 = vpop.permute.xlu1 %3489 }
 0x58f   : > { %3568 = vst.msk [vmem:[#allocation2 + $0x48] sm:$0xf] %vm3549_vm8, %v3490_v33  ;;  %v3766_v4 = vpop.permute.xlu0 %3765  ;;  %v4647_v32 = vld [vmem:[#allocation2 + $0x10] sm:$0xff]  ;;  %v3657_v16 = vpop.permute.xlu2 %3656 }
 0x590   : > { %3851 = vst.msk [vmem:[#allocation2 + $0x2c] sm:$0xf] %vm3839_vm10, %v3766_v4  ;;  %4628 = vmatmul.msk.bf16.gmra.mxu0 %vm4020_vm11, %v4647_v32 }
 0x591   : > { %3721 = vst.msk [vmem:[#allocation2 + $0x48] sm:$0xf] %vm3702_vm9, %v3643_v13 }
 0x594   : > { %3509 = vrot.lane.b32.xlu1 %v8405_v50, %s4895_s22 }
 0x595   : > { %3499 = vrot.lane.b32.xlu0 %v4854_v48, %s4895_s22  ;;  %3497 = vrot.lane.b32.xlu2 %v4855_v26, %s4895_s22 }
 0x596   : > { %v3504_v7 = vpop.permute.xlu1 %3503 }
 0x597   : > { %3575 = vst.msk [vmem:[#allocation2 + $0x64] sm:$0xf] %vm3549_vm8, %v3504_v7  ;;  %v3502_v15 = vpop.permute.xlu0 %3501  ;;  %v4650_v14 = vld [vmem:[#allocation2 + $0x28] sm:$0xff]  ;;  %v3792_v61 = vpop.permute.xlu2 %3791 }
 0x598   : > { %3574 = vst.msk [vmem:[#allocation2 + $0x60] sm:$0xf] %vm3549_vm8, %v3502_v15  ;;  %4631 = vmatmul.msk.bf16.gmra.mxu1 %vm4020_vm11, %v4650_v14 }
 0x599   : > { %3728 = vst.msk [vmem:[#allocation2 + $0x64] sm:$0xf] %vm3702_vm9, %v3657_v16 }
 0x59c   : > { %3652 = vrot.lane.b32.xlu1 %v8406_v10, %s4896_s23 }
 0x59d   : > { %3650 = vrot.lane.b32.xlu0 %v8407_v51, %s4896_s23  ;;  %3511 = vrot.lane.b32.xlu2 %v8408_v0, %s4895_s22 }
 0x59e   : > { %v3655_v45 = vpop.permute.xlu1 %3654 }
 0x59f   : > { %3727 = vst.msk [vmem:[#allocation2 + $0x60] sm:$0xf] %vm3702_vm9, %v3655_v45  ;;  %v3645_v57 = vpop.permute.xlu0 %3644  ;;  %v3468_v41 = vpop.permute.xlu2 %3467 }
 0x5a0   : > { %3722 = vst.msk [vmem:[#allocation2 + $0x4c] sm:$0xf] %vm3702_vm9, %v3645_v57 }
 0x5a1   : > { %3864 = vst.msk [vmem:[#allocation2 + $0x60] sm:$0xf] %vm3839_vm10, %v3792_v61 }
 0x5a2   : > { %3557 = vst.msk [vmem:[#allocation2 + $0x1c] sm:$0xf] %vm3549_vm8, %v3468_v41 }
 0x5a4   : > { %3787 = vrot.lane.b32.xlu1 %v8384_v53, %s4897_s24  ;;  %v2097_v53 = vld [vmem:[%s6326_s11 + $0xd0] sm:$0xf] }
 0x5a5   : > { %3664 = vrot.lane.b32.xlu0 %v7439_v25, %s4896_s23  ;;  %3662 = vrot.lane.b32.xlu2 %v7443_v17, %s4896_s23  ;;  %v3321_v25 = vsel %vm5377_vm6, %v3319_v21, %v3320_v44  ;;  %v3596_v63 = vshrl.u32 %v2097_v53, 16  ;;  %v3592_v60 = vshll.u32 %v2097_v53, 16  ;;  %v3738_v24 = vrot.slane %v2097_v53, 5 }
 0x5a6   : > { %v3782_v30 = vpop.permute.xlu1 %3781 }
 0x5a7   : > { %3859 = vst.msk [vmem:[#allocation2 + $0x4c] sm:$0xf] %vm3839_vm10, %v3782_v30  ;;  %v3780_v5 = vpop.permute.xlu0 %3779  ;;  %v3619_v18 = vpop.permute.xlu2 %3618  ;;  %v3598_v17 = vrot.slane %v3596_v63, 4  ;;  %v3594_v46 = vrot.slane %v3592_v60, 5  ;;  %v3740_v28 = vrot.slane %v3738_v24, 4  ;;  %v3739_v13 = vsel %vm5377_vm6, %v4545_v23, %v3738_v24 }
 0x5a8   : > { %3858 = vst.msk [vmem:[#allocation2 + $0x48] sm:$0xf] %vm3839_vm10, %v3780_v5 }
 0x5a9   : > { %v3599_v62 = vor.u32 %v3598_v17, %v3594_v46  ;;  %v3595_v12 = vsel %vm4990_vm2, %v3590_v19, %v3594_v46  ;;  %v3742_v39 = vsel %vm5377_vm6, %v3740_v28, %v3741_v47 }
 0x5ab   : > { %v3600_v38 = vrot.slane %v3599_v62, 4 }
 0x5ac   : > { %3801 = vrot.lane.b32.xlu1 %v3321_v25, %s4897_s24 }
 0x5ad   : > { %3799 = vrot.lane.b32.xlu0 %v3318_v8, %s4897_s24  ;;  %3789 = vrot.lane.b32.xlu2 %v7183_v59, %s4897_s24  ;;  %v3605_v3 = vsel %vm4990_vm2, %v3600_v38, %v3604_v20 }
 0x5ae   : > { %v3466_v36 = vpop.permute.xlu1 %3465 }
 0x5af   : > { %3556 = vst.msk [vmem:[#allocation2 + $0x18] sm:$0xf] %vm3549_vm8, %v3466_v36  ;;  %v3794_v9 = vpop.permute.xlu0 %3793  ;;  %v4654_v31 = vld [vmem:[#allocation2 + $0x48] sm:$0xff]  ;;  %v3633_v2 = vpop.permute.xlu2 %3632 }
 0x5b0   : > { %3865 = vst.msk [vmem:[#allocation2 + $0x64] sm:$0xf] %vm3839_vm10, %v3794_v9  ;;  %4635 = vmatmul.msk.bf16.gmra.mxu2 %vm4020_vm11, %v4654_v31 }
 0x5b1   : > { %3709 = vst.msk [vmem:[#allocation2 + $0x18] sm:$0xf] %vm3702_vm9, %v3619_v18 }
 0x5b4   : > { %3513 = vrot.lane.b32.xlu1 %v2096_v49, %s4895_s22 }
 0x5b5   : > { %3384 = vrot.lane.b32.xlu0 %v3321_v25, %s4894_s17  ;;  %3382 = vrot.lane.b32.xlu2 %v3318_v8, %s4894_s17 }
 0x5b6   : > { %v3480_v1 = vpop.permute.xlu1 %3479 }
 0x5b7   : > { %3563 = vst.msk [vmem:[#allocation2 + $0x34] sm:$0xf] %vm3549_vm8, %v3480_v1  ;;  %v3478_v59 = vpop.permute.xlu0 %3477  ;;  %v4657_v58 = vld [vmem:[#allocation2 + $0x60] sm:$0xff]  ;;  %v3768_v54 = vpop.permute.xlu2 %3767 }
 0x5b8   : > { %3562 = vst.msk [vmem:[#allocation2 + $0x30] sm:$0xf] %vm3549_vm8, %v3478_v59  ;;  %4638 = vmatmul.msk.bf16.vlgmr.msra.gmra.mxu3 %vm4020_vm11, %v4657_v58 }
 0x5b9   : > { %3716 = vst.msk [vmem:[#allocation2 + $0x34] sm:$0xf] %vm3702_vm9, %v3633_v2 }
 0x5bc   : > { %3668 = vrot.lane.b32.xlu1 %v3605_v3, %s4896_s23 }
 0x5bd   : > { %3666 = vrot.lane.b32.xlu0 %v3595_v12, %s4896_s23  ;;  %3515 = vrot.lane.b32.xlu2 %v2097_v53, %s4895_s22  ;;  %s300_s23 = scalar_lea.vmem %s8015_s5, %s8415_s18 }
 0x5be   : > { %v3631_v34 = vpop.permute.xlu1 %3630 }
 0x5bf   : > { %3715 = vst.msk [vmem:[#allocation2 + $0x30] sm:$0xf] %vm3702_vm9, %v3631_v34  ;;  %v3621_v55 = vpop.permute.xlu0 %3620  ;;  %v3496_v27 = vpop.permute.xlu2 %3495 }
 0x5c0   : > { %3710 = vst.msk [vmem:[#allocation2 + $0x1c] sm:$0xf] %vm3702_vm9, %v3621_v55 }
 0x5c1   : > { %3852 = vst.msk [vmem:[#allocation2 + $0x30] sm:$0xf] %vm3839_vm10, %v3768_v54 }
 0x5c2   : > { %3571 = vst.msk [vmem:[#allocation2 + $0x54] sm:$0xf] %vm3549_vm8, %v3496_v27 }
 0x5c5   : > { %3805 = vrot.lane.b32.xlu0 %v3742_v39, %s4897_s24  ;;  %v4082_v4 = vpop.f32.mrf.mxu0  ;;  %3803 = vrot.lane.b32.xlu2 %v3739_v13, %s4897_s24 }
 0x5c6   : > { %v3758_v33 = vpop.permute.xlu1 %3757  ;;  %v4264_v7 = vmul.f32 %v4082_v4, %v4082_v4 }
 0x5c7   : > { %3847 = vst.msk [vmem:[#allocation2 + $0x1c] sm:$0xf] %vm3839_vm10, %v3758_v33  ;;  %v3756_v32 = vpop.permute.xlu0 %3755  ;;  %v3647_v16 = vpop.permute.xlu2 %3646 }
 0x5c8   : > { %3846 = vst.msk [vmem:[#allocation2 + $0x18] sm:$0xf] %vm3839_vm10, %v3756_v32 }
 0x5cd   : > { %v4084_v48 = vpop.f32.mrf.mxu0 }
 0x5ce   : > { %v3494_v50 = vpop.permute.xlu1 %3493  ;;  %v4668_v14 = vpack.c.bf16 %v4084_v48, %v4082_v4  ;;  %v4226_v26 = vadd.f32 %v4084_v48, %v4082_v4  ;;  %v4265_v61 = vmul.f32 %v4084_v48, %v4084_v48 }
 0x5cf   : > { %3570 = vst.msk [vmem:[#allocation2 + $0x50] sm:$0xf] %vm3549_vm8, %v3494_v50  ;;  %v3770_v15 = vpop.permute.xlu0 %3769  ;;  %v4648_v10 = vld [vmem:[#allocation2 + $0x18] sm:$0xff]  ;;  %v3661_v45 = vpop.permute.xlu2 %3660 }
 0x5d0   : > { %3853 = vst.msk [vmem:[#allocation2 + $0x34] sm:$0xf] %vm3839_vm10, %v3770_v15  ;;  %v4296_v51 = vadd.f32 %v4265_v61, %v4264_v7  ;;  %4629 = vmatmul.msk.bf16.gmra.mxu0 %vm4020_vm11, %v4648_v10 }
 0x5d1   : > { %4669 = vst [vmem:[%s7874_s13] sm:$0xff] %v4668_v14  }
 0x5d2   : > { %3723 = vst.msk [vmem:[#allocation2 + $0x50] sm:$0xf] %vm3702_vm9, %v3647_v16 }
 0x5d6   : > { %v3508_v57 = vpop.permute.xlu1 %3507 }
 0x5d7   : > { %3577 = vst.msk [vmem:[#allocation2 + $0x6c] sm:$0xf] %vm3549_vm8, %v3508_v57  ;;  %v3506_v0 = vpop.permute.xlu0 %3505  ;;  %v4651_v22 = vld [vmem:[#allocation2 + $0x30] sm:$0xff]  ;;  %v3796_v41 = vpop.permute.xlu2 %3795 }
 0x5d8   : > { %3576 = vst.msk [vmem:[#allocation2 + $0x68] sm:$0xf] %vm3549_vm8, %v3506_v0  ;;  %4632 = vmatmul.msk.bf16.gmra.mxu1 %vm4020_vm11, %v4651_v22 }
 0x5d9   : > { %3730 = vst.msk [vmem:[#allocation2 + $0x6c] sm:$0xf] %vm3702_vm9, %v3661_v45 }
 0x5dd   : > { %v4087_v44 = vpop.f32.mrf.mxu0 }
 0x5de   : > { %v3659_v21 = vpop.permute.xlu1 %3658  ;;  %v4227_v56 = vadd.f32 %v4226_v26, %v4087_v44  ;;  %v4266_v43 = vmul.f32 %v4087_v44, %v4087_v44 }
 0x5df   : > { %3729 = vst.msk [vmem:[#allocation2 + $0x68] sm:$0xf] %vm3702_vm9, %v3659_v21  ;;  %v3649_v30 = vpop.permute.xlu0 %3648  ;;  %v3484_v49 = vpop.permute.xlu2 %3483 }
 0x5e0   : > { %3724 = vst.msk [vmem:[#allocation2 + $0x54] sm:$0xf] %vm3702_vm9, %v3649_v30  ;;  %v4297_v5 = vadd.f32 %v4296_v51, %v4266_v43 }
 0x5e1   : > { %3866 = vst.msk [vmem:[#allocation2 + $0x68] sm:$0xf] %vm3839_vm10, %v3796_v41 }
 0x5e2   : > { %3565 = vst.msk [vmem:[#allocation2 + $0x3c] sm:$0xf] %vm3549_vm8, %v3484_v49 }
 0x5e5   : > { %v7889_v29 = vpop.f32.mrf.mxu1  ;;  %v4089_v18 = vpop.f32.mrf.mxu0 }
 0x5e6   : > { %v3786_v53 = vpop.permute.xlu1 %3785  ;;  %v4673_v63 = vpack.c.bf16 %v4089_v18, %v4087_v44  ;;  %v4228_v8 = vadd.f32 %v4227_v56, %v4089_v18  ;;  %v4267_v11 = vmul.f32 %v4089_v18, %v4089_v18 }
 0x5e7   : > { %3861 = vst.msk [vmem:[#allocation2 + $0x54] sm:$0xf] %vm3839_vm10, %v3786_v53  ;;  %v3784_v25 = vpop.permute.xlu0 %3783  ;;  %v3772_v6 = vpop.permute.xlu2 %3771 }
 0x5e8   : > { %3860 = vst.msk [vmem:[#allocation2 + $0x50] sm:$0xf] %vm3839_vm10, %v3784_v25  ;;  %v4298_v60 = vadd.f32 %v4297_v5, %v4267_v11 }
 0x5e9   : > { %4745 = vst [vmem:[%s7874_s13 + $0x8] sm:$0xff] %v4673_v63  }
 0x5ed   : > { %v7894_v36 = vpop.f32.mrf.mxu1 }
 0x5ee   : > { %v3482_v17 = vpop.permute.xlu1 %3481  ;;  %v4688_v40 = vpack.c.bf16 %v7894_v36, %v7889_v29 }
 0x5ef   : > { %3564 = vst.msk [vmem:[#allocation2 + $0x38] sm:$0xf] %vm3549_vm8, %v3482_v17  ;;  %v3798_v52 = vpop.permute.xlu0 %3797  ;;  %v4655_v42 = vld [vmem:[#allocation2 + $0x50] sm:$0xff]  ;;  %v3498_v9 = vpop.permute.xlu2 %3497 }
 0x5f0   : > { %3867 = vst.msk [vmem:[#allocation2 + $0x6c] sm:$0xf] %vm3839_vm10, %v3798_v52  ;;  %4636 = vmatmul.msk.bf16.gmra.mxu2 %vm4020_vm11, %v4655_v42 }
 0x5f1   : > { %4748 = vst [vmem:[%s7874_s13 + $0x20] sm:$0xff] %v4688_v40   ;;  %v4272_v40 = vmul.f32 %v7889_v29, %v7889_v29 }
 0x5f2   : > { %3572 = vst.msk [vmem:[#allocation2 + $0x58] sm:$0xf] %vm3549_vm8, %v3498_v9  ;;  %v4273_v9 = vmul.f32 %v7894_v36, %v7894_v36 }
 0x5f6   : > { %v3637_v31 = vpop.permute.xlu1 %3636 }
 0x5f7   : > { %3718 = vst.msk [vmem:[#allocation2 + $0x3c] sm:$0xf] %vm3702_vm9, %v3637_v31  ;;  %v3635_v46 = vpop.permute.xlu0 %3634  ;;  %v4658_v2 = vld [vmem:[#allocation2 + $0x68] sm:$0xff]  ;;  %v3512_v62 = vpop.permute.xlu2 %3511 }
 0x5f8   : > { %3717 = vst.msk [vmem:[#allocation2 + $0x38] sm:$0xf] %vm3702_vm9, %v3635_v46  ;;  %4639 = vmatmul.msk.bf16.gmra.mxu3 %vm4020_vm11, %v4658_v2 }
 0x5f9   : > { %3854 = vst.msk [vmem:[#allocation2 + $0x38] sm:$0xf] %vm3839_vm10, %v3772_v6 }
 0x5fb   : > { %v7907_v35 = vpop.f32.mrf.mxu2 }
 0x5fe   : > { %v3381_v37 = vpop.permute.xlu1 %3380 }
 0x5ff   : > { %3448 = vst.msk [vmem:[#allocation2 + $0x74] sm:$0xf] %vm3418_vm5, %v3381_v37  ;;  %v3774_v38 = vpop.permute.xlu0 %3773  ;;  %v3663_v20 = vpop.permute.xlu2 %3662 }
 0x600   : > { %3855 = vst.msk [vmem:[#allocation2 + $0x3c] sm:$0xf] %vm3839_vm10, %v3774_v38 }
 0x601   : > { %3579 = vst.msk [vmem:[#allocation2 + $0x74] sm:$0xf] %vm3549_vm8, %v3512_v62 }
 0x603   : > { %v7912_v1 = vpop.f32.mrf.mxu2 }
 0x604   : > { %v4708_v19 = vpack.c.bf16 %v7912_v1, %v7907_v35 }
 0x606   : > { %v3510_v59 = vpop.permute.xlu1 %3509  ;;  %4752 = vst [vmem:[%s7874_s13 + $0x40] sm:$0xff] %v4708_v19  }
 0x607   : > { %v3500_v58 = vpop.permute.xlu0 %3499  ;;  %v4652_v3 = vld [vmem:[#allocation2 + $0x38] sm:$0xff]  ;;  %3578 = vst.msk [vmem:[#allocation2 + $0x70] sm:$0xf] %vm3549_vm8, %v3510_v59  ;;  %v3790_v54 = vpop.permute.xlu2 %3789 }
 0x608   : > { %3573 = vst.msk [vmem:[#allocation2 + $0x5c] sm:$0xf] %vm3549_vm8, %v3500_v58  ;;  %4633 = vmatmul.msk.bf16.gmra.mxu1 %vm4020_vm11, %v4652_v3 }
 0x609   : > { %3731 = vst.msk [vmem:[#allocation2 + $0x70] sm:$0xf] %vm3702_vm9, %v3663_v20 }
 0x60d   : > { %v4092_v24 = vpop.f32.mrf.mxu0 }
 0x60e   : > { %v3653_v12 = vpop.permute.xlu1 %3652  ;;  %v4229_v28 = vadd.f32 %v4228_v8, %v4092_v24  ;;  %v4268_v47 = vmul.f32 %v4092_v24, %v4092_v24 }
 0x60f   : > { %3726 = vst.msk [vmem:[#allocation2 + $0x5c] sm:$0xf] %vm3702_vm9, %v3653_v12  ;;  %v3651_v34 = vpop.permute.xlu0 %3650  ;;  %v3383_v23 = vpop.permute.xlu2 %3382 }
 0x610   : > { %3725 = vst.msk [vmem:[#allocation2 + $0x58] sm:$0xf] %vm3702_vm9, %v3651_v34  ;;  %v4299_v55 = vadd.f32 %v4298_v60, %v4268_v47 }
 0x611   : > { %3863 = vst.msk [vmem:[#allocation2 + $0x5c] sm:$0xf] %vm3839_vm10, %v3790_v54 }
 0x612   : > { %3449 = vst.msk [vmem:[#allocation2 + $0x78] sm:$0xf] %vm3418_vm5, %v3383_v23 }
 0x615   : > { %v7925_v39 = vpop.f32.mrf.mxu1  ;;  %v4094_v33 = vpop.f32.mrf.mxu0 }
 0x616   : > { %v3788_v27 = vpop.permute.xlu1 %3787  ;;  %v4678_v4 = vpack.c.bf16 %v4094_v33, %v4092_v24  ;;  %v4230_v32 = vadd.f32 %v4229_v28, %v4094_v33  ;;  %v4269_v16 = vmul.f32 %v4094_v33, %v4094_v33  ;;  %v4274_v2 = vmul.f32 %v7925_v39, %v7925_v39 }
 0x617   : > { %3862 = vst.msk [vmem:[#allocation2 + $0x58] sm:$0xf] %vm3839_vm10, %v3788_v27  ;;  %v3665_v13 = vpop.permute.xlu0 %3664  ;;  %v3516_v61 = vpop.permute.xlu2 %3515 }
 0x618   : > { %3732 = vst.msk [vmem:[#allocation2 + $0x74] sm:$0xf] %vm3702_vm9, %v3665_v13  ;;  %v4300_v50 = vadd.f32 %v4299_v55, %v4269_v16 }
 0x619   : > { %4746 = vst [vmem:[%s7874_s13 + $0x10] sm:$0xff] %v4678_v4  }
 0x61d   : > { %v4109_v7 = vpop.f32.mrf.mxu1 }
 0x61e   : > { %v3802_v48 = vpop.permute.xlu1 %3801  ;;  %v4656_v15 = vld [vmem:[#allocation2 + $0x58] sm:$0xff]  ;;  %v4693_v14 = vpack.c.bf16 %v4109_v7, %v7925_v39  ;;  %v4275_v20 = vmul.f32 %v4109_v7, %v4109_v7 }
 0x61f   : > { %3869 = vst.msk [vmem:[#allocation2 + $0x74] sm:$0xf] %vm3839_vm10, %v3802_v48  ;;  %v3800_v26 = vpop.permute.xlu0 %3799  ;;  %4637 = vmatmul.msk.bf16.gmra.mxu2 %vm4020_vm11, %v4656_v15  ;;  %v3804_v0 = vpop.permute.xlu2 %3803  ;;  %v4280_v15 = vmul.f32 %v7907_v35, %v7907_v35 }
 0x620   : > { %3868 = vst.msk [vmem:[#allocation2 + $0x70] sm:$0xf] %vm3839_vm10, %v3800_v26 }
 0x621   : > { %4749 = vst [vmem:[%s7874_s13 + $0x28] sm:$0xff] %v4693_v14  }
 0x626   : > { %v3514_v10 = vpop.permute.xlu1 %3513 }
 0x627   : > { %v3385_v51 = vpop.permute.xlu0 %3384  ;;  %v4659_v45 = vld [vmem:[#allocation2 + $0x70] sm:$0xff]  ;;  %3580 = vst.msk [vmem:[#allocation2 + $0x78] sm:$0xf] %vm3549_vm8, %v3514_v10 }
 0x628   : > { %3450 = vst.msk [vmem:[#allocation2 + $0x7c] sm:$0xf] %vm3418_vm5, %v3385_v51  ;;  %4640 = vmatmul.msk.bf16.gmra.mxu3 %vm4020_vm11, %v4659_v45 }
 0x629   : > { %3581 = vst.msk [vmem:[#allocation2 + $0x7c] sm:$0xf] %vm3549_vm8, %v3516_v61  ;;  %v4281_v61 = vmul.f32 %v7912_v1, %v7912_v1 }
 0x62e   : > { %v3669_v57 = vpop.permute.xlu1 %3668 }
 0x62f   : > { %v3667_v22 = vpop.permute.xlu0 %3666  ;;  %3734 = vst.msk [vmem:[#allocation2 + $0x7c] sm:$0xf] %vm3702_vm9, %v3669_v57 }
 0x630   : > { %3733 = vst.msk [vmem:[#allocation2 + $0x78] sm:$0xf] %vm3702_vm9, %v3667_v22 }
 0x631   : > { %3870 = vst.msk [vmem:[#allocation2 + $0x78] sm:$0xf] %vm3839_vm10, %v3804_v0 }
 0x633   : > { %v7942_v41 = vpop.f32.mrf.mxu2 }
 0x634   : > { %v4282_v45 = vmul.f32 %v7942_v41, %v7942_v41 }
 0x637   : > { %v3806_v21 = vpop.permute.xlu0 %3805 }
 0x638   : > { %3871 = vst.msk [vmem:[#allocation2 + $0x7c] sm:$0xf] %vm3839_vm10, %v3806_v21 }
 0x63b   : > { %v7945_v44 = vpop.f32.mrf.mxu2  ;;  %v7947_v30 = vpop.f32.mrf.mxu3 }
 0x63c   : > { %v4713_v56 = vpack.c.bf16 %v7945_v44, %v7942_v41  ;;  %v4283_v22 = vmul.f32 %v7945_v44, %v7945_v44 }
 0x63e   : > { %4753 = vst [vmem:[%s7874_s13 + $0x48] sm:$0xff] %v4713_v56  }
 0x63f   : > { %v4660_v43 = vld [vmem:[#allocation2 + $0x78] sm:$0xff] }
 0x640   : > { %4641 = vmatmul.msk.bf16.gmra.mxu3 %vm4020_vm11, %v4660_v43 }
 0x643   : > { %v7953_v5 = vpop.f32.mrf.mxu3 }
 0x644   : > { %v4728_v49 = vpack.c.bf16 %v7953_v5, %v7947_v30 }
 0x646   : > { %4756 = vst [vmem:[%s7874_s13 + $0x60] sm:$0xff] %v4728_v49  }
 0x64d   : > { %v4097_v53 = vpop.f32.mrf.mxu0 }
 0x64e   : > { %v4231_v25 = vadd.f32 %v4230_v32, %v4097_v53  ;;  %v4270_v18 = vmul.f32 %v4097_v53, %v4097_v53 }
 0x650   : > { %v4301_v63 = vadd.f32 %v4300_v50, %v4270_v18 }
 0x655   : > { %v4099_v8 = vpop.f32.mrf.mxu0  ;;  %v4112_v11 = vpop.f32.mrf.mxu1 }
 0x656   : > { %v4683_v6 = vpack.c.bf16 %v4099_v8, %v4097_v53  ;;  %v4232_v60 = vadd.f32 %v4231_v25, %v4099_v8  ;;  %v4271_v17 = vmul.f32 %v4099_v8, %v4099_v8  ;;  %v4276_v3 = vmul.f32 %v4112_v11, %v4112_v11 }
 0x658   : > { %4747 = vst [vmem:[%s7874_s13 + $0x18] sm:$0xff] %v4683_v6   ;;  %v4233_v52 = vadd.f32 %v4232_v60, %v7889_v29  ;;  %v4302_v42 = vadd.f32 %v4301_v63, %v4271_v17 }
 0x65a   : > { %v4234_v31 = vadd.f32 %v4233_v52, %v7894_v36  ;;  %v4303_v46 = vadd.f32 %v4302_v42, %v4272_v40 }
 0x65c   : > { %v4304_v62 = vadd.f32 %v4303_v46, %v4273_v9  ;;  %v4235_v37 = vadd.f32 %v4234_v31, %v7925_v39  ;;  %v4289_v31 = vmul.f32 %v7953_v5, %v7953_v5 }
 0x65d   : > { %v4114_v38 = vpop.f32.mrf.mxu1 }
 0x65e   : > { %v4236_v19 = vadd.f32 %v4235_v37, %v4109_v7  ;;  %v4305_v59 = vadd.f32 %v4304_v62, %v4274_v2  ;;  %v4698_v29 = vpack.c.bf16 %v4114_v38, %v4112_v11  ;;  %v4277_v24 = vmul.f32 %v4114_v38, %v4114_v38 }
 0x660   : > { %v4237_v58 = vadd.f32 %v4236_v19, %v4112_v11  ;;  %v4306_v54 = vadd.f32 %v4305_v59, %v4275_v20  ;;  %4750 = vst [vmem:[%s7874_s13 + $0x30] sm:$0xff] %v4698_v29  }
 0x662   : > { %v4307_v12 = vadd.f32 %v4306_v54, %v4276_v3  ;;  %v4238_v36 = vadd.f32 %v4237_v58, %v4114_v38 }
 0x664   : > { %v4308_v34 = vadd.f32 %v4307_v12, %v4277_v24 }
 0x673   : > { %v4132_v28 = vpop.f32.mrf.mxu2 }
 0x67b   : > { %v4134_v47 = vpop.f32.mrf.mxu2  ;;  %v4147_v55 = vpop.f32.mrf.mxu3 }
 0x67c   : > { %v4718_v23 = vpack.c.bf16 %v4134_v47, %v4132_v28  ;;  %v4290_v62 = vmul.f32 %v4147_v55, %v4147_v55 }
 0x67e   : > { %4754 = vst [vmem:[%s7874_s13 + $0x50] sm:$0xff] %v4718_v23  }
 0x683   : > { %v4149_v27 = vpop.f32.mrf.mxu3 }
 0x684   : > { %v4733_v39 = vpack.c.bf16 %v4149_v27, %v4147_v55  ;;  %v4291_v20 = vmul.f32 %v4149_v27, %v4149_v27 }
 0x685   : > { %v4117_v13 = vpop.f32.mrf.mxu1 }
 0x686   : > { %4757 = vst [vmem:[%s7874_s13 + $0x68] sm:$0xff] %v4733_v39   ;;  %v4278_v33 = vmul.f32 %v4117_v13, %v4117_v13  ;;  %v4239_v4 = vadd.f32 %v4238_v36, %v4117_v13 }
 0x688   : > { %v4309_v16 = vadd.f32 %v4308_v34, %v4278_v33 }
 0x68d   : > { %v4119_v32 = vpop.f32.mrf.mxu1 }
 0x68e   : > { %v4703_v50 = vpack.c.bf16 %v4119_v32, %v4117_v13  ;;  %v4240_v48 = vadd.f32 %v4239_v4, %v4119_v32  ;;  %v4279_v7 = vmul.f32 %v4119_v32, %v4119_v32 }
 0x690   : > { %4751 = vst [vmem:[%s7874_s13 + $0x38] sm:$0xff] %v4703_v50   ;;  %v4241_v14 = vadd.f32 %v4240_v48, %v7907_v35  ;;  %v4310_v26 = vadd.f32 %v4309_v16, %v4279_v7  ;;  %v4284_v35 = vmul.f32 %v4132_v28, %v4132_v28 }
 0x692   : > { %v4242_v10 = vadd.f32 %v4241_v14, %v7912_v1  ;;  %v4311_v51 = vadd.f32 %v4310_v26, %v4280_v15  ;;  %v4285_v1 = vmul.f32 %v4134_v47, %v4134_v47 }
 0x694   : > { %v4243_v57 = vadd.f32 %v4242_v10, %v7942_v41  ;;  %v4312_v0 = vadd.f32 %v4311_v51, %v4281_v61 }
 0x696   : > { %v4313_v21 = vadd.f32 %v4312_v0, %v4282_v45  ;;  %v4244_v56 = vadd.f32 %v4243_v57, %v7945_v44  ;;  %v4288_v44 = vmul.f32 %v7947_v30, %v7947_v30 }
 0x698   : > { %v4245_v43 = vadd.f32 %v4244_v56, %v4132_v28  ;;  %v4314_v49 = vadd.f32 %v4313_v21, %v4283_v22 }
 0x69a   : > { %v4315_v53 = vadd.f32 %v4314_v49, %v4284_v35  ;;  %v4246_v18 = vadd.f32 %v4245_v43, %v4134_v47 }
 0x69c   : > { %v4316_v11 = vadd.f32 %v4315_v53, %v4285_v1 }
 0x6a2   : > { %v4137_v25 = vpop.f32.mrf.mxu2 }
 0x6a3   : > { %v4286_v63 = vmul.f32 %v4137_v25, %v4137_v25  ;;  %v4247_v8 = vadd.f32 %v4246_v18, %v4137_v25 }
 0x6a5   : > { %v4317_v41 = vadd.f32 %v4316_v11, %v4286_v63 }
 0x6aa   : > { %v4139_v6 = vpop.f32.mrf.mxu2 }
 0x6ab   : > { %v4723_v60 = vpack.c.bf16 %v4139_v6, %v4137_v25  ;;  %v4248_v17 = vadd.f32 %v4247_v8, %v4139_v6  ;;  %v4287_v40 = vmul.f32 %v4139_v6, %v4139_v6  ;;  %v4152_v52 = vpop.f32.mrf.mxu3 }
 0x6ac   : > { %v4292_v12 = vmul.f32 %v4152_v52, %v4152_v52 }
 0x6ad   : > { %4755 = vst [vmem:[%s7874_s13 + $0x58] sm:$0xff] %v4723_v60   ;;  %v4249_v42 = vadd.f32 %v4248_v17, %v7947_v30  ;;  %v4318_v9 = vadd.f32 %v4317_v41, %v4287_v40 }
 0x6af   : > { %v4250_v46 = vadd.f32 %v4249_v42, %v7953_v5  ;;  %v4319_v2 = vadd.f32 %v4318_v9, %v4288_v44 }
 0x6b1   : > { %v4320_v37 = vadd.f32 %v4319_v2, %v4289_v31  ;;  %v4251_v38 = vadd.f32 %v4250_v46, %v4147_v55 }
 0x6b3   : > { %v4252_v19 = vadd.f32 %v4251_v38, %v4149_v27  ;;  %v4321_v59 = vadd.f32 %v4320_v37, %v4290_v62  ;;  %v4154_v29 = vpop.f32.mrf.mxu3 }
 0x6b4   : > { %v4738_v58 = vpack.c.bf16 %v4154_v29, %v4152_v52  ;;  %v4293_v34 = vmul.f32 %v4154_v29, %v4154_v29 }
 0x6b5   : > { %v4322_v3 = vadd.f32 %v4321_v59, %v4291_v20  ;;  %v4253_v30 = vadd.f32 %v4252_v19, %v4152_v52 }
 0x6b6   : > { %4758 = vst [vmem:[%s7874_s13 + $0x70] sm:$0xff] %v4738_v58  }
 0x6b7   : > { %v4323_v36 = vadd.f32 %v4322_v3, %v4292_v12  ;;  %v4254_v24 = vadd.f32 %v4253_v30, %v4154_v29 }
 0x6b9   : > { %v4324_v5 = vadd.f32 %v4323_v36, %v4293_v34 }
 0x6c3   : > { %v4157_v54 = vpop.f32.mrf.mxu3 }
 0x6c4   : > { %v4294_v28 = vmul.f32 %v4157_v54, %v4157_v54  ;;  %v4255_v47 = vadd.f32 %v4254_v24, %v4157_v54 }
 0x6c6   : > { %v4325_v55 = vadd.f32 %v4324_v5, %v4294_v28 }
 0x6cb   : > { %v4159_v23 = vpop.f32.mrf.mxu3 }
 0x6cc   : > { %v4743_v39 = vpack.c.bf16 %v4159_v23, %v4157_v54  ;;  %v4256_v27 = vadd.f32 %v4255_v47, %v4159_v23  ;;  %v4295_v13 = vmul.f32 %v4159_v23, %v4159_v23 }
 0x6ce   : > { %4759 = vst [vmem:[%s7874_s13 + $0x78] sm:$0xff] %v4743_v39   ;;  %v4257_v33 = vrot.slane %v4256_v27, 4  ;;  %v4326_v4 = vadd.f32 %v4325_v55, %v4295_v13 }
 0x6d0   : > { %v4258_v32 = vadd.f32 %v4257_v33, %v4256_v27  ;;  %v4327_v16 = vrot.slane %v4326_v4, 4 }
 0x6d2   : > { %v4259_v50 = vrot.slane %v4258_v32, 2  ;;  %v4328_v48 = vadd.f32 %v4327_v16, %v4326_v4 }
 0x6d4   : > { %v4260_v7 = vadd.f32 %v4259_v50, %v4258_v32  ;;  %v4329_v15 = vrot.slane %v4328_v48, 2 }
 0x6d6   : > { %v4261_v14 = vrot.slane %v4260_v7, 1  ;;  %v4330_v26 = vadd.f32 %v4329_v15, %v4328_v48 }
 0x6d8   : > { %v4262_v61 = vadd.f32 %v4261_v14, %v4260_v7  ;;  %v4331_v10 = vrot.slane %v4330_v26, 1 }
 0x6da   : > { %4263 = vst [vmem:[%s294_s16] sm:$0x1] %v4262_v61  ;;  %v4332_v51 = vadd.f32 %v4331_v10, %v4330_v26 }
 0x6dc   : > { %4333 = vst [vmem:[%s300_s23] sm:$0x1] %v4332_v51 }
 0x6dd PF: > { %s16_s20 = sadd.s32 1, %s4879_s20   ;;  %s8410_s18 = smov %s4875_s19 }
 0x6de   : > { %p13_p5 = scmp.ge.s32.totalorder %s16_s20, 4   ;;  %s8411_s19 = smov %s8413_s21 }
 0x6e0   :  { %15 = sbr.rel (!%p13_p5) target bundleno = 2 (0x2), region = 91 }

</bundles_post_ra>
